<compile_context>
chip_gen: v7x
topology: tpu7x:2x2x1
jax: 0.10.0
libtpu: 0.0.40
codegen_flags: <defaults>
</compile_context>

<pallas_src>
import jax
import jax.numpy as jnp
from jax.experimental import pallas as pl
from jax.experimental.pallas import tpu as pltpu

NEG_INF_BIAS = -1e9  # bias for padded (fake) class columns -> exp() underflows to 0


def _round_up(x, m):
    return ((x + m - 1) // m) * m


def _classifier_kernel(x_ref, w1_ref, b1_ref, w2_ref, b2_ref,
                       w3_ref, b3_ref, w4_ref, b4_ref, out_ref):
    # x tile arrives as f32 and is cast to bf16 here (free VPU work); weights are
    # bf16 and VMEM-resident across the batch grid; biases are f32; all matmuls
    # accumulate in f32 on the MXU.
    x = x_ref[...].astype(jnp.bfloat16)

    h = jnp.dot(x, w1_ref[...], preferred_element_type=jnp.float32) + b1_ref[...]
    h = jnp.maximum(h, 0.0)

    h = jnp.dot(h.astype(jnp.bfloat16), w2_ref[...],
                preferred_element_type=jnp.float32) + b2_ref[...]
    h = jnp.maximum(h, 0.0)

    h = jnp.dot(h.astype(jnp.bfloat16), w3_ref[...],
                preferred_element_type=jnp.float32) + b3_ref[...]
    h = jnp.maximum(h, 0.0)

    logits = jnp.dot(h.astype(jnp.bfloat16), w4_ref[...],
                     preferred_element_type=jnp.float32) + b4_ref[...]

    # log_softmax over the padded, lane-dense 128-wide class axis.
    # Padded columns have bias = -1e9, so they contribute exp(..) == 0 and the
    # result is exact for the real classes.
    m = jnp.max(logits, axis=1, keepdims=True)
    shifted = logits - m
    lse = jnp.log(jnp.sum(jnp.exp(shifted), axis=1, keepdims=True))
    out_ref[...] = shifted - lse


def classifier_forward(x_nchw, params, num_class):
    """x_nchw: (B, C, H, W) with C*H*W == 2048. Returns (B, num_class) log-probs."""
    B = x_nchw.shape[0]
    # Equivalent of torch .view(B, -1). Keep f32: the bf16 cast happens in-kernel.
    x_flat = x_nchw.reshape(B, -1).astype(jnp.float32)
    assert x_flat.shape[1] == 2048, "Classifier expects 2048 input features"

    w1, b1, w2, b2, w3, b3, w4, b4 = params
    head_pad = w4.shape[1]  # lane-dense padded class width (multiple of 128)

    # Batch tiling (multiples of 8 sublanes for the f32 x stream):
    #   - tiny batches: one tile (per-step overhead dominates otherwise)
    #   - larger batches: >= 2 tiles so the "parallel" axis can shard across
    #     v7x's two TensorCores, each tile capped at 512 rows (VMEM budget ok
    #     on all of v5e/v6e/v7x with single-buffered weights).
    b_pad8 = _round_up(B, 8)
    if b_pad8 <= 256:
        tile_b = b_pad8
    else:
        tile_b = min(512, _round_up(pl.cdiv(b_pad8, 2), 8))
    b_pad = _round_up(B, tile_b)
    if b_pad != B:
        x_flat = jnp.pad(x_flat, ((0, b_pad - B), (0, 0)))
    nb = b_pad // tile_b

    weights = (w1, b1, w2, b2, w3, b3, w4, b4)
    # Constant index_map + Buffered(1): each weight/bias block is DMA'd into
    # VMEM exactly once and stays resident for every batch tile (no pointless
    # double-buffering of ~5.3 MiB of constant data).
    weight_specs = [
        pl.BlockSpec(p.shape, lambda i: (0, 0), pipeline_mode=pl.Buffered(1))
        for p in weights
    ]

    flops = 2 * b_pad * (2048 * 1024 + 1024 * 512 + 512 * 256 + 256 * head_pad)
    weight_bytes = sum(int(p.size) * p.dtype.itemsize for p in weights)
    bytes_accessed = weight_bytes + int(x_flat.size) * 4 + b_pad * head_pad * 4

    out = pl.pallas_call(
        _classifier_kernel,
        out_shape=jax.ShapeDtypeStruct((b_pad, head_pad), jnp.float32),
        grid=(nb,),
        in_specs=[pl.BlockSpec((tile_b, 2048), lambda i: (i, 0))] + weight_specs,
        out_specs=pl.BlockSpec((tile_b, head_pad), lambda i: (i, 0)),
        compiler_params=pltpu.CompilerParams(
            dimension_semantics=("parallel",),
            vmem_limit_bytes=32 * 1024 * 1024,  # safe on v5e/v6e and v7x (64 MiB phys)
        ),
        cost_estimate=pl.CostEstimate(
            flops=flops,
            transcendentals=b_pad * head_pad,
            bytes_accessed=bytes_accessed,
        ),
    )(x_flat, *weights)

    return out[:B, :num_class]


def init_params(key, num_class):
    """Deterministic init matching nn.Linear shapes (uniform ±1/sqrt(fan_in)).

    Weights are stored as (in, out) bf16 (kernel computes x @ W, equivalent to
    torch's x @ W.T); biases are (1, out) f32. The final layer is padded to a
    lane-dense 128-wide head: zero weight columns and -1e9 bias on the padding.
    """
    dims = [2048, 1024, 512, 256, num_class]
    params = []
    for i in range(4):
        fan_in, fan_out = dims[i], dims[i + 1]
        key, kw, kb = jax.random.split(key, 3)
        bound = 1.0 / jnp.sqrt(fan_in)
        w = jax.random.uniform(kw, (fan_in, fan_out), jnp.float32, -bound, bound)
        b = jax.random.uniform(kb, (1, fan_out), jnp.float32, -bound, bound)
        if i == 3:  # pad classifier head to a multiple of 128 lanes
            head_pad = _round_up(max(fan_out, 128), 128)
            w = jnp.pad(w, ((0, 0), (0, head_pad - fan_out)))
            b = jnp.pad(b, ((0, 0), (0, head_pad - fan_out)),
                        constant_values=NEG_INF_BIAS)
        params.extend([w.astype(jnp.bfloat16), b.astype(jnp.float32)])
    return tuple(params)


def _reference_forward(x_nchw, params, num_class):
    """Pure-JAX reference with identical bf16/f32 mixed-precision choices."""
    w1, b1, w2, b2, w3, b3, w4, b4 = params
    h = x_nchw.reshape(x_nchw.shape[0], -1).astype(jnp.bfloat16)
    h = jnp.maximum(jnp.dot(h, w1, preferred_element_type=jnp.float32) + b1, 0.0)
    h = jnp.maximum(jnp.dot(h.astype(jnp.bfloat16), w2,
                            preferred_element_type=jnp.float32) + b2, 0.0)
    h = jnp.maximum(jnp.dot(h.astype(jnp.bfloat16), w3,
                            preferred_element_type=jnp.float32) + b3, 0.0)
    logits = jnp.dot(h.astype(jnp.bfloat16), w4,
                     preferred_element_type=jnp.float32) + b4
    return jax.nn.log_softmax(logits, axis=1)[:, :num_class]


if __name__ == "__main__":
    num_class = 5
    key = jax.random.PRNGKey(0)
    k_x, k_p = jax.random.split(key)

    # (B, C, H, W) with C*H*W = 8*16*16 = 2048 (what Linear(2048, ...) implies)
    x = jax.random.normal(k_x, (2, 8, 16, 16), jnp.float32)
    params = init_params(k_p, num_class)

    out = classifier_forward(x, params, num_class)
    out = jax.block_until_ready(out)

    assert out.shape == (2, num_class)

    # log-softmax over real + padded (-inf) classes: padded columns contribute
    # exp(-1e9) == 0, so rows exp-sum to ~1 exactly over the real classes.
    row_sums = jnp.exp(out).sum(axis=1)
    assert jnp.allclose(row_sums, 1.0, atol=1e-4), row_sums

    # Compare against a pure-JAX reference using the same mixed precision.
    ref = _reference_forward(x, params, num_class)
    assert jnp.allclose(out, ref, atol=2e-2, rtol=2e-2), (out, ref)

    print("KERNEL_OK")
</pallas_src>

<mosaic_0001>
module attributes {stable_mosaic.version = 11 : i64} {
  func.func @_classifier_kernel(%arg0: i32, %arg1: memref<8x2048xf32, #tpu.memory_space<vmem>>, %arg2: memref<2048x1024xbf16, #tpu.memory_space<vmem>>, %arg3: memref<1x1024xf32, #tpu.memory_space<vmem>>, %arg4: memref<1024x512xbf16, #tpu.memory_space<vmem>>, %arg5: memref<1x512xf32, #tpu.memory_space<vmem>>, %arg6: memref<512x256xbf16, #tpu.memory_space<vmem>>, %arg7: memref<1x256xf32, #tpu.memory_space<vmem>>, %arg8: memref<256x128xbf16, #tpu.memory_space<vmem>>, %arg9: memref<1x128xf32, #tpu.memory_space<vmem>>, %arg10: memref<8x128xf32, #tpu.memory_space<vmem>>) attributes {dimension_semantics = [#tpu.dimension_semantics<parallel>], iteration_bounds = array<i64: 1>, scalar_prefetch = 0 : i64, scratch_operands = 0 : i64, tpu.core_type = #tpu.core_type<tc>, window_params = [{transform_indices = @transform_0, window_bounds = array<i64: 8, 2048>}, {pipeline_mode = #tpu.pipeline_mode<synchronous>, transform_indices = @transform_1, window_bounds = array<i64: 2048, 1024>}, {pipeline_mode = #tpu.pipeline_mode<synchronous>, transform_indices = @transform_2, window_bounds = array<i64: 1, 1024>}, {pipeline_mode = #tpu.pipeline_mode<synchronous>, transform_indices = @transform_3, window_bounds = array<i64: 1024, 512>}, {pipeline_mode = #tpu.pipeline_mode<synchronous>, transform_indices = @transform_4, window_bounds = array<i64: 1, 512>}, {pipeline_mode = #tpu.pipeline_mode<synchronous>, transform_indices = @transform_5, window_bounds = array<i64: 512, 256>}, {pipeline_mode = #tpu.pipeline_mode<synchronous>, transform_indices = @transform_6, window_bounds = array<i64: 1, 256>}, {pipeline_mode = #tpu.pipeline_mode<synchronous>, transform_indices = @transform_7, window_bounds = array<i64: 256, 128>}, {pipeline_mode = #tpu.pipeline_mode<synchronous>, transform_indices = @transform_8, window_bounds = array<i64: 1, 128>}, {transform_indices = @transform_9, window_bounds = array<i64: 8, 128>}]} {
    %c0 = arith.constant 0 : index
    %c0_0 = arith.constant 0 : index
    %0 = vector.load %arg1[%c0, %c0_0] : memref<8x2048xf32, #tpu.memory_space<vmem>>, vector<8x2048xf32>
    %1 = arith.truncf %0 : vector<8x2048xf32> to vector<8x2048xbf16>
    %c0_1 = arith.constant 0 : index
    %c0_2 = arith.constant 0 : index
    %2 = vector.load %arg2[%c0_1, %c0_2] : memref<2048x1024xbf16, #tpu.memory_space<vmem>>, vector<2048x1024xbf16>
    %cst = arith.constant dense<0.000000e+00> : vector<8x1024xf32>
    %3 = tpu.matmul %1, %2, %cst {dimension_numbers = #tpu.dot_dimension_numbers<[1], [0], [0], [1], [0, 0, 1, 1], [], []>} : vector<8x2048xbf16>, vector<2048x1024xbf16>, vector<8x1024xf32> -> vector<8x1024xf32>
    %c0_3 = arith.constant 0 : index
    %c0_4 = arith.constant 0 : index
    %4 = vector.load %arg3[%c0_3, %c0_4] : memref<1x1024xf32, #tpu.memory_space<vmem>>, vector<1x1024xf32>
    %5 = vector.broadcast %4 : vector<1x1024xf32> to vector<8x1024xf32>
    %6 = arith.addf %3, %5 : vector<8x1024xf32>
    %cst_5 = arith.constant 0.000000e+00 : f32
    %7 = vector.broadcast %cst_5 : f32 to vector<8x1024xf32>
    %8 = arith.maximumf %6, %7 : vector<8x1024xf32>
    %9 = arith.truncf %8 : vector<8x1024xf32> to vector<8x1024xbf16>
    %c0_6 = arith.constant 0 : index
    %c0_7 = arith.constant 0 : index
    %10 = vector.load %arg4[%c0_6, %c0_7] : memref<1024x512xbf16, #tpu.memory_space<vmem>>, vector<1024x512xbf16>
    %cst_8 = arith.constant dense<0.000000e+00> : vector<8x512xf32>
    %11 = tpu.matmul %9, %10, %cst_8 {dimension_numbers = #tpu.dot_dimension_numbers<[1], [0], [0], [1], [0, 0, 1, 1], [], []>} : vector<8x1024xbf16>, vector<1024x512xbf16>, vector<8x512xf32> -> vector<8x512xf32>
    %c0_9 = arith.constant 0 : index
    %c0_10 = arith.constant 0 : index
    %12 = vector.load %arg5[%c0_9, %c0_10] : memref<1x512xf32, #tpu.memory_space<vmem>>, vector<1x512xf32>
    %13 = vector.broadcast %12 : vector<1x512xf32> to vector<8x512xf32>
    %14 = arith.addf %11, %13 : vector<8x512xf32>
    %cst_11 = arith.constant 0.000000e+00 : f32
    %15 = vector.broadcast %cst_11 : f32 to vector<8x512xf32>
    %16 = arith.maximumf %14, %15 : vector<8x512xf32>
    %17 = arith.truncf %16 : vector<8x512xf32> to vector<8x512xbf16>
    %c0_12 = arith.constant 0 : index
    %c0_13 = arith.constant 0 : index
    %18 = vector.load %arg6[%c0_12, %c0_13] : memref<512x256xbf16, #tpu.memory_space<vmem>>, vector<512x256xbf16>
    %cst_14 = arith.constant dense<0.000000e+00> : vector<8x256xf32>
    %19 = tpu.matmul %17, %18, %cst_14 {dimension_numbers = #tpu.dot_dimension_numbers<[1], [0], [0], [1], [0, 0, 1, 1], [], []>} : vector<8x512xbf16>, vector<512x256xbf16>, vector<8x256xf32> -> vector<8x256xf32>
    %c0_15 = arith.constant 0 : index
    %c0_16 = arith.constant 0 : index
    %20 = vector.load %arg7[%c0_15, %c0_16] : memref<1x256xf32, #tpu.memory_space<vmem>>, vector<1x256xf32>
    %21 = vector.broadcast %20 : vector<1x256xf32> to vector<8x256xf32>
    %22 = arith.addf %19, %21 : vector<8x256xf32>
    %cst_17 = arith.constant 0.000000e+00 : f32
    %23 = vector.broadcast %cst_17 : f32 to vector<8x256xf32>
    %24 = arith.maximumf %22, %23 : vector<8x256xf32>
    %25 = arith.truncf %24 : vector<8x256xf32> to vector<8x256xbf16>
    %c0_18 = arith.constant 0 : index
    %c0_19 = arith.constant 0 : index
    %26 = vector.load %arg8[%c0_18, %c0_19] : memref<256x128xbf16, #tpu.memory_space<vmem>>, vector<256x128xbf16>
    %cst_20 = arith.constant dense<0.000000e+00> : vector<8x128xf32>
    %27 = tpu.matmul %25, %26, %cst_20 {dimension_numbers = #tpu.dot_dimension_numbers<[1], [0], [0], [1], [0, 0, 1, 1], [], []>} : vector<8x256xbf16>, vector<256x128xbf16>, vector<8x128xf32> -> vector<8x128xf32>
    %c0_21 = arith.constant 0 : index
    %c0_22 = arith.constant 0 : index
    %28 = vector.load %arg9[%c0_21, %c0_22] : memref<1x128xf32, #tpu.memory_space<vmem>>, vector<1x128xf32>
    %29 = vector.broadcast %28 : vector<1x128xf32> to vector<8x128xf32>
    %30 = arith.addf %27, %29 : vector<8x128xf32>
    %cst_23 = arith.constant dense<0xFF800000> : vector<8xf32>
    %31 = vector.multi_reduction <maximumf>, %30, %cst_23 [1] : vector<8x128xf32> to vector<8xf32>
    %32 = vector.shape_cast %31 : vector<8xf32> to vector<8x1xf32>
    %33 = vector.broadcast %32 : vector<8x1xf32> to vector<8x128xf32>
    %34 = arith.subf %30, %33 : vector<8x128xf32>
    %35 = math.exp %34 : vector<8x128xf32>
    %cst_24 = arith.constant dense<0.000000e+00> : vector<8xf32>
    %36 = vector.multi_reduction <add>, %35, %cst_24 [1] : vector<8x128xf32> to vector<8xf32>
    %37 = vector.shape_cast %36 : vector<8xf32> to vector<8x1xf32>
    %38 = math.log %37 : vector<8x1xf32>
    %39 = vector.broadcast %38 : vector<8x1xf32> to vector<8x128xf32>
    %40 = arith.subf %34, %39 : vector<8x128xf32>
    %c0_25 = arith.constant 0 : index
    %c0_26 = arith.constant 0 : index
    %41 = vector.load %arg10[%c0_25, %c0_26] : memref<8x128xf32, #tpu.memory_space<vmem>>, vector<8x128xf32>
    tpu.vector_store %arg10[%c0_25, %c0_26], %40 {strides = array<i32>} : memref<8x128xf32, #tpu.memory_space<vmem>>, vector<8x128xf32>,
    return
  }
  func.func @transform_0(%arg0: i32) -> (i32, i32) {
    %c0_i32 = arith.constant 0 : i32
    %c0_i32_0 = arith.constant 0 : i32
    return %arg0, %c0_i32 : i32, i32
  }
  func.func @transform_1(%arg0: i32) -> (i32, i32) {
    %c0_i32 = arith.constant 0 : i32
    %c0_i32_0 = arith.constant 0 : i32
    %c0_i32_1 = arith.constant 0 : i32
    return %c0_i32, %c0_i32_0 : i32, i32
  }
  func.func @transform_2(%arg0: i32) -> (i32, i32) {
    %c0_i32 = arith.constant 0 : i32
    %c0_i32_0 = arith.constant 0 : i32
    %c0_i32_1 = arith.constant 0 : i32
    return %c0_i32, %c0_i32_0 : i32, i32
  }
  func.func @transform_3(%arg0: i32) -> (i32, i32) {
    %c0_i32 = arith.constant 0 : i32
    %c0_i32_0 = arith.constant 0 : i32
    %c0_i32_1 = arith.constant 0 : i32
    return %c0_i32, %c0_i32_0 : i32, i32
  }
  func.func @transform_4(%arg0: i32) -> (i32, i32) {
    %c0_i32 = arith.constant 0 : i32
    %c0_i32_0 = arith.constant 0 : i32
    %c0_i32_1 = arith.constant 0 : i32
    return %c0_i32, %c0_i32_0 : i32, i32
  }
  func.func @transform_5(%arg0: i32) -> (i32, i32) {
    %c0_i32 = arith.constant 0 : i32
    %c0_i32_0 = arith.constant 0 : i32
    %c0_i32_1 = arith.constant 0 : i32
    return %c0_i32, %c0_i32_0 : i32, i32
  }
  func.func @transform_6(%arg0: i32) -> (i32, i32) {
    %c0_i32 = arith.constant 0 : i32
    %c0_i32_0 = arith.constant 0 : i32
    %c0_i32_1 = arith.constant 0 : i32
    return %c0_i32, %c0_i32_0 : i32, i32
  }
  func.func @transform_7(%arg0: i32) -> (i32, i32) {
    %c0_i32 = arith.constant 0 : i32
    %c0_i32_0 = arith.constant 0 : i32
    %c0_i32_1 = arith.constant 0 : i32
    return %c0_i32, %c0_i32_0 : i32, i32
  }
  func.func @transform_8(%arg0: i32) -> (i32, i32) {
    %c0_i32 = arith.constant 0 : i32
    %c0_i32_0 = arith.constant 0 : i32
    %c0_i32_1 = arith.constant 0 : i32
    return %c0_i32, %c0_i32_0 : i32, i32
  }
  func.func @transform_9(%arg0: i32) -> (i32, i32) {
    %c0_i32 = arith.constant 0 : i32
    %c0_i32_0 = arith.constant 0 : i32
    return %arg0, %c0_i32 : i32, i32
  }
}

</mosaic_0001>

<bundles_post_ra>
// kernel: tpu_custom_call.1
= control target key start
LH: loop header
LB: loop body
LE: loop exit
PB: predicated region body
PF: predicated region fallthrough
CT: control target
= control target key end

     0   :  { %14 = vsyncpa [#allocation3], 0  ;;  %s12930_s0 = inlined_call_operand.hbm [shape: f32[8,2048], index: 0, kind: input, shape index: {}]   ;;  %s12931_s1 = inlined_call_operand.hbm [shape: bf16[2048,1024], index: 1, kind: input, shape index: {}]   ;;  %s12932_s2 = inlined_call_operand.hbm [shape: f32[1,1024], index: 2, kind: input, shape index: {}]   ;;  %s12933_s3 = inlined_call_operand.hbm [shape: bf16[1024,512], index: 3, kind: input, shape index: {}]   ;;  %s12934_s4 = inlined_call_operand.hbm [shape: f32[1,512], index: 4, kind: input, shape index: {}]   ;;  %s12935_s5 = inlined_call_operand.hbm [shape: bf16[512,256], index: 5, kind: input, shape index: {}]   ;;  %s12936_s6 = inlined_call_operand.hbm [shape: f32[1,256], index: 6, kind: input, shape index: {}]   ;;  %s12937_s7 = inlined_call_operand.hbm [shape: bf16[256,128], index: 7, kind: input, shape index: {}]   ;;  %s12938_s8 = inlined_call_operand.hbm [shape: f32[1,128], index: 8, kind: input, shape index: {}]   ;;  %s12939_s9 = inlined_call_operand.hbm [shape: f32[8,128], index: 9, kind: output, shape index: {}]  }
   0x1   :  { %15 = vsyncpa [#allocation6], 0 }
   0x2   :  { %16 = vsyncpa [#allocation9], 0 }
   0x3   :  { %17 = vsyncpa [#allocation12], 0 }
   0x4   :  { %18 = vsyncpa [#allocation15], 0 }
   0x5   :  { %19 = vsyncpa [#allocation4], 0  ;;  %s12560_s30 = smov [#allocation5]   ;;  %s12328_s13 = scalar_lea.hbm %s12931_s1, 131072 }
   0x6   :  { %s35_s10 = sshll.u32 %s12560_s30, 4  ;;  %p12329_p0 = scmp.ne.s32.totalorder %s12931_s1, %s12328_s13  ;;  %s36_s10 = int_to_ptr.vmem [resolvable:$true] %s35_s10 }
   0x7   :  { %p12332_p1 = scmp.lt.u32.totalorder %s12328_s13, %s12931_s1 }
   0x9   :  { %p12334_p2 = pnand %p12332_p1, %p12329_p0 }
   0xb   :  { %12337 = shalt.err (!%p12334_p2)
}
   0xc   :  { %s12338_s18 = scalar_lea.vmem %s36_s10, 131072  ;;  %p12343_p4 = scmp.lt.s32.totalorder %s36_s10, %s36_s10 }
   0xd   :  { %p12339_p3 = scmp.ne.s32.totalorder %s36_s10, %s12338_s18  ;;  %p12344_p5 = scmp.lt.s32.totalorder %s12338_s18, %s12338_s18 }
   0xf   :  { %p12345_p6 = por %p12344_p5, %p12343_p4 }
  0x11   :  { %p12346_p7 = pnand %p12345_p6, %p12339_p3 }
  0x13   :  { %12349 = shalt.err (!%p12346_p7)
}
  0x14   :  { %s12561_s19 = smov 512   ;;  %s12562_s20 = smov 32  }
  0x15   :  { %41 = dma.hbm_to_vmem [thread:$0]  %s12931_s1, 131072, %s36_s10, [#allocation6], %s12561_s19, %s12561_s19, %s12562_s20  }
  0x16   :  { %s12563_s23 = smov [#allocation8]   ;;  %s12350_s27 = scalar_lea.hbm %s12933_s3, 32768 }
  0x17   :  { %s57_s24 = sshll.u32 %s12563_s23, 4  ;;  %p12351_p8 = scmp.ne.s32.totalorder %s12933_s3, %s12350_s27  ;;  %s58_s24 = int_to_ptr.vmem [resolvable:$true] %s57_s24 }
  0x18   :  { %p12354_p9 = scmp.lt.u32.totalorder %s12350_s27, %s12933_s3 }
  0x1a   :  { %p12356_p10 = pnand %p12354_p9, %p12351_p8 }
  0x1c   :  { %12359 = shalt.err (!%p12356_p10)
}
  0x1d   :  { %s12360_s12 = scalar_lea.vmem %s58_s24, 32768  ;;  %p12365_p12 = scmp.lt.s32.totalorder %s58_s24, %s58_s24 }
  0x1e   :  { %p12361_p11 = scmp.ne.s32.totalorder %s58_s24, %s12360_s12  ;;  %p12366_p13 = scmp.lt.s32.totalorder %s12360_s12, %s12360_s12 }
  0x20   :  { %p12367_p0 = por %p12366_p13, %p12365_p12 }
  0x22   :  { %p12368_p1 = pnand %p12367_p0, %p12361_p11 }
  0x24   :  { %12371 = shalt.err (!%p12368_p1)
}
  0x25   :  { %s12564_s1 = smov 256   ;;  %s12565_s10 = smov 16  }
  0x26   :  { %63 = dma.hbm_to_vmem [thread:$0]  %s12933_s3, 32768, %s58_s24, [#allocation9], %s12564_s1, %s12564_s1, %s12565_s10  }
  0x27   :  { %s12566_s15 = smov [#allocation11]   ;;  %s12372_s19 = scalar_lea.hbm %s12935_s5, 8192 }
  0x28   :  { %s79_s16 = sshll.u32 %s12566_s15, 4  ;;  %p12373_p2 = scmp.ne.s32.totalorder %s12935_s5, %s12372_s19  ;;  %s80_s16 = int_to_ptr.vmem [resolvable:$true] %s79_s16 }
  0x29   :  { %p12376_p3 = scmp.lt.u32.totalorder %s12372_s19, %s12935_s5 }
  0x2b   :  { %p12378_p4 = pnand %p12376_p3, %p12373_p2 }
  0x2d   :  { %12381 = shalt.err (!%p12378_p4)
}
  0x2e   :  { %s12382_s25 = scalar_lea.vmem %s80_s16, 8192  ;;  %p12387_p6 = scmp.lt.s32.totalorder %s80_s16, %s80_s16 }
  0x2f   :  { %p12383_p5 = scmp.ne.s32.totalorder %s80_s16, %s12382_s25  ;;  %p12388_p7 = scmp.lt.s32.totalorder %s12382_s25, %s12382_s25 }
  0x31   :  { %p12389_p8 = por %p12388_p7, %p12387_p6 }
  0x33   :  { %p12390_p9 = pnand %p12389_p8, %p12383_p5 }
  0x35   :  { %12393 = shalt.err (!%p12390_p9)
}
  0x36   :  { %s12567_s3 = smov 128   ;;  %s12568_s24 = smov 8  }
  0x37   :  { %85 = dma.hbm_to_vmem [thread:$0]  %s12935_s5, 8192, %s80_s16, [#allocation12], %s12567_s3, %s12567_s3, %s12568_s24  }
  0x38   :  { %s12569_s28 = smov [#allocation14]   ;;  %s12394_s12 = scalar_lea.hbm %s12937_s7, 2048 }
  0x39   :  { %s101_s29 = sshll.u32 %s12569_s28, 4  ;;  %p12395_p10 = scmp.ne.s32.totalorder %s12937_s7, %s12394_s12  ;;  %s102_s29 = int_to_ptr.vmem [resolvable:$true] %s101_s29 }
  0x3a   :  { %p12398_p11 = scmp.lt.u32.totalorder %s12394_s12, %s12937_s7 }
  0x3c   :  { %p12400_p12 = pnand %p12398_p11, %p12395_p10 }
  0x3e   :  { %12403 = shalt.err (!%p12400_p12)
}
  0x3f   :  { %s12404_s15 = scalar_lea.vmem %s102_s29, 2048  ;;  %p12409_p0 = scmp.lt.s32.totalorder %s102_s29, %s102_s29 }
  0x40   :  { %p12405_p13 = scmp.ne.s32.totalorder %s102_s29, %s12404_s15  ;;  %p12410_p1 = scmp.lt.s32.totalorder %s12404_s15, %s12404_s15 }
  0x42   :  { %p12411_p2 = por %p12410_p1, %p12409_p0 }
  0x44   :  { %p12412_p3 = pnand %p12411_p2, %p12405_p13 }
  0x46   :  { %12415 = shalt.err (!%p12412_p3)
}
  0x47   :  { %s12570_s5 = smov 64   ;;  %s12571_s16 = smov 4  }
  0x48   :  { %107 = dma.hbm_to_vmem [thread:$0]  %s12937_s7, 2048, %s102_s29, [#allocation15], %s12570_s5, %s12570_s5, %s12571_s16  }
  0x49   :  { %s12572_s19 = smov [#allocation2]   ;;  %s12573_s21 = smov [#allocation7]  }
  0x4a   :  { %s26_s20 = sshll.u32 %s12572_s19, 4  ;;  %s48_s22 = sshll.u32 %s12573_s21, 4  ;;  %s27_s20 = int_to_ptr.vmem [resolvable:$true] %s26_s20  ;;  %s49_s22 = int_to_ptr.vmem [resolvable:$true] %s48_s22 }
  0x4b   :  { %s12416_s3 = scalar_lea.hbm %s12930_s0, 2048 }
  0x4c   :  { %p12417_p4 = scmp.ne.s32.totalorder %s12930_s0, %s12416_s3  ;;  %p12420_p5 = scmp.lt.u32.totalorder %s12416_s3, %s12930_s0 }
  0x4e   :  { %p12422_p6 = pnand %p12420_p5, %p12417_p4 }
  0x50   :  { %12425 = shalt.err (!%p12422_p6)
}
  0x51   :  { %s12426_s7 = scalar_lea.vmem %s27_s20, 2048  ;;  %p12431_p8 = scmp.lt.s32.totalorder %s27_s20, %s27_s20 }
  0x52   :  { %p12427_p7 = scmp.ne.s32.totalorder %s27_s20, %s12426_s7  ;;  %p12432_p9 = scmp.lt.s32.totalorder %s12426_s7, %s12426_s7 }
  0x54   :  { %p12433_p10 = por %p12432_p9, %p12431_p8 }
  0x56   :  { %p12434_p11 = pnand %p12433_p10, %p12427_p7 }
  0x58   :  { %12437 = shalt.err (!%p12434_p11)
}
  0x59   :  { %29 = dma.hbm_to_vmem [thread:$0]  %s12930_s0, 2048, %s27_s20, [#allocation3]  }
  0x5a   :  { %s12438_s1 = scalar_lea.hbm %s12932_s2, 128 }
  0x5b   :  { %p12439_p12 = scmp.ne.s32.totalorder %s12932_s2, %s12438_s1  ;;  %p12442_p13 = scmp.lt.u32.totalorder %s12438_s1, %s12932_s2 }
  0x5d   :  { %p12444_p0 = pnand %p12442_p13, %p12439_p12 }
  0x5f   :  { %12447 = shalt.err (!%p12444_p0)
}
  0x60   :  { %s12448_s5 = scalar_lea.vmem %s49_s22, 128  ;;  %p12453_p2 = scmp.lt.s32.totalorder %s49_s22, %s49_s22 }
  0x61   :  { %p12449_p1 = scmp.ne.s32.totalorder %s49_s22, %s12448_s5  ;;  %p12454_p3 = scmp.lt.s32.totalorder %s12448_s5, %s12448_s5 }
  0x63   :  { %p12455_p4 = por %p12454_p3, %p12453_p2 }
  0x65   :  { %p12456_p5 = pnand %p12455_p4, %p12449_p1 }
  0x67   :  { %12459 = shalt.err (!%p12456_p5)
}
  0x68   :  { %51 = dma.hbm_to_vmem [thread:$0]  %s12932_s2, 128, %s49_s22, [#allocation6]  }
  0x69   :  { %s12574_s17 = smov [#allocation10]   ;;  %s12575_s19 = smov [#allocation13]  }
  0x6a   :  { %s70_s18 = sshll.u32 %s12574_s17, 4  ;;  %s92_s20 = sshll.u32 %s12575_s19, 4  ;;  %s71_s18 = int_to_ptr.vmem [resolvable:$true] %s70_s18  ;;  %s93_s20 = int_to_ptr.vmem [resolvable:$true] %s92_s20 }
  0x6b   :  { %s12460_s25 = scalar_lea.hbm %s12934_s4, 64 }
  0x6c   :  { %p12461_p6 = scmp.ne.s32.totalorder %s12934_s4, %s12460_s25  ;;  %p12464_p7 = scmp.lt.u32.totalorder %s12460_s25, %s12934_s4 }
  0x6e   :  { %p12466_p8 = pnand %p12464_p7, %p12461_p6 }
  0x70   :  { %12469 = shalt.err (!%p12466_p8)
}
  0x71   :  { %s12470_s2 = scalar_lea.vmem %s71_s18, 64  ;;  %p12475_p10 = scmp.lt.s32.totalorder %s71_s18, %s71_s18 }
  0x72   :  { %p12471_p9 = scmp.ne.s32.totalorder %s71_s18, %s12470_s2  ;;  %p12476_p11 = scmp.lt.s32.totalorder %s12470_s2, %s12470_s2 }
  0x74   :  { %p12477_p12 = por %p12476_p11, %p12475_p10 }
  0x76   :  { %p12478_p13 = pnand %p12477_p12, %p12471_p9 }
  0x78   :  { %12481 = shalt.err (!%p12478_p13)
}
  0x79   :  { %73 = dma.hbm_to_vmem [thread:$0]  %s12934_s4, 64, %s71_s18, [#allocation9]  }
  0x7a   :  { %s12482_s30 = scalar_lea.hbm %s12936_s6, 32 }
  0x7b   :  { %p12483_p0 = scmp.ne.s32.totalorder %s12936_s6, %s12482_s30  ;;  %p12486_p1 = scmp.lt.u32.totalorder %s12482_s30, %s12936_s6 }
  0x7d   :  { %p12488_p2 = pnand %p12486_p1, %p12483_p0 }
  0x7f   :  { %12491 = shalt.err (!%p12488_p2)
}
  0x80   :  { %s12492_s13 = scalar_lea.vmem %s93_s20, 32  ;;  %p12497_p4 = scmp.lt.s32.totalorder %s93_s20, %s93_s20 }
  0x81   :  { %p12493_p3 = scmp.ne.s32.totalorder %s93_s20, %s12492_s13  ;;  %p12498_p5 = scmp.lt.s32.totalorder %s12492_s13, %s12492_s13 }
  0x83   :  { %p12499_p6 = por %p12498_p5, %p12497_p4 }
  0x85   :  { %p12500_p7 = pnand %p12499_p6, %p12493_p3 }
  0x87   :  { %12503 = shalt.err (!%p12500_p7)
}
  0x88   :  { %95 = dma.hbm_to_vmem [thread:$0]  %s12936_s6, 32, %s93_s20, [#allocation12]  }
  0x89   :  { %s12576_s15 = smov [#allocation16]   ;;  %s12504_s17 = scalar_lea.hbm %s12938_s8, 16 }
  0x8a   :  { %s114_s5 = sshll.u32 %s12576_s15, 4  ;;  %p12505_p8 = scmp.ne.s32.totalorder %s12938_s8, %s12504_s17  ;;  %s115_s5 = int_to_ptr.vmem [resolvable:$true] %s114_s5 }
  0x8b   :  { %p12508_p9 = scmp.lt.u32.totalorder %s12504_s17, %s12938_s8 }
  0x8d   :  { %p12510_p10 = pnand %p12508_p9, %p12505_p8 }
  0x8f   :  { %12513 = shalt.err (!%p12510_p10)
}
  0x90   :  { %s12514_s25 = scalar_lea.vmem %s115_s5, 16  ;;  %s12518_s6 = scalar_lea.vmem %s115_s5, 32 }
  0x91   :  { %p12515_p11 = scmp.ne.s32.totalorder %s115_s5, %s12514_s25  ;;  %p12519_p12 = scmp.lt.s32.totalorder %s115_s5, %s115_s5 }
  0x92   :  { %p12520_p13 = scmp.lt.s32.totalorder %s12518_s6, %s12514_s25 }
  0x94   :  { %p12521_p0 = por %p12520_p13, %p12519_p12 }
  0x96   :  { %p12522_p1 = pnand %p12521_p0, %p12515_p11 }
  0x98   :  { %12525 = shalt.err (!%p12522_p1)
}
  0x99   :  { %117 = dma.hbm_to_vmem [thread:$0]  %s12938_s8, 16, %s115_s5, [#allocation15]  }
  0x9a   :  { %12548 = dma.done.wait [#allocation3], 2048  }
  0x9b   :  { %12549 = vsyncadd [#allocation3], 4294965248 }
  0x9c   :  { %12550 = dma.done.wait [#allocation6], 131200  }
  0x9d   :  { %12551 = vsyncadd [#allocation6], 4294836096 }
  0x9e   :  { %12552 = dma.done.wait [#allocation9], 32832  }
  0x9f   :  { %12553 = vsyncadd [#allocation9], 4294934464 }
  0xa0   :  { %12554 = dma.done.wait [#allocation12], 8224  }
  0xa1   :  { %12555 = vsyncadd [#allocation12], 4294959072 }
  0xa2   :  { %12556 = dma.done.wait [#allocation15], 2064  }
  0xa3   :  { %12557 = vsyncadd [#allocation15], 4294965232  ;;  %v178_v0 = vld [vmem:[#allocation5] sm:$0xff]  ;;  %v147_v53 = vld [vmem:[#allocation2 + $0x8] sm:$0xff]  ;;  %s12577_s8 = smov [#allocation17]  }
  0xa4   :  { %v182_v1 = vld [vmem:[#allocation5 + $0x20] sm:$0xff]  ;;  %v12736_v57 = vpack.c.bf16 %v147_v53, %v147_v53  ;;  %v149_v58 = vld [vmem:[#allocation2 + $0x18] sm:$0xff]  ;;  %s10260_s24 = sshll.u32 %s12577_s8, 4  ;;  %s10261_s24 = int_to_ptr.vmem [resolvable:$true] %s10260_s24 }
  0xa5   :  { %v306_v2 = vld [vmem:[#allocation5 + $0x400] sm:$0xff]  ;;  %v10274_v3 = vcombine.high %v178_v0, %v182_v1  ;;  %v10273_v5 = vcombine.low %v178_v0, %v182_v1  ;;  %v12738_v61 = vpack.c.bf16 %v149_v58, %v149_v58  ;;  %s12526_s26 = scalar_lea.vmem %s10261_s24, 128  ;;  %p12531_p3 = scmp.lt.s32.totalorder %s10261_s24, %s10261_s24 }
  0xa6   :  { %v310_v4 = vld [vmem:[#allocation5 + $0x420] sm:$0xff]  ;;  %6396 = vmatprep.mubr.bf16.mxu1 %v12736_v57  ;;  %p12527_p2 = scmp.ne.s32.totalorder %s10261_s24, %s12526_s26  ;;  %p12532_p4 = scmp.lt.s32.totalorder %s12526_s26, %s12526_s26 }
  0xa7   :  { %v186_v6 = vld [vmem:[#allocation5 + $0x40] sm:$0xff]  ;;  %v10402_v8 = vcombine.high %v306_v2, %v310_v4  ;;  %v10401_v9 = vcombine.low %v306_v2, %v310_v4  ;;  %6364 = vmatprep.subr.bf16.mxu1 %v10274_v3  ;;  %6437 = vmatprep.mubr.bf16.mxu0 %v12738_v61 }
  0xa8   :  { %v190_v7 = vld [vmem:[#allocation5 + $0x60] sm:$0xff]  ;;  %6365 = vmatpush1.bf16.msra.mxu1 %v10273_v5  ;;  %p12533_p5 = por %p12532_p4, %p12531_p3 }
  0xa9   :  { %v10282_v10 = vcombine.high %v186_v6, %v190_v7  ;;  %v314_v11 = vld [vmem:[#allocation5 + $0x440] sm:$0xff]  ;;  %6405 = vmatprep.subr.bf16.mxu0 %v10402_v8  ;;  %v10281_v18 = vcombine.low %v186_v6, %v190_v7 }
  0xaa   :  { %v318_v12 = vld [vmem:[#allocation5 + $0x460] sm:$0xff]  ;;  %6406 = vmatpush1.bf16.msra.mxu0 %v10401_v9  ;;  %p12534_p6 = pnand %p12533_p5, %p12527_p2 }
  0xab   :  { %v194_v13 = vld [vmem:[#allocation5 + $0x80] sm:$0xff]  ;;  %v10410_v14 = vcombine.high %v314_v11, %v318_v12  ;;  %6366 = vmatprep.subr.bf16.mxu1 %v10282_v10  ;;  %v10409_v19 = vcombine.low %v314_v11, %v318_v12 }
  0xac   :  { %v198_v15 = vld [vmem:[#allocation5 + $0xa0] sm:$0xff]  ;;  %6367 = vmatpush1.bf16.msra.mxu1 %v10281_v18 }
  0xad   :  { %v322_v16 = vld [vmem:[#allocation5 + $0x480] sm:$0xff]  ;;  %v10290_v20 = vcombine.high %v194_v13, %v198_v15  ;;  %6407 = vmatprep.subr.bf16.mxu0 %v10410_v14  ;;  %v10289_v26 = vcombine.low %v194_v13, %v198_v15 }
  0xae   :  { %v326_v17 = vld [vmem:[#allocation5 + $0x4a0] sm:$0xff]  ;;  %6408 = vmatpush1.bf16.msra.mxu0 %v10409_v19 }
  0xaf   :  { %v10418_v21 = vcombine.high %v322_v16, %v326_v17  ;;  %v202_v22 = vld [vmem:[#allocation5 + $0xc0] sm:$0xff]  ;;  %6368 = vmatprep.subr.bf16.mxu1 %v10290_v20  ;;  %v10417_v27 = vcombine.low %v322_v16, %v326_v17 }
  0xb0   :  { %v206_v23 = vld [vmem:[#allocation5 + $0xe0] sm:$0xff]  ;;  %6369 = vmatpush1.bf16.msra.mxu1 %v10289_v26 }
  0xb1   :  { %v330_v24 = vld [vmem:[#allocation5 + $0x4c0] sm:$0xff]  ;;  %v10298_v28 = vcombine.high %v202_v22, %v206_v23  ;;  %6409 = vmatprep.subr.bf16.mxu0 %v10418_v21  ;;  %v10297_v34 = vcombine.low %v202_v22, %v206_v23 }
  0xb2   :  { %v334_v25 = vld [vmem:[#allocation5 + $0x4e0] sm:$0xff]  ;;  %6410 = vmatpush1.bf16.msra.mxu0 %v10417_v27 }
  0xb3   :  { %v10426_v29 = vcombine.high %v330_v24, %v334_v25  ;;  %v210_v30 = vld [vmem:[#allocation5 + $0x100] sm:$0xff]  ;;  %6370 = vmatprep.subr.bf16.mxu1 %v10298_v28  ;;  %v10425_v35 = vcombine.low %v330_v24, %v334_v25 }
  0xb4   :  { %v214_v31 = vld [vmem:[#allocation5 + $0x120] sm:$0xff]  ;;  %6371 = vmatpush1.bf16.msra.mxu1 %v10297_v34 }
  0xb5   :  { %v338_v32 = vld [vmem:[#allocation5 + $0x500] sm:$0xff]  ;;  %v10306_v36 = vcombine.high %v210_v30, %v214_v31  ;;  %6411 = vmatprep.subr.bf16.mxu0 %v10426_v29  ;;  %v10305_v42 = vcombine.low %v210_v30, %v214_v31 }
  0xb6   :  { %v342_v33 = vld [vmem:[#allocation5 + $0x520] sm:$0xff]  ;;  %6412 = vmatpush1.bf16.msra.mxu0 %v10425_v35 }
  0xb7   :  { %v10434_v37 = vcombine.high %v338_v32, %v342_v33  ;;  %v218_v38 = vld [vmem:[#allocation5 + $0x140] sm:$0xff]  ;;  %6372 = vmatprep.subr.bf16.mxu1 %v10306_v36  ;;  %v10433_v43 = vcombine.low %v338_v32, %v342_v33 }
  0xb8   :  { %v222_v39 = vld [vmem:[#allocation5 + $0x160] sm:$0xff]  ;;  %6373 = vmatpush1.bf16.msra.mxu1 %v10305_v42 }
  0xb9   :  { %v346_v40 = vld [vmem:[#allocation5 + $0x540] sm:$0xff]  ;;  %v10314_v44 = vcombine.high %v218_v38, %v222_v39  ;;  %6413 = vmatprep.subr.bf16.mxu0 %v10434_v37  ;;  %v10313_v50 = vcombine.low %v218_v38, %v222_v39 }
  0xba   :  { %v350_v41 = vld [vmem:[#allocation5 + $0x560] sm:$0xff]  ;;  %6414 = vmatpush1.bf16.msra.mxu0 %v10433_v43 }
  0xbb   :  { %v10442_v45 = vcombine.high %v346_v40, %v350_v41  ;;  %v226_v46 = vld [vmem:[#allocation5 + $0x180] sm:$0xff]  ;;  %6374 = vmatprep.subr.bf16.mxu1 %v10314_v44  ;;  %v10441_v51 = vcombine.low %v346_v40, %v350_v41 }
  0xbc   :  { %v230_v47 = vld [vmem:[#allocation5 + $0x1a0] sm:$0xff]  ;;  %6375 = vmatpush1.bf16.msra.mxu1 %v10313_v50 }
  0xbd   :  { %v354_v48 = vld [vmem:[#allocation5 + $0x580] sm:$0xff]  ;;  %v10322_v52 = vcombine.high %v226_v46, %v230_v47  ;;  %6415 = vmatprep.subr.bf16.mxu0 %v10442_v45  ;;  %v10321_v62 = vcombine.low %v226_v46, %v230_v47 }
  0xbe   :  { %v358_v49 = vld [vmem:[#allocation5 + $0x5a0] sm:$0xff]  ;;  %6416 = vmatpush1.bf16.msra.mxu0 %v10441_v51 }
  0xbf   :  { %v10450_v54 = vcombine.high %v354_v48, %v358_v49  ;;  %v234_v55 = vld [vmem:[#allocation5 + $0x1c0] sm:$0xff]  ;;  %6376 = vmatprep.subr.bf16.mxu1 %v10322_v52  ;;  %v10449_v63 = vcombine.low %v354_v48, %v358_v49 }
  0xc0   :  { %v238_v56 = vld [vmem:[#allocation5 + $0x1e0] sm:$0xff]  ;;  %6377 = vmatpush1.bf16.msra.mxu1 %v10321_v62 }
  0xc1   :  { %v362_v59 = vld [vmem:[#allocation5 + $0x5c0] sm:$0xff]  ;;  %v10330_v0 = vcombine.high %v234_v55, %v238_v56  ;;  %6417 = vmatprep.subr.bf16.mxu0 %v10450_v54  ;;  %v10329_v6 = vcombine.low %v234_v55, %v238_v56 }
  0xc2   :  { %v366_v60 = vld [vmem:[#allocation5 + $0x5e0] sm:$0xff]  ;;  %6418 = vmatpush1.bf16.msra.mxu0 %v10449_v63 }
  0xc3   :  { %v10458_v1 = vcombine.high %v362_v59, %v366_v60  ;;  %v242_v2 = vld [vmem:[#allocation5 + $0x200] sm:$0xff]  ;;  %6378 = vmatprep.subr.bf16.mxu1 %v10330_v0  ;;  %v10457_v7 = vcombine.low %v362_v59, %v366_v60 }
  0xc4   :  { %v246_v3 = vld [vmem:[#allocation5 + $0x220] sm:$0xff]  ;;  %6379 = vmatpush1.bf16.msra.mxu1 %v10329_v6 }
  0xc5   :  { %v370_v4 = vld [vmem:[#allocation5 + $0x600] sm:$0xff]  ;;  %v10338_v8 = vcombine.high %v242_v2, %v246_v3  ;;  %6419 = vmatprep.subr.bf16.mxu0 %v10458_v1  ;;  %v10337_v14 = vcombine.low %v242_v2, %v246_v3 }
  0xc6   :  { %v374_v5 = vld [vmem:[#allocation5 + $0x620] sm:$0xff]  ;;  %6420 = vmatpush1.bf16.msra.mxu0 %v10457_v7 }
  0xc7   :  { %v10466_v9 = vcombine.high %v370_v4, %v374_v5  ;;  %v250_v10 = vld [vmem:[#allocation5 + $0x240] sm:$0xff]  ;;  %6380 = vmatprep.subr.bf16.mxu1 %v10338_v8  ;;  %v10465_v15 = vcombine.low %v370_v4, %v374_v5  ;;  %v179_v4 = vld [vmem:[#allocation5 + $0x8] sm:$0xff] }
  0xc8   :  { %v254_v11 = vld [vmem:[#allocation5 + $0x260] sm:$0xff]  ;;  %6381 = vmatpush1.bf16.msra.mxu1 %v10337_v14  ;;  %v183_v5 = vld [vmem:[#allocation5 + $0x28] sm:$0xff] }
  0xc9   :  { %v378_v12 = vld [vmem:[#allocation5 + $0x640] sm:$0xff]  ;;  %v10346_v16 = vcombine.high %v250_v10, %v254_v11  ;;  %6421 = vmatprep.subr.bf16.mxu0 %v10466_v9  ;;  %v10345_v22 = vcombine.low %v250_v10, %v254_v11  ;;  %v10276_v11 = vcombine.high %v179_v4, %v183_v5  ;;  %v187_v14 = vld [vmem:[#allocation5 + $0x48] sm:$0xff] }
  0xca   :  { %v382_v13 = vld [vmem:[#allocation5 + $0x660] sm:$0xff]  ;;  %6422 = vmatpush1.bf16.msra.mxu0 %v10465_v15  ;;  %v191_v15 = vld [vmem:[#allocation5 + $0x68] sm:$0xff] }
  0xcb   :  { %v10474_v17 = vcombine.high %v378_v12, %v382_v13  ;;  %v258_v18 = vld [vmem:[#allocation5 + $0x280] sm:$0xff]  ;;  %6382 = vmatprep.subr.bf16.mxu1 %v10346_v16  ;;  %v10473_v23 = vcombine.low %v378_v12, %v382_v13  ;;  %v148_v12 = vld [vmem:[#allocation2 + $0x10] sm:$0xff] }
  0xcc   :  { %v262_v19 = vld [vmem:[#allocation5 + $0x2a0] sm:$0xff]  ;;  %6383 = vmatpush1.bf16.msra.mxu1 %v10345_v22 }
  0xcd   :  { %v386_v20 = vld [vmem:[#allocation5 + $0x680] sm:$0xff]  ;;  %v10354_v24 = vcombine.high %v258_v18, %v262_v19  ;;  %6423 = vmatprep.subr.bf16.mxu0 %v10474_v17  ;;  %v10353_v30 = vcombine.low %v258_v18, %v262_v19  ;;  %v151_v19 = vld [vmem:[#allocation2 + $0x28] sm:$0xff] }
  0xce   :  { %v390_v21 = vld [vmem:[#allocation5 + $0x6a0] sm:$0xff]  ;;  %6424 = vmatpush1.bf16.msra.mxu0 %v10473_v23  ;;  %v10284_v23 = vcombine.high %v187_v14, %v191_v15 }
  0xcf   :  { %v10482_v25 = vcombine.high %v386_v20, %v390_v21  ;;  %v266_v26 = vld [vmem:[#allocation5 + $0x2c0] sm:$0xff]  ;;  %6384 = vmatprep.subr.bf16.mxu1 %v10354_v24  ;;  %v10481_v31 = vcombine.low %v386_v20, %v390_v21  ;;  %v10275_v20 = vcombine.low %v179_v4, %v183_v5  ;;  %v12744_v21 = vpack.c.bf16 %v148_v12, %v148_v12  ;;  %v235_v5 = vld [vmem:[#allocation5 + $0x1c8] sm:$0xff] }
  0xd0   :  { %v270_v27 = vld [vmem:[#allocation5 + $0x2e0] sm:$0xff]  ;;  %6385 = vmatpush1.bf16.msra.mxu1 %v10353_v30  ;;  %v10283_v30 = vcombine.low %v187_v14, %v191_v15  ;;  %v247_v15 = vld [vmem:[#allocation5 + $0x228] sm:$0xff] }
  0xd1   :  { %v394_v28 = vld [vmem:[#allocation5 + $0x6c0] sm:$0xff]  ;;  %v10362_v32 = vcombine.high %v266_v26, %v270_v27  ;;  %6425 = vmatprep.subr.bf16.mxu0 %v10482_v25  ;;  %v10361_v38 = vcombine.low %v266_v26, %v270_v27  ;;  %v195_v25 = vld [vmem:[#allocation5 + $0x88] sm:$0xff]  ;;  %v12746_v27 = vpack.c.bf16 %v151_v19, %v151_v19 }
  0xd2   :  { %v398_v29 = vld [vmem:[#allocation5 + $0x6e0] sm:$0xff]  ;;  %6426 = vmatpush1.bf16.msra.mxu0 %v10481_v31  ;;  %v199_v26 = vld [vmem:[#allocation5 + $0xa8] sm:$0xff] }
  0xd3   :  { %v10490_v33 = vcombine.high %v394_v28, %v398_v29  ;;  %v274_v34 = vld [vmem:[#allocation5 + $0x300] sm:$0xff]  ;;  %6386 = vmatprep.subr.bf16.mxu1 %v10362_v32  ;;  %v10489_v39 = vcombine.low %v394_v28, %v398_v29  ;;  %v10292_v32 = vcombine.high %v195_v25, %v199_v26 }
  0xd4   :  { %v278_v35 = vld [vmem:[#allocation5 + $0x320] sm:$0xff]  ;;  %6387 = vmatpush1.bf16.msra.mxu1 %v10361_v38  ;;  %v10291_v38 = vcombine.low %v195_v25, %v199_v26  ;;  %v255_v25 = vld [vmem:[#allocation5 + $0x268] sm:$0xff] }
  0xd5   :  { %v402_v36 = vld [vmem:[#allocation5 + $0x700] sm:$0xff]  ;;  %v10370_v40 = vcombine.high %v274_v34, %v278_v35  ;;  %6427 = vmatprep.subr.bf16.mxu0 %v10490_v33  ;;  %v10369_v46 = vcombine.low %v274_v34, %v278_v35  ;;  %v203_v35 = vld [vmem:[#allocation5 + $0xc8] sm:$0xff] }
  0xd6   :  { %v406_v37 = vld [vmem:[#allocation5 + $0x720] sm:$0xff]  ;;  %6428 = vmatpush1.bf16.msra.mxu0 %v10489_v39 }
  0xd7   :  { %v10498_v41 = vcombine.high %v402_v36, %v406_v37  ;;  %v282_v42 = vld [vmem:[#allocation5 + $0x340] sm:$0xff]  ;;  %6388 = vmatprep.subr.bf16.mxu1 %v10370_v40  ;;  %v10497_v47 = vcombine.low %v402_v36, %v406_v37  ;;  %v207_v37 = vld [vmem:[#allocation5 + $0xe8] sm:$0xff] }
  0xd8   :  { %v286_v43 = vld [vmem:[#allocation5 + $0x360] sm:$0xff]  ;;  %6389 = vmatpush1.bf16.msra.mxu1 %v10369_v46  ;;  %v10300_v40 = vcombine.high %v203_v35, %v207_v37  ;;  %v10299_v46 = vcombine.low %v203_v35, %v207_v37 }
  0xd9   :  { %v410_v44 = vld [vmem:[#allocation5 + $0x740] sm:$0xff]  ;;  %v10378_v48 = vcombine.high %v282_v42, %v286_v43  ;;  %6429 = vmatprep.subr.bf16.mxu0 %v10498_v41  ;;  %v10377_v54 = vcombine.low %v282_v42, %v286_v43  ;;  %v211_v43 = vld [vmem:[#allocation5 + $0x108] sm:$0xff] }
  0xda   :  { %v414_v45 = vld [vmem:[#allocation5 + $0x760] sm:$0xff]  ;;  %6430 = vmatpush1.bf16.msra.mxu0 %v10497_v47 }
  0xdb   :  { %v10506_v49 = vcombine.high %v410_v44, %v414_v45  ;;  %v290_v50 = vld [vmem:[#allocation5 + $0x380] sm:$0xff]  ;;  %6390 = vmatprep.subr.bf16.mxu1 %v10378_v48  ;;  %v10505_v55 = vcombine.low %v410_v44, %v414_v45  ;;  %v215_v45 = vld [vmem:[#allocation5 + $0x128] sm:$0xff] }
  0xdc   :  { %v294_v51 = vld [vmem:[#allocation5 + $0x3a0] sm:$0xff]  ;;  %6391 = vmatpush1.bf16.msra.mxu1 %v10377_v54  ;;  %v10308_v48 = vcombine.high %v211_v43, %v215_v45  ;;  %v10307_v54 = vcombine.low %v211_v43, %v215_v45 }
  0xdd   :  { %v418_v52 = vld [vmem:[#allocation5 + $0x780] sm:$0xff]  ;;  %v10386_v56 = vcombine.high %v290_v50, %v294_v51  ;;  %6431 = vmatprep.subr.bf16.mxu0 %v10506_v49  ;;  %v10385_v0 = vcombine.low %v290_v50, %v294_v51  ;;  %v219_v51 = vld [vmem:[#allocation5 + $0x148] sm:$0xff] }
  0xde   :  { %v422_v53 = vld [vmem:[#allocation5 + $0x7a0] sm:$0xff]  ;;  %6432 = vmatpush1.bf16.msra.mxu0 %v10505_v55 }
  0xdf   :  { %v10514_v58 = vcombine.high %v418_v52, %v422_v53  ;;  %v298_v59 = vld [vmem:[#allocation5 + $0x3c0] sm:$0xff]  ;;  %6392 = vmatprep.subr.bf16.mxu1 %v10386_v56  ;;  %v10513_v1 = vcombine.low %v418_v52, %v422_v53  ;;  %v223_v53 = vld [vmem:[#allocation5 + $0x168] sm:$0xff] }
  0xe0   :  { %v302_v60 = vld [vmem:[#allocation5 + $0x3e0] sm:$0xff]  ;;  %6393 = vmatpush1.bf16.msra.mxu1 %v10385_v0  ;;  %v10316_v56 = vcombine.high %v219_v51, %v223_v53  ;;  %v10315_v0 = vcombine.low %v219_v51, %v223_v53 }
  0xe1   :  { %v426_v62 = vld [vmem:[#allocation5 + $0x7c0] sm:$0xff]  ;;  %v10394_v2 = vcombine.high %v298_v59, %v302_v60  ;;  %6433 = vmatprep.subr.bf16.mxu0 %v10514_v58  ;;  %v10393_v8 = vcombine.low %v298_v59, %v302_v60  ;;  %v227_v60 = vld [vmem:[#allocation5 + $0x188] sm:$0xff] }
  0xe2   :  { %v430_v63 = vld [vmem:[#allocation5 + $0x7e0] sm:$0xff]  ;;  %6434 = vmatpush1.bf16.msra.mxu0 %v10513_v1 }
  0xe3   :  { %v10522_v3 = vcombine.high %v426_v62, %v430_v63  ;;  %v434_v6 = vld [vmem:[#allocation5 + $0x800] sm:$0xff]  ;;  %6394 = vmatprep.subr.bf16.mxu1 %v10394_v2  ;;  %v10521_v10 = vcombine.low %v426_v62, %v430_v63  ;;  %v231_v63 = vld [vmem:[#allocation5 + $0x1a8] sm:$0xff] }
  0xe4   :  { %v438_v7 = vld [vmem:[#allocation5 + $0x820] sm:$0xff]  ;;  %6395 = vmatpush1.bf16.msra.mxu1 %v10393_v8  ;;  %v10324_v2 = vcombine.high %v227_v60, %v231_v63  ;;  %v10323_v8 = vcombine.low %v227_v60, %v231_v63 }
  0xe5   :  { %v146_v9 = vld [vmem:[#allocation2] sm:$0xff]  ;;  %6435 = vmatprep.subr.bf16.mxu0 %v10522_v3  ;;  %v10530_v13 = vcombine.high %v434_v6, %v438_v7  ;;  %v10529_v22 = vcombine.low %v434_v6, %v438_v7  ;;  %6692 = vmatprep.subr.bf16.mxu1 %v10276_v11  ;;  %v239_v7 = vld [vmem:[#allocation5 + $0x1e8] sm:$0xff] }
  0xe6   :  { %v12742_v16 = vpack.c.bf16 %v146_v9, %v146_v9  ;;  %v442_v17 = vld [vmem:[#allocation5 + $0x840] sm:$0xff]  ;;  %6436 = vmatpush1.bf16.msra.mxu0 %v10521_v10  ;;  %v10332_v10 = vcombine.high %v235_v5, %v239_v7 }
  0xe7   :  { %v446_v18 = vld [vmem:[#allocation5 + $0x860] sm:$0xff]  ;;  %6446 = vmatprep.subr.bf16.mxu0 %v10530_v13  ;;  %v243_v13 = vld [vmem:[#allocation5 + $0x208] sm:$0xff] }
  0xe8   :  { %v10538_v24 = vcombine.high %v442_v17, %v446_v18  ;;  %6397 = vmatmul.mubr.bf16.vlgmr.msra.gmra.mrb[0].mxu1 %v12742_v16  ;;  %v450_v28 = vld [vmem:[#allocation5 + $0x880] sm:$0xff]  ;;  %v10537_v31 = vcombine.low %v442_v17, %v446_v18  ;;  %v10331_v17 = vcombine.low %v235_v5, %v239_v7  ;;  %v10340_v19 = vcombine.high %v243_v13, %v247_v15 }
  0xe9   :  { %v454_v29 = vld [vmem:[#allocation5 + $0x8a0] sm:$0xff]  ;;  %6438 = vmatmul.mubr.bf16.vlgmr.msra.gmra.mrb[0].mxu0 %v12744_v21  ;;  %6693 = vmatpush1.bf16.msra.mxu1 %v10275_v20  ;;  %v10339_v26 = vcombine.low %v243_v13, %v247_v15 }
  0xea   :  { %6447 = vmatpush1.bf16.msra.mxu0 %v10529_v22  ;;  %6694 = vmatprep.subr.bf16.mxu1 %v10284_v23  ;;  %v458_v33 = vld [vmem:[#allocation5 + $0x8c0] sm:$0xff]  ;;  %v10546_v36 = vcombine.high %v450_v28, %v454_v29  ;;  %v10545_v39 = vcombine.low %v450_v28, %v454_v29  ;;  %v251_v23 = vld [vmem:[#allocation5 + $0x248] sm:$0xff] }
  0xeb   :  { %v462_v34 = vld [vmem:[#allocation5 + $0x8e0] sm:$0xff]  ;;  %6448 = vmatprep.subr.bf16.mxu0 %v10538_v24  ;;  %6478 = vmatprep.mubr.bf16.mxu0 %v12746_v27  ;;  %v10348_v29 = vcombine.high %v251_v23, %v255_v25  ;;  %v10347_v35 = vcombine.low %v251_v23, %v255_v25 }
  0xec   :  { %6724 = vmatprep.mubr.bf16.mxu1 %v12736_v57  ;;  %v466_v41 = vld [vmem:[#allocation5 + $0x900] sm:$0xff]  ;;  %v10554_v44 = vcombine.high %v458_v33, %v462_v34  ;;  %v10553_v47 = vcombine.low %v458_v33, %v462_v34  ;;  %v263_v34 = vld [vmem:[#allocation5 + $0x2a8] sm:$0xff] }
  0xed   :  { %6695 = vmatpush1.bf16.msra.mxu1 %v10283_v30  ;;  %v470_v42 = vld [vmem:[#allocation5 + $0x920] sm:$0xff] }
  0xee   :  { %6449 = vmatpush1.bf16.msra.mxu0 %v10537_v31  ;;  %6696 = vmatprep.subr.bf16.mxu1 %v10292_v32  ;;  %v474_v49 = vld [vmem:[#allocation5 + $0x940] sm:$0xff]  ;;  %v10562_v52 = vcombine.high %v466_v41, %v470_v42  ;;  %v10561_v55 = vcombine.low %v466_v41, %v470_v42  ;;  %v259_v32 = vld [vmem:[#allocation5 + $0x288] sm:$0xff] }
  0xef   :  { %6450 = vmatprep.subr.bf16.mxu0 %v10546_v36  ;;  %v478_v50 = vld [vmem:[#allocation5 + $0x960] sm:$0xff]  ;;  %v10356_v37 = vcombine.high %v259_v32, %v263_v34  ;;  %v271_v42 = vld [vmem:[#allocation5 + $0x2e8] sm:$0xff]  ;;  %v10355_v43 = vcombine.low %v259_v32, %v263_v34 }
  0xf0   :  { %v482_v58 = vld [vmem:[#allocation5 + $0x980] sm:$0xff]  ;;  %v10570_v62 = vcombine.high %v474_v49, %v478_v50  ;;  %v10569_v1 = vcombine.low %v474_v49, %v478_v50  ;;  %v279_v50 = vld [vmem:[#allocation5 + $0x328] sm:$0xff] }
  0xf1   :  { %6697 = vmatpush1.bf16.msra.mxu1 %v10291_v38  ;;  %v486_v59 = vld [vmem:[#allocation5 + $0x9a0] sm:$0xff] }
  0xf2   :  { %6451 = vmatpush1.bf16.msra.mxu0 %v10545_v39  ;;  %6698 = vmatprep.subr.bf16.mxu1 %v10300_v40  ;;  %v490_v3 = vld [vmem:[#allocation5 + $0x9c0] sm:$0xff]  ;;  %v10578_v6 = vcombine.high %v482_v58, %v486_v59  ;;  %v10577_v9 = vcombine.low %v482_v58, %v486_v59  ;;  %v267_v40 = vld [vmem:[#allocation5 + $0x2c8] sm:$0xff] }
  0xf3   :  { %6452 = vmatprep.subr.bf16.mxu0 %v10554_v44  ;;  %v494_v4 = vld [vmem:[#allocation5 + $0x9e0] sm:$0xff]  ;;  %v10364_v45 = vcombine.high %v267_v40, %v271_v42  ;;  %v10363_v51 = vcombine.low %v267_v40, %v271_v42  ;;  %v287_v59 = vld [vmem:[#allocation5 + $0x368] sm:$0xff] }
  0xf4   :  { %v498_v11 = vld [vmem:[#allocation5 + $0xa00] sm:$0xff]  ;;  %v10586_v14 = vcombine.high %v490_v3, %v494_v4  ;;  %v10585_v18 = vcombine.low %v490_v3, %v494_v4  ;;  %v295_v4 = vld [vmem:[#allocation5 + $0x3a8] sm:$0xff] }
  0xf5   :  { %6699 = vmatpush1.bf16.msra.mxu1 %v10299_v46  ;;  %v502_v12 = vld [vmem:[#allocation5 + $0xa20] sm:$0xff]  ;;  %v327_v42 = vld [vmem:[#allocation5 + $0x4a8] sm:$0xff] }
  0xf6   :  { %6453 = vmatpush1.bf16.msra.mxu0 %v10553_v47  ;;  %6700 = vmatprep.subr.bf16.mxu1 %v10308_v48  ;;  %v506_v20 = vld [vmem:[#allocation5 + $0xa40] sm:$0xff]  ;;  %v10594_v24 = vcombine.high %v498_v11, %v502_v12  ;;  %v10593_v28 = vcombine.low %v498_v11, %v502_v12  ;;  %v275_v48 = vld [vmem:[#allocation5 + $0x308] sm:$0xff] }
  0xf7   :  { %6454 = vmatprep.subr.bf16.mxu0 %v10562_v52  ;;  %v510_v22 = vld [vmem:[#allocation5 + $0xa60] sm:$0xff]  ;;  %v10372_v53 = vcombine.high %v275_v48, %v279_v50  ;;  %v10371_v60 = vcombine.low %v275_v48, %v279_v50  ;;  %v303_v12 = vld [vmem:[#allocation5 + $0x3e8] sm:$0xff] }
  0xf8   :  { %v514_v30 = vld [vmem:[#allocation5 + $0xa80] sm:$0xff]  ;;  %v10602_v33 = vcombine.high %v506_v20, %v510_v22  ;;  %v10601_v36 = vcombine.low %v506_v20, %v510_v22  ;;  %v311_v22 = vld [vmem:[#allocation5 + $0x428] sm:$0xff] }
  0xf9   :  { %6701 = vmatpush1.bf16.msra.mxu1 %v10307_v54  ;;  %v518_v31 = vld [vmem:[#allocation5 + $0xaa0] sm:$0xff] }
  0xfa   :  { %6455 = vmatpush1.bf16.msra.mxu0 %v10561_v55  ;;  %6702 = vmatprep.subr.bf16.mxu1 %v10316_v56  ;;  %v522_v38 = vld [vmem:[#allocation5 + $0xac0] sm:$0xff]  ;;  %v10610_v41 = vcombine.high %v514_v30, %v518_v31  ;;  %v10609_v44 = vcombine.low %v514_v30, %v518_v31  ;;  %v283_v56 = vld [vmem:[#allocation5 + $0x348] sm:$0xff] }
  0xfb   :  { %6456 = vmatprep.subr.bf16.mxu0 %v10570_v62  ;;  %v526_v39 = vld [vmem:[#allocation5 + $0xae0] sm:$0xff]  ;;  %v10380_v63 = vcombine.high %v283_v56, %v287_v59  ;;  %v10379_v5 = vcombine.low %v283_v56, %v287_v59  ;;  %v315_v30 = vld [vmem:[#allocation5 + $0x448] sm:$0xff] }
  0xfc   :  { %v530_v46 = vld [vmem:[#allocation5 + $0xb00] sm:$0xff]  ;;  %v10618_v49 = vcombine.high %v522_v38, %v526_v39  ;;  %v10617_v52 = vcombine.low %v522_v38, %v526_v39  ;;  %v319_v31 = vld [vmem:[#allocation5 + $0x468] sm:$0xff] }
  0xfd   :  { %6703 = vmatpush1.bf16.msra.mxu1 %v10315_v0  ;;  %v534_v47 = vld [vmem:[#allocation5 + $0xb20] sm:$0xff] }
  0xfe   :  { %6457 = vmatpush1.bf16.msra.mxu0 %v10569_v1  ;;  %6704 = vmatprep.subr.bf16.mxu1 %v10324_v2  ;;  %v538_v54 = vld [vmem:[#allocation5 + $0xb40] sm:$0xff]  ;;  %v10626_v58 = vcombine.high %v530_v46, %v534_v47  ;;  %v10625_v62 = vcombine.low %v530_v46, %v534_v47  ;;  %v291_v2 = vld [vmem:[#allocation5 + $0x388] sm:$0xff] }
  0xff   :  { %6458 = vmatprep.subr.bf16.mxu0 %v10578_v6  ;;  %v542_v55 = vld [vmem:[#allocation5 + $0xb60] sm:$0xff]  ;;  %v10388_v7 = vcombine.high %v291_v2, %v295_v4  ;;  %v10387_v13 = vcombine.low %v291_v2, %v295_v4 }
 0x100   :  { %v546_v0 = vld [vmem:[#allocation5 + $0xb80] sm:$0xff]  ;;  %v10634_v3 = vcombine.high %v538_v54, %v542_v55  ;;  %v10633_v6 = vcombine.low %v538_v54, %v542_v55 }
 0x101   :  { %6705 = vmatpush1.bf16.msra.mxu1 %v10323_v8  ;;  %v550_v1 = vld [vmem:[#allocation5 + $0xba0] sm:$0xff] }
 0x102   :  { %6459 = vmatpush1.bf16.msra.mxu0 %v10577_v9  ;;  %6706 = vmatprep.subr.bf16.mxu1 %v10332_v10  ;;  %v554_v8 = vld [vmem:[#allocation5 + $0xbc0] sm:$0xff]  ;;  %v299_v10 = vld [vmem:[#allocation5 + $0x3c8] sm:$0xff]  ;;  %v10642_v11 = vcombine.high %v546_v0, %v550_v1 }
 0x103   :  { %6460 = vmatprep.subr.bf16.mxu0 %v10586_v14  ;;  %v558_v9 = vld [vmem:[#allocation5 + $0xbe0] sm:$0xff]  ;;  %v10641_v14 = vcombine.low %v546_v0, %v550_v1  ;;  %v10396_v15 = vcombine.high %v299_v10, %v303_v12 }
 0x104   :  { %v10650_v20 = vcombine.high %v554_v8, %v558_v9  ;;  %v150_v23 = vld [vmem:[#allocation2 + $0x20] sm:$0xff]  ;;  %v10649_v25 = vcombine.low %v554_v8, %v558_v9 }
 0x105   :  { %6707 = vmatpush1.bf16.msra.mxu1 %v10331_v17  ;;  %v562_v17 = vld [vmem:[#allocation5 + $0xc00] sm:$0xff] }
 0x106   :  { %6461 = vmatpush1.bf16.msra.mxu0 %v10585_v18  ;;  %6708 = vmatprep.subr.bf16.mxu1 %v10340_v19  ;;  %v566_v18 = vld [vmem:[#allocation5 + $0xc20] sm:$0xff]  ;;  %v307_v19 = vld [vmem:[#allocation5 + $0x408] sm:$0xff] }
 0x107   :  { %6462 = vmatprep.subr.bf16.mxu0 %v10594_v24  ;;  %v10395_v24 = vcombine.low %v299_v10, %v303_v12  ;;  %v10658_v32 = vcombine.high %v562_v17, %v566_v18  ;;  %v10403_v34 = vcombine.low %v307_v19, %v311_v22  ;;  %v578_v38 = vld [vmem:[#allocation5 + $0xc80] sm:$0xff] }
 0x108   :  { %v582_v40 = vld [vmem:[#allocation5 + $0xca0] sm:$0xff] }
 0x109   :  { %6709 = vmatpush1.bf16.msra.mxu1 %v10339_v26  ;;  %v10404_v26 = vcombine.high %v307_v19, %v311_v22  ;;  %v586_v47 = vld [vmem:[#allocation5 + $0xcc0] sm:$0xff]  ;;  %v10674_v50 = vcombine.high %v578_v38, %v582_v40  ;;  %v363_v22 = vld [vmem:[#allocation5 + $0x5c8] sm:$0xff] }
 0x10a   :  { %6463 = vmatpush1.bf16.msra.mxu0 %v10593_v28  ;;  %6710 = vmatprep.subr.bf16.mxu1 %v10348_v29  ;;  %v570_v28 = vld [vmem:[#allocation5 + $0xc40] sm:$0xff] }
 0x10b   :  { %6464 = vmatprep.subr.bf16.mxu0 %v10602_v33  ;;  %v574_v29 = vld [vmem:[#allocation5 + $0xc60] sm:$0xff]  ;;  %v153_v33 = vld [vmem:[#allocation2 + $0x38] sm:$0xff] }
 0x10c   :  { %v10666_v39 = vcombine.high %v570_v28, %v574_v29  ;;  %v590_v48 = vld [vmem:[#allocation5 + $0xce0] sm:$0xff] }
 0x10d   :  { %6711 = vmatpush1.bf16.msra.mxu1 %v10347_v35  ;;  %v12752_v35 = vpack.c.bf16 %v150_v23, %v150_v23  ;;  %v594_v55 = vld [vmem:[#allocation5 + $0xd00] sm:$0xff]  ;;  %v10682_v59 = vcombine.high %v586_v47, %v590_v48  ;;  %v367_v23 = vld [vmem:[#allocation5 + $0x5e8] sm:$0xff] }
 0x10e   :  { %6465 = vmatpush1.bf16.msra.mxu0 %v10601_v36  ;;  %6712 = vmatprep.subr.bf16.mxu1 %v10356_v37  ;;  %v10657_v36 = vcombine.low %v562_v17, %v566_v18  ;;  %v10412_v37 = vcombine.high %v315_v30, %v319_v31  ;;  %v598_v56 = vld [vmem:[#allocation5 + $0xd20] sm:$0xff] }
 0x10f   :  { %6466 = vmatprep.subr.bf16.mxu0 %v10610_v41  ;;  %v323_v41 = vld [vmem:[#allocation5 + $0x488] sm:$0xff]  ;;  %v602_v1 = vld [vmem:[#allocation5 + $0xd40] sm:$0xff]  ;;  %v10690_v4 = vcombine.high %v594_v55, %v598_v56 }
 0x110   :  { %v10420_v46 = vcombine.high %v323_v41, %v327_v42  ;;  %v606_v2 = vld [vmem:[#allocation5 + $0xd60] sm:$0xff] }
 0x111   :  { %6713 = vmatpush1.bf16.msra.mxu1 %v10355_v43  ;;  %v12754_v43 = vpack.c.bf16 %v153_v33, %v153_v33  ;;  %v610_v9 = vld [vmem:[#allocation5 + $0xd80] sm:$0xff]  ;;  %v10698_v12 = vcombine.high %v602_v1, %v606_v2  ;;  %v10459_v33 = vcombine.low %v363_v22, %v367_v23 }
 0x112   :  { %6467 = vmatpush1.bf16.msra.mxu0 %v10609_v44  ;;  %6714 = vmatprep.subr.bf16.mxu1 %v10364_v45  ;;  %v10411_v44 = vcombine.low %v315_v30, %v319_v31  ;;  %v10665_v45 = vcombine.low %v570_v28, %v574_v29  ;;  %v614_v10 = vld [vmem:[#allocation5 + $0xda0] sm:$0xff]  ;;  %v371_v30 = vld [vmem:[#allocation5 + $0x608] sm:$0xff] }
 0x113   :  { %6468 = vmatprep.subr.bf16.mxu0 %v10618_v49  ;;  %v331_v49 = vld [vmem:[#allocation5 + $0x4c8] sm:$0xff]  ;;  %v618_v18 = vld [vmem:[#allocation5 + $0xdc0] sm:$0xff] }
 0x114   :  { %v622_v19 = vld [vmem:[#allocation5 + $0xde0] sm:$0xff] }
 0x115   :  { %6715 = vmatpush1.bf16.msra.mxu1 %v10363_v51  ;;  %v335_v51 = vld [vmem:[#allocation5 + $0x4e8] sm:$0xff]  ;;  %v626_v28 = vld [vmem:[#allocation5 + $0xe00] sm:$0xff]  ;;  %v10714_v31 = vcombine.high %v618_v18, %v622_v19 }
 0x116   :  { %6469 = vmatpush1.bf16.msra.mxu0 %v10617_v52  ;;  %6716 = vmatprep.subr.bf16.mxu1 %v10372_v53  ;;  %v10419_v52 = vcombine.low %v323_v41, %v327_v42  ;;  %v10673_v53 = vcombine.low %v578_v38, %v582_v40  ;;  %v10428_v54 = vcombine.high %v331_v49, %v335_v51  ;;  %v630_v29 = vld [vmem:[#allocation5 + $0xe20] sm:$0xff]  ;;  %v383_v41 = vld [vmem:[#allocation5 + $0x668] sm:$0xff] }
 0x117   :  { %6470 = vmatprep.subr.bf16.mxu0 %v10626_v58  ;;  %v339_v58 = vld [vmem:[#allocation5 + $0x508] sm:$0xff]  ;;  %v638_v38 = vld [vmem:[#allocation5 + $0xe60] sm:$0xff]  ;;  %v10722_v40 = vcombine.high %v626_v28, %v630_v29 }
 0x119   :  { %6717 = vmatpush1.bf16.msra.mxu1 %v10371_v60  ;;  %v343_v60 = vld [vmem:[#allocation5 + $0x528] sm:$0xff] }
 0x11a   :  { %6471 = vmatpush1.bf16.msra.mxu0 %v10625_v62  ;;  %6718 = vmatprep.subr.bf16.mxu1 %v10380_v63  ;;  %v10427_v62 = vcombine.low %v331_v49, %v335_v51  ;;  %v10681_v63 = vcombine.low %v586_v47, %v590_v48  ;;  %v10436_v0 = vcombine.high %v339_v58, %v343_v60  ;;  %v646_v47 = vld [vmem:[#allocation5 + $0xea0] sm:$0xff]  ;;  %v387_v48 = vld [vmem:[#allocation5 + $0x688] sm:$0xff] }
 0x11b   :  { %6472 = vmatprep.subr.bf16.mxu0 %v10634_v3  ;;  %v347_v3 = vld [vmem:[#allocation5 + $0x548] sm:$0xff] }
 0x11d   :  { %6719 = vmatpush1.bf16.msra.mxu1 %v10379_v5  ;;  %v351_v5 = vld [vmem:[#allocation5 + $0x568] sm:$0xff] }
 0x11e   :  { %6473 = vmatpush1.bf16.msra.mxu0 %v10633_v6  ;;  %6720 = vmatprep.subr.bf16.mxu1 %v10388_v7  ;;  %v10435_v6 = vcombine.low %v339_v58, %v343_v60  ;;  %v10689_v7 = vcombine.low %v594_v55, %v598_v56  ;;  %v10444_v8 = vcombine.high %v347_v3, %v351_v5  ;;  %v654_v55 = vld [vmem:[#allocation5 + $0xee0] sm:$0xff]  ;;  %v395_v56 = vld [vmem:[#allocation5 + $0x6c8] sm:$0xff] }
 0x11f   :  { %6474 = vmatprep.subr.bf16.mxu0 %v10642_v11  ;;  %v355_v11 = vld [vmem:[#allocation5 + $0x588] sm:$0xff] }
 0x121   :  { %6721 = vmatpush1.bf16.msra.mxu1 %v10387_v13  ;;  %v359_v13 = vld [vmem:[#allocation5 + $0x5a8] sm:$0xff] }
 0x122   :  { %6475 = vmatpush1.bf16.msra.mxu0 %v10641_v14  ;;  %6722 = vmatprep.subr.bf16.mxu1 %v10396_v15  ;;  %v10443_v14 = vcombine.low %v347_v3, %v351_v5  ;;  %v10697_v15 = vcombine.low %v602_v1, %v606_v2  ;;  %v10452_v17 = vcombine.high %v355_v11, %v359_v13  ;;  %v662_v1 = vld [vmem:[#allocation5 + $0xf20] sm:$0xff]  ;;  %v403_v2 = vld [vmem:[#allocation5 + $0x708] sm:$0xff] }
 0x123   :  { %6476 = vmatprep.subr.bf16.mxu0 %v10650_v20  ;;  %v10706_v20 = vcombine.high %v610_v9, %v614_v10 }
 0x125   :  { %6723 = vmatpush1.bf16.msra.mxu1 %v10395_v24  ;;  %v10451_v24 = vcombine.low %v355_v11, %v359_v13 }
 0x126   :  { %6477 = vmatpush1.bf16.msra.mxu0 %v10649_v25  ;;  %6733 = vmatprep.subr.bf16.mxu1 %v10404_v26  ;;  %v10705_v25 = vcombine.low %v610_v9, %v614_v10  ;;  %v10460_v26 = vcombine.high %v363_v22, %v367_v23  ;;  %v670_v9 = vld [vmem:[#allocation5 + $0xf60] sm:$0xff]  ;;  %v411_v10 = vld [vmem:[#allocation5 + $0x748] sm:$0xff] }
 0x127   :  { %6487 = vmatprep.subr.bf16.mxu0 %v10658_v32  ;;  %v375_v32 = vld [vmem:[#allocation5 + $0x628] sm:$0xff] }
 0x128   :  { %6725 = vmatmul.mubr.bf16.vlgmr.msra.gmra.mrb[4].mxu1 %v12742_v16  ;;  %v10467_v42 = vcombine.low %v371_v30, %v375_v32  ;;  %v423_v22 = vld [vmem:[#allocation5 + $0x7a8] sm:$0xff] }
 0x129   :  { %6479 = vmatmul.mubr.bf16.vlgmr.msra.gmra.mrb[0].mxu0 %v12752_v35  ;;  %6734 = vmatpush1.bf16.msra.mxu1 %v10403_v34  ;;  %v10713_v34 = vcombine.low %v618_v18, %v622_v19  ;;  %v678_v18 = vld [vmem:[#allocation5 + $0xfa0] sm:$0xff]  ;;  %v419_v19 = vld [vmem:[#allocation5 + $0x788] sm:$0xff] }
 0x12a   :  { %6488 = vmatpush1.bf16.msra.mxu0 %v10657_v36  ;;  %6735 = vmatprep.subr.bf16.mxu1 %v10412_v37  ;;  %v10468_v36 = vcombine.high %v371_v30, %v375_v32  ;;  %v634_v37 = vld [vmem:[#allocation5 + $0xe40] sm:$0xff]  ;;  %v10515_v32 = vcombine.low %v419_v19, %v423_v22 }
 0x12b   :  { %6489 = vmatprep.subr.bf16.mxu0 %v10666_v39  ;;  %6519 = vmatprep.mubr.bf16.mxu0 %v12754_v43  ;;  %v379_v39 = vld [vmem:[#allocation5 + $0x648] sm:$0xff]  ;;  %v10730_v49 = vcombine.high %v634_v37, %v638_v38 }
 0x12c   :  { %6765 = vmatprep.mubr.bf16.mxu1 %v12738_v61  ;;  %v10475_v51 = vcombine.low %v379_v39, %v383_v41 }
 0x12d   :  { %6736 = vmatpush1.bf16.msra.mxu1 %v10411_v44  ;;  %v10721_v44 = vcombine.low %v626_v28, %v630_v29  ;;  %v686_v28 = vld [vmem:[#allocation5 + $0xfe0] sm:$0xff]  ;;  %v427_v29 = vld [vmem:[#allocation5 + $0x7c8] sm:$0xff] }
 0x12e   :  { %6490 = vmatpush1.bf16.msra.mxu0 %v10665_v45  ;;  %6737 = vmatprep.subr.bf16.mxu1 %v10420_v46  ;;  %v10476_v45 = vcombine.high %v379_v39, %v383_v41  ;;  %v642_v46 = vld [vmem:[#allocation5 + $0xe80] sm:$0xff]  ;;  %v152_v41 = vld [vmem:[#allocation2 + $0x30] sm:$0xff] }
 0x12f   :  { %6491 = vmatprep.subr.bf16.mxu0 %v10674_v50  ;;  %v391_v50 = vld [vmem:[#allocation5 + $0x6a8] sm:$0xff]  ;;  %v10738_v58 = vcombine.high %v642_v46, %v646_v47 }
 0x130   :  { %v10483_v60 = vcombine.low %v387_v48, %v391_v50 }
 0x131   :  { %6738 = vmatpush1.bf16.msra.mxu1 %v10419_v52  ;;  %v10729_v52 = vcombine.low %v634_v37, %v638_v38  ;;  %v694_v37 = vld [vmem:[#allocation5 + $0x1020] sm:$0xff]  ;;  %v435_v38 = vld [vmem:[#allocation5 + $0x808] sm:$0xff] }
 0x132   :  { %6492 = vmatpush1.bf16.msra.mxu0 %v10673_v53  ;;  %6739 = vmatprep.subr.bf16.mxu1 %v10428_v54  ;;  %v10484_v53 = vcombine.high %v387_v48, %v391_v50  ;;  %v650_v54 = vld [vmem:[#allocation5 + $0xec0] sm:$0xff]  ;;  %v443_v48 = vld [vmem:[#allocation5 + $0x848] sm:$0xff] }
 0x133   :  { %6493 = vmatprep.subr.bf16.mxu0 %v10682_v59  ;;  %v399_v59 = vld [vmem:[#allocation5 + $0x6e8] sm:$0xff]  ;;  %v10746_v3 = vcombine.high %v650_v54, %v654_v55 }
 0x134   :  { %v10491_v5 = vcombine.low %v395_v56, %v399_v59 }
 0x135   :  { %6740 = vmatpush1.bf16.msra.mxu1 %v10427_v62  ;;  %v10737_v62 = vcombine.low %v642_v46, %v646_v47  ;;  %v698_v46 = vld [vmem:[#allocation5 + $0x1040] sm:$0xff] }
 0x136   :  { %6494 = vmatpush1.bf16.msra.mxu0 %v10681_v63  ;;  %6741 = vmatprep.subr.bf16.mxu1 %v10436_v0  ;;  %v10492_v63 = vcombine.high %v395_v56, %v399_v59  ;;  %v658_v0 = vld [vmem:[#allocation5 + $0xf00] sm:$0xff] }
 0x137   :  { %6495 = vmatprep.subr.bf16.mxu0 %v10690_v4  ;;  %v407_v4 = vld [vmem:[#allocation5 + $0x728] sm:$0xff]  ;;  %v10754_v11 = vcombine.high %v658_v0, %v662_v1  ;;  %v702_v47 = vld [vmem:[#allocation5 + $0x1060] sm:$0xff] }
 0x138   :  { %v10499_v13 = vcombine.low %v403_v2, %v407_v4  ;;  %v706_v56 = vld [vmem:[#allocation5 + $0x1080] sm:$0xff] }
 0x139   :  { %6742 = vmatpush1.bf16.msra.mxu1 %v10435_v6  ;;  %v10745_v6 = vcombine.low %v650_v54, %v654_v55  ;;  %v710_v59 = vld [vmem:[#allocation5 + $0x10a0] sm:$0xff] }
 0x13a   :  { %6496 = vmatpush1.bf16.msra.mxu0 %v10689_v7  ;;  %6743 = vmatprep.subr.bf16.mxu1 %v10444_v8  ;;  %v10500_v7 = vcombine.high %v403_v2, %v407_v4  ;;  %v666_v8 = vld [vmem:[#allocation5 + $0xf40] sm:$0xff] }
 0x13b   :  { %6497 = vmatprep.subr.bf16.mxu0 %v10698_v12  ;;  %v415_v12 = vld [vmem:[#allocation5 + $0x768] sm:$0xff]  ;;  %v718_v4 = vld [vmem:[#allocation5 + $0x10e0] sm:$0xff] }
 0x13c   :  { %v10507_v23 = vcombine.low %v411_v10, %v415_v12 }
 0x13d   :  { %6744 = vmatpush1.bf16.msra.mxu1 %v10443_v14  ;;  %v10753_v14 = vcombine.low %v658_v0, %v662_v1  ;;  %v10793_v1 = vcombine.low %v698_v46, %v702_v47 }
 0x13e   :  { %6498 = vmatpush1.bf16.msra.mxu0 %v10697_v15  ;;  %6745 = vmatprep.subr.bf16.mxu1 %v10452_v17  ;;  %v10508_v15 = vcombine.high %v411_v10, %v415_v12  ;;  %v674_v17 = vld [vmem:[#allocation5 + $0xf80] sm:$0xff] }
 0x13f   :  { %6499 = vmatprep.subr.bf16.mxu0 %v10706_v20  ;;  %v10762_v20 = vcombine.high %v666_v8, %v670_v9  ;;  %v10770_v30 = vcombine.high %v674_v17, %v678_v18  ;;  %v726_v12 = vld [vmem:[#allocation5 + $0x1120] sm:$0xff] }
 0x141   :  { %6746 = vmatpush1.bf16.msra.mxu1 %v10451_v24  ;;  %v10761_v24 = vcombine.low %v666_v8, %v670_v9  ;;  %v10801_v9 = vcombine.low %v706_v56, %v710_v59 }
 0x142   :  { %6500 = vmatpush1.bf16.msra.mxu0 %v10705_v25  ;;  %6747 = vmatprep.subr.bf16.mxu1 %v10460_v26  ;;  %v10516_v25 = vcombine.high %v419_v19, %v423_v22  ;;  %v682_v26 = vld [vmem:[#allocation5 + $0xfc0] sm:$0xff] }
 0x143   :  { %6501 = vmatprep.subr.bf16.mxu0 %v10714_v31  ;;  %v431_v31 = vld [vmem:[#allocation5 + $0x7e8] sm:$0xff]  ;;  %v10778_v39 = vcombine.high %v682_v26, %v686_v28  ;;  %v734_v22 = vld [vmem:[#allocation5 + $0x1160] sm:$0xff] }
 0x145   :  { %6748 = vmatpush1.bf16.msra.mxu1 %v10459_v33  ;;  %v10769_v33 = vcombine.low %v674_v17, %v678_v18 }
 0x146   :  { %6502 = vmatpush1.bf16.msra.mxu0 %v10713_v34  ;;  %6749 = vmatprep.subr.bf16.mxu1 %v10468_v36  ;;  %v10524_v34 = vcombine.high %v427_v29, %v431_v31  ;;  %v690_v36 = vld [vmem:[#allocation5 + $0x1000] sm:$0xff] }
 0x147   :  { %6503 = vmatprep.subr.bf16.mxu0 %v10722_v40  ;;  %v439_v40 = vld [vmem:[#allocation5 + $0x828] sm:$0xff]  ;;  %v10786_v50 = vcombine.high %v690_v36, %v694_v37  ;;  %v10785_v54 = vcombine.low %v690_v36, %v694_v37 }
 0x149   :  { %6750 = vmatpush1.bf16.msra.mxu1 %v10467_v42  ;;  %v10523_v42 = vcombine.low %v427_v29, %v431_v31  ;;  %v742_v31 = vld [vmem:[#allocation5 + $0x11a0] sm:$0xff] }
 0x14a   :  { %6504 = vmatpush1.bf16.msra.mxu0 %v10721_v44  ;;  %6751 = vmatprep.subr.bf16.mxu1 %v10476_v45  ;;  %v10777_v44 = vcombine.low %v682_v26, %v686_v28  ;;  %v10532_v45 = vcombine.high %v435_v38, %v439_v40 }
 0x14b   :  { %6505 = vmatprep.subr.bf16.mxu0 %v10730_v49  ;;  %v447_v49 = vld [vmem:[#allocation5 + $0x868] sm:$0xff] }
 0x14c   :  { %v10540_v55 = vcombine.high %v443_v48, %v447_v49  ;;  %v10539_v0 = vcombine.low %v443_v48, %v447_v49  ;;  %v754_v48 = vld [vmem:[#allocation5 + $0x1200] sm:$0xff] }
 0x14d   :  { %6752 = vmatpush1.bf16.msra.mxu1 %v10475_v51  ;;  %v155_v51 = vld [vmem:[#allocation2 + $0x48] sm:$0xff]  ;;  %v758_v49 = vld [vmem:[#allocation5 + $0x1220] sm:$0xff] }
 0x14e   :  { %6506 = vmatpush1.bf16.msra.mxu0 %v10729_v52  ;;  %6753 = vmatprep.subr.bf16.mxu1 %v10484_v53  ;;  %v10531_v52 = vcombine.low %v435_v38, %v439_v40  ;;  %v12760_v53 = vpack.c.bf16 %v152_v41, %v152_v41  ;;  %v750_v40 = vld [vmem:[#allocation5 + $0x11e0] sm:$0xff]  ;;  %v491_v41 = vld [vmem:[#allocation5 + $0x9c8] sm:$0xff] }
 0x14f   :  { %6507 = vmatprep.subr.bf16.mxu0 %v10738_v58  ;;  %v10794_v58 = vcombine.high %v698_v46, %v702_v47 }
 0x151   :  { %6754 = vmatpush1.bf16.msra.mxu1 %v10483_v60  ;;  %v451_v60 = vld [vmem:[#allocation5 + $0x888] sm:$0xff] }
 0x152   :  { %6508 = vmatpush1.bf16.msra.mxu0 %v10737_v62  ;;  %6755 = vmatprep.subr.bf16.mxu1 %v10492_v63  ;;  %v455_v62 = vld [vmem:[#allocation5 + $0x8a8] sm:$0xff]  ;;  %v12762_v63 = vpack.c.bf16 %v155_v51, %v155_v51 }
 0x153   :  { %6509 = vmatprep.subr.bf16.mxu0 %v10746_v3  ;;  %v10548_v2 = vcombine.high %v451_v60, %v455_v62  ;;  %v714_v3 = vld [vmem:[#allocation5 + $0x10c0] sm:$0xff]  ;;  %v10547_v8 = vcombine.low %v451_v60, %v455_v62  ;;  %v507_v60 = vld [vmem:[#allocation5 + $0xa48] sm:$0xff]  ;;  %v10850_v62 = vcombine.high %v754_v48, %v758_v49 }
 0x154   :  { %v10809_v18 = vcombine.low %v714_v3, %v718_v4 }
 0x155   :  { %6756 = vmatpush1.bf16.msra.mxu1 %v10491_v5  ;;  %v459_v5 = vld [vmem:[#allocation5 + $0x8c8] sm:$0xff] }
 0x156   :  { %6510 = vmatpush1.bf16.msra.mxu0 %v10745_v6  ;;  %6757 = vmatprep.subr.bf16.mxu1 %v10500_v7  ;;  %v10802_v6 = vcombine.high %v706_v56, %v710_v59  ;;  %v463_v7 = vld [vmem:[#allocation5 + $0x8e8] sm:$0xff]  ;;  %v766_v59 = vld [vmem:[#allocation5 + $0x1260] sm:$0xff] }
 0x157   :  { %6511 = vmatprep.subr.bf16.mxu0 %v10754_v11  ;;  %v10556_v10 = vcombine.high %v459_v5, %v463_v7  ;;  %v722_v11 = vld [vmem:[#allocation5 + $0x1100] sm:$0xff]  ;;  %v10555_v17 = vcombine.low %v459_v5, %v463_v7 }
 0x158   :  { %v10817_v28 = vcombine.low %v722_v11, %v726_v12  ;;  %v774_v5 = vld [vmem:[#allocation5 + $0x12a0] sm:$0xff] }
 0x159   :  { %6758 = vmatpush1.bf16.msra.mxu1 %v10499_v13  ;;  %v467_v13 = vld [vmem:[#allocation5 + $0x908] sm:$0xff] }
 0x15a   :  { %6512 = vmatpush1.bf16.msra.mxu0 %v10753_v14  ;;  %6759 = vmatprep.subr.bf16.mxu1 %v10508_v15  ;;  %v10810_v14 = vcombine.high %v714_v3, %v718_v4  ;;  %v471_v15 = vld [vmem:[#allocation5 + $0x928] sm:$0xff]  ;;  %v770_v4 = vld [vmem:[#allocation5 + $0x1280] sm:$0xff] }
 0x15b   :  { %6513 = vmatprep.subr.bf16.mxu0 %v10762_v20  ;;  %v10564_v19 = vcombine.high %v467_v13, %v471_v15  ;;  %v730_v20 = vld [vmem:[#allocation5 + $0x1140] sm:$0xff]  ;;  %v10563_v26 = vcombine.low %v467_v13, %v471_v15  ;;  %v10866_v15 = vcombine.high %v770_v4, %v774_v5 }
 0x15c   :  { %v10825_v37 = vcombine.low %v730_v20, %v734_v22  ;;  %v782_v13 = vld [vmem:[#allocation5 + $0x12e0] sm:$0xff] }
 0x15d   :  { %6760 = vmatpush1.bf16.msra.mxu1 %v10507_v23  ;;  %v475_v23 = vld [vmem:[#allocation5 + $0x948] sm:$0xff] }
 0x15e   :  { %6514 = vmatpush1.bf16.msra.mxu0 %v10761_v24  ;;  %6761 = vmatprep.subr.bf16.mxu1 %v10516_v25  ;;  %v10818_v24 = vcombine.high %v722_v11, %v726_v12  ;;  %v479_v25 = vld [vmem:[#allocation5 + $0x968] sm:$0xff]  ;;  %v778_v12 = vld [vmem:[#allocation5 + $0x12c0] sm:$0xff] }
 0x15f   :  { %6515 = vmatprep.subr.bf16.mxu0 %v10770_v30  ;;  %v10572_v29 = vcombine.high %v475_v23, %v479_v25  ;;  %v738_v30 = vld [vmem:[#allocation5 + $0x1180] sm:$0xff]  ;;  %v10571_v36 = vcombine.low %v475_v23, %v479_v25  ;;  %v10874_v25 = vcombine.high %v778_v12, %v782_v13 }
 0x160   :  { %v10833_v46 = vcombine.low %v738_v30, %v742_v31  ;;  %v790_v23 = vld [vmem:[#allocation5 + $0x1320] sm:$0xff] }
 0x161   :  { %6762 = vmatpush1.bf16.msra.mxu1 %v10515_v32  ;;  %v483_v32 = vld [vmem:[#allocation5 + $0x988] sm:$0xff] }
 0x162   :  { %6516 = vmatpush1.bf16.msra.mxu0 %v10769_v33  ;;  %6763 = vmatprep.subr.bf16.mxu1 %v10524_v34  ;;  %v10826_v33 = vcombine.high %v730_v20, %v734_v22  ;;  %v487_v34 = vld [vmem:[#allocation5 + $0x9a8] sm:$0xff]  ;;  %v786_v22 = vld [vmem:[#allocation5 + $0x1300] sm:$0xff] }
 0x163   :  { %6517 = vmatprep.subr.bf16.mxu0 %v10778_v39  ;;  %v10580_v38 = vcombine.high %v483_v32, %v487_v34  ;;  %v746_v39 = vld [vmem:[#allocation5 + $0x11c0] sm:$0xff] }
 0x164   :  { %v10842_v51 = vcombine.high %v746_v39, %v750_v40 }
 0x165   :  { %6764 = vmatpush1.bf16.msra.mxu1 %v10523_v42  ;;  %v10834_v42 = vcombine.high %v738_v30, %v742_v31  ;;  %v794_v31 = vld [vmem:[#allocation5 + $0x1340] sm:$0xff] }
 0x166   :  { %6518 = vmatpush1.bf16.msra.mxu0 %v10777_v44  ;;  %6774 = vmatprep.subr.bf16.mxu1 %v10532_v45  ;;  %v495_v44 = vld [vmem:[#allocation5 + $0x9e8] sm:$0xff]  ;;  %v10579_v45 = vcombine.low %v483_v32, %v487_v34  ;;  %v798_v32 = vld [vmem:[#allocation5 + $0x1360] sm:$0xff]  ;;  %v10882_v34 = vcombine.high %v786_v22, %v790_v23 }
 0x167   :  { %6528 = vmatprep.subr.bf16.mxu0 %v10786_v50  ;;  %v10588_v47 = vcombine.high %v491_v41, %v495_v44  ;;  %v499_v50 = vld [vmem:[#allocation5 + $0xa08] sm:$0xff] }
 0x168   :  { %6766 = vmatmul.mubr.bf16.vlgmr.msra.gmra.mrb[4].mxu1 %v12744_v21 }
 0x169   :  { %6520 = vmatmul.mubr.bf16.vlgmr.msra.gmra.mrb[0].mxu0 %v12760_v53  ;;  %6775 = vmatpush1.bf16.msra.mxu1 %v10531_v52  ;;  %v503_v52 = vld [vmem:[#allocation5 + $0xa28] sm:$0xff] }
 0x16a   :  { %6529 = vmatpush1.bf16.msra.mxu0 %v10785_v54  ;;  %6776 = vmatprep.subr.bf16.mxu1 %v10540_v55  ;;  %v10587_v54 = vcombine.low %v491_v41, %v495_v44  ;;  %v10841_v55 = vcombine.low %v746_v39, %v750_v40  ;;  %v10596_v56 = vcombine.high %v499_v50, %v503_v52  ;;  %v802_v40 = vld [vmem:[#allocation5 + $0x1380] sm:$0xff] }
 0x16b   :  { %6530 = vmatprep.subr.bf16.mxu0 %v10794_v58  ;;  %6560 = vmatprep.mubr.bf16.mxu0 %v12762_v63  ;;  %v762_v58 = vld [vmem:[#allocation5 + $0x1240] sm:$0xff]  ;;  %v10890_v44 = vcombine.high %v794_v31, %v798_v32 }
 0x16c   :  { %6806 = vmatprep.mubr.bf16.mxu1 %v12746_v27  ;;  %v10858_v7 = vcombine.high %v762_v58, %v766_v59  ;;  %v806_v41 = vld [vmem:[#allocation5 + $0x13a0] sm:$0xff] }
 0x16d   :  { %6777 = vmatpush1.bf16.msra.mxu1 %v10539_v0  ;;  %v511_v0 = vld [vmem:[#allocation5 + $0xa68] sm:$0xff] }
 0x16e   :  { %6531 = vmatpush1.bf16.msra.mxu0 %v10793_v1  ;;  %6778 = vmatprep.subr.bf16.mxu1 %v10548_v2  ;;  %v10595_v1 = vcombine.low %v499_v50, %v503_v52  ;;  %v10849_v2 = vcombine.low %v754_v48, %v758_v49  ;;  %v10604_v3 = vcombine.high %v507_v60, %v511_v0  ;;  %v555_v49 = vld [vmem:[#allocation5 + $0xbc8] sm:$0xff]  ;;  %v810_v52 = vld [vmem:[#allocation5 + $0x13c0] sm:$0xff] }
 0x16f   :  { %6532 = vmatprep.subr.bf16.mxu0 %v10802_v6  ;;  %v515_v6 = vld [vmem:[#allocation5 + $0xa88] sm:$0xff]  ;;  %v10898_v50 = vcombine.high %v802_v40, %v806_v41 }
 0x171   :  { %6779 = vmatpush1.bf16.msra.mxu1 %v10547_v8  ;;  %v519_v8 = vld [vmem:[#allocation5 + $0xaa8] sm:$0xff] }
 0x172   :  { %6533 = vmatpush1.bf16.msra.mxu0 %v10801_v9  ;;  %6780 = vmatprep.subr.bf16.mxu1 %v10556_v10  ;;  %v10603_v9 = vcombine.low %v507_v60, %v511_v0  ;;  %v10857_v10 = vcombine.low %v762_v58, %v766_v59  ;;  %v10612_v11 = vcombine.high %v515_v6, %v519_v8  ;;  %v563_v60 = vld [vmem:[#allocation5 + $0xc08] sm:$0xff]  ;;  %v818_v0 = vld [vmem:[#allocation5 + $0x1400] sm:$0xff] }
 0x173   :  { %6534 = vmatprep.subr.bf16.mxu0 %v10810_v14  ;;  %v523_v14 = vld [vmem:[#allocation5 + $0xac8] sm:$0xff] }
 0x175   :  { %6781 = vmatpush1.bf16.msra.mxu1 %v10555_v17  ;;  %v527_v17 = vld [vmem:[#allocation5 + $0xae8] sm:$0xff] }
 0x176   :  { %6535 = vmatpush1.bf16.msra.mxu0 %v10809_v18  ;;  %6782 = vmatprep.subr.bf16.mxu1 %v10564_v19  ;;  %v10611_v18 = vcombine.low %v515_v6, %v519_v8  ;;  %v10865_v19 = vcombine.low %v770_v4, %v774_v5  ;;  %v10620_v20 = vcombine.high %v523_v14, %v527_v17  ;;  %v154_v5 = vld [vmem:[#allocation2 + $0x40] sm:$0xff]  ;;  %v575_v8 = vld [vmem:[#allocation5 + $0xc68] sm:$0xff] }
 0x177   :  { %6536 = vmatprep.subr.bf16.mxu0 %v10818_v24  ;;  %v531_v24 = vld [vmem:[#allocation5 + $0xb08] sm:$0xff] }
 0x179   :  { %6783 = vmatpush1.bf16.msra.mxu1 %v10563_v26  ;;  %v535_v26 = vld [vmem:[#allocation5 + $0xb28] sm:$0xff] }
 0x17a   :  { %6537 = vmatpush1.bf16.msra.mxu0 %v10817_v28  ;;  %6784 = vmatprep.subr.bf16.mxu1 %v10572_v29  ;;  %v10619_v28 = vcombine.low %v523_v14, %v527_v17  ;;  %v10873_v29 = vcombine.low %v778_v12, %v782_v13  ;;  %v10628_v30 = vcombine.high %v531_v24, %v535_v26 }
 0x17b   :  { %6538 = vmatprep.subr.bf16.mxu0 %v10826_v33  ;;  %v539_v33 = vld [vmem:[#allocation5 + $0xb48] sm:$0xff]  ;;  %v12768_v13 = vpack.c.bf16 %v154_v5, %v154_v5 }
 0x17c   :  { %v623_v5 = vld [vmem:[#allocation5 + $0xde8] sm:$0xff] }
 0x17d   :  { %6785 = vmatpush1.bf16.msra.mxu1 %v10571_v36  ;;  %v543_v36 = vld [vmem:[#allocation5 + $0xb68] sm:$0xff] }
 0x17e   :  { %6539 = vmatpush1.bf16.msra.mxu0 %v10825_v37  ;;  %6786 = vmatprep.subr.bf16.mxu1 %v10580_v38  ;;  %v10627_v37 = vcombine.low %v531_v24, %v535_v26  ;;  %v10881_v38 = vcombine.low %v786_v22, %v790_v23  ;;  %v10636_v39 = vcombine.high %v539_v33, %v543_v36  ;;  %v834_v22 = vld [vmem:[#allocation5 + $0x1480] sm:$0xff] }
 0x17f   :  { %6540 = vmatprep.subr.bf16.mxu0 %v10834_v42  ;;  %v547_v42 = vld [vmem:[#allocation5 + $0xb88] sm:$0xff]  ;;  %v838_v23 = vld [vmem:[#allocation5 + $0x14a0] sm:$0xff] }
 0x181   :  { %6787 = vmatpush1.bf16.msra.mxu1 %v10579_v45  ;;  %v551_v45 = vld [vmem:[#allocation5 + $0xba8] sm:$0xff] }
 0x182   :  { %6541 = vmatpush1.bf16.msra.mxu0 %v10833_v46  ;;  %6788 = vmatprep.subr.bf16.mxu1 %v10588_v47  ;;  %v10635_v46 = vcombine.low %v539_v33, %v543_v36  ;;  %v10889_v47 = vcombine.low %v794_v31, %v798_v32  ;;  %v10644_v48 = vcombine.high %v547_v42, %v551_v45  ;;  %v842_v31 = vld [vmem:[#allocation5 + $0x14c0] sm:$0xff] }
 0x183   :  { %6542 = vmatprep.subr.bf16.mxu0 %v10842_v51  ;;  %v559_v51 = vld [vmem:[#allocation5 + $0xbe8] sm:$0xff]  ;;  %v846_v32 = vld [vmem:[#allocation5 + $0x14e0] sm:$0xff] }
 0x184   :  { %v10652_v58 = vcombine.high %v555_v49, %v559_v51 }
 0x185   :  { %6789 = vmatpush1.bf16.msra.mxu1 %v10587_v54  ;;  %v814_v54 = vld [vmem:[#allocation5 + $0x13e0] sm:$0xff] }
 0x186   :  { %6543 = vmatpush1.bf16.msra.mxu0 %v10841_v55  ;;  %6790 = vmatprep.subr.bf16.mxu1 %v10596_v56  ;;  %v10643_v55 = vcombine.low %v547_v42, %v551_v45  ;;  %v10897_v56 = vcombine.low %v802_v40, %v806_v41  ;;  %v10906_v59 = vcombine.high %v810_v52, %v814_v54  ;;  %v850_v40 = vld [vmem:[#allocation5 + $0x1500] sm:$0xff] }
 0x187   :  { %6544 = vmatprep.subr.bf16.mxu0 %v10850_v62  ;;  %v567_v62 = vld [vmem:[#allocation5 + $0xc28] sm:$0xff]  ;;  %v854_v41 = vld [vmem:[#allocation5 + $0x1520] sm:$0xff] }
 0x188   :  { %v10660_v4 = vcombine.high %v563_v60, %v567_v62  ;;  %v10659_v12 = vcombine.low %v563_v60, %v567_v62  ;;  %v870_v60 = vld [vmem:[#allocation5 + $0x15a0] sm:$0xff] }
 0x189   :  { %6791 = vmatpush1.bf16.msra.mxu1 %v10595_v1  ;;  %v822_v1 = vld [vmem:[#allocation5 + $0x1420] sm:$0xff] }
 0x18a   :  { %6545 = vmatpush1.bf16.msra.mxu0 %v10849_v2  ;;  %6792 = vmatprep.subr.bf16.mxu1 %v10604_v3  ;;  %v10651_v2 = vcombine.low %v555_v49, %v559_v51  ;;  %v10905_v3 = vcombine.low %v810_v52, %v814_v54  ;;  %v10914_v6 = vcombine.high %v818_v0, %v822_v1  ;;  %v858_v49 = vld [vmem:[#allocation5 + $0x1540] sm:$0xff] }
 0x18b   :  { %6546 = vmatprep.subr.bf16.mxu0 %v10858_v7  ;;  %v571_v7 = vld [vmem:[#allocation5 + $0xc48] sm:$0xff]  ;;  %v10913_v14 = vcombine.low %v818_v0, %v822_v1  ;;  %v10945_v52 = vcombine.low %v850_v40, %v854_v41 }
 0x18c   :  { %v10667_v24 = vcombine.low %v571_v7, %v575_v8 }
 0x18d   :  { %6793 = vmatpush1.bf16.msra.mxu1 %v10603_v9  ;;  %v826_v9 = vld [vmem:[#allocation5 + $0x1440] sm:$0xff] }
 0x18e   :  { %6547 = vmatpush1.bf16.msra.mxu0 %v10857_v10  ;;  %6794 = vmatprep.subr.bf16.mxu1 %v10612_v11  ;;  %v830_v10 = vld [vmem:[#allocation5 + $0x1460] sm:$0xff]  ;;  %v157_v11 = vld [vmem:[#allocation2 + $0x58] sm:$0xff] }
 0x18f   :  { %6548 = vmatprep.subr.bf16.mxu0 %v10866_v15  ;;  %v10668_v15 = vcombine.high %v571_v7, %v575_v8  ;;  %v10922_v17 = vcombine.high %v826_v9, %v830_v10  ;;  %v874_v7 = vld [vmem:[#allocation5 + $0x15c0] sm:$0xff] }
 0x190   :  { %v878_v8 = vld [vmem:[#allocation5 + $0x15e0] sm:$0xff] }
 0x191   :  { %6795 = vmatpush1.bf16.msra.mxu1 %v10611_v18  ;;  %v579_v18 = vld [vmem:[#allocation5 + $0xc88] sm:$0xff] }
 0x192   :  { %6549 = vmatpush1.bf16.msra.mxu0 %v10865_v19  ;;  %6796 = vmatprep.subr.bf16.mxu1 %v10620_v20  ;;  %v583_v19 = vld [vmem:[#allocation5 + $0xca8] sm:$0xff]  ;;  %v12770_v20 = vpack.c.bf16 %v157_v11, %v157_v11 }
 0x193   :  { %6550 = vmatprep.subr.bf16.mxu0 %v10874_v25  ;;  %v10921_v25 = vcombine.low %v826_v9, %v830_v10  ;;  %v10676_v26 = vcombine.high %v579_v18, %v583_v19  ;;  %v10675_v33 = vcombine.low %v579_v18, %v583_v19  ;;  %v631_v18 = vld [vmem:[#allocation5 + $0xe28] sm:$0xff]  ;;  %v882_v19 = vld [vmem:[#allocation5 + $0x1600] sm:$0xff] }
 0x195   :  { %6797 = vmatpush1.bf16.msra.mxu1 %v10619_v28  ;;  %v10930_v28 = vcombine.high %v834_v22, %v838_v23 }
 0x196   :  { %6551 = vmatpush1.bf16.msra.mxu0 %v10873_v29  ;;  %6798 = vmatprep.subr.bf16.mxu1 %v10628_v30  ;;  %v587_v29 = vld [vmem:[#allocation5 + $0xcc8] sm:$0xff] }
 0x197   :  { %6552 = vmatprep.subr.bf16.mxu0 %v10882_v34  ;;  %v591_v30 = vld [vmem:[#allocation5 + $0xce8] sm:$0xff]  ;;  %v10929_v34 = vcombine.low %v834_v22, %v838_v23  ;;  %v886_v22 = vld [vmem:[#allocation5 + $0x1620] sm:$0xff] }
 0x198   :  { %v10684_v36 = vcombine.high %v587_v29, %v591_v30  ;;  %v10683_v42 = vcombine.low %v587_v29, %v591_v30  ;;  %v639_v29 = vld [vmem:[#allocation5 + $0xe68] sm:$0xff]  ;;  %v890_v30 = vld [vmem:[#allocation5 + $0x1640] sm:$0xff] }
 0x199   :  { %6799 = vmatpush1.bf16.msra.mxu1 %v10627_v37  ;;  %v10938_v37 = vcombine.high %v842_v31, %v846_v32 }
 0x19a   :  { %6553 = vmatpush1.bf16.msra.mxu0 %v10881_v38  ;;  %6800 = vmatprep.subr.bf16.mxu1 %v10636_v39  ;;  %v595_v38 = vld [vmem:[#allocation5 + $0xd08] sm:$0xff] }
 0x19b   :  { %6554 = vmatprep.subr.bf16.mxu0 %v10890_v44  ;;  %v599_v39 = vld [vmem:[#allocation5 + $0xd28] sm:$0xff]  ;;  %v10937_v44 = vcombine.low %v842_v31, %v846_v32  ;;  %v894_v31 = vld [vmem:[#allocation5 + $0x1660] sm:$0xff] }
 0x19c   :  { %v10692_v45 = vcombine.high %v595_v38, %v599_v39  ;;  %v10691_v51 = vcombine.low %v595_v38, %v599_v39  ;;  %v647_v38 = vld [vmem:[#allocation5 + $0xea8] sm:$0xff]  ;;  %v898_v39 = vld [vmem:[#allocation5 + $0x1680] sm:$0xff] }
 0x19d   :  { %6801 = vmatpush1.bf16.msra.mxu1 %v10635_v46  ;;  %v10946_v46 = vcombine.high %v850_v40, %v854_v41  ;;  %v902_v40 = vld [vmem:[#allocation5 + $0x16a0] sm:$0xff] }
 0x19e   :  { %6555 = vmatpush1.bf16.msra.mxu0 %v10889_v47  ;;  %6802 = vmatprep.subr.bf16.mxu1 %v10644_v48  ;;  %v603_v47 = vld [vmem:[#allocation5 + $0xd48] sm:$0xff] }
 0x19f   :  { %6556 = vmatprep.subr.bf16.mxu0 %v10898_v50  ;;  %v607_v48 = vld [vmem:[#allocation5 + $0xd68] sm:$0xff]  ;;  %v862_v50 = vld [vmem:[#allocation5 + $0x1560] sm:$0xff] }
 0x1a0   :  { %v10700_v54 = vcombine.high %v603_v47, %v607_v48  ;;  %v10699_v62 = vcombine.low %v603_v47, %v607_v48  ;;  %v10953_v0 = vcombine.low %v858_v49, %v862_v50  ;;  %v655_v47 = vld [vmem:[#allocation5 + $0xee8] sm:$0xff]  ;;  %v906_v48 = vld [vmem:[#allocation5 + $0x16c0] sm:$0xff] }
 0x1a1   :  { %6803 = vmatpush1.bf16.msra.mxu1 %v10643_v55  ;;  %v10954_v55 = vcombine.high %v858_v49, %v862_v50  ;;  %v910_v49 = vld [vmem:[#allocation5 + $0x16e0] sm:$0xff] }
 0x1a2   :  { %6557 = vmatpush1.bf16.msra.mxu0 %v10897_v56  ;;  %6804 = vmatprep.subr.bf16.mxu1 %v10652_v58  ;;  %v611_v56 = vld [vmem:[#allocation5 + $0xd88] sm:$0xff] }
 0x1a3   :  { %6558 = vmatprep.subr.bf16.mxu0 %v10906_v59  ;;  %v615_v58 = vld [vmem:[#allocation5 + $0xda8] sm:$0xff]  ;;  %v866_v59 = vld [vmem:[#allocation5 + $0x1580] sm:$0xff] }
 0x1a4   :  { %v10708_v1 = vcombine.high %v611_v56, %v615_v58  ;;  %v10707_v10 = vcombine.low %v611_v56, %v615_v58  ;;  %v663_v56 = vld [vmem:[#allocation5 + $0xf28] sm:$0xff]  ;;  %v914_v58 = vld [vmem:[#allocation5 + $0x1700] sm:$0xff] }
 0x1a5   :  { %6805 = vmatpush1.bf16.msra.mxu1 %v10651_v2 }
 0x1a6   :  { %6559 = vmatpush1.bf16.msra.mxu0 %v10905_v3  ;;  %6815 = vmatprep.subr.bf16.mxu1 %v10660_v4  ;;  %v10962_v3 = vcombine.high %v866_v59, %v870_v60  ;;  %v619_v4 = vld [vmem:[#allocation5 + $0xdc8] sm:$0xff] }
 0x1a7   :  { %6569 = vmatprep.subr.bf16.mxu0 %v10914_v6  ;;  %v10715_v23 = vcombine.low %v619_v4, %v623_v5 }
 0x1a8   :  { %6807 = vmatmul.mubr.bf16.vlgmr.msra.gmra.mrb[4].mxu1 %v12752_v35 }
 0x1a9   :  { %6561 = vmatmul.mubr.bf16.vlgmr.msra.gmra.mrb[0].mxu0 %v12768_v13  ;;  %6816 = vmatpush1.bf16.msra.mxu1 %v10659_v12  ;;  %v10961_v12 = vcombine.low %v866_v59, %v870_v60  ;;  %v918_v59 = vld [vmem:[#allocation5 + $0x1720] sm:$0xff] }
 0x1aa   :  { %6570 = vmatpush1.bf16.msra.mxu0 %v10913_v14  ;;  %6817 = vmatprep.subr.bf16.mxu1 %v10668_v15  ;;  %v10716_v14 = vcombine.high %v619_v4, %v623_v5  ;;  %v10970_v15 = vcombine.high %v874_v7, %v878_v8  ;;  %v671_v4 = vld [vmem:[#allocation5 + $0xf68] sm:$0xff]  ;;  %v922_v5 = vld [vmem:[#allocation5 + $0x1740] sm:$0xff] }
 0x1ab   :  { %6571 = vmatprep.subr.bf16.mxu0 %v10922_v17  ;;  %6601 = vmatprep.mubr.bf16.mxu0 %v12770_v20  ;;  %v627_v17 = vld [vmem:[#allocation5 + $0xe08] sm:$0xff] }
 0x1ac   :  { %6847 = vmatprep.mubr.bf16.mxu1 %v12754_v43  ;;  %v10723_v32 = vcombine.low %v627_v17, %v631_v18 }
 0x1ad   :  { %6818 = vmatpush1.bf16.msra.mxu1 %v10667_v24  ;;  %v10969_v24 = vcombine.low %v874_v7, %v878_v8  ;;  %v926_v7 = vld [vmem:[#allocation5 + $0x1760] sm:$0xff] }
 0x1ae   :  { %6572 = vmatpush1.bf16.msra.mxu0 %v10921_v25  ;;  %6819 = vmatprep.subr.bf16.mxu1 %v10676_v26  ;;  %v10724_v25 = vcombine.high %v627_v17, %v631_v18  ;;  %v10978_v26 = vcombine.high %v882_v19, %v886_v22  ;;  %v934_v17 = vld [vmem:[#allocation5 + $0x17a0] sm:$0xff] }
 0x1af   :  { %6573 = vmatprep.subr.bf16.mxu0 %v10930_v28  ;;  %v635_v28 = vld [vmem:[#allocation5 + $0xe48] sm:$0xff] }
 0x1b0   :  { %v10731_v41 = vcombine.low %v635_v28, %v639_v29 }
 0x1b1   :  { %6820 = vmatpush1.bf16.msra.mxu1 %v10675_v33  ;;  %v10977_v33 = vcombine.low %v882_v19, %v886_v22  ;;  %v11017_v19 = vcombine.low %v922_v5, %v926_v7 }
 0x1b2   :  { %6574 = vmatpush1.bf16.msra.mxu0 %v10929_v34  ;;  %6821 = vmatprep.subr.bf16.mxu1 %v10684_v36  ;;  %v10732_v34 = vcombine.high %v635_v28, %v639_v29  ;;  %v10986_v36 = vcombine.high %v890_v30, %v894_v31  ;;  %v942_v28 = vld [vmem:[#allocation5 + $0x17e0] sm:$0xff] }
 0x1b3   :  { %6575 = vmatprep.subr.bf16.mxu0 %v10938_v37  ;;  %v643_v37 = vld [vmem:[#allocation5 + $0xe88] sm:$0xff] }
 0x1b4   :  { %v10739_v50 = vcombine.low %v643_v37, %v647_v38 }
 0x1b5   :  { %6822 = vmatpush1.bf16.msra.mxu1 %v10683_v42  ;;  %v10985_v42 = vcombine.low %v890_v30, %v894_v31 }
 0x1b6   :  { %6576 = vmatpush1.bf16.msra.mxu0 %v10937_v44  ;;  %6823 = vmatprep.subr.bf16.mxu1 %v10692_v45  ;;  %v10740_v44 = vcombine.high %v643_v37, %v647_v38  ;;  %v10994_v45 = vcombine.high %v898_v39, %v902_v40  ;;  %v950_v37 = vld [vmem:[#allocation5 + $0x1820] sm:$0xff] }
 0x1b7   :  { %6577 = vmatprep.subr.bf16.mxu0 %v10946_v46  ;;  %v651_v46 = vld [vmem:[#allocation5 + $0xec8] sm:$0xff] }
 0x1b8   :  { %v10747_v60 = vcombine.low %v651_v46, %v655_v47 }
 0x1b9   :  { %6824 = vmatpush1.bf16.msra.mxu1 %v10691_v51  ;;  %v10993_v51 = vcombine.low %v898_v39, %v902_v40 }
 0x1ba   :  { %6578 = vmatpush1.bf16.msra.mxu0 %v10945_v52  ;;  %6825 = vmatprep.subr.bf16.mxu1 %v10700_v54  ;;  %v10748_v52 = vcombine.high %v651_v46, %v655_v47  ;;  %v11002_v54 = vcombine.high %v906_v48, %v910_v49  ;;  %v954_v46 = vld [vmem:[#allocation5 + $0x1840] sm:$0xff] }
 0x1bb   :  { %v12776_v2 = vpop.f32.mrb[0].mxu1  ;;  %6579 = vmatprep.subr.bf16.mxu0 %v10954_v55  ;;  %v659_v55 = vld [vmem:[#allocation5 + $0xf08] sm:$0xff]  ;;  %v958_v47 = vld [vmem:[#allocation5 + $0x1860] sm:$0xff] }
 0x1bc   :  { %v12778_v6 = vpop.f32.mrb[1].mxu1  ;;  %v10755_v8 = vcombine.low %v659_v55, %v663_v56 }
 0x1bd   :  { %v6402_v9 = vpop.f32.mrb[2].mxu1  ;;  %6826 = vmatpush1.bf16.msra.mxu1 %v10699_v62  ;;  %v11001_v62 = vcombine.low %v906_v48, %v910_v49  ;;  %v159_v48 = vld [vmem:[#allocation2 + $0x68] sm:$0xff] }
 0x1be   :  { %6580 = vmatpush1.bf16.msra.mxu0 %v10953_v0  ;;  %v6403_v11 = vpop.f32.mrb[3].mxu1  ;;  %6827 = vmatprep.subr.bf16.mxu1 %v10708_v1  ;;  %v10756_v0 = vcombine.high %v659_v55, %v663_v56  ;;  %v11010_v1 = vcombine.high %v914_v58, %v918_v59  ;;  %v11009_v9 = vcombine.low %v914_v58, %v918_v59  ;;  %v707_v55 = vld [vmem:[#allocation5 + $0x1088] sm:$0xff]  ;;  %v962_v59 = vld [vmem:[#allocation5 + $0x1880] sm:$0xff] }
 0x1bf   :  { %6581 = vmatprep.subr.bf16.mxu0 %v10962_v3  ;;  %v667_v3 = vld [vmem:[#allocation5 + $0xf48] sm:$0xff]  ;;  %v11018_v11 = vcombine.high %v922_v5, %v926_v7  ;;  %v12782_v58 = vpack.c.bf16 %v159_v48, %v159_v48  ;;  %v970_v7 = vld [vmem:[#allocation5 + $0x18c0] sm:$0xff] }
 0x1c0   :  { %v10763_v18 = vcombine.low %v667_v3, %v671_v4  ;;  %v711_v56 = vld [vmem:[#allocation5 + $0x10a8] sm:$0xff] }
 0x1c1   :  { %6828 = vmatpush1.bf16.msra.mxu1 %v10707_v10  ;;  %v10764_v10 = vcombine.high %v667_v3, %v671_v4  ;;  %v715_v4 = vld [vmem:[#allocation5 + $0x10c8] sm:$0xff] }
 0x1c2   :  { %6582 = vmatpush1.bf16.msra.mxu0 %v10961_v12  ;;  %6829 = vmatprep.subr.bf16.mxu1 %v10716_v14  ;;  %v675_v12 = vld [vmem:[#allocation5 + $0xf88] sm:$0xff] }
 0x1c3   :  { %6583 = vmatprep.subr.bf16.mxu0 %v10970_v15  ;;  %v679_v14 = vld [vmem:[#allocation5 + $0xfa8] sm:$0xff]  ;;  %v930_v15 = vld [vmem:[#allocation5 + $0x1780] sm:$0xff] }
 0x1c4   :  { %v10772_v22 = vcombine.high %v675_v12, %v679_v14  ;;  %v10771_v29 = vcombine.low %v675_v12, %v679_v14  ;;  %v11025_v30 = vcombine.low %v930_v15, %v934_v17  ;;  %v719_v5 = vld [vmem:[#allocation5 + $0x10e8] sm:$0xff] }
 0x1c5   :  { %6830 = vmatpush1.bf16.msra.mxu1 %v10715_v23  ;;  %v11026_v23 = vcombine.high %v930_v15, %v934_v17  ;;  %v723_v14 = vld [vmem:[#allocation5 + $0x1108] sm:$0xff]  ;;  %v978_v17 = vld [vmem:[#allocation5 + $0x1900] sm:$0xff] }
 0x1c6   :  { %6584 = vmatpush1.bf16.msra.mxu0 %v10969_v24  ;;  %6831 = vmatprep.subr.bf16.mxu1 %v10724_v25  ;;  %v683_v24 = vld [vmem:[#allocation5 + $0xfc8] sm:$0xff] }
 0x1c7   :  { %6585 = vmatprep.subr.bf16.mxu0 %v10978_v26  ;;  %v687_v25 = vld [vmem:[#allocation5 + $0xfe8] sm:$0xff]  ;;  %v938_v26 = vld [vmem:[#allocation5 + $0x17c0] sm:$0xff] }
 0x1c8   :  { %v10780_v31 = vcombine.high %v683_v24, %v687_v25  ;;  %v10779_v38 = vcombine.low %v683_v24, %v687_v25  ;;  %v11033_v39 = vcombine.low %v938_v26, %v942_v28  ;;  %v727_v15 = vld [vmem:[#allocation5 + $0x1128] sm:$0xff] }
 0x1c9   :  { %6832 = vmatpush1.bf16.msra.mxu1 %v10723_v32  ;;  %v11034_v32 = vcombine.high %v938_v26, %v942_v28  ;;  %v731_v25 = vld [vmem:[#allocation5 + $0x1148] sm:$0xff]  ;;  %v986_v28 = vld [vmem:[#allocation5 + $0x1940] sm:$0xff] }
 0x1ca   :  { %6586 = vmatpush1.bf16.msra.mxu0 %v10977_v33  ;;  %6833 = vmatprep.subr.bf16.mxu1 %v10732_v34  ;;  %v691_v33 = vld [vmem:[#allocation5 + $0x1008] sm:$0xff] }
 0x1cb   :  { %6587 = vmatprep.subr.bf16.mxu0 %v10986_v36  ;;  %v695_v34 = vld [vmem:[#allocation5 + $0x1028] sm:$0xff]  ;;  %v946_v36 = vld [vmem:[#allocation5 + $0x1800] sm:$0xff] }
 0x1cc   :  { %v10788_v40 = vcombine.high %v691_v33, %v695_v34  ;;  %v10787_v49 = vcombine.low %v691_v33, %v695_v34  ;;  %v735_v26 = vld [vmem:[#allocation5 + $0x1168] sm:$0xff] }
 0x1cd   :  { %6834 = vmatpush1.bf16.msra.mxu1 %v10731_v41  ;;  %v156_v41 = vld [vmem:[#allocation2 + $0x50] sm:$0xff]  ;;  %v739_v34 = vld [vmem:[#allocation5 + $0x1188] sm:$0xff] }
 0x1ce   :  { %6588 = vmatpush1.bf16.msra.mxu0 %v10985_v42  ;;  %6835 = vmatprep.subr.bf16.mxu1 %v10740_v44  ;;  %v11042_v42 = vcombine.high %v946_v36, %v950_v37  ;;  %v699_v44 = vld [vmem:[#allocation5 + $0x1048] sm:$0xff] }
 0x1cf   :  { %6589 = vmatprep.subr.bf16.mxu0 %v10994_v45  ;;  %v703_v45 = vld [vmem:[#allocation5 + $0x1068] sm:$0xff] }
 0x1d1   :  { %6836 = vmatpush1.bf16.msra.mxu1 %v10739_v50  ;;  %v12780_v50 = vpack.c.bf16 %v156_v41, %v156_v41 }
 0x1d2   :  { %6590 = vmatpush1.bf16.msra.mxu0 %v10993_v51  ;;  %6837 = vmatprep.subr.bf16.mxu1 %v10748_v52  ;;  %v11041_v51 = vcombine.low %v946_v36, %v950_v37  ;;  %v10796_v52 = vcombine.high %v699_v44, %v703_v45  ;;  %v743_v36 = vld [vmem:[#allocation5 + $0x11a8] sm:$0xff]  ;;  %v994_v37 = vld [vmem:[#allocation5 + $0x1980] sm:$0xff] }
 0x1d3   :  { %6591 = vmatprep.subr.bf16.mxu0 %v11002_v54  ;;  %v11050_v54 = vcombine.high %v954_v46, %v958_v47  ;;  %v10836_v41 = vcombine.high %v739_v34, %v743_v36  ;;  %v10835_v48 = vcombine.low %v739_v34, %v743_v36  ;;  %v791_v34 = vld [vmem:[#allocation5 + $0x1328] sm:$0xff]  ;;  %v1042_v36 = vld [vmem:[#allocation5 + $0x1b00] sm:$0xff] }
 0x1d5   :  { %6838 = vmatpush1.bf16.msra.mxu1 %v10747_v60  ;;  %v966_v60 = vld [vmem:[#allocation5 + $0x18a0] sm:$0xff] }
 0x1d6   :  { %6592 = vmatpush1.bf16.msra.mxu0 %v11001_v62  ;;  %6839 = vmatprep.subr.bf16.mxu1 %v10756_v0  ;;  %v10795_v62 = vcombine.low %v699_v44, %v703_v45  ;;  %v11049_v0 = vcombine.low %v954_v46, %v958_v47  ;;  %v11058_v3 = vcombine.high %v962_v59, %v966_v60  ;;  %v747_v44 = vld [vmem:[#allocation5 + $0x11c8] sm:$0xff]  ;;  %v1002_v46 = vld [vmem:[#allocation5 + $0x19c0] sm:$0xff] }
 0x1d7   :  { %6593 = vmatprep.subr.bf16.mxu0 %v11010_v1  ;;  %v10804_v1 = vcombine.high %v707_v55, %v711_v56  ;;  %v751_v45 = vld [vmem:[#allocation5 + $0x11e8] sm:$0xff]  ;;  %v1006_v47 = vld [vmem:[#allocation5 + $0x19e0] sm:$0xff] }
 0x1d9   :  { %6840 = vmatpush1.bf16.msra.mxu1 %v10755_v8  ;;  %v974_v8 = vld [vmem:[#allocation5 + $0x18e0] sm:$0xff] }
 0x1da   :  { %6594 = vmatpush1.bf16.msra.mxu0 %v11009_v9  ;;  %6841 = vmatprep.subr.bf16.mxu1 %v10764_v10  ;;  %v10803_v9 = vcombine.low %v707_v55, %v711_v56  ;;  %v11057_v10 = vcombine.low %v962_v59, %v966_v60  ;;  %v11066_v12 = vcombine.high %v970_v7, %v974_v8  ;;  %v759_v55 = vld [vmem:[#allocation5 + $0x1228] sm:$0xff]  ;;  %v1010_v56 = vld [vmem:[#allocation5 + $0x1a00] sm:$0xff] }
 0x1db   :  { %6595 = vmatprep.subr.bf16.mxu0 %v11018_v11  ;;  %v10812_v11 = vcombine.high %v715_v4, %v719_v5  ;;  %v1014_v59 = vld [vmem:[#allocation5 + $0x1a20] sm:$0xff]  ;;  %v10843_v60 = vcombine.low %v747_v44, %v751_v45 }
 0x1dd   :  { %6842 = vmatpush1.bf16.msra.mxu1 %v10763_v18  ;;  %v982_v18 = vld [vmem:[#allocation5 + $0x1920] sm:$0xff] }
 0x1de   :  { %6596 = vmatpush1.bf16.msra.mxu0 %v11017_v19  ;;  %6843 = vmatprep.subr.bf16.mxu1 %v10772_v22  ;;  %v10811_v19 = vcombine.low %v715_v4, %v719_v5  ;;  %v11065_v22 = vcombine.low %v970_v7, %v974_v8  ;;  %v11074_v24 = vcombine.high %v978_v17, %v982_v18  ;;  %v767_v4 = vld [vmem:[#allocation5 + $0x1268] sm:$0xff]  ;;  %v1018_v5 = vld [vmem:[#allocation5 + $0x1a40] sm:$0xff] }
 0x1df   :  { %6597 = vmatprep.subr.bf16.mxu0 %v11026_v23  ;;  %v10820_v23 = vcombine.high %v723_v14, %v727_v15  ;;  %v1022_v7 = vld [vmem:[#allocation5 + $0x1a60] sm:$0xff] }
 0x1e1   :  { %6844 = vmatpush1.bf16.msra.mxu1 %v10771_v29  ;;  %v990_v29 = vld [vmem:[#allocation5 + $0x1960] sm:$0xff] }
 0x1e2   :  { %6598 = vmatpush1.bf16.msra.mxu0 %v11025_v30  ;;  %6845 = vmatprep.subr.bf16.mxu1 %v10780_v31  ;;  %v10819_v30 = vcombine.low %v723_v14, %v727_v15  ;;  %v11073_v31 = vcombine.low %v978_v17, %v982_v18  ;;  %v11082_v33 = vcombine.high %v986_v28, %v990_v29  ;;  %v775_v14 = vld [vmem:[#allocation5 + $0x12a8] sm:$0xff]  ;;  %v1026_v15 = vld [vmem:[#allocation5 + $0x1a80] sm:$0xff] }
 0x1e3   :  { %6599 = vmatprep.subr.bf16.mxu0 %v11034_v32  ;;  %v10828_v32 = vcombine.high %v731_v25, %v735_v26  ;;  %v1030_v17 = vld [vmem:[#allocation5 + $0x1aa0] sm:$0xff] }
 0x1e5   :  { %6846 = vmatpush1.bf16.msra.mxu1 %v10779_v38  ;;  %v998_v38 = vld [vmem:[#allocation5 + $0x19a0] sm:$0xff] }
 0x1e6   :  { %6600 = vmatpush1.bf16.msra.mxu0 %v11033_v39  ;;  %6856 = vmatprep.subr.bf16.mxu1 %v10788_v40  ;;  %v10827_v39 = vcombine.low %v731_v25, %v735_v26  ;;  %v11081_v40 = vcombine.low %v986_v28, %v990_v29  ;;  %v783_v25 = vld [vmem:[#allocation5 + $0x12e8] sm:$0xff]  ;;  %v1034_v26 = vld [vmem:[#allocation5 + $0x1ac0] sm:$0xff] }
 0x1e7   :  { %6610 = vmatprep.subr.bf16.mxu0 %v11042_v42  ;;  %v11090_v42 = vcombine.high %v994_v37, %v998_v38  ;;  %v1038_v28 = vld [vmem:[#allocation5 + $0x1ae0] sm:$0xff] }
 0x1e8   :  { %6848 = vmatmul.mubr.bf16.vlgmr.msra.gmra.mrb[4].mxu1 %v12760_v53 }
 0x1e9   :  { %6602 = vmatmul.mubr.bf16.vlgmr.msra.gmra.mrb[0].mxu0 %v12780_v50  ;;  %6857 = vmatpush1.bf16.msra.mxu1 %v10787_v49  ;;  %v11089_v49 = vcombine.low %v994_v37, %v998_v38  ;;  %v1046_v37 = vld [vmem:[#allocation5 + $0x1b20] sm:$0xff] }
 0x1ea   :  { %6611 = vmatpush1.bf16.msra.mxu0 %v11041_v51  ;;  %6858 = vmatprep.subr.bf16.mxu1 %v10796_v52  ;;  %v10844_v51 = vcombine.high %v747_v44, %v751_v45  ;;  %v11098_v52 = vcombine.high %v1002_v46, %v1006_v47  ;;  %v799_v44 = vld [vmem:[#allocation5 + $0x1368] sm:$0xff]  ;;  %v1050_v45 = vld [vmem:[#allocation5 + $0x1b40] sm:$0xff] }
 0x1eb   :  { %6612 = vmatprep.subr.bf16.mxu0 %v11050_v54  ;;  %6642 = vmatprep.mubr.bf16.mxu0 %v12782_v58  ;;  %v755_v54 = vld [vmem:[#allocation5 + $0x1208] sm:$0xff] }
 0x1ec   :  { %6888 = vmatprep.mubr.bf16.mxu1 %v12762_v63  ;;  %v10851_v8 = vcombine.low %v755_v54, %v759_v55 }
 0x1ed   :  { %6859 = vmatpush1.bf16.msra.mxu1 %v10795_v62  ;;  %v11097_v62 = vcombine.low %v1002_v46, %v1006_v47  ;;  %v1054_v46 = vld [vmem:[#allocation5 + $0x1b60] sm:$0xff] }
 0x1ee   :  { %6613 = vmatpush1.bf16.msra.mxu0 %v11049_v0  ;;  %6860 = vmatprep.subr.bf16.mxu1 %v10804_v1  ;;  %v10852_v0 = vcombine.high %v755_v54, %v759_v55  ;;  %v11106_v1 = vcombine.high %v1010_v56, %v1014_v59  ;;  %v807_v54 = vld [vmem:[#allocation5 + $0x13a8] sm:$0xff]  ;;  %v1058_v55 = vld [vmem:[#allocation5 + $0x1b80] sm:$0xff] }
 0x1ef   :  { %6614 = vmatprep.subr.bf16.mxu0 %v11058_v3  ;;  %v763_v3 = vld [vmem:[#allocation5 + $0x1248] sm:$0xff] }
 0x1f0   :  { %v10859_v18 = vcombine.low %v763_v3, %v767_v4 }
 0x1f1   :  { %6861 = vmatpush1.bf16.msra.mxu1 %v10803_v9  ;;  %v11105_v9 = vcombine.low %v1010_v56, %v1014_v59  ;;  %v1062_v56 = vld [vmem:[#allocation5 + $0x1ba0] sm:$0xff] }
 0x1f2   :  { %6615 = vmatpush1.bf16.msra.mxu0 %v11057_v10  ;;  %6862 = vmatprep.subr.bf16.mxu1 %v10812_v11  ;;  %v10860_v10 = vcombine.high %v763_v3, %v767_v4  ;;  %v11114_v11 = vcombine.high %v1018_v5, %v1022_v7  ;;  %v815_v3 = vld [vmem:[#allocation5 + $0x13e8] sm:$0xff]  ;;  %v1066_v4 = vld [vmem:[#allocation5 + $0x1bc0] sm:$0xff] }
 0x1f3   :  { %6616 = vmatprep.subr.bf16.mxu0 %v11066_v12  ;;  %v771_v12 = vld [vmem:[#allocation5 + $0x1288] sm:$0xff] }
 0x1f4   :  { %v10867_v29 = vcombine.low %v771_v12, %v775_v14 }
 0x1f5   :  { %6863 = vmatpush1.bf16.msra.mxu1 %v10811_v19  ;;  %v11113_v19 = vcombine.low %v1018_v5, %v1022_v7  ;;  %v1070_v5 = vld [vmem:[#allocation5 + $0x1be0] sm:$0xff] }
 0x1f6   :  { %6617 = vmatpush1.bf16.msra.mxu0 %v11065_v22  ;;  %6864 = vmatprep.subr.bf16.mxu1 %v10820_v23  ;;  %v10868_v22 = vcombine.high %v771_v12, %v775_v14  ;;  %v11122_v23 = vcombine.high %v1026_v15, %v1030_v17  ;;  %v823_v12 = vld [vmem:[#allocation5 + $0x1428] sm:$0xff]  ;;  %v1074_v14 = vld [vmem:[#allocation5 + $0x1c00] sm:$0xff] }
 0x1f7   :  { %6618 = vmatprep.subr.bf16.mxu0 %v11074_v24  ;;  %v779_v24 = vld [vmem:[#allocation5 + $0x12c8] sm:$0xff] }
 0x1f8   :  { %v10875_v38 = vcombine.low %v779_v24, %v783_v25 }
 0x1f9   :  { %6865 = vmatpush1.bf16.msra.mxu1 %v10819_v30  ;;  %v11121_v30 = vcombine.low %v1026_v15, %v1030_v17  ;;  %v1078_v15 = vld [vmem:[#allocation5 + $0x1c20] sm:$0xff] }
 0x1fa   :  { %6619 = vmatpush1.bf16.msra.mxu0 %v11073_v31  ;;  %6866 = vmatprep.subr.bf16.mxu1 %v10828_v32  ;;  %v10876_v31 = vcombine.high %v779_v24, %v783_v25  ;;  %v11130_v32 = vcombine.high %v1034_v26, %v1038_v28  ;;  %v827_v24 = vld [vmem:[#allocation5 + $0x1448] sm:$0xff] }
 0x1fb   :  { %6620 = vmatprep.subr.bf16.mxu0 %v11082_v33  ;;  %v787_v33 = vld [vmem:[#allocation5 + $0x1308] sm:$0xff] }
 0x1fc   :  { %v10883_v47 = vcombine.low %v787_v33, %v791_v34  ;;  %v831_v25 = vld [vmem:[#allocation5 + $0x1468] sm:$0xff] }
 0x1fd   :  { %6867 = vmatpush1.bf16.msra.mxu1 %v10827_v39  ;;  %v11129_v39 = vcombine.low %v1034_v26, %v1038_v28  ;;  %v1082_v26 = vld [vmem:[#allocation5 + $0x1c40] sm:$0xff] }
 0x1fe   :  { %6621 = vmatpush1.bf16.msra.mxu0 %v11081_v40  ;;  %6868 = vmatprep.subr.bf16.mxu1 %v10836_v41  ;;  %v10884_v40 = vcombine.high %v787_v33, %v791_v34  ;;  %v11138_v41 = vcombine.high %v1042_v36, %v1046_v37  ;;  %v1086_v28 = vld [vmem:[#allocation5 + $0x1c60] sm:$0xff]  ;;  %v10924_v33 = vcombine.high %v827_v24, %v831_v25 }
 0x1ff   :  { %6622 = vmatprep.subr.bf16.mxu0 %v11090_v42  ;;  %v795_v42 = vld [vmem:[#allocation5 + $0x1348] sm:$0xff]  ;;  %v11178_v34 = vcombine.high %v1082_v26, %v1086_v28 }
 0x200   :  { %v10891_v59 = vcombine.low %v795_v42, %v799_v44 }
 0x201   :  { %6869 = vmatpush1.bf16.msra.mxu1 %v10835_v48  ;;  %v11137_v48 = vcombine.low %v1042_v36, %v1046_v37  ;;  %v835_v36 = vld [vmem:[#allocation5 + $0x1488] sm:$0xff] }
 0x202   :  { %6623 = vmatpush1.bf16.msra.mxu0 %v11089_v49  ;;  %6870 = vmatprep.subr.bf16.mxu1 %v10844_v51  ;;  %v10892_v49 = vcombine.high %v795_v42, %v799_v44  ;;  %v11146_v51 = vcombine.high %v1050_v45, %v1054_v46  ;;  %v839_v37 = vld [vmem:[#allocation5 + $0x14a8] sm:$0xff]  ;;  %v11177_v42 = vcombine.low %v1082_v26, %v1086_v28 }
 0x203   :  { %6624 = vmatprep.subr.bf16.mxu0 %v11098_v52  ;;  %v803_v52 = vld [vmem:[#allocation5 + $0x1388] sm:$0xff]  ;;  %v10932_v44 = vcombine.high %v835_v36, %v839_v37 }
 0x204   :  { %v10899_v7 = vcombine.low %v803_v52, %v807_v54  ;;  %v875_v26 = vld [vmem:[#allocation5 + $0x15c8] sm:$0xff] }
 0x205   :  { %6871 = vmatpush1.bf16.msra.mxu1 %v10843_v60  ;;  %v11145_v60 = vcombine.low %v1050_v45, %v1054_v46  ;;  %v843_v46 = vld [vmem:[#allocation5 + $0x14c8] sm:$0xff] }
 0x206   :  { %6625 = vmatpush1.bf16.msra.mxu0 %v11097_v62  ;;  %6872 = vmatprep.subr.bf16.mxu1 %v10852_v0  ;;  %v10900_v62 = vcombine.high %v803_v52, %v807_v54  ;;  %v11154_v0 = vcombine.high %v1058_v55, %v1062_v56  ;;  %v879_v28 = vld [vmem:[#allocation5 + $0x15e8] sm:$0xff] }
 0x207   :  { %6626 = vmatprep.subr.bf16.mxu0 %v11106_v1  ;;  %v811_v1 = vld [vmem:[#allocation5 + $0x13c8] sm:$0xff] }
 0x208   :  { %v10907_v17 = vcombine.low %v811_v1, %v815_v3 }
 0x209   :  { %6873 = vmatpush1.bf16.msra.mxu1 %v10851_v8  ;;  %v11153_v8 = vcombine.low %v1058_v55, %v1062_v56  ;;  %v851_v56 = vld [vmem:[#allocation5 + $0x1508] sm:$0xff] }
 0x20a   :  { %6627 = vmatpush1.bf16.msra.mxu0 %v11105_v9  ;;  %6874 = vmatprep.subr.bf16.mxu1 %v10860_v10  ;;  %v10908_v9 = vcombine.high %v811_v1, %v815_v3  ;;  %v11162_v10 = vcombine.high %v1066_v4, %v1070_v5 }
 0x20b   :  { %6628 = vmatprep.subr.bf16.mxu0 %v11114_v11  ;;  %v819_v11 = vld [vmem:[#allocation5 + $0x1408] sm:$0xff] }
 0x20d   :  { %6875 = vmatpush1.bf16.msra.mxu1 %v10859_v18  ;;  %v11161_v18 = vcombine.low %v1066_v4, %v1070_v5  ;;  %v859_v5 = vld [vmem:[#allocation5 + $0x1548] sm:$0xff] }
 0x20e   :  { %6629 = vmatpush1.bf16.msra.mxu0 %v11113_v19  ;;  %6876 = vmatprep.subr.bf16.mxu1 %v10868_v22  ;;  %v10916_v19 = vcombine.high %v819_v11, %v823_v12  ;;  %v158_v22 = vld [vmem:[#allocation2 + $0x60] sm:$0xff] }
 0x20f   :  { %6630 = vmatprep.subr.bf16.mxu0 %v11122_v23  ;;  %v11170_v23 = vcombine.high %v1074_v14, %v1078_v15 }
 0x211   :  { %6877 = vmatpush1.bf16.msra.mxu1 %v10867_v29  ;;  %v161_v29 = vld [vmem:[#allocation2 + $0x78] sm:$0xff] }
 0x212   :  { %6631 = vmatpush1.bf16.msra.mxu0 %v11121_v30  ;;  %6878 = vmatprep.subr.bf16.mxu1 %v10876_v31  ;;  %v10915_v30 = vcombine.low %v819_v11, %v823_v12  ;;  %v12788_v31 = vpack.c.bf16 %v158_v22, %v158_v22 }
 0x213   :  { %6632 = vmatprep.subr.bf16.mxu0 %v11130_v32  ;;  %v11169_v32 = vcombine.low %v1074_v14, %v1078_v15  ;;  %v867_v15 = vld [vmem:[#allocation5 + $0x1588] sm:$0xff] }
 0x215   :  { %6879 = vmatpush1.bf16.msra.mxu1 %v10875_v38  ;;  %v12790_v38 = vpack.c.bf16 %v161_v29, %v161_v29  ;;  %v1130_v29 = vld [vmem:[#allocation5 + $0x1dc0] sm:$0xff] }
 0x216   :  { %6633 = vmatpush1.bf16.msra.mxu0 %v11129_v39  ;;  %6880 = vmatprep.subr.bf16.mxu1 %v10884_v40  ;;  %v1090_v39 = vld [vmem:[#allocation5 + $0x1c80] sm:$0xff] }
 0x217   :  { %6634 = vmatprep.subr.bf16.mxu0 %v11138_v41  ;;  %v1094_v40 = vld [vmem:[#allocation5 + $0x1ca0] sm:$0xff]  ;;  %v10923_v41 = vcombine.low %v827_v24, %v831_v25 }
 0x218   :  { %v11186_v45 = vcombine.high %v1090_v39, %v1094_v40  ;;  %v11185_v52 = vcombine.low %v1090_v39, %v1094_v40  ;;  %v887_v39 = vld [vmem:[#allocation5 + $0x1628] sm:$0xff]  ;;  %v1138_v40 = vld [vmem:[#allocation5 + $0x1e00] sm:$0xff] }
 0x219   :  { %6881 = vmatpush1.bf16.msra.mxu1 %v10883_v47  ;;  %v847_v47 = vld [vmem:[#allocation5 + $0x14e8] sm:$0xff] }
 0x21a   :  { %6635 = vmatpush1.bf16.msra.mxu0 %v11137_v48  ;;  %6882 = vmatprep.subr.bf16.mxu1 %v10892_v49  ;;  %v1098_v48 = vld [vmem:[#allocation5 + $0x1cc0] sm:$0xff]  ;;  %v10940_v54 = vcombine.high %v843_v46, %v847_v47 }
 0x21b   :  { %6636 = vmatprep.subr.bf16.mxu0 %v11146_v51  ;;  %v1102_v49 = vld [vmem:[#allocation5 + $0x1ce0] sm:$0xff]  ;;  %v10931_v51 = vcombine.low %v835_v36, %v839_v37  ;;  %v883_v37 = vld [vmem:[#allocation5 + $0x1608] sm:$0xff] }
 0x21c   :  { %v11194_v55 = vcombine.high %v1098_v48, %v1102_v49  ;;  %v11193_v1 = vcombine.low %v1098_v48, %v1102_v49  ;;  %v895_v48 = vld [vmem:[#allocation5 + $0x1668] sm:$0xff]  ;;  %v1146_v49 = vld [vmem:[#allocation5 + $0x1e40] sm:$0xff] }
 0x21d   :  { %6883 = vmatpush1.bf16.msra.mxu1 %v10891_v59  ;;  %v855_v59 = vld [vmem:[#allocation5 + $0x1528] sm:$0xff] }
 0x21e   :  { %6637 = vmatpush1.bf16.msra.mxu0 %v11145_v60  ;;  %6884 = vmatprep.subr.bf16.mxu1 %v10900_v62  ;;  %v1106_v60 = vld [vmem:[#allocation5 + $0x1d00] sm:$0xff]  ;;  %v10948_v3 = vcombine.high %v851_v56, %v855_v59 }
 0x21f   :  { %6638 = vmatprep.subr.bf16.mxu0 %v11154_v0  ;;  %v1110_v62 = vld [vmem:[#allocation5 + $0x1d20] sm:$0xff]  ;;  %v10939_v0 = vcombine.low %v843_v46, %v847_v47  ;;  %v891_v47 = vld [vmem:[#allocation5 + $0x1648] sm:$0xff] }
 0x220   :  { %v11202_v4 = vcombine.high %v1106_v60, %v1110_v62  ;;  %v11201_v11 = vcombine.low %v1106_v60, %v1110_v62  ;;  %v903_v60 = vld [vmem:[#allocation5 + $0x16a8] sm:$0xff]  ;;  %v1154_v62 = vld [vmem:[#allocation5 + $0x1e80] sm:$0xff] }
 0x221   :  { %6885 = vmatpush1.bf16.msra.mxu1 %v10899_v7  ;;  %v863_v7 = vld [vmem:[#allocation5 + $0x1568] sm:$0xff] }
 0x222   :  { %6639 = vmatpush1.bf16.msra.mxu0 %v11153_v8  ;;  %6886 = vmatprep.subr.bf16.mxu1 %v10908_v9  ;;  %v1114_v8 = vld [vmem:[#allocation5 + $0x1d40] sm:$0xff]  ;;  %v10956_v12 = vcombine.high %v859_v5, %v863_v7  ;;  %v10955_v22 = vcombine.low %v859_v5, %v863_v7  ;;  %v907_v7 = vld [vmem:[#allocation5 + $0x16c8] sm:$0xff] }
 0x223   :  { %6640 = vmatprep.subr.bf16.mxu0 %v11162_v10  ;;  %v1118_v9 = vld [vmem:[#allocation5 + $0x1d60] sm:$0xff]  ;;  %v10947_v10 = vcombine.low %v851_v56, %v855_v59  ;;  %v899_v59 = vld [vmem:[#allocation5 + $0x1688] sm:$0xff] }
 0x224   :  { %v11210_v14 = vcombine.high %v1114_v8, %v1118_v9 }
 0x225   :  { %6887 = vmatpush1.bf16.msra.mxu1 %v10907_v17  ;;  %v871_v17 = vld [vmem:[#allocation5 + $0x15a8] sm:$0xff] }
 0x226   :  { %6641 = vmatpush1.bf16.msra.mxu0 %v11161_v18  ;;  %6897 = vmatprep.subr.bf16.mxu1 %v10916_v19  ;;  %v1122_v18 = vld [vmem:[#allocation5 + $0x1d80] sm:$0xff]  ;;  %v10964_v24 = vcombine.high %v867_v15, %v871_v17 }
 0x227   :  { %6651 = vmatprep.subr.bf16.mxu0 %v11170_v23  ;;  %v1126_v19 = vld [vmem:[#allocation5 + $0x1da0] sm:$0xff]  ;;  %v11209_v23 = vcombine.low %v1114_v8, %v1118_v9  ;;  %v911_v8 = vld [vmem:[#allocation5 + $0x16e8] sm:$0xff] }
 0x228   :  { %6889 = vmatmul.mubr.bf16.vlgmr.msra.gmra.mrb[4].mxu1 %v12768_v13  ;;  %v11218_v25 = vcombine.high %v1122_v18, %v1126_v19  ;;  %v1162_v9 = vld [vmem:[#allocation5 + $0x1ec0] sm:$0xff] }
 0x229   :  { %6643 = vmatmul.mubr.bf16.vlgmr.msra.gmra.mrb[0].mxu0 %v12788_v31  ;;  %6898 = vmatpush1.bf16.msra.mxu1 %v10915_v30  ;;  %v1134_v30 = vld [vmem:[#allocation5 + $0x1de0] sm:$0xff] }
 0x22a   :  { %6652 = vmatpush1.bf16.msra.mxu0 %v11169_v32  ;;  %6899 = vmatprep.subr.bf16.mxu1 %v10924_v33  ;;  %v10963_v32 = vcombine.low %v867_v15, %v871_v17  ;;  %v11217_v33 = vcombine.low %v1122_v18, %v1126_v19  ;;  %v11226_v36 = vcombine.high %v1130_v29, %v1134_v30  ;;  %v915_v17 = vld [vmem:[#allocation5 + $0x1708] sm:$0xff]  ;;  %v1170_v19 = vld [vmem:[#allocation5 + $0x1f00] sm:$0xff] }
 0x22b   :  { %6653 = vmatprep.subr.bf16.mxu0 %v11178_v34  ;;  %6683 = vmatprep.mubr.bf16.mxu0 %v12790_v38  ;;  %v10972_v34 = vcombine.high %v875_v26, %v879_v28  ;;  %v919_v18 = vld [vmem:[#allocation5 + $0x1728] sm:$0xff] }
 0x22c   :  { %6929 = vmatprep.mubr.bf16.mxu1 %v12770_v20 }
 0x22d   :  { %6900 = vmatpush1.bf16.msra.mxu1 %v10923_v41  ;;  %v1142_v41 = vld [vmem:[#allocation5 + $0x1e20] sm:$0xff] }
 0x22e   :  { %6654 = vmatpush1.bf16.msra.mxu0 %v11177_v42  ;;  %6901 = vmatprep.subr.bf16.mxu1 %v10932_v44  ;;  %v10971_v42 = vcombine.low %v875_v26, %v879_v28  ;;  %v11225_v44 = vcombine.low %v1130_v29, %v1134_v30  ;;  %v11234_v46 = vcombine.high %v1138_v40, %v1142_v41  ;;  %v923_v28 = vld [vmem:[#allocation5 + $0x1748] sm:$0xff]  ;;  %v1178_v30 = vld [vmem:[#allocation5 + $0x1f40] sm:$0xff] }
 0x22f   :  { %6655 = vmatprep.subr.bf16.mxu0 %v11186_v45  ;;  %v10980_v45 = vcombine.high %v883_v37, %v887_v39  ;;  %v927_v29 = vld [vmem:[#allocation5 + $0x1768] sm:$0xff] }
 0x231   :  { %6902 = vmatpush1.bf16.msra.mxu1 %v10931_v51  ;;  %v1150_v51 = vld [vmem:[#allocation5 + $0x1e60] sm:$0xff] }
 0x232   :  { %6656 = vmatpush1.bf16.msra.mxu0 %v11185_v52  ;;  %6903 = vmatprep.subr.bf16.mxu1 %v10940_v54  ;;  %v10979_v52 = vcombine.low %v883_v37, %v887_v39  ;;  %v11233_v54 = vcombine.low %v1138_v40, %v1142_v41  ;;  %v11242_v56 = vcombine.high %v1146_v49, %v1150_v51  ;;  %v931_v39 = vld [vmem:[#allocation5 + $0x1788] sm:$0xff]  ;;  %v1186_v41 = vld [vmem:[#allocation5 + $0x1f80] sm:$0xff] }
 0x233   :  { %6657 = vmatprep.subr.bf16.mxu0 %v11194_v55  ;;  %v10988_v55 = vcombine.high %v891_v47, %v895_v48  ;;  %v935_v40 = vld [vmem:[#allocation5 + $0x17a8] sm:$0xff] }
 0x235   :  { %6904 = vmatpush1.bf16.msra.mxu1 %v10939_v0  ;;  %v1158_v0 = vld [vmem:[#allocation5 + $0x1ea0] sm:$0xff] }
 0x236   :  { %6658 = vmatpush1.bf16.msra.mxu0 %v11193_v1  ;;  %6905 = vmatprep.subr.bf16.mxu1 %v10948_v3  ;;  %v10987_v1 = vcombine.low %v891_v47, %v895_v48  ;;  %v11241_v3 = vcombine.low %v1146_v49, %v1150_v51  ;;  %v11250_v5 = vcombine.high %v1154_v62, %v1158_v0  ;;  %v939_v48 = vld [vmem:[#allocation5 + $0x17c8] sm:$0xff]  ;;  %v1194_v51 = vld [vmem:[#allocation5 + $0x1fc0] sm:$0xff] }
 0x237   :  { %6659 = vmatprep.subr.bf16.mxu0 %v11202_v4  ;;  %v10996_v4 = vcombine.high %v899_v59, %v903_v60  ;;  %v943_v49 = vld [vmem:[#allocation5 + $0x17e8] sm:$0xff] }
 0x239   :  { %6906 = vmatpush1.bf16.msra.mxu1 %v10947_v10  ;;  %v1166_v10 = vld [vmem:[#allocation5 + $0x1ee0] sm:$0xff] }
 0x23a   :  { %6660 = vmatpush1.bf16.msra.mxu0 %v11201_v11  ;;  %6907 = vmatprep.subr.bf16.mxu1 %v10956_v12  ;;  %v10995_v11 = vcombine.low %v899_v59, %v903_v60  ;;  %v11249_v12 = vcombine.low %v1154_v62, %v1158_v0  ;;  %v11258_v15 = vcombine.high %v1162_v9, %v1166_v10  ;;  %v947_v60 = vld [vmem:[#allocation5 + $0x1808] sm:$0xff]  ;;  %v180_v0 = vld [vmem:[#allocation5 + $0x10] sm:$0xff] }
 0x23b   :  { %6661 = vmatprep.subr.bf16.mxu0 %v11210_v14  ;;  %v11004_v14 = vcombine.high %v907_v7, %v911_v8  ;;  %v951_v62 = vld [vmem:[#allocation5 + $0x1828] sm:$0xff] }
 0x23d   :  { %6908 = vmatpush1.bf16.msra.mxu1 %v10955_v22  ;;  %v1174_v22 = vld [vmem:[#allocation5 + $0x1f20] sm:$0xff] }
 0x23e   :  { %6662 = vmatpush1.bf16.msra.mxu0 %v11209_v23  ;;  %6909 = vmatprep.subr.bf16.mxu1 %v10964_v24  ;;  %v11003_v23 = vcombine.low %v907_v7, %v911_v8  ;;  %v11257_v24 = vcombine.low %v1162_v9, %v1166_v10  ;;  %v11266_v26 = vcombine.high %v1170_v19, %v1174_v22  ;;  %v955_v9 = vld [vmem:[#allocation5 + $0x1848] sm:$0xff] }
 0x23f   :  { %6663 = vmatprep.subr.bf16.mxu0 %v11218_v25  ;;  %v11012_v25 = vcombine.high %v915_v17, %v919_v18  ;;  %v11044_v7 = vcombine.high %v947_v60, %v951_v62  ;;  %v959_v10 = vld [vmem:[#allocation5 + $0x1868] sm:$0xff] }
 0x241   :  { %6910 = vmatpush1.bf16.msra.mxu1 %v10963_v32  ;;  %v1182_v32 = vld [vmem:[#allocation5 + $0x1f60] sm:$0xff] }
 0x242   :  { %6664 = vmatpush1.bf16.msra.mxu0 %v11217_v33  ;;  %6911 = vmatprep.subr.bf16.mxu1 %v10972_v34  ;;  %v11011_v33 = vcombine.low %v915_v17, %v919_v18  ;;  %v11265_v34 = vcombine.low %v1170_v19, %v1174_v22  ;;  %v11274_v37 = vcombine.high %v1178_v30, %v1182_v32  ;;  %v963_v22 = vld [vmem:[#allocation5 + $0x1888] sm:$0xff] }
 0x243   :  { %6665 = vmatprep.subr.bf16.mxu0 %v11226_v36  ;;  %v11020_v36 = vcombine.high %v923_v28, %v927_v29  ;;  %v11052_v18 = vcombine.high %v955_v9, %v959_v10 }
 0x245   :  { %6912 = vmatpush1.bf16.msra.mxu1 %v10971_v42  ;;  %v1190_v42 = vld [vmem:[#allocation5 + $0x1fa0] sm:$0xff] }
 0x246   :  { %6666 = vmatpush1.bf16.msra.mxu0 %v11225_v44  ;;  %6913 = vmatprep.subr.bf16.mxu1 %v10980_v45  ;;  %v11019_v44 = vcombine.low %v923_v28, %v927_v29  ;;  %v11273_v45 = vcombine.low %v1178_v30, %v1182_v32  ;;  %v11282_v47 = vcombine.high %v1186_v41, %v1190_v42  ;;  %v971_v32 = vld [vmem:[#allocation5 + $0x18c8] sm:$0xff] }
 0x247   :  { %6667 = vmatprep.subr.bf16.mxu0 %v11234_v46  ;;  %v11028_v46 = vcombine.high %v931_v39, %v935_v40 }
 0x249   :  { %6914 = vmatpush1.bf16.msra.mxu1 %v10979_v52  ;;  %v1198_v52 = vld [vmem:[#allocation5 + $0x1fe0] sm:$0xff] }
 0x24a   :  { %6668 = vmatpush1.bf16.msra.mxu0 %v11233_v54  ;;  %6915 = vmatprep.subr.bf16.mxu1 %v10988_v55  ;;  %v11027_v54 = vcombine.low %v931_v39, %v935_v40  ;;  %v11281_v55 = vcombine.low %v1186_v41, %v1190_v42  ;;  %v11290_v59 = vcombine.high %v1194_v51, %v1198_v52  ;;  %v979_v42 = vld [vmem:[#allocation5 + $0x1908] sm:$0xff] }
 0x24b   :  { %6669 = vmatprep.subr.bf16.mxu0 %v11242_v56  ;;  %v11036_v56 = vcombine.high %v939_v48, %v943_v49 }
 0x24d   :  { %6916 = vmatpush1.bf16.msra.mxu1 %v10987_v1  ;;  %v184_v1 = vld [vmem:[#allocation5 + $0x30] sm:$0xff] }
 0x24e   :  { %6670 = vmatpush1.bf16.msra.mxu0 %v11241_v3  ;;  %6917 = vmatprep.subr.bf16.mxu1 %v10996_v4  ;;  %v11035_v3 = vcombine.low %v939_v48, %v943_v49  ;;  %v11289_v4 = vcombine.low %v1194_v51, %v1198_v52  ;;  %v10278_v8 = vcombine.high %v180_v0, %v184_v1  ;;  %v987_v52 = vld [vmem:[#allocation5 + $0x1948] sm:$0xff] }
 0x24f   :  { %6671 = vmatprep.subr.bf16.mxu0 %v11250_v5  ;;  %v160_v5 = vld [vmem:[#allocation2 + $0x70] sm:$0xff]  ;;  %v10277_v17 = vcombine.low %v180_v0, %v184_v1  ;;  %v995_v1 = vld [vmem:[#allocation5 + $0x1988] sm:$0xff] }
 0x251   :  { %6918 = vmatpush1.bf16.msra.mxu1 %v10995_v11  ;;  %v188_v11 = vld [vmem:[#allocation5 + $0x50] sm:$0xff] }
 0x252   :  { %6672 = vmatpush1.bf16.msra.mxu0 %v11249_v12  ;;  %6919 = vmatprep.subr.bf16.mxu1 %v11004_v14  ;;  %v192_v12 = vld [vmem:[#allocation5 + $0x70] sm:$0xff]  ;;  %v12796_v14 = vpack.c.bf16 %v160_v5, %v160_v5 }
 0x253   :  { %6673 = vmatprep.subr.bf16.mxu0 %v11258_v15  ;;  %v11043_v15 = vcombine.low %v947_v60, %v951_v62  ;;  %v10286_v19 = vcombine.high %v188_v11, %v192_v12  ;;  %v10285_v28 = vcombine.low %v188_v11, %v192_v12  ;;  %v232_v5 = vld [vmem:[#allocation5 + $0x1b0] sm:$0xff]  ;;  %v1003_v11 = vld [vmem:[#allocation5 + $0x19c8] sm:$0xff] }
 0x254   :  { %v1007_v12 = vld [vmem:[#allocation5 + $0x19e8] sm:$0xff] }
 0x255   :  { %6920 = vmatpush1.bf16.msra.mxu1 %v11003_v23  ;;  %v967_v23 = vld [vmem:[#allocation5 + $0x18a8] sm:$0xff] }
 0x256   :  { %6674 = vmatpush1.bf16.msra.mxu0 %v11257_v24  ;;  %6921 = vmatprep.subr.bf16.mxu1 %v11012_v25  ;;  %v196_v24 = vld [vmem:[#allocation5 + $0x90] sm:$0xff]  ;;  %v11060_v29 = vcombine.high %v963_v22, %v967_v23 }
 0x257   :  { %6675 = vmatprep.subr.bf16.mxu0 %v11266_v26  ;;  %v200_v25 = vld [vmem:[#allocation5 + $0xb0] sm:$0xff]  ;;  %v11051_v26 = vcombine.low %v955_v9, %v959_v10 }
 0x258   :  { %v10294_v30 = vcombine.high %v196_v24, %v200_v25  ;;  %v10293_v39 = vcombine.low %v196_v24, %v200_v25  ;;  %v1011_v24 = vld [vmem:[#allocation5 + $0x1a08] sm:$0xff] }
 0x259   :  { %6922 = vmatpush1.bf16.msra.mxu1 %v11011_v33  ;;  %v975_v33 = vld [vmem:[#allocation5 + $0x18e8] sm:$0xff] }
 0x25a   :  { %6676 = vmatpush1.bf16.msra.mxu0 %v11265_v34  ;;  %6923 = vmatprep.subr.bf16.mxu1 %v11020_v36  ;;  %v204_v34 = vld [vmem:[#allocation5 + $0xd0] sm:$0xff]  ;;  %v11068_v40 = vcombine.high %v971_v32, %v975_v33  ;;  %v1015_v25 = vld [vmem:[#allocation5 + $0x1a28] sm:$0xff] }
 0x25b   :  { %6677 = vmatprep.subr.bf16.mxu0 %v11274_v37  ;;  %v208_v36 = vld [vmem:[#allocation5 + $0xf0] sm:$0xff]  ;;  %v11059_v37 = vcombine.low %v963_v22, %v967_v23  ;;  %v11100_v22 = vcombine.high %v1003_v11, %v1007_v12 }
 0x25c   :  { %v10302_v41 = vcombine.high %v204_v34, %v208_v36  ;;  %v10301_v48 = vcombine.low %v204_v34, %v208_v36  ;;  %v1019_v34 = vld [vmem:[#allocation5 + $0x1a48] sm:$0xff] }
 0x25d   :  { %6924 = vmatpush1.bf16.msra.mxu1 %v11019_v44  ;;  %v983_v44 = vld [vmem:[#allocation5 + $0x1928] sm:$0xff] }
 0x25e   :  { %6678 = vmatpush1.bf16.msra.mxu0 %v11273_v45  ;;  %6925 = vmatprep.subr.bf16.mxu1 %v11028_v46  ;;  %v212_v45 = vld [vmem:[#allocation5 + $0x110] sm:$0xff]  ;;  %v11076_v49 = vcombine.high %v979_v42, %v983_v44  ;;  %v1023_v36 = vld [vmem:[#allocation5 + $0x1a68] sm:$0xff] }
 0x25f   :  { %6679 = vmatprep.subr.bf16.mxu0 %v11282_v47  ;;  %v216_v46 = vld [vmem:[#allocation5 + $0x130] sm:$0xff]  ;;  %v11067_v47 = vcombine.low %v971_v32, %v975_v33  ;;  %v11108_v32 = vcombine.high %v1011_v24, %v1015_v25 }
 0x260   :  { %v10310_v51 = vcombine.high %v212_v45, %v216_v46  ;;  %v10309_v60 = vcombine.low %v212_v45, %v216_v46  ;;  %v1027_v45 = vld [vmem:[#allocation5 + $0x1a88] sm:$0xff] }
 0x261   :  { %6926 = vmatpush1.bf16.msra.mxu1 %v11027_v54  ;;  %v991_v54 = vld [vmem:[#allocation5 + $0x1968] sm:$0xff] }
 0x262   :  { %6680 = vmatpush1.bf16.msra.mxu0 %v11281_v55  ;;  %6927 = vmatprep.subr.bf16.mxu1 %v11036_v56  ;;  %v220_v55 = vld [vmem:[#allocation5 + $0x150] sm:$0xff]  ;;  %v11084_v62 = vcombine.high %v987_v52, %v991_v54  ;;  %v1031_v46 = vld [vmem:[#allocation5 + $0x1aa8] sm:$0xff] }
 0x263   :  { %6681 = vmatprep.subr.bf16.mxu0 %v11290_v59  ;;  %v224_v56 = vld [vmem:[#allocation5 + $0x170] sm:$0xff]  ;;  %v11075_v59 = vcombine.low %v979_v42, %v983_v44  ;;  %v11116_v42 = vcombine.high %v1019_v34, %v1023_v36 }
 0x264   :  { %v10318_v0 = vcombine.high %v220_v55, %v224_v56 }
 0x265   :  { %6928 = vmatpush1.bf16.msra.mxu1 %v11035_v3  ;;  %v999_v3 = vld [vmem:[#allocation5 + $0x19a8] sm:$0xff] }
 0x266   :  { %6682 = vmatpush1.bf16.msra.mxu0 %v11289_v4  ;;  %6938 = vmatprep.subr.bf16.mxu1 %v11044_v7  ;;  %v228_v4 = vld [vmem:[#allocation5 + $0x190] sm:$0xff]  ;;  %v11083_v7 = vcombine.low %v987_v52, %v991_v54  ;;  %v11092_v9 = vcombine.high %v995_v1, %v999_v3  ;;  %v11124_v52 = vcombine.high %v1027_v45, %v1031_v46 }
 0x267   :  { %7020 = vmatprep.subr.bf16.mxu0 %v10278_v8  ;;  %v10317_v8 = vcombine.low %v220_v55, %v224_v56  ;;  %v10326_v10 = vcombine.high %v228_v4, %v232_v5  ;;  %v1035_v55 = vld [vmem:[#allocation5 + $0x1ac8] sm:$0xff] }
 0x268   :  { %6930 = vmatmul.mubr.bf16.vlgmr.msra.gmra.mrb[4].mxu1 %v12780_v50  ;;  %v1039_v56 = vld [vmem:[#allocation5 + $0x1ae8] sm:$0xff] }
 0x269   :  { %6684 = vmatmul.mubr.bf16.vlgmr.msra.gmra.mrb[0].mxu0 %v12796_v14  ;;  %6939 = vmatpush1.bf16.msra.mxu1 %v11043_v15  ;;  %v236_v15 = vld [vmem:[#allocation5 + $0x1d0] sm:$0xff] }
 0x26a   :  { %7021 = vmatpush1.bf16.msra.mxu0 %v10277_v17  ;;  %6940 = vmatprep.subr.bf16.mxu1 %v11052_v18  ;;  %v240_v17 = vld [vmem:[#allocation5 + $0x1f0] sm:$0xff]  ;;  %v11091_v18 = vcombine.low %v995_v1, %v999_v3  ;;  %v11132_v1 = vcombine.high %v1035_v55, %v1039_v56 }
 0x26b   :  { %7022 = vmatprep.subr.bf16.mxu0 %v10286_v19  ;;  %6970 = vmatprep.mubr.bf16.mxu1 %v12782_v58  ;;  %v10325_v19 = vcombine.low %v228_v4, %v232_v5  ;;  %v10334_v23 = vcombine.high %v236_v15, %v240_v17  ;;  %v1043_v4 = vld [vmem:[#allocation5 + $0x1b08] sm:$0xff] }
 0x26c   :  { %7052 = vmatprep.mubr.bf16.mxu0 %v12736_v57  ;;  %v1047_v5 = vld [vmem:[#allocation5 + $0x1b28] sm:$0xff] }
 0x26d   :  { %6941 = vmatpush1.bf16.msra.mxu1 %v11051_v26  ;;  %v244_v26 = vld [vmem:[#allocation5 + $0x210] sm:$0xff] }
 0x26e   :  { %7023 = vmatpush1.bf16.msra.mxu0 %v10285_v28  ;;  %6942 = vmatprep.subr.bf16.mxu1 %v11060_v29  ;;  %v248_v28 = vld [vmem:[#allocation5 + $0x230] sm:$0xff]  ;;  %v11099_v29 = vcombine.low %v1003_v11, %v1007_v12  ;;  %v11140_v11 = vcombine.high %v1043_v4, %v1047_v5 }
 0x26f   :  { %7024 = vmatprep.subr.bf16.mxu0 %v10294_v30  ;;  %v10333_v30 = vcombine.low %v236_v15, %v240_v17  ;;  %v10342_v33 = vcombine.high %v244_v26, %v248_v28  ;;  %v1051_v15 = vld [vmem:[#allocation5 + $0x1b48] sm:$0xff] }
 0x270   :  { %v1055_v17 = vld [vmem:[#allocation5 + $0x1b68] sm:$0xff] }
 0x271   :  { %6943 = vmatpush1.bf16.msra.mxu1 %v11059_v37  ;;  %v252_v37 = vld [vmem:[#allocation5 + $0x250] sm:$0xff] }
 0x272   :  { %7025 = vmatpush1.bf16.msra.mxu0 %v10293_v39  ;;  %6944 = vmatprep.subr.bf16.mxu1 %v11068_v40  ;;  %v256_v39 = vld [vmem:[#allocation5 + $0x270] sm:$0xff]  ;;  %v11107_v40 = vcombine.low %v1011_v24, %v1015_v25  ;;  %v11148_v24 = vcombine.high %v1051_v15, %v1055_v17 }
 0x273   :  { %7026 = vmatprep.subr.bf16.mxu0 %v10302_v41  ;;  %v10341_v41 = vcombine.low %v244_v26, %v248_v28  ;;  %v10350_v44 = vcombine.high %v252_v37, %v256_v39  ;;  %v1059_v26 = vld [vmem:[#allocation5 + $0x1b88] sm:$0xff] }
 0x274   :  { %v1063_v28 = vld [vmem:[#allocation5 + $0x1ba8] sm:$0xff] }
 0x275   :  { %6945 = vmatpush1.bf16.msra.mxu1 %v11067_v47  ;;  %v260_v47 = vld [vmem:[#allocation5 + $0x290] sm:$0xff] }
 0x276   :  { %7027 = vmatpush1.bf16.msra.mxu0 %v10301_v48  ;;  %6946 = vmatprep.subr.bf16.mxu1 %v11076_v49  ;;  %v264_v48 = vld [vmem:[#allocation5 + $0x2b0] sm:$0xff]  ;;  %v11115_v49 = vcombine.low %v1019_v34, %v1023_v36  ;;  %v11156_v34 = vcombine.high %v1059_v26, %v1063_v28 }
 0x277   :  { %7028 = vmatprep.subr.bf16.mxu0 %v10310_v51  ;;  %v10349_v51 = vcombine.low %v252_v37, %v256_v39  ;;  %v10358_v54 = vcombine.high %v260_v47, %v264_v48  ;;  %v1067_v37 = vld [vmem:[#allocation5 + $0x1bc8] sm:$0xff] }
 0x278   :  { %v1071_v39 = vld [vmem:[#allocation5 + $0x1be8] sm:$0xff] }
 0x279   :  { %6947 = vmatpush1.bf16.msra.mxu1 %v11075_v59  ;;  %v268_v59 = vld [vmem:[#allocation5 + $0x2d0] sm:$0xff] }
 0x27a   :  { %7029 = vmatpush1.bf16.msra.mxu0 %v10309_v60  ;;  %6948 = vmatprep.subr.bf16.mxu1 %v11084_v62  ;;  %v272_v60 = vld [vmem:[#allocation5 + $0x2f0] sm:$0xff]  ;;  %v11123_v62 = vcombine.low %v1027_v45, %v1031_v46  ;;  %v11164_v45 = vcombine.high %v1067_v37, %v1071_v39 }
 0x27b   :  { %7030 = vmatprep.subr.bf16.mxu0 %v10318_v0  ;;  %v10357_v0 = vcombine.low %v260_v47, %v264_v48  ;;  %v10366_v3 = vcombine.high %v268_v59, %v272_v60  ;;  %v1075_v47 = vld [vmem:[#allocation5 + $0x1c08] sm:$0xff] }
 0x27c   :  { %v1079_v48 = vld [vmem:[#allocation5 + $0x1c28] sm:$0xff] }
 0x27d   :  { %6949 = vmatpush1.bf16.msra.mxu1 %v11083_v7  ;;  %v276_v7 = vld [vmem:[#allocation5 + $0x310] sm:$0xff] }
 0x27e   :  { %7031 = vmatpush1.bf16.msra.mxu0 %v10317_v8  ;;  %6950 = vmatprep.subr.bf16.mxu1 %v11092_v9  ;;  %v280_v8 = vld [vmem:[#allocation5 + $0x330] sm:$0xff]  ;;  %v11131_v9 = vcombine.low %v1035_v55, %v1039_v56  ;;  %v11172_v55 = vcombine.high %v1075_v47, %v1079_v48 }
 0x27f   :  { %7032 = vmatprep.subr.bf16.mxu0 %v10326_v10  ;;  %v10365_v10 = vcombine.low %v268_v59, %v272_v60  ;;  %v10374_v12 = vcombine.high %v276_v7, %v280_v8  ;;  %v1083_v59 = vld [vmem:[#allocation5 + $0x1c48] sm:$0xff] }
 0x280   :  { %v1087_v60 = vld [vmem:[#allocation5 + $0x1c68] sm:$0xff] }
 0x281   :  { %6951 = vmatpush1.bf16.msra.mxu1 %v11091_v18  ;;  %v284_v18 = vld [vmem:[#allocation5 + $0x350] sm:$0xff] }
 0x282   :  { %7033 = vmatpush1.bf16.msra.mxu0 %v10325_v19  ;;  %6952 = vmatprep.subr.bf16.mxu1 %v11100_v22  ;;  %v288_v19 = vld [vmem:[#allocation5 + $0x370] sm:$0xff]  ;;  %v11139_v22 = vcombine.low %v1043_v4, %v1047_v5  ;;  %v11180_v4 = vcombine.high %v1083_v59, %v1087_v60 }
 0x283   :  { %7034 = vmatprep.subr.bf16.mxu0 %v10334_v23  ;;  %v10373_v23 = vcombine.low %v276_v7, %v280_v8  ;;  %v10382_v25 = vcombine.high %v284_v18, %v288_v19  ;;  %v1091_v7 = vld [vmem:[#allocation5 + $0x1c88] sm:$0xff] }
 0x284   :  { %v1095_v8 = vld [vmem:[#allocation5 + $0x1ca8] sm:$0xff] }
 0x285   :  { %6953 = vmatpush1.bf16.msra.mxu1 %v11099_v29  ;;  %v292_v29 = vld [vmem:[#allocation5 + $0x390] sm:$0xff] }
 0x286   :  { %7035 = vmatpush1.bf16.msra.mxu0 %v10333_v30  ;;  %6954 = vmatprep.subr.bf16.mxu1 %v11108_v32  ;;  %v296_v30 = vld [vmem:[#allocation5 + $0x3b0] sm:$0xff]  ;;  %v11147_v32 = vcombine.low %v1051_v15, %v1055_v17  ;;  %v11188_v15 = vcombine.high %v1091_v7, %v1095_v8 }
 0x287   :  { %7036 = vmatprep.subr.bf16.mxu0 %v10342_v33  ;;  %v10381_v33 = vcombine.low %v284_v18, %v288_v19  ;;  %v10390_v36 = vcombine.high %v292_v29, %v296_v30  ;;  %v1099_v18 = vld [vmem:[#allocation5 + $0x1cc8] sm:$0xff] }
 0x288   :  { %v1103_v19 = vld [vmem:[#allocation5 + $0x1ce8] sm:$0xff] }
 0x289   :  { %6955 = vmatpush1.bf16.msra.mxu1 %v11107_v40  ;;  %v300_v40 = vld [vmem:[#allocation5 + $0x3d0] sm:$0xff] }
 0x28a   :  { %7037 = vmatpush1.bf16.msra.mxu0 %v10341_v41  ;;  %6956 = vmatprep.subr.bf16.mxu1 %v11116_v42  ;;  %v304_v41 = vld [vmem:[#allocation5 + $0x3f0] sm:$0xff]  ;;  %v11155_v42 = vcombine.low %v1059_v26, %v1063_v28  ;;  %v11196_v26 = vcombine.high %v1099_v18, %v1103_v19 }
 0x28b   :  { %7038 = vmatprep.subr.bf16.mxu0 %v10350_v44  ;;  %v10389_v44 = vcombine.low %v292_v29, %v296_v30  ;;  %v10398_v46 = vcombine.high %v300_v40, %v304_v41  ;;  %v1107_v29 = vld [vmem:[#allocation5 + $0x1d08] sm:$0xff] }
 0x28c   :  { %v1111_v30 = vld [vmem:[#allocation5 + $0x1d28] sm:$0xff] }
 0x28d   :  { %6957 = vmatpush1.bf16.msra.mxu1 %v11115_v49  ;;  %v308_v49 = vld [vmem:[#allocation5 + $0x410] sm:$0xff] }
 0x28e   :  { %7039 = vmatpush1.bf16.msra.mxu0 %v10349_v51  ;;  %6958 = vmatprep.subr.bf16.mxu1 %v11124_v52  ;;  %v312_v51 = vld [vmem:[#allocation5 + $0x430] sm:$0xff]  ;;  %v11163_v52 = vcombine.low %v1067_v37, %v1071_v39  ;;  %v11204_v37 = vcombine.high %v1107_v29, %v1111_v30 }
 0x28f   :  { %7040 = vmatprep.subr.bf16.mxu0 %v10358_v54  ;;  %v10397_v54 = vcombine.low %v300_v40, %v304_v41  ;;  %v10406_v56 = vcombine.high %v308_v49, %v312_v51  ;;  %v1115_v40 = vld [vmem:[#allocation5 + $0x1d48] sm:$0xff] }
 0x290   :  { %v1119_v41 = vld [vmem:[#allocation5 + $0x1d68] sm:$0xff] }
 0x291   :  { %6959 = vmatpush1.bf16.msra.mxu1 %v11123_v62  ;;  %v316_v62 = vld [vmem:[#allocation5 + $0x450] sm:$0xff] }
 0x292   :  { %7041 = vmatpush1.bf16.msra.mxu0 %v10357_v0  ;;  %6960 = vmatprep.subr.bf16.mxu1 %v11132_v1  ;;  %v320_v0 = vld [vmem:[#allocation5 + $0x470] sm:$0xff]  ;;  %v11171_v1 = vcombine.low %v1075_v47, %v1079_v48  ;;  %v11212_v47 = vcombine.high %v1115_v40, %v1119_v41 }
 0x293   :  { %7042 = vmatprep.subr.bf16.mxu0 %v10366_v3  ;;  %v10405_v3 = vcombine.low %v308_v49, %v312_v51  ;;  %v10414_v5 = vcombine.high %v316_v62, %v320_v0  ;;  %v1123_v49 = vld [vmem:[#allocation5 + $0x1d88] sm:$0xff] }
 0x294   :  { %v1127_v51 = vld [vmem:[#allocation5 + $0x1da8] sm:$0xff] }
 0x295   :  { %6961 = vmatpush1.bf16.msra.mxu1 %v11131_v9  ;;  %v324_v9 = vld [vmem:[#allocation5 + $0x490] sm:$0xff] }
 0x296   :  { %7043 = vmatpush1.bf16.msra.mxu0 %v10365_v10  ;;  %6962 = vmatprep.subr.bf16.mxu1 %v11140_v11  ;;  %v328_v10 = vld [vmem:[#allocation5 + $0x4b0] sm:$0xff]  ;;  %v11179_v11 = vcombine.low %v1083_v59, %v1087_v60  ;;  %v11220_v59 = vcombine.high %v1123_v49, %v1127_v51 }
 0x297   :  { %7044 = vmatprep.subr.bf16.mxu0 %v10374_v12  ;;  %v10413_v12 = vcombine.low %v316_v62, %v320_v0  ;;  %v10422_v17 = vcombine.high %v324_v9, %v328_v10  ;;  %v1131_v62 = vld [vmem:[#allocation5 + $0x1dc8] sm:$0xff] }
 0x298   :  { %v1135_v0 = vld [vmem:[#allocation5 + $0x1de8] sm:$0xff] }
 0x299   :  { %6963 = vmatpush1.bf16.msra.mxu1 %v11139_v22  ;;  %v332_v22 = vld [vmem:[#allocation5 + $0x4d0] sm:$0xff] }
 0x29a   :  { %7045 = vmatpush1.bf16.msra.mxu0 %v10373_v23  ;;  %6964 = vmatprep.subr.bf16.mxu1 %v11148_v24  ;;  %v336_v23 = vld [vmem:[#allocation5 + $0x4f0] sm:$0xff]  ;;  %v11187_v24 = vcombine.low %v1091_v7, %v1095_v8  ;;  %v11228_v7 = vcombine.high %v1131_v62, %v1135_v0 }
 0x29b   :  { %7046 = vmatprep.subr.bf16.mxu0 %v10382_v25  ;;  %v10421_v25 = vcombine.low %v324_v9, %v328_v10  ;;  %v10430_v28 = vcombine.high %v332_v22, %v336_v23  ;;  %v1139_v9 = vld [vmem:[#allocation5 + $0x1e08] sm:$0xff] }
 0x29c   :  { %v1143_v10 = vld [vmem:[#allocation5 + $0x1e28] sm:$0xff] }
 0x29d   :  { %6965 = vmatpush1.bf16.msra.mxu1 %v11147_v32  ;;  %v340_v32 = vld [vmem:[#allocation5 + $0x510] sm:$0xff] }
 0x29e   :  { %7047 = vmatpush1.bf16.msra.mxu0 %v10381_v33  ;;  %6966 = vmatprep.subr.bf16.mxu1 %v11156_v34  ;;  %v344_v33 = vld [vmem:[#allocation5 + $0x530] sm:$0xff]  ;;  %v11195_v34 = vcombine.low %v1099_v18, %v1103_v19  ;;  %v11236_v18 = vcombine.high %v1139_v9, %v1143_v10 }
 0x29f   :  { %7048 = vmatprep.subr.bf16.mxu0 %v10390_v36  ;;  %v10429_v36 = vcombine.low %v332_v22, %v336_v23  ;;  %v10438_v39 = vcombine.high %v340_v32, %v344_v33  ;;  %v1147_v22 = vld [vmem:[#allocation5 + $0x1e48] sm:$0xff] }
 0x2a0   :  { %v1151_v23 = vld [vmem:[#allocation5 + $0x1e68] sm:$0xff] }
 0x2a1   :  { %6967 = vmatpush1.bf16.msra.mxu1 %v11155_v42  ;;  %v348_v42 = vld [vmem:[#allocation5 + $0x550] sm:$0xff] }
 0x2a2   :  { %7049 = vmatpush1.bf16.msra.mxu0 %v10389_v44  ;;  %6968 = vmatprep.subr.bf16.mxu1 %v11164_v45  ;;  %v352_v44 = vld [vmem:[#allocation5 + $0x570] sm:$0xff]  ;;  %v11203_v45 = vcombine.low %v1107_v29, %v1111_v30  ;;  %v11244_v29 = vcombine.high %v1147_v22, %v1151_v23 }
 0x2a3   :  { %7050 = vmatprep.subr.bf16.mxu0 %v10398_v46  ;;  %v10437_v46 = vcombine.low %v340_v32, %v344_v33  ;;  %v10446_v48 = vcombine.high %v348_v42, %v352_v44  ;;  %v1155_v32 = vld [vmem:[#allocation5 + $0x1e88] sm:$0xff] }
 0x2a4   :  { %v1159_v33 = vld [vmem:[#allocation5 + $0x1ea8] sm:$0xff] }
 0x2a5   :  { %6969 = vmatpush1.bf16.msra.mxu1 %v11163_v52  ;;  %v356_v52 = vld [vmem:[#allocation5 + $0x590] sm:$0xff] }
 0x2a6   :  { %7051 = vmatpush1.bf16.msra.mxu0 %v10397_v54  ;;  %6979 = vmatprep.subr.bf16.mxu1 %v11172_v55  ;;  %v360_v54 = vld [vmem:[#allocation5 + $0x5b0] sm:$0xff]  ;;  %v11211_v55 = vcombine.low %v1115_v40, %v1119_v41  ;;  %v11252_v40 = vcombine.high %v1155_v32, %v1159_v33 }
 0x2a7   :  { %7061 = vmatprep.subr.bf16.mxu0 %v10406_v56  ;;  %v10445_v56 = vcombine.low %v348_v42, %v352_v44  ;;  %v10454_v60 = vcombine.high %v356_v52, %v360_v54  ;;  %v1163_v42 = vld [vmem:[#allocation5 + $0x1ec8] sm:$0xff] }
 0x2a8   :  { %6971 = vmatmul.mubr.bf16.vlgmr.msra.gmra.mrb[4].mxu1 %v12788_v31  ;;  %v1167_v44 = vld [vmem:[#allocation5 + $0x1ee8] sm:$0xff] }
 0x2a9   :  { %6980 = vmatpush1.bf16.msra.mxu1 %v11171_v1  ;;  %7053 = vmatmul.mubr.bf16.vlgmr.msra.gmra.mrb[4].mxu0 %v12742_v16  ;;  %v364_v1 = vld [vmem:[#allocation5 + $0x5d0] sm:$0xff] }
 0x2aa   :  { %7062 = vmatpush1.bf16.msra.mxu0 %v10405_v3  ;;  %6981 = vmatprep.subr.bf16.mxu1 %v11180_v4  ;;  %v368_v3 = vld [vmem:[#allocation5 + $0x5f0] sm:$0xff]  ;;  %v11219_v4 = vcombine.low %v1123_v49, %v1127_v51  ;;  %v11260_v49 = vcombine.high %v1163_v42, %v1167_v44 }
 0x2ab   :  { %7063 = vmatprep.subr.bf16.mxu0 %v10414_v5  ;;  %7011 = vmatprep.mubr.bf16.mxu1 %v12790_v38  ;;  %v10453_v5 = vcombine.low %v356_v52, %v360_v54  ;;  %v10462_v8 = vcombine.high %v364_v1, %v368_v3  ;;  %v1171_v52 = vld [vmem:[#allocation5 + $0x1f08] sm:$0xff] }
 0x2ac   :  { %7093 = vmatprep.mubr.bf16.mxu0 %v12738_v61  ;;  %v1175_v54 = vld [vmem:[#allocation5 + $0x1f28] sm:$0xff] }
 0x2ad   :  { %6982 = vmatpush1.bf16.msra.mxu1 %v11179_v11  ;;  %v372_v11 = vld [vmem:[#allocation5 + $0x610] sm:$0xff] }
 0x2ae   :  { %7064 = vmatpush1.bf16.msra.mxu0 %v10413_v12  ;;  %6983 = vmatprep.subr.bf16.mxu1 %v11188_v15  ;;  %v376_v12 = vld [vmem:[#allocation5 + $0x630] sm:$0xff]  ;;  %v11227_v15 = vcombine.low %v1131_v62, %v1135_v0  ;;  %v11268_v62 = vcombine.high %v1171_v52, %v1175_v54 }
 0x2af   :  { %7065 = vmatprep.subr.bf16.mxu0 %v10422_v17  ;;  %v10461_v17 = vcombine.low %v364_v1, %v368_v3  ;;  %v10470_v19 = vcombine.high %v372_v11, %v376_v12  ;;  %v1179_v1 = vld [vmem:[#allocation5 + $0x1f48] sm:$0xff] }
 0x2b0   :  { %v1183_v3 = vld [vmem:[#allocation5 + $0x1f68] sm:$0xff] }
 0x2b1   :  { %6984 = vmatpush1.bf16.msra.mxu1 %v11187_v24  ;;  %v380_v24 = vld [vmem:[#allocation5 + $0x650] sm:$0xff] }
 0x2b2   :  { %7066 = vmatpush1.bf16.msra.mxu0 %v10421_v25  ;;  %6985 = vmatprep.subr.bf16.mxu1 %v11196_v26  ;;  %v384_v25 = vld [vmem:[#allocation5 + $0x670] sm:$0xff]  ;;  %v11235_v26 = vcombine.low %v1139_v9, %v1143_v10  ;;  %v11276_v9 = vcombine.high %v1179_v1, %v1183_v3 }
 0x2b3   :  { %7067 = vmatprep.subr.bf16.mxu0 %v10430_v28  ;;  %v10469_v28 = vcombine.low %v372_v11, %v376_v12  ;;  %v10478_v30 = vcombine.high %v380_v24, %v384_v25  ;;  %v1187_v11 = vld [vmem:[#allocation5 + $0x1f88] sm:$0xff] }
 0x2b4   :  { %v1191_v12 = vld [vmem:[#allocation5 + $0x1fa8] sm:$0xff] }
 0x2b5   :  { %6986 = vmatpush1.bf16.msra.mxu1 %v11195_v34  ;;  %v388_v34 = vld [vmem:[#allocation5 + $0x690] sm:$0xff] }
 0x2b6   :  { %7068 = vmatpush1.bf16.msra.mxu0 %v10429_v36  ;;  %6987 = vmatprep.subr.bf16.mxu1 %v11204_v37  ;;  %v392_v36 = vld [vmem:[#allocation5 + $0x6b0] sm:$0xff]  ;;  %v11243_v37 = vcombine.low %v1147_v22, %v1151_v23  ;;  %v11284_v22 = vcombine.high %v1187_v11, %v1191_v12 }
 0x2b7   :  { %7069 = vmatprep.subr.bf16.mxu0 %v10438_v39  ;;  %v10477_v39 = vcombine.low %v380_v24, %v384_v25  ;;  %v10486_v41 = vcombine.high %v388_v34, %v392_v36  ;;  %v1195_v24 = vld [vmem:[#allocation5 + $0x1fc8] sm:$0xff] }
 0x2b8   :  { %v1199_v25 = vld [vmem:[#allocation5 + $0x1fe8] sm:$0xff] }
 0x2b9   :  { %6988 = vmatpush1.bf16.msra.mxu1 %v11203_v45  ;;  %v396_v45 = vld [vmem:[#allocation5 + $0x6d0] sm:$0xff] }
 0x2ba   :  { %7070 = vmatpush1.bf16.msra.mxu0 %v10437_v46  ;;  %6989 = vmatprep.subr.bf16.mxu1 %v11212_v47  ;;  %v400_v46 = vld [vmem:[#allocation5 + $0x6f0] sm:$0xff]  ;;  %v11251_v47 = vcombine.low %v1155_v32, %v1159_v33  ;;  %v11292_v32 = vcombine.high %v1195_v24, %v1199_v25 }
 0x2bb   :  { %7071 = vmatprep.subr.bf16.mxu0 %v10446_v48  ;;  %v10485_v48 = vcombine.low %v388_v34, %v392_v36  ;;  %v10494_v51 = vcombine.high %v396_v45, %v400_v46  ;;  %v181_v34 = vld [vmem:[#allocation5 + $0x18] sm:$0xff] }
 0x2bc   :  { %v185_v36 = vld [vmem:[#allocation5 + $0x38] sm:$0xff] }
 0x2bd   :  { %6990 = vmatpush1.bf16.msra.mxu1 %v11211_v55  ;;  %v404_v55 = vld [vmem:[#allocation5 + $0x710] sm:$0xff] }
 0x2be   :  { %7072 = vmatpush1.bf16.msra.mxu0 %v10445_v56  ;;  %6991 = vmatprep.subr.bf16.mxu1 %v11220_v59  ;;  %v408_v56 = vld [vmem:[#allocation5 + $0x730] sm:$0xff]  ;;  %v11259_v59 = vcombine.low %v1163_v42, %v1167_v44  ;;  %v10280_v42 = vcombine.high %v181_v34, %v185_v36 }
 0x2bf   :  { %7073 = vmatprep.subr.bf16.mxu0 %v10454_v60  ;;  %v10493_v60 = vcombine.low %v396_v45, %v400_v46  ;;  %v10502_v0 = vcombine.high %v404_v55, %v408_v56  ;;  %v189_v45 = vld [vmem:[#allocation5 + $0x58] sm:$0xff] }
 0x2c0   :  { %v193_v46 = vld [vmem:[#allocation5 + $0x78] sm:$0xff] }
 0x2c1   :  { %6992 = vmatpush1.bf16.msra.mxu1 %v11219_v4  ;;  %v412_v4 = vld [vmem:[#allocation5 + $0x750] sm:$0xff] }
 0x2c2   :  { %7074 = vmatpush1.bf16.msra.mxu0 %v10453_v5  ;;  %6993 = vmatprep.subr.bf16.mxu1 %v11228_v7  ;;  %v416_v5 = vld [vmem:[#allocation5 + $0x770] sm:$0xff]  ;;  %v11267_v7 = vcombine.low %v1171_v52, %v1175_v54  ;;  %v10288_v52 = vcombine.high %v189_v45, %v193_v46 }
 0x2c3   :  { %7075 = vmatprep.subr.bf16.mxu0 %v10462_v8  ;;  %v10501_v8 = vcombine.low %v404_v55, %v408_v56  ;;  %v10510_v10 = vcombine.high %v412_v4, %v416_v5  ;;  %v197_v55 = vld [vmem:[#allocation5 + $0x98] sm:$0xff] }
 0x2c4   :  { %v201_v56 = vld [vmem:[#allocation5 + $0xb8] sm:$0xff] }
 0x2c5   :  { %6994 = vmatpush1.bf16.msra.mxu1 %v11227_v15  ;;  %v420_v15 = vld [vmem:[#allocation5 + $0x790] sm:$0xff] }
 0x2c6   :  { %7076 = vmatpush1.bf16.msra.mxu0 %v10461_v17  ;;  %6995 = vmatprep.subr.bf16.mxu1 %v11236_v18  ;;  %v424_v17 = vld [vmem:[#allocation5 + $0x7b0] sm:$0xff]  ;;  %v11275_v18 = vcombine.low %v1179_v1, %v1183_v3  ;;  %v10296_v1 = vcombine.high %v197_v55, %v201_v56 }
 0x2c7   :  { %7077 = vmatprep.subr.bf16.mxu0 %v10470_v19  ;;  %v10509_v19 = vcombine.low %v412_v4, %v416_v5  ;;  %v10518_v23 = vcombine.high %v420_v15, %v424_v17  ;;  %v205_v4 = vld [vmem:[#allocation5 + $0xd8] sm:$0xff] }
 0x2c8   :  { %v209_v5 = vld [vmem:[#allocation5 + $0xf8] sm:$0xff] }
 0x2c9   :  { %6996 = vmatpush1.bf16.msra.mxu1 %v11235_v26  ;;  %v428_v26 = vld [vmem:[#allocation5 + $0x7d0] sm:$0xff] }
 0x2ca   :  { %7078 = vmatpush1.bf16.msra.mxu0 %v10469_v28  ;;  %6997 = vmatprep.subr.bf16.mxu1 %v11244_v29  ;;  %v432_v28 = vld [vmem:[#allocation5 + $0x7f0] sm:$0xff]  ;;  %v11283_v29 = vcombine.low %v1187_v11, %v1191_v12  ;;  %v10304_v11 = vcombine.high %v205_v4, %v209_v5 }
 0x2cb   :  { %7079 = vmatprep.subr.bf16.mxu0 %v10478_v30  ;;  %v10517_v30 = vcombine.low %v420_v15, %v424_v17  ;;  %v10526_v33 = vcombine.high %v428_v26, %v432_v28  ;;  %v213_v15 = vld [vmem:[#allocation5 + $0x118] sm:$0xff] }
 0x2cc   :  { %v217_v17 = vld [vmem:[#allocation5 + $0x138] sm:$0xff] }
 0x2cd   :  { %6998 = vmatpush1.bf16.msra.mxu1 %v11243_v37  ;;  %v436_v37 = vld [vmem:[#allocation5 + $0x810] sm:$0xff] }
 0x2ce   :  { %7080 = vmatpush1.bf16.msra.mxu0 %v10477_v39  ;;  %6999 = vmatprep.subr.bf16.mxu1 %v11252_v40  ;;  %v440_v39 = vld [vmem:[#allocation5 + $0x830] sm:$0xff]  ;;  %v11291_v40 = vcombine.low %v1195_v24, %v1199_v25  ;;  %v10312_v24 = vcombine.high %v213_v15, %v217_v17  ;;  %v221_v25 = vld [vmem:[#allocation5 + $0x158] sm:$0xff] }
 0x2cf   :  { %7081 = vmatprep.subr.bf16.mxu0 %v10486_v41  ;;  %v10525_v41 = vcombine.low %v428_v26, %v432_v28  ;;  %v10534_v44 = vcombine.high %v436_v37, %v440_v39  ;;  %v225_v26 = vld [vmem:[#allocation5 + $0x178] sm:$0xff]  ;;  %v476_v28 = vld [vmem:[#allocation5 + $0x950] sm:$0xff] }
 0x2d1   :  { %7000 = vmatpush1.bf16.msra.mxu1 %v11251_v47  ;;  %v444_v47 = vld [vmem:[#allocation5 + $0x850] sm:$0xff] }
 0x2d2   :  { %7082 = vmatpush1.bf16.msra.mxu0 %v10485_v48  ;;  %7001 = vmatprep.subr.bf16.mxu1 %v11260_v49  ;;  %v448_v48 = vld [vmem:[#allocation5 + $0x870] sm:$0xff]  ;;  %v10279_v49 = vcombine.low %v181_v34, %v185_v36  ;;  %v229_v36 = vld [vmem:[#allocation5 + $0x198] sm:$0xff] }
 0x2d3   :  { %7083 = vmatprep.subr.bf16.mxu0 %v10494_v51  ;;  %v10533_v51 = vcombine.low %v436_v37, %v440_v39  ;;  %v10542_v54 = vcombine.high %v444_v47, %v448_v48  ;;  %v233_v37 = vld [vmem:[#allocation5 + $0x1b8] sm:$0xff]  ;;  %v484_v39 = vld [vmem:[#allocation5 + $0x990] sm:$0xff] }
 0x2d5   :  { %7002 = vmatpush1.bf16.msra.mxu1 %v11259_v59  ;;  %v452_v59 = vld [vmem:[#allocation5 + $0x890] sm:$0xff] }
 0x2d6   :  { %7084 = vmatpush1.bf16.msra.mxu0 %v10493_v60  ;;  %7003 = vmatprep.subr.bf16.mxu1 %v11268_v62  ;;  %v456_v60 = vld [vmem:[#allocation5 + $0x8b0] sm:$0xff]  ;;  %v10287_v62 = vcombine.low %v189_v45, %v193_v46  ;;  %v237_v46 = vld [vmem:[#allocation5 + $0x1d8] sm:$0xff] }
 0x2d7   :  { %7085 = vmatprep.subr.bf16.mxu0 %v10502_v0  ;;  %v10541_v0 = vcombine.low %v444_v47, %v448_v48  ;;  %v10550_v3 = vcombine.high %v452_v59, %v456_v60  ;;  %v241_v47 = vld [vmem:[#allocation5 + $0x1f8] sm:$0xff]  ;;  %v492_v48 = vld [vmem:[#allocation5 + $0x9d0] sm:$0xff] }
 0x2d9   :  { %7004 = vmatpush1.bf16.msra.mxu1 %v11267_v7  ;;  %v460_v7 = vld [vmem:[#allocation5 + $0x8d0] sm:$0xff] }
 0x2da   :  { %7086 = vmatpush1.bf16.msra.mxu0 %v10501_v8  ;;  %7005 = vmatprep.subr.bf16.mxu1 %v11276_v9  ;;  %v464_v8 = vld [vmem:[#allocation5 + $0x8f0] sm:$0xff]  ;;  %v10295_v9 = vcombine.low %v197_v55, %v201_v56  ;;  %v245_v56 = vld [vmem:[#allocation5 + $0x218] sm:$0xff] }
 0x2db   :  { %7087 = vmatprep.subr.bf16.mxu0 %v10510_v10  ;;  %v10549_v10 = vcombine.low %v452_v59, %v456_v60  ;;  %v10558_v12 = vcombine.high %v460_v7, %v464_v8  ;;  %v249_v59 = vld [vmem:[#allocation5 + $0x238] sm:$0xff]  ;;  %v500_v60 = vld [vmem:[#allocation5 + $0xa10] sm:$0xff] }
 0x2dd   :  { %7006 = vmatpush1.bf16.msra.mxu1 %v11275_v18  ;;  %v468_v18 = vld [vmem:[#allocation5 + $0x910] sm:$0xff] }
 0x2de   :  { %7088 = vmatpush1.bf16.msra.mxu0 %v10509_v19  ;;  %7007 = vmatprep.subr.bf16.mxu1 %v11284_v22  ;;  %v472_v19 = vld [vmem:[#allocation5 + $0x930] sm:$0xff]  ;;  %v10303_v22 = vcombine.low %v205_v4, %v209_v5  ;;  %v253_v5 = vld [vmem:[#allocation5 + $0x258] sm:$0xff] }
 0x2df   :  { %7089 = vmatprep.subr.bf16.mxu0 %v10518_v23  ;;  %v10557_v23 = vcombine.low %v460_v7, %v464_v8  ;;  %v257_v7 = vld [vmem:[#allocation5 + $0x278] sm:$0xff]  ;;  %v508_v8 = vld [vmem:[#allocation5 + $0xa50] sm:$0xff] }
 0x2e1   :  { %7008 = vmatpush1.bf16.msra.mxu1 %v11283_v29  ;;  %v480_v29 = vld [vmem:[#allocation5 + $0x970] sm:$0xff] }
 0x2e2   :  { %7090 = vmatpush1.bf16.msra.mxu0 %v10517_v30  ;;  %7009 = vmatprep.subr.bf16.mxu1 %v11292_v32  ;;  %v10311_v30 = vcombine.low %v213_v15, %v217_v17  ;;  %v10565_v32 = vcombine.low %v468_v18, %v472_v19  ;;  %v10574_v34 = vcombine.high %v476_v28, %v480_v29  ;;  %v261_v17 = vld [vmem:[#allocation5 + $0x298] sm:$0xff] }
 0x2e3   :  { %7091 = vmatprep.subr.bf16.mxu0 %v10526_v33  ;;  %v10320_v33 = vcombine.high %v221_v25, %v225_v26 }
 0x2e5   :  { %7010 = vmatpush1.bf16.msra.mxu1 %v11291_v40  ;;  %v488_v40 = vld [vmem:[#allocation5 + $0x9b0] sm:$0xff] }
 0x2e6   :  { %7092 = vmatpush1.bf16.msra.mxu0 %v10525_v41  ;;  %7348 = vmatprep.subr.bf16.mxu1 %v10280_v42  ;;  %v10319_v41 = vcombine.low %v221_v25, %v225_v26  ;;  %v10573_v42 = vcombine.low %v476_v28, %v480_v29  ;;  %v10582_v45 = vcombine.high %v484_v39, %v488_v40  ;;  %v269_v26 = vld [vmem:[#allocation5 + $0x2d8] sm:$0xff]  ;;  %v524_v29 = vld [vmem:[#allocation5 + $0xad0] sm:$0xff] }
 0x2e7   :  { %7102 = vmatprep.subr.bf16.mxu0 %v10534_v44  ;;  %v10328_v44 = vcombine.high %v229_v36, %v233_v37  ;;  %v273_v28 = vld [vmem:[#allocation5 + $0x2f8] sm:$0xff] }
 0x2e8   :  { %7012 = vmatmul.mubr.bf16.vlgmr.msra.gmra.mrb[4].mxu1 %v12796_v14 }
 0x2e9   :  { %7094 = vmatmul.mubr.bf16.vlgmr.msra.gmra.mrb[4].mxu0 %v12744_v21  ;;  %7349 = vmatpush1.bf16.msra.mxu1 %v10279_v49  ;;  %v496_v49 = vld [vmem:[#allocation5 + $0x9f0] sm:$0xff] }
 0x2ea   :  { %7103 = vmatpush1.bf16.msra.mxu0 %v10533_v51  ;;  %7350 = vmatprep.subr.bf16.mxu1 %v10288_v52  ;;  %v10327_v51 = vcombine.low %v229_v36, %v233_v37  ;;  %v10581_v52 = vcombine.low %v484_v39, %v488_v40  ;;  %v10590_v55 = vcombine.high %v492_v48, %v496_v49  ;;  %v277_v37 = vld [vmem:[#allocation5 + $0x318] sm:$0xff]  ;;  %v532_v40 = vld [vmem:[#allocation5 + $0xb10] sm:$0xff] }
 0x2eb   :  { %7104 = vmatprep.subr.bf16.mxu0 %v10542_v54  ;;  %7134 = vmatprep.mubr.bf16.mxu0 %v12746_v27  ;;  %v10336_v54 = vcombine.high %v237_v46, %v241_v47  ;;  %v281_v39 = vld [vmem:[#allocation5 + $0x338] sm:$0xff] }
 0x2ec   :  { %7380 = vmatprep.mubr.bf16.mxu1 %v12736_v57  ;;  %v10566_v57 = vcombine.high %v468_v18, %v472_v19  ;;  %v265_v18 = vld [vmem:[#allocation5 + $0x2b8] sm:$0xff]  ;;  %v516_v19 = vld [vmem:[#allocation5 + $0xa90] sm:$0xff] }
 0x2ed   :  { %7351 = vmatpush1.bf16.msra.mxu1 %v10287_v62  ;;  %v504_v62 = vld [vmem:[#allocation5 + $0xa30] sm:$0xff] }
 0x2ee   :  { %7105 = vmatpush1.bf16.msra.mxu0 %v10541_v0  ;;  %7352 = vmatprep.subr.bf16.mxu1 %v10296_v1  ;;  %v10335_v0 = vcombine.low %v237_v46, %v241_v47  ;;  %v10589_v1 = vcombine.low %v492_v48, %v496_v49  ;;  %v10598_v4 = vcombine.high %v500_v60, %v504_v62  ;;  %v285_v47 = vld [vmem:[#allocation5 + $0x358] sm:$0xff]  ;;  %v540_v49 = vld [vmem:[#allocation5 + $0xb50] sm:$0xff] }
 0x2ef   :  { %7106 = vmatprep.subr.bf16.mxu0 %v10550_v3  ;;  %v10344_v3 = vcombine.high %v245_v56, %v249_v59  ;;  %v289_v48 = vld [vmem:[#allocation5 + $0x378] sm:$0xff] }
 0x2f1   :  { %7353 = vmatpush1.bf16.msra.mxu1 %v10295_v9  ;;  %v512_v9 = vld [vmem:[#allocation5 + $0xa70] sm:$0xff] }
 0x2f2   :  { %7107 = vmatpush1.bf16.msra.mxu0 %v10549_v10  ;;  %7354 = vmatprep.subr.bf16.mxu1 %v10304_v11  ;;  %v10343_v10 = vcombine.low %v245_v56, %v249_v59  ;;  %v10597_v11 = vcombine.low %v500_v60, %v504_v62  ;;  %v10606_v15 = vcombine.high %v508_v8, %v512_v9  ;;  %v293_v59 = vld [vmem:[#allocation5 + $0x398] sm:$0xff]  ;;  %v548_v62 = vld [vmem:[#allocation5 + $0xb90] sm:$0xff] }
 0x2f3   :  { %7108 = vmatprep.subr.bf16.mxu0 %v10558_v12  ;;  %v10352_v12 = vcombine.high %v253_v5, %v257_v7  ;;  %v297_v60 = vld [vmem:[#allocation5 + $0x3b8] sm:$0xff] }
 0x2f5   :  { %7355 = vmatpush1.bf16.msra.mxu1 %v10303_v22  ;;  %v520_v22 = vld [vmem:[#allocation5 + $0xab0] sm:$0xff] }
 0x2f6   :  { %7109 = vmatpush1.bf16.msra.mxu0 %v10557_v23  ;;  %7356 = vmatprep.subr.bf16.mxu1 %v10312_v24  ;;  %v10351_v23 = vcombine.low %v253_v5, %v257_v7  ;;  %v10605_v24 = vcombine.low %v508_v8, %v512_v9  ;;  %v10614_v25 = vcombine.high %v516_v19, %v520_v22  ;;  %v301_v7 = vld [vmem:[#allocation5 + $0x3d8] sm:$0xff]  ;;  %v556_v9 = vld [vmem:[#allocation5 + $0xbd0] sm:$0xff] }
 0x2f7   :  { %7110 = vmatprep.subr.bf16.mxu0 %v10566_v57  ;;  %v10360_v57 = vcombine.high %v261_v17, %v265_v18  ;;  %v305_v8 = vld [vmem:[#allocation5 + $0x3f8] sm:$0xff] }
 0x2f9   :  { %7357 = vmatpush1.bf16.msra.mxu1 %v10311_v30  ;;  %v528_v30 = vld [vmem:[#allocation5 + $0xaf0] sm:$0xff] }
 0x2fa   :  { %7111 = vmatpush1.bf16.msra.mxu0 %v10565_v32  ;;  %7358 = vmatprep.subr.bf16.mxu1 %v10320_v33  ;;  %v10359_v32 = vcombine.low %v261_v17, %v265_v18  ;;  %v10613_v33 = vcombine.low %v516_v19, %v520_v22  ;;  %v10622_v36 = vcombine.high %v524_v29, %v528_v30  ;;  %v309_v18 = vld [vmem:[#allocation5 + $0x418] sm:$0xff]  ;;  %v564_v22 = vld [vmem:[#allocation5 + $0xc10] sm:$0xff] }
 0x2fb   :  { %7112 = vmatprep.subr.bf16.mxu0 %v10574_v34  ;;  %v10368_v34 = vcombine.high %v269_v26, %v273_v28  ;;  %v313_v19 = vld [vmem:[#allocation5 + $0x438] sm:$0xff] }
 0x2fd   :  { %7359 = vmatpush1.bf16.msra.mxu1 %v10319_v41  ;;  %v536_v41 = vld [vmem:[#allocation5 + $0xb30] sm:$0xff] }
 0x2fe   :  { %7113 = vmatpush1.bf16.msra.mxu0 %v10573_v42  ;;  %7360 = vmatprep.subr.bf16.mxu1 %v10328_v44  ;;  %v10367_v42 = vcombine.low %v269_v26, %v273_v28  ;;  %v10621_v44 = vcombine.low %v524_v29, %v528_v30  ;;  %v10630_v46 = vcombine.high %v532_v40, %v536_v41  ;;  %v317_v28 = vld [vmem:[#allocation5 + $0x458] sm:$0xff]  ;;  %v572_v30 = vld [vmem:[#allocation5 + $0xc50] sm:$0xff] }
 0x2ff   :  { %7114 = vmatprep.subr.bf16.mxu0 %v10582_v45  ;;  %v10376_v45 = vcombine.high %v277_v37, %v281_v39  ;;  %v321_v29 = vld [vmem:[#allocation5 + $0x478] sm:$0xff] }
 0x301   :  { %7361 = vmatpush1.bf16.msra.mxu1 %v10327_v51  ;;  %v544_v51 = vld [vmem:[#allocation5 + $0xb70] sm:$0xff] }
 0x302   :  { %7115 = vmatpush1.bf16.msra.mxu0 %v10581_v52  ;;  %7362 = vmatprep.subr.bf16.mxu1 %v10336_v54  ;;  %v10375_v52 = vcombine.low %v277_v37, %v281_v39  ;;  %v10629_v54 = vcombine.low %v532_v40, %v536_v41  ;;  %v10638_v56 = vcombine.high %v540_v49, %v544_v51  ;;  %v325_v39 = vld [vmem:[#allocation5 + $0x498] sm:$0xff]  ;;  %v580_v41 = vld [vmem:[#allocation5 + $0xc90] sm:$0xff] }
 0x303   :  { %7116 = vmatprep.subr.bf16.mxu0 %v10590_v55  ;;  %v10384_v55 = vcombine.high %v285_v47, %v289_v48  ;;  %v329_v40 = vld [vmem:[#allocation5 + $0x4b8] sm:$0xff] }
 0x305   :  { %7363 = vmatpush1.bf16.msra.mxu1 %v10335_v0  ;;  %v552_v0 = vld [vmem:[#allocation5 + $0xbb0] sm:$0xff] }
 0x306   :  { %7117 = vmatpush1.bf16.msra.mxu0 %v10589_v1  ;;  %7364 = vmatprep.subr.bf16.mxu1 %v10344_v3  ;;  %v10383_v1 = vcombine.low %v285_v47, %v289_v48  ;;  %v10637_v3 = vcombine.low %v540_v49, %v544_v51  ;;  %v10646_v5 = vcombine.high %v548_v62, %v552_v0  ;;  %v1204_v47 = vlaneseq  ;;  %v333_v49 = vld [vmem:[#allocation5 + $0x4d8] sm:$0xff] }
 0x307   :  { %7118 = vmatprep.subr.bf16.mxu0 %v10598_v4  ;;  %v10392_v4 = vcombine.high %v293_v59, %v297_v60  ;;  %v337_v51 = vld [vmem:[#allocation5 + $0x4f8] sm:$0xff] }
 0x309   :  { %7365 = vmatpush1.bf16.msra.mxu1 %v10343_v10  ;;  %v560_v10 = vld [vmem:[#allocation5 + $0xbf0] sm:$0xff] }
 0x30a   :  { %7119 = vmatpush1.bf16.msra.mxu0 %v10597_v11  ;;  %7366 = vmatprep.subr.bf16.mxu1 %v10352_v12  ;;  %v10391_v11 = vcombine.low %v293_v59, %v297_v60  ;;  %v10645_v12 = vcombine.low %v548_v62, %v552_v0  ;;  %v10654_v17 = vcombine.high %v556_v9, %v560_v10  ;;  %v12814_v59 = vshrl.u32 %v1204_v47, 7  ;;  %v341_v62 = vld [vmem:[#allocation5 + $0x518] sm:$0xff] }
 0x30b   :  { %7120 = vmatprep.subr.bf16.mxu0 %v10606_v15  ;;  %v10400_v15 = vcombine.high %v301_v7, %v305_v8  ;;  %v345_v0 = vld [vmem:[#allocation5 + $0x538] sm:$0xff] }
 0x30d   :  { %7367 = vmatpush1.bf16.msra.mxu1 %v10351_v23  ;;  %v568_v23 = vld [vmem:[#allocation5 + $0xc30] sm:$0xff] }
 0x30e   :  { %7121 = vmatpush1.bf16.msra.mxu0 %v10605_v24  ;;  %7368 = vmatprep.subr.bf16.mxu1 %v10360_v57  ;;  %v10399_v24 = vcombine.low %v301_v7, %v305_v8  ;;  %v10653_v57 = vcombine.low %v556_v9, %v560_v10  ;;  %v10662_v26 = vcombine.high %v564_v22, %v568_v23  ;;  %v12817_v7 = vsub.s32 0, %v12814_v59  ;;  %v349_v9 = vld [vmem:[#allocation5 + $0x558] sm:$0xff] }
 0x30f   :  { %7122 = vmatprep.subr.bf16.mxu0 %v10614_v25  ;;  %v10408_v25 = vcombine.high %v309_v18, %v313_v19  ;;  %v353_v10 = vld [vmem:[#allocation5 + $0x578] sm:$0xff] }
 0x311   :  { %7369 = vmatpush1.bf16.msra.mxu1 %v10359_v32  ;;  %v576_v32 = vld [vmem:[#allocation5 + $0xc70] sm:$0xff] }
 0x312   :  { %7123 = vmatpush1.bf16.msra.mxu0 %v10613_v33  ;;  %7370 = vmatprep.subr.bf16.mxu1 %v10368_v34  ;;  %v10407_v33 = vcombine.low %v309_v18, %v313_v19  ;;  %v10661_v34 = vcombine.low %v564_v22, %v568_v23  ;;  %v10670_v37 = vcombine.high %v572_v30, %v576_v32 }
 0x313   :  { %7124 = vmatprep.subr.bf16.mxu0 %v10622_v36  ;;  %v10416_v36 = vcombine.high %v317_v28, %v321_v29  ;;  %v10439_v18 = vcombine.low %v341_v62, %v345_v0  ;;  %v10448_v22 = vcombine.high %v349_v9, %v353_v10 }
 0x315   :  { %7371 = vmatpush1.bf16.msra.mxu1 %v10367_v42  ;;  %v584_v42 = vld [vmem:[#allocation5 + $0xcb0] sm:$0xff] }
 0x316   :  { %7125 = vmatpush1.bf16.msra.mxu0 %v10621_v44  ;;  %7372 = vmatprep.subr.bf16.mxu1 %v10376_v45  ;;  %v10415_v44 = vcombine.low %v317_v28, %v321_v29  ;;  %v10669_v45 = vcombine.low %v572_v30, %v576_v32  ;;  %v10678_v48 = vcombine.high %v580_v41, %v584_v42  ;;  %v612_v28 = vld [vmem:[#allocation5 + $0xd90] sm:$0xff] }
 0x317   :  { %7126 = vmatprep.subr.bf16.mxu0 %v10630_v46  ;;  %v10424_v46 = vcombine.high %v325_v39, %v329_v40  ;;  %v616_v29 = vld [vmem:[#allocation5 + $0xdb0] sm:$0xff]  ;;  %v10447_v30 = vcombine.low %v349_v9, %v353_v10 }
 0x319   :  { %7373 = vmatpush1.bf16.msra.mxu1 %v10375_v52  ;;  %v588_v52 = vld [vmem:[#allocation5 + $0xcd0] sm:$0xff] }
 0x31a   :  { %7127 = vmatpush1.bf16.msra.mxu0 %v10629_v54  ;;  %7374 = vmatprep.subr.bf16.mxu1 %v10384_v55  ;;  %v592_v54 = vld [vmem:[#allocation5 + $0xcf0] sm:$0xff]  ;;  %v10677_v55 = vcombine.low %v580_v41, %v584_v42 }
 0x31b   :  { %7128 = vmatprep.subr.bf16.mxu0 %v10638_v56  ;;  %v10432_v56 = vcombine.high %v333_v49, %v337_v51  ;;  %v10686_v60 = vcombine.high %v588_v52, %v592_v54  ;;  %v620_v42 = vld [vmem:[#allocation5 + $0xdd0] sm:$0xff] }
 0x31d   :  { %7375 = vmatpush1.bf16.msra.mxu1 %v10383_v1  ;;  %v596_v1 = vld [vmem:[#allocation5 + $0xd10] sm:$0xff] }
 0x31e   :  { %7129 = vmatpush1.bf16.msra.mxu0 %v10637_v3  ;;  %7376 = vmatprep.subr.bf16.mxu1 %v10392_v4  ;;  %v600_v3 = vld [vmem:[#allocation5 + $0xd30] sm:$0xff]  ;;  %v10431_v4 = vcombine.low %v333_v49, %v337_v51  ;;  %v10709_v51 = vcombine.low %v612_v28, %v616_v29 }
 0x31f   :  { %7130 = vmatprep.subr.bf16.mxu0 %v10646_v5  ;;  %v10685_v5 = vcombine.low %v588_v52, %v592_v54  ;;  %v10694_v8 = vcombine.high %v596_v1, %v600_v3  ;;  %v10693_v19 = vcombine.low %v596_v1, %v600_v3  ;;  %v381_v3 = vld [vmem:[#allocation5 + $0x658] sm:$0xff] }
 0x321   :  { %7377 = vmatpush1.bf16.msra.mxu1 %v10391_v11  ;;  %v1202_v11 = vld [vmem:[#allocation7] sm:$0xff] }
 0x322   :  { %7131 = vmatpush1.bf16.msra.mxu0 %v10645_v12  ;;  %7378 = vmatprep.subr.bf16.mxu1 %v10400_v15  ;;  %v12820_v12 = vsub.s32 1, %v12814_v59  ;;  %v604_v15 = vld [vmem:[#allocation5 + $0xd50] sm:$0xff]  ;;  %v1207_v23 = vrot.slane %v1202_v11, %v12817_v7 }
 0x323   :  { %7132 = vmatprep.subr.bf16.mxu0 %v10654_v17  ;;  %v608_v17 = vld [vmem:[#allocation5 + $0xd70] sm:$0xff] }
 0x324   :  { %v10701_v32 = vcombine.low %v604_v15, %v608_v17 }
 0x325   :  { %7379 = vmatpush1.bf16.msra.mxu1 %v10399_v24  ;;  %v10702_v24 = vcombine.high %v604_v15, %v608_v17  ;;  %v389_v15 = vld [vmem:[#allocation5 + $0x698] sm:$0xff] }
 0x326   :  { %7133 = vmatpush1.bf16.msra.mxu0 %v10653_v57  ;;  %7389 = vmatprep.subr.bf16.mxu1 %v10408_v25  ;;  %v357_v57 = vld [vmem:[#allocation5 + $0x598] sm:$0xff] }
 0x327   :  { %7143 = vmatprep.subr.bf16.mxu0 %v10662_v26  ;;  %v361_v25 = vld [vmem:[#allocation5 + $0x5b8] sm:$0xff]  ;;  %v1211_v26 = vrot.slane %v1202_v11, %v12820_v12 }
 0x328   :  { %7381 = vmatmul.mubr.bf16.vlgmr.msra.gmra.mrb[8].mxu1 %v12742_v16  ;;  %v10423_v16 = vcombine.low %v325_v39, %v329_v40  ;;  %v369_v39 = vld [vmem:[#allocation5 + $0x5f8] sm:$0xff]  ;;  %v10455_v47 = vcombine.low %v357_v57, %v361_v25 }
 0x329   :  { %7135 = vmatmul.mubr.bf16.vlgmr.msra.gmra.mrb[4].mxu0 %v12752_v35  ;;  %7390 = vmatpush1.bf16.msra.mxu1 %v10407_v33  ;;  %v10456_v33 = vcombine.high %v357_v57, %v361_v25  ;;  %v6401_v40 = vadd.f32 %v12778_v6, %v1211_v26  ;;  %v377_v6 = vld [vmem:[#allocation5 + $0x638] sm:$0xff] }
 0x32a   :  { %7144 = vmatpush1.bf16.msra.mxu0 %v10661_v34  ;;  %7391 = vmatprep.subr.bf16.mxu1 %v10416_v36  ;;  %v6399_v34 = vadd.f32 %v12776_v2, %v1207_v23  ;;  %v10710_v36 = vcombine.high %v612_v28, %v616_v29  ;;  %v393_v17 = vld [vmem:[#allocation5 + $0x6b8] sm:$0xff]  ;;  %v652_v28 = vld [vmem:[#allocation5 + $0xed0] sm:$0xff] }
 0x32b   :  { %7145 = vmatprep.subr.bf16.mxu0 %v10670_v37  ;;  %7175 = vmatprep.mubr.bf16.mxu0 %v12754_v43  ;;  %v365_v37 = vld [vmem:[#allocation5 + $0x5d8] sm:$0xff]  ;;  %v656_v29 = vld [vmem:[#allocation5 + $0xef0] sm:$0xff] }
 0x32c   :  { %7421 = vmatprep.mubr.bf16.mxu1 %v12738_v61  ;;  %v10440_v61 = vcombine.high %v341_v62, %v345_v0  ;;  %v10464_v2 = vcombine.high %v365_v37, %v369_v39  ;;  %v397_v25 = vld [vmem:[#allocation5 + $0x6d8] sm:$0xff] }
 0x32d   :  { %7392 = vmatpush1.bf16.msra.mxu1 %v10415_v44  ;;  %v624_v44 = vld [vmem:[#allocation5 + $0xdf0] sm:$0xff]  ;;  %v401_v26 = vld [vmem:[#allocation5 + $0x6f8] sm:$0xff] }
 0x32e   :  { %7146 = vmatpush1.bf16.msra.mxu0 %v10669_v45  ;;  %7393 = vmatprep.subr.bf16.mxu1 %v10424_v46  ;;  %v10718_v54 = vcombine.high %v620_v42, %v624_v44  ;;  %v10717_v62 = vcombine.low %v620_v42, %v624_v44  ;;  %v10749_v42 = vcombine.low %v652_v28, %v656_v29 }
 0x32f   :  { %7147 = vmatprep.subr.bf16.mxu0 %v10678_v48 }
 0x331   :  { %7394 = vmatpush1.bf16.msra.mxu1 %v10423_v16  ;;  %v373_v16 = vld [vmem:[#allocation5 + $0x618] sm:$0xff] }
 0x332   :  { %7148 = vmatpush1.bf16.msra.mxu0 %v10677_v55  ;;  %7395 = vmatprep.subr.bf16.mxu1 %v10432_v56  ;;  %v628_v55 = vld [vmem:[#allocation5 + $0xe10] sm:$0xff]  ;;  %v10472_v0 = vcombine.high %v373_v16, %v377_v6 }
 0x333   :  { %7149 = vmatprep.subr.bf16.mxu0 %v10686_v60  ;;  %v632_v56 = vld [vmem:[#allocation5 + $0xe30] sm:$0xff]  ;;  %v10463_v60 = vcombine.low %v365_v37, %v369_v39  ;;  %v409_v37 = vld [vmem:[#allocation5 + $0x738] sm:$0xff] }
 0x334   :  { %v10726_v1 = vcombine.high %v628_v55, %v632_v56  ;;  %v10725_v9 = vcombine.low %v628_v55, %v632_v56  ;;  %v660_v39 = vld [vmem:[#allocation5 + $0xf10] sm:$0xff]  ;;  %v421_v55 = vld [vmem:[#allocation5 + $0x798] sm:$0xff] }
 0x335   :  { %7396 = vmatpush1.bf16.msra.mxu1 %v10431_v4  ;;  %v385_v4 = vld [vmem:[#allocation5 + $0x678] sm:$0xff] }
 0x336   :  { %7150 = vmatpush1.bf16.msra.mxu0 %v10685_v5  ;;  %7397 = vmatprep.subr.bf16.mxu1 %v10440_v61  ;;  %v636_v5 = vld [vmem:[#allocation5 + $0xe50] sm:$0xff]  ;;  %v10480_v10 = vcombine.high %v381_v3, %v385_v4  ;;  %v425_v56 = vld [vmem:[#allocation5 + $0x7b8] sm:$0xff] }
 0x337   :  { %7151 = vmatprep.subr.bf16.mxu0 %v10694_v8  ;;  %v640_v61 = vld [vmem:[#allocation5 + $0xe70] sm:$0xff]  ;;  %v10471_v8 = vcombine.low %v373_v16, %v377_v6 }
 0x338   :  { %v10734_v11 = vcombine.high %v636_v5, %v640_v61  ;;  %v10733_v23 = vcombine.low %v636_v5, %v640_v61  ;;  %v429_v5 = vld [vmem:[#allocation5 + $0x7d8] sm:$0xff] }
 0x339   :  { %7398 = vmatpush1.bf16.msra.mxu1 %v10439_v18  ;;  %v644_v18 = vld [vmem:[#allocation5 + $0xe90] sm:$0xff]  ;;  %v433_v61 = vld [vmem:[#allocation5 + $0x7f8] sm:$0xff] }
 0x33a   :  { %7152 = vmatpush1.bf16.msra.mxu0 %v10693_v19  ;;  %7399 = vmatprep.subr.bf16.mxu1 %v10448_v22  ;;  %v648_v19 = vld [vmem:[#allocation5 + $0xeb0] sm:$0xff]  ;;  %v10479_v22 = vcombine.low %v381_v3, %v385_v4  ;;  %v10520_v3 = vcombine.high %v421_v55, %v425_v56 }
 0x33b   :  { %7153 = vmatprep.subr.bf16.mxu0 %v10702_v24  ;;  %v10488_v24 = vcombine.high %v389_v15, %v393_v17  ;;  %v10742_v57 = vcombine.high %v644_v18, %v648_v19 }
 0x33c   :  { %v6685_v41 = vpop.f32.mrb[0].mxu0 }
 0x33d   :  { %v12826_v45 = vadd.f32 %v6685_v41, %v6399_v34  ;;  %v6687_v46 = vpop.f32.mrb[1].mxu0  ;;  %7400 = vmatpush1.bf16.msra.mxu1 %v10447_v30  ;;  %v10487_v30 = vcombine.low %v389_v15, %v393_v17  ;;  %v10750_v34 = vcombine.high %v652_v28, %v656_v29  ;;  %v10495_v41 = vcombine.low %v397_v25, %v401_v26  ;;  %v445_v28 = vld [vmem:[#allocation5 + $0x858] sm:$0xff] }
 0x33e   :  { %v12828_v48 = vadd.f32 %v6687_v46, %v6401_v40  ;;  %v6689_v49 = vpop.f32.mrb[2].mxu0  ;;  %7154 = vmatpush1.bf16.msra.mxu0 %v10701_v32  ;;  %7401 = vmatprep.subr.bf16.mxu1 %v10456_v33  ;;  %v10741_v32 = vcombine.low %v644_v18, %v648_v19  ;;  %v10496_v33 = vcombine.high %v397_v25, %v401_v26  ;;  %v664_v40 = vld [vmem:[#allocation5 + $0xf30] sm:$0xff]  ;;  %v437_v18 = vld [vmem:[#allocation5 + $0x818] sm:$0xff] }
 0x33f   :  { %v6690_v52 = vpop.f32.mrb[3].mxu0  ;;  %7155 = vmatprep.subr.bf16.mxu0 %v10710_v36  ;;  %v405_v36 = vld [vmem:[#allocation5 + $0x718] sm:$0xff]  ;;  %v10758_v46 = vcombine.high %v660_v39, %v664_v40  ;;  %v10528_v15 = vcombine.high %v429_v5, %v433_v61 }
 0x340   :  { %v10504_v44 = vcombine.high %v405_v36, %v409_v37  ;;  %v417_v49 = vld [vmem:[#allocation5 + $0x778] sm:$0xff]  ;;  %v10503_v52 = vcombine.low %v405_v36, %v409_v37 }
 0x341   :  { %7402 = vmatpush1.bf16.msra.mxu1 %v10455_v47  ;;  %v413_v47 = vld [vmem:[#allocation5 + $0x758] sm:$0xff] }
 0x342   :  { %7156 = vmatpush1.bf16.msra.mxu0 %v10709_v51  ;;  %7403 = vmatprep.subr.bf16.mxu1 %v10464_v2  ;;  %v668_v51 = vld [vmem:[#allocation5 + $0xf50] sm:$0xff]  ;;  %v10512_v16 = vcombine.high %v413_v47, %v417_v49  ;;  %v441_v19 = vld [vmem:[#allocation5 + $0x838] sm:$0xff] }
 0x343   :  { %7157 = vmatprep.subr.bf16.mxu0 %v10718_v54  ;;  %v672_v2 = vld [vmem:[#allocation5 + $0xf70] sm:$0xff]  ;;  %v10757_v54 = vcombine.low %v660_v39, %v664_v40  ;;  %v10536_v25 = vcombine.high %v437_v18, %v441_v19  ;;  %v449_v29 = vld [vmem:[#allocation5 + $0x878] sm:$0xff] }
 0x344   :  { %v10766_v6 = vcombine.high %v668_v51, %v672_v2  ;;  %v10544_v36 = vcombine.high %v445_v28, %v449_v29  ;;  %v453_v39 = vld [vmem:[#allocation5 + $0x898] sm:$0xff] }
 0x345   :  { %7404 = vmatpush1.bf16.msra.mxu1 %v10463_v60  ;;  %v676_v60 = vld [vmem:[#allocation5 + $0xf90] sm:$0xff]  ;;  %v457_v40 = vld [vmem:[#allocation5 + $0x8b8] sm:$0xff] }
 0x346   :  { %7158 = vmatpush1.bf16.msra.mxu0 %v10717_v62  ;;  %7405 = vmatprep.subr.bf16.mxu1 %v10472_v0  ;;  %v680_v62 = vld [vmem:[#allocation5 + $0xfb0] sm:$0xff]  ;;  %v10511_v0 = vcombine.low %v413_v47, %v417_v49  ;;  %v10552_v47 = vcombine.high %v453_v39, %v457_v40 }
 0x347   :  { %7159 = vmatprep.subr.bf16.mxu0 %v10726_v1  ;;  %v10765_v1 = vcombine.low %v668_v51, %v672_v2  ;;  %v10774_v4 = vcombine.high %v676_v60, %v680_v62  ;;  %v461_v51 = vld [vmem:[#allocation5 + $0x8d8] sm:$0xff] }
 0x348   :  { %v465_v2 = vld [vmem:[#allocation5 + $0x8f8] sm:$0xff] }
 0x349   :  { %7406 = vmatpush1.bf16.msra.mxu1 %v10471_v8  ;;  %v684_v8 = vld [vmem:[#allocation5 + $0xfd0] sm:$0xff] }
 0x34a   :  { %7160 = vmatpush1.bf16.msra.mxu0 %v10725_v9  ;;  %7407 = vmatprep.subr.bf16.mxu1 %v10480_v10  ;;  %v688_v9 = vld [vmem:[#allocation5 + $0xff0] sm:$0xff]  ;;  %v10519_v10 = vcombine.low %v421_v55, %v425_v56  ;;  %v469_v56 = vld [vmem:[#allocation5 + $0x918] sm:$0xff] }
 0x34b   :  { %7161 = vmatprep.subr.bf16.mxu0 %v10734_v11  ;;  %v10773_v11 = vcombine.low %v676_v60, %v680_v62  ;;  %v10782_v17 = vcombine.high %v684_v8, %v688_v9  ;;  %v473_v60 = vld [vmem:[#allocation5 + $0x938] sm:$0xff]  ;;  %v724_v62 = vld [vmem:[#allocation5 + $0x1110] sm:$0xff] }
 0x34d   :  { %7408 = vmatpush1.bf16.msra.mxu1 %v10479_v22  ;;  %v692_v22 = vld [vmem:[#allocation5 + $0x1010] sm:$0xff] }
 0x34e   :  { %7162 = vmatpush1.bf16.msra.mxu0 %v10733_v23  ;;  %7409 = vmatprep.subr.bf16.mxu1 %v10488_v24  ;;  %v696_v23 = vld [vmem:[#allocation5 + $0x1030] sm:$0xff]  ;;  %v10527_v24 = vcombine.low %v429_v5, %v433_v61  ;;  %v477_v5 = vld [vmem:[#allocation5 + $0x958] sm:$0xff] }
 0x34f   :  { %7163 = vmatprep.subr.bf16.mxu0 %v10742_v57  ;;  %v10781_v57 = vcombine.low %v684_v8, %v688_v9  ;;  %v10790_v26 = vcombine.high %v692_v22, %v696_v23  ;;  %v481_v61 = vld [vmem:[#allocation5 + $0x978] sm:$0xff]  ;;  %v732_v8 = vld [vmem:[#allocation5 + $0x1150] sm:$0xff] }
 0x350   :  { %v736_v9 = vld [vmem:[#allocation5 + $0x1170] sm:$0xff] }
 0x351   :  { %7410 = vmatpush1.bf16.msra.mxu1 %v10487_v30  ;;  %v700_v30 = vld [vmem:[#allocation5 + $0x1050] sm:$0xff] }
 0x352   :  { %7164 = vmatpush1.bf16.msra.mxu0 %v10741_v32  ;;  %7411 = vmatprep.subr.bf16.mxu1 %v10496_v33  ;;  %v704_v32 = vld [vmem:[#allocation5 + $0x1070] sm:$0xff]  ;;  %v10535_v33 = vcombine.low %v437_v18, %v441_v19  ;;  %v485_v18 = vld [vmem:[#allocation5 + $0x998] sm:$0xff] }
 0x353   :  { %7165 = vmatprep.subr.bf16.mxu0 %v10750_v34  ;;  %v10789_v34 = vcombine.low %v692_v22, %v696_v23  ;;  %v10798_v37 = vcombine.high %v700_v30, %v704_v32  ;;  %v489_v19 = vld [vmem:[#allocation5 + $0x9b8] sm:$0xff]  ;;  %v740_v22 = vld [vmem:[#allocation5 + $0x1190] sm:$0xff] }
 0x354   :  { %v744_v23 = vld [vmem:[#allocation5 + $0x11b0] sm:$0xff] }
 0x355   :  { %7412 = vmatpush1.bf16.msra.mxu1 %v10495_v41  ;;  %v708_v41 = vld [vmem:[#allocation5 + $0x1090] sm:$0xff] }
 0x356   :  { %7166 = vmatpush1.bf16.msra.mxu0 %v10749_v42  ;;  %7413 = vmatprep.subr.bf16.mxu1 %v10504_v44  ;;  %v712_v42 = vld [vmem:[#allocation5 + $0x10b0] sm:$0xff]  ;;  %v10543_v44 = vcombine.low %v445_v28, %v449_v29  ;;  %v493_v28 = vld [vmem:[#allocation5 + $0x9d8] sm:$0xff] }
 0x357   :  { %7167 = vmatprep.subr.bf16.mxu0 %v10758_v46  ;;  %v10797_v46 = vcombine.low %v700_v30, %v704_v32  ;;  %v10806_v49 = vcombine.high %v708_v41, %v712_v42  ;;  %v497_v29 = vld [vmem:[#allocation5 + $0x9f8] sm:$0xff]  ;;  %v748_v30 = vld [vmem:[#allocation5 + $0x11d0] sm:$0xff] }
 0x358   :  { %v752_v32 = vld [vmem:[#allocation5 + $0x11f0] sm:$0xff] }
 0x359   :  { %7414 = vmatpush1.bf16.msra.mxu1 %v10503_v52  ;;  %v716_v52 = vld [vmem:[#allocation5 + $0x10d0] sm:$0xff] }
 0x35a   :  { %7168 = vmatpush1.bf16.msra.mxu0 %v10757_v54  ;;  %7415 = vmatprep.subr.bf16.mxu1 %v10512_v16  ;;  %v720_v54 = vld [vmem:[#allocation5 + $0x10f0] sm:$0xff]  ;;  %v10805_v16 = vcombine.low %v708_v41, %v712_v42 }
 0x35b   :  { %7169 = vmatprep.subr.bf16.mxu0 %v10766_v6  ;;  %v10560_v6 = vcombine.high %v461_v51, %v465_v2  ;;  %v10814_v55 = vcombine.high %v716_v52, %v720_v54  ;;  %v756_v41 = vld [vmem:[#allocation5 + $0x1210] sm:$0xff] }
 0x35c   :  { %v760_v42 = vld [vmem:[#allocation5 + $0x1230] sm:$0xff] }
 0x35d   :  { %7416 = vmatpush1.bf16.msra.mxu1 %v10511_v0  ;;  %v728_v0 = vld [vmem:[#allocation5 + $0x1130] sm:$0xff] }
 0x35e   :  { %7170 = vmatpush1.bf16.msra.mxu0 %v10765_v1  ;;  %7417 = vmatprep.subr.bf16.mxu1 %v10520_v3  ;;  %v10559_v1 = vcombine.low %v461_v51, %v465_v2  ;;  %v10813_v3 = vcombine.low %v716_v52, %v720_v54  ;;  %v509_v51 = vld [vmem:[#allocation5 + $0xa58] sm:$0xff]  ;;  %v764_v52 = vld [vmem:[#allocation5 + $0x1250] sm:$0xff] }
 0x35f   :  { %7171 = vmatprep.subr.bf16.mxu0 %v10774_v4  ;;  %v10568_v4 = vcombine.high %v469_v56, %v473_v60  ;;  %v513_v2 = vld [vmem:[#allocation5 + $0xa78] sm:$0xff]  ;;  %v768_v54 = vld [vmem:[#allocation5 + $0x1270] sm:$0xff] }
 0x361   :  { %7418 = vmatpush1.bf16.msra.mxu1 %v10519_v10  ;;  %v10567_v10 = vcombine.low %v469_v56, %v473_v60  ;;  %v517_v56 = vld [vmem:[#allocation5 + $0xa98] sm:$0xff] }
 0x362   :  { %7172 = vmatpush1.bf16.msra.mxu0 %v10773_v11  ;;  %7419 = vmatprep.subr.bf16.mxu1 %v10528_v15  ;;  %v10821_v11 = vcombine.low %v724_v62, %v728_v0  ;;  %v10576_v15 = vcombine.high %v477_v5, %v481_v61  ;;  %v521_v60 = vld [vmem:[#allocation5 + $0xab8] sm:$0xff] }
 0x363   :  { %7173 = vmatprep.subr.bf16.mxu0 %v10782_v17  ;;  %v10830_v17 = vcombine.high %v732_v8, %v736_v9 }
 0x365   :  { %7420 = vmatpush1.bf16.msra.mxu1 %v10527_v24  ;;  %v10575_v24 = vcombine.low %v477_v5, %v481_v61  ;;  %v525_v5 = vld [vmem:[#allocation5 + $0xad8] sm:$0xff] }
 0x366   :  { %7174 = vmatpush1.bf16.msra.mxu0 %v10781_v57  ;;  %7430 = vmatprep.subr.bf16.mxu1 %v10536_v25  ;;  %v10829_v57 = vcombine.low %v732_v8, %v736_v9  ;;  %v10584_v25 = vcombine.high %v485_v18, %v489_v19  ;;  %v529_v61 = vld [vmem:[#allocation5 + $0xaf8] sm:$0xff]  ;;  %v780_v8 = vld [vmem:[#allocation5 + $0x12d0] sm:$0xff] }
 0x367   :  { %7184 = vmatprep.subr.bf16.mxu0 %v10790_v26  ;;  %v10838_v26 = vcombine.high %v740_v22, %v744_v23  ;;  %v784_v9 = vld [vmem:[#allocation5 + $0x12f0] sm:$0xff] }
 0x368   :  { %7422 = vmatmul.mubr.bf16.vlgmr.msra.gmra.mrb[8].mxu1 %v12744_v21  ;;  %v10551_v21 = vcombine.low %v453_v39, %v457_v40  ;;  %v501_v39 = vld [vmem:[#allocation5 + $0xa18] sm:$0xff] }
 0x369   :  { %7176 = vmatmul.mubr.bf16.vlgmr.msra.gmra.mrb[4].mxu0 %v12760_v53  ;;  %7431 = vmatpush1.bf16.msra.mxu1 %v10535_v33  ;;  %v10583_v33 = vcombine.low %v485_v18, %v489_v19  ;;  %v505_v40 = vld [vmem:[#allocation5 + $0xa38] sm:$0xff] }
 0x36a   :  { %7185 = vmatpush1.bf16.msra.mxu0 %v10789_v34  ;;  %7432 = vmatprep.subr.bf16.mxu1 %v10544_v36  ;;  %v10837_v34 = vcombine.low %v740_v22, %v744_v23  ;;  %v10592_v36 = vcombine.high %v493_v28, %v497_v29  ;;  %v533_v18 = vld [vmem:[#allocation5 + $0xb18] sm:$0xff]  ;;  %v788_v22 = vld [vmem:[#allocation5 + $0x1310] sm:$0xff] }
 0x36b   :  { %7186 = vmatprep.subr.bf16.mxu0 %v10798_v37  ;;  %7216 = vmatprep.mubr.bf16.mxu0 %v12762_v63  ;;  %v10846_v37 = vcombine.high %v748_v30, %v752_v32  ;;  %v537_v19 = vld [vmem:[#allocation5 + $0xb38] sm:$0xff]  ;;  %v792_v23 = vld [vmem:[#allocation5 + $0x1330] sm:$0xff] }
 0x36c   :  { %7462 = vmatprep.mubr.bf16.mxu1 %v12746_v27  ;;  %v10822_v27 = vcombine.high %v724_v62, %v728_v0  ;;  %v772_v62 = vld [vmem:[#allocation5 + $0x1290] sm:$0xff] }
 0x36d   :  { %7433 = vmatpush1.bf16.msra.mxu1 %v10543_v44  ;;  %v10591_v44 = vcombine.low %v493_v28, %v497_v29  ;;  %v776_v0 = vld [vmem:[#allocation5 + $0x12b0] sm:$0xff]  ;;  %v541_v28 = vld [vmem:[#allocation5 + $0xb58] sm:$0xff] }
 0x36e   :  { %7187 = vmatpush1.bf16.msra.mxu0 %v10797_v46  ;;  %7434 = vmatprep.subr.bf16.mxu1 %v10552_v47  ;;  %v10845_v46 = vcombine.low %v748_v30, %v752_v32  ;;  %v10600_v47 = vcombine.high %v501_v39, %v505_v40  ;;  %v545_v29 = vld [vmem:[#allocation5 + $0xb78] sm:$0xff]  ;;  %v796_v30 = vld [vmem:[#allocation5 + $0x1350] sm:$0xff] }
 0x36f   :  { %7188 = vmatprep.subr.bf16.mxu0 %v10806_v49  ;;  %v10854_v49 = vcombine.high %v756_v41, %v760_v42  ;;  %v800_v32 = vld [vmem:[#allocation5 + $0x1370] sm:$0xff] }
 0x371   :  { %7435 = vmatpush1.bf16.msra.mxu1 %v10551_v21  ;;  %v10599_v21 = vcombine.low %v501_v39, %v505_v40  ;;  %v549_v39 = vld [vmem:[#allocation5 + $0xb98] sm:$0xff] }
 0x372   :  { %7189 = vmatpush1.bf16.msra.mxu0 %v10805_v16  ;;  %7436 = vmatprep.subr.bf16.mxu1 %v10560_v6  ;;  %v10853_v16 = vcombine.low %v756_v41, %v760_v42  ;;  %v10608_v6 = vcombine.high %v509_v51, %v513_v2  ;;  %v553_v40 = vld [vmem:[#allocation5 + $0xbb8] sm:$0xff]  ;;  %v804_v41 = vld [vmem:[#allocation5 + $0x1390] sm:$0xff] }
 0x373   :  { %7190 = vmatprep.subr.bf16.mxu0 %v10814_v55  ;;  %v10862_v55 = vcombine.high %v764_v52, %v768_v54  ;;  %v808_v42 = vld [vmem:[#allocation5 + $0x13b0] sm:$0xff] }
 0x375   :  { %7437 = vmatpush1.bf16.msra.mxu1 %v10559_v1  ;;  %v10607_v1 = vcombine.low %v509_v51, %v513_v2  ;;  %v557_v51 = vld [vmem:[#allocation5 + $0xbd8] sm:$0xff] }
 0x376   :  { %7191 = vmatpush1.bf16.msra.mxu0 %v10813_v3  ;;  %7438 = vmatprep.subr.bf16.mxu1 %v10568_v4  ;;  %v10861_v3 = vcombine.low %v764_v52, %v768_v54  ;;  %v10616_v4 = vcombine.high %v517_v56, %v521_v60  ;;  %v561_v2 = vld [vmem:[#allocation5 + $0xbf8] sm:$0xff]  ;;  %v812_v52 = vld [vmem:[#allocation5 + $0x13d0] sm:$0xff] }
 0x377   :  { %7192 = vmatprep.subr.bf16.mxu0 %v10822_v27  ;;  %v10870_v27 = vcombine.high %v772_v62, %v776_v0  ;;  %v816_v54 = vld [vmem:[#allocation5 + $0x13f0] sm:$0xff] }
 0x379   :  { %7439 = vmatpush1.bf16.msra.mxu1 %v10567_v10  ;;  %v10615_v10 = vcombine.low %v517_v56, %v521_v60  ;;  %v565_v56 = vld [vmem:[#allocation5 + $0xc18] sm:$0xff] }
 0x37a   :  { %7193 = vmatpush1.bf16.msra.mxu0 %v10821_v11  ;;  %7440 = vmatprep.subr.bf16.mxu1 %v10576_v15  ;;  %v10869_v11 = vcombine.low %v772_v62, %v776_v0  ;;  %v10624_v15 = vcombine.high %v525_v5, %v529_v61  ;;  %v569_v60 = vld [vmem:[#allocation5 + $0xc38] sm:$0xff]  ;;  %v820_v62 = vld [vmem:[#allocation5 + $0x1410] sm:$0xff] }
 0x37b   :  { %7194 = vmatprep.subr.bf16.mxu0 %v10830_v17  ;;  %v10878_v17 = vcombine.high %v780_v8, %v784_v9  ;;  %v824_v0 = vld [vmem:[#allocation5 + $0x1430] sm:$0xff] }
 0x37d   :  { %7441 = vmatpush1.bf16.msra.mxu1 %v10575_v24  ;;  %v10623_v24 = vcombine.low %v525_v5, %v529_v61  ;;  %v573_v5 = vld [vmem:[#allocation5 + $0xc58] sm:$0xff] }
 0x37e   :  { %7195 = vmatpush1.bf16.msra.mxu0 %v10829_v57  ;;  %7442 = vmatprep.subr.bf16.mxu1 %v10584_v25  ;;  %v10877_v57 = vcombine.low %v780_v8, %v784_v9  ;;  %v10632_v25 = vcombine.high %v533_v18, %v537_v19  ;;  %v577_v61 = vld [vmem:[#allocation5 + $0xc78] sm:$0xff]  ;;  %v828_v8 = vld [vmem:[#allocation5 + $0x1450] sm:$0xff] }
 0x37f   :  { %7196 = vmatprep.subr.bf16.mxu0 %v10838_v26  ;;  %v10886_v26 = vcombine.high %v788_v22, %v792_v23  ;;  %v832_v9 = vld [vmem:[#allocation5 + $0x1470] sm:$0xff] }
 0x381   :  { %7443 = vmatpush1.bf16.msra.mxu1 %v10583_v33  ;;  %v10631_v33 = vcombine.low %v533_v18, %v537_v19  ;;  %v581_v18 = vld [vmem:[#allocation5 + $0xc98] sm:$0xff] }
 0x382   :  { %7197 = vmatpush1.bf16.msra.mxu0 %v10837_v34  ;;  %7444 = vmatprep.subr.bf16.mxu1 %v10592_v36  ;;  %v10885_v34 = vcombine.low %v788_v22, %v792_v23  ;;  %v10640_v36 = vcombine.high %v541_v28, %v545_v29  ;;  %v585_v19 = vld [vmem:[#allocation5 + $0xcb8] sm:$0xff]  ;;  %v836_v22 = vld [vmem:[#allocation5 + $0x1490] sm:$0xff] }
 0x383   :  { %7198 = vmatprep.subr.bf16.mxu0 %v10846_v37  ;;  %v10894_v37 = vcombine.high %v796_v30, %v800_v32  ;;  %v840_v23 = vld [vmem:[#allocation5 + $0x14b0] sm:$0xff] }
 0x385   :  { %7445 = vmatpush1.bf16.msra.mxu1 %v10591_v44  ;;  %v10639_v44 = vcombine.low %v541_v28, %v545_v29  ;;  %v589_v28 = vld [vmem:[#allocation5 + $0xcd8] sm:$0xff] }
 0x386   :  { %7199 = vmatpush1.bf16.msra.mxu0 %v10845_v46  ;;  %7446 = vmatprep.subr.bf16.mxu1 %v10600_v47  ;;  %v10893_v46 = vcombine.low %v796_v30, %v800_v32  ;;  %v10648_v47 = vcombine.high %v549_v39, %v553_v40  ;;  %v593_v29 = vld [vmem:[#allocation5 + $0xcf8] sm:$0xff]  ;;  %v844_v30 = vld [vmem:[#allocation5 + $0x14d0] sm:$0xff] }
 0x387   :  { %7200 = vmatprep.subr.bf16.mxu0 %v10854_v49  ;;  %v10902_v49 = vcombine.high %v804_v41, %v808_v42  ;;  %v848_v32 = vld [vmem:[#allocation5 + $0x14f0] sm:$0xff] }
 0x389   :  { %7447 = vmatpush1.bf16.msra.mxu1 %v10599_v21  ;;  %v10647_v21 = vcombine.low %v549_v39, %v553_v40  ;;  %v601_v39 = vld [vmem:[#allocation5 + $0xd38] sm:$0xff]  ;;  %v852_v40 = vld [vmem:[#allocation5 + $0x1510] sm:$0xff] }
 0x38a   :  { %7201 = vmatpush1.bf16.msra.mxu0 %v10853_v16  ;;  %7448 = vmatprep.subr.bf16.mxu1 %v10608_v6  ;;  %v10901_v16 = vcombine.low %v804_v41, %v808_v42  ;;  %v10656_v6 = vcombine.high %v557_v51, %v561_v2  ;;  %v856_v41 = vld [vmem:[#allocation5 + $0x1530] sm:$0xff]  ;;  %v10687_v42 = vcombine.low %v589_v28, %v593_v29 }
 0x38b   :  { %7202 = vmatprep.subr.bf16.mxu0 %v10862_v55  ;;  %v10910_v55 = vcombine.high %v812_v52, %v816_v54 }
 0x38d   :  { %7449 = vmatpush1.bf16.msra.mxu1 %v10607_v1  ;;  %v10655_v1 = vcombine.low %v557_v51, %v561_v2  ;;  %v860_v51 = vld [vmem:[#allocation5 + $0x1550] sm:$0xff] }
 0x38e   :  { %7203 = vmatpush1.bf16.msra.mxu0 %v10861_v3  ;;  %7450 = vmatprep.subr.bf16.mxu1 %v10616_v4  ;;  %v10909_v3 = vcombine.low %v812_v52, %v816_v54  ;;  %v10664_v4 = vcombine.high %v565_v56, %v569_v60  ;;  %v864_v2 = vld [vmem:[#allocation5 + $0x1570] sm:$0xff]  ;;  %v10949_v54 = vcombine.low %v852_v40, %v856_v41 }
 0x38f   :  { %7204 = vmatprep.subr.bf16.mxu0 %v10870_v27  ;;  %v10918_v27 = vcombine.high %v820_v62, %v824_v0 }
 0x391   :  { %7451 = vmatpush1.bf16.msra.mxu1 %v10615_v10  ;;  %v10663_v10 = vcombine.low %v565_v56, %v569_v60  ;;  %v868_v56 = vld [vmem:[#allocation5 + $0x1590] sm:$0xff] }
 0x392   :  { %7205 = vmatpush1.bf16.msra.mxu0 %v10869_v11  ;;  %7452 = vmatprep.subr.bf16.mxu1 %v10624_v15  ;;  %v10917_v11 = vcombine.low %v820_v62, %v824_v0  ;;  %v10672_v15 = vcombine.high %v573_v5, %v577_v61  ;;  %v872_v60 = vld [vmem:[#allocation5 + $0x15b0] sm:$0xff]  ;;  %v10957_v0 = vcombine.low %v860_v51, %v864_v2 }
 0x393   :  { %7206 = vmatprep.subr.bf16.mxu0 %v10878_v17  ;;  %v10926_v17 = vcombine.high %v828_v8, %v832_v9 }
 0x395   :  { %7453 = vmatpush1.bf16.msra.mxu1 %v10623_v24  ;;  %v10671_v24 = vcombine.low %v573_v5, %v577_v61  ;;  %v625_v5 = vld [vmem:[#allocation5 + $0xdf8] sm:$0xff] }
 0x396   :  { %7207 = vmatpush1.bf16.msra.mxu0 %v10877_v57  ;;  %7454 = vmatprep.subr.bf16.mxu1 %v10632_v25  ;;  %v10925_v57 = vcombine.low %v828_v8, %v832_v9  ;;  %v10680_v25 = vcombine.high %v581_v18, %v585_v19  ;;  %v876_v8 = vld [vmem:[#allocation5 + $0x15d0] sm:$0xff] }
 0x397   :  { %7208 = vmatprep.subr.bf16.mxu0 %v10886_v26  ;;  %v10934_v26 = vcombine.high %v836_v22, %v840_v23  ;;  %v880_v9 = vld [vmem:[#allocation5 + $0x15f0] sm:$0xff] }
 0x399   :  { %7455 = vmatpush1.bf16.msra.mxu1 %v10631_v33  ;;  %v10933_v33 = vcombine.low %v836_v22, %v840_v23  ;;  %v629_v22 = vld [vmem:[#allocation5 + $0xe18] sm:$0xff] }
 0x39a   :  { %7209 = vmatpush1.bf16.msra.mxu0 %v10885_v34  ;;  %7456 = vmatprep.subr.bf16.mxu1 %v10640_v36  ;;  %v10688_v34 = vcombine.high %v589_v28, %v593_v29  ;;  %v10942_v36 = vcombine.high %v844_v30, %v848_v32  ;;  %v633_v23 = vld [vmem:[#allocation5 + $0xe38] sm:$0xff] }
 0x39b   :  { %7210 = vmatprep.subr.bf16.mxu0 %v10894_v37  ;;  %v597_v37 = vld [vmem:[#allocation5 + $0xd18] sm:$0xff]  ;;  %v10728_v28 = vcombine.high %v629_v22, %v633_v23 }
 0x39c   :  { %v10695_v52 = vcombine.low %v597_v37, %v601_v39 }
 0x39d   :  { %7457 = vmatpush1.bf16.msra.mxu1 %v10639_v44  ;;  %v10941_v44 = vcombine.low %v844_v30, %v848_v32  ;;  %v637_v30 = vld [vmem:[#allocation5 + $0xe58] sm:$0xff] }
 0x39e   :  { %7211 = vmatpush1.bf16.msra.mxu0 %v10893_v46  ;;  %7458 = vmatprep.subr.bf16.mxu1 %v10648_v47  ;;  %v10696_v46 = vcombine.high %v597_v37, %v601_v39  ;;  %v605_v47 = vld [vmem:[#allocation5 + $0xd58] sm:$0xff] }
 0x39f   :  { %7212 = vmatprep.subr.bf16.mxu0 %v10902_v49  ;;  %v609_v49 = vld [vmem:[#allocation5 + $0xd78] sm:$0xff] }
 0x3a0   :  { %v10703_v62 = vcombine.low %v605_v47, %v609_v49  ;;  %v641_v32 = vld [vmem:[#allocation5 + $0xe78] sm:$0xff] }
 0x3a1   :  { %7459 = vmatpush1.bf16.msra.mxu1 %v10647_v21  ;;  %v10704_v21 = vcombine.high %v605_v47, %v609_v49  ;;  %v10736_v37 = vcombine.high %v637_v30, %v641_v32 }
 0x3a2   :  { %7213 = vmatpush1.bf16.msra.mxu0 %v10901_v16  ;;  %7460 = vmatprep.subr.bf16.mxu1 %v10656_v6  ;;  %v10958_v16 = vcombine.high %v860_v51, %v864_v2  ;;  %v613_v6 = vld [vmem:[#allocation5 + $0xd98] sm:$0xff] }
 0x3a3   :  { %7214 = vmatprep.subr.bf16.mxu0 %v10910_v55  ;;  %v617_v55 = vld [vmem:[#allocation5 + $0xdb8] sm:$0xff] }
 0x3a4   :  { %v653_v51 = vld [vmem:[#allocation5 + $0xed8] sm:$0xff] }
 0x3a5   :  { %7461 = vmatpush1.bf16.msra.mxu1 %v10655_v1  ;;  %v10712_v1 = vcombine.high %v613_v6, %v617_v55  ;;  %v657_v2 = vld [vmem:[#allocation5 + $0xef8] sm:$0xff] }
 0x3a6   :  { %7215 = vmatpush1.bf16.msra.mxu0 %v10909_v3  ;;  %7471 = vmatprep.subr.bf16.mxu1 %v10664_v4  ;;  %v10966_v4 = vcombine.high %v868_v56, %v872_v60 }
 0x3a7   :  { %7225 = vmatprep.subr.bf16.mxu0 %v10918_v27  ;;  %v621_v27 = vld [vmem:[#allocation5 + $0xdd8] sm:$0xff] }
 0x3a8   :  { %7463 = vmatmul.mubr.bf16.vlgmr.msra.gmra.mrb[8].mxu1 %v12752_v35  ;;  %v10679_v35 = vcombine.low %v581_v18, %v585_v19  ;;  %v10720_v18 = vcombine.high %v621_v27, %v625_v5  ;;  %v10974_v19 = vcombine.high %v876_v8, %v880_v9 }
 0x3a9   :  { %7217 = vmatmul.mubr.bf16.vlgmr.msra.gmra.mrb[4].mxu0 %v12768_v13  ;;  %7472 = vmatpush1.bf16.msra.mxu1 %v10663_v10 }
 0x3aa   :  { %7226 = vmatpush1.bf16.msra.mxu0 %v10917_v11  ;;  %7473 = vmatprep.subr.bf16.mxu1 %v10672_v15  ;;  %v10711_v11 = vcombine.low %v613_v6, %v617_v55  ;;  %v10752_v6 = vcombine.high %v653_v51, %v657_v2 }
 0x3ab   :  { %7227 = vmatprep.subr.bf16.mxu0 %v10926_v17  ;;  %7257 = vmatprep.mubr.bf16.mxu0 %v12770_v20  ;;  %v10965_v17 = vcombine.low %v868_v56, %v872_v60  ;;  %v661_v56 = vld [vmem:[#allocation5 + $0xf18] sm:$0xff] }
 0x3ac   :  { %7503 = vmatprep.mubr.bf16.mxu1 %v12754_v43  ;;  %v10950_v43 = vcombine.high %v852_v40, %v856_v41  ;;  %v645_v40 = vld [vmem:[#allocation5 + $0xe98] sm:$0xff] }
 0x3ad   :  { %7474 = vmatpush1.bf16.msra.mxu1 %v10671_v24  ;;  %v884_v24 = vld [vmem:[#allocation5 + $0x1610] sm:$0xff]  ;;  %v649_v41 = vld [vmem:[#allocation5 + $0xeb8] sm:$0xff] }
 0x3ae   :  { %7228 = vmatpush1.bf16.msra.mxu0 %v10925_v57  ;;  %7475 = vmatprep.subr.bf16.mxu1 %v10680_v25  ;;  %v888_v57 = vld [vmem:[#allocation5 + $0x1630] sm:$0xff]  ;;  %v10719_v25 = vcombine.low %v621_v27, %v625_v5  ;;  %v10744_v47 = vcombine.high %v645_v40, %v649_v41  ;;  %v665_v60 = vld [vmem:[#allocation5 + $0xf38] sm:$0xff] }
 0x3af   :  { %7229 = vmatprep.subr.bf16.mxu0 %v10934_v26  ;;  %v10973_v26 = vcombine.low %v876_v8, %v880_v9  ;;  %v10982_v29 = vcombine.high %v884_v24, %v888_v57  ;;  %v10760_v27 = vcombine.high %v661_v56, %v665_v60  ;;  %v669_v8 = vld [vmem:[#allocation5 + $0xf58] sm:$0xff] }
 0x3b0   :  { %v673_v9 = vld [vmem:[#allocation5 + $0xf78] sm:$0xff] }
 0x3b1   :  { %7476 = vmatpush1.bf16.msra.mxu1 %v10679_v35  ;;  %v892_v35 = vld [vmem:[#allocation5 + $0x1650] sm:$0xff] }
 0x3b2   :  { %7230 = vmatpush1.bf16.msra.mxu0 %v10933_v33  ;;  %7477 = vmatprep.subr.bf16.mxu1 %v10688_v34  ;;  %v896_v33 = vld [vmem:[#allocation5 + $0x1670] sm:$0xff]  ;;  %v10727_v34 = vcombine.low %v629_v22, %v633_v23  ;;  %v677_v22 = vld [vmem:[#allocation5 + $0xf98] sm:$0xff] }
 0x3b3   :  { %7231 = vmatprep.subr.bf16.mxu0 %v10942_v36  ;;  %v10981_v36 = vcombine.low %v884_v24, %v888_v57  ;;  %v10990_v39 = vcombine.high %v892_v35, %v896_v33  ;;  %v681_v23 = vld [vmem:[#allocation5 + $0xfb8] sm:$0xff]  ;;  %v932_v24 = vld [vmem:[#allocation5 + $0x1790] sm:$0xff] }
 0x3b4   :  { %v936_v57 = vld [vmem:[#allocation5 + $0x17b0] sm:$0xff] }
 0x3b5   :  { %7478 = vmatpush1.bf16.msra.mxu1 %v10687_v42  ;;  %v900_v42 = vld [vmem:[#allocation5 + $0x1690] sm:$0xff] }
 0x3b6   :  { %7232 = vmatpush1.bf16.msra.mxu0 %v10941_v44  ;;  %7479 = vmatprep.subr.bf16.mxu1 %v10696_v46  ;;  %v904_v44 = vld [vmem:[#allocation5 + $0x16b0] sm:$0xff]  ;;  %v10735_v46 = vcombine.low %v637_v30, %v641_v32  ;;  %v685_v30 = vld [vmem:[#allocation5 + $0xfd8] sm:$0xff] }
 0x3b7   :  { %7233 = vmatprep.subr.bf16.mxu0 %v10950_v43  ;;  %v10989_v43 = vcombine.low %v892_v35, %v896_v33  ;;  %v10998_v49 = vcombine.high %v900_v42, %v904_v44  ;;  %v689_v32 = vld [vmem:[#allocation5 + $0xff8] sm:$0xff]  ;;  %v940_v35 = vld [vmem:[#allocation5 + $0x17d0] sm:$0xff] }
 0x3b8   :  { %v944_v33 = vld [vmem:[#allocation5 + $0x17f0] sm:$0xff] }
 0x3b9   :  { %7480 = vmatpush1.bf16.msra.mxu1 %v10695_v52  ;;  %v908_v52 = vld [vmem:[#allocation5 + $0x16d0] sm:$0xff] }
 0x3ba   :  { %7234 = vmatpush1.bf16.msra.mxu0 %v10949_v54  ;;  %7481 = vmatprep.subr.bf16.mxu1 %v10704_v21  ;;  %v912_v54 = vld [vmem:[#allocation5 + $0x16f0] sm:$0xff]  ;;  %v10743_v21 = vcombine.low %v645_v40, %v649_v41  ;;  %v693_v40 = vld [vmem:[#allocation5 + $0x1018] sm:$0xff] }
 0x3bb   :  { %v12838_v3 = vpop.f32.mrb[4].mxu1  ;;  %7235 = vmatprep.subr.bf16.mxu0 %v10958_v16  ;;  %v10997_v16 = vcombine.low %v900_v42, %v904_v44  ;;  %v11006_v55 = vcombine.high %v908_v52, %v912_v54  ;;  %v697_v41 = vld [vmem:[#allocation5 + $0x1038] sm:$0xff]  ;;  %v948_v42 = vld [vmem:[#allocation5 + $0x1810] sm:$0xff] }
 0x3bc   :  { %v12840_v61 = vpop.f32.mrb[5].mxu1  ;;  %v952_v44 = vld [vmem:[#allocation5 + $0x1830] sm:$0xff] }
 0x3bd   :  { %v7017_v10 = vpop.f32.mrb[6].mxu1  ;;  %7482 = vmatpush1.bf16.msra.mxu1 %v10703_v62  ;;  %v916_v62 = vld [vmem:[#allocation5 + $0x1710] sm:$0xff] }
 0x3be   :  { %7236 = vmatpush1.bf16.msra.mxu0 %v10957_v0  ;;  %v7018_v15 = vpop.f32.mrb[7].mxu1  ;;  %7483 = vmatprep.subr.bf16.mxu1 %v10712_v1  ;;  %v920_v0 = vld [vmem:[#allocation5 + $0x1730] sm:$0xff]  ;;  %v10751_v1 = vcombine.low %v653_v51, %v657_v2  ;;  %v701_v51 = vld [vmem:[#allocation5 + $0x1058] sm:$0xff] }
 0x3bf   :  { %7237 = vmatprep.subr.bf16.mxu0 %v10966_v4  ;;  %v11005_v4 = vcombine.low %v908_v52, %v912_v54  ;;  %v11014_v5 = vcombine.high %v916_v62, %v920_v0  ;;  %v924_v10 = vld [vmem:[#allocation5 + $0x1750] sm:$0xff]  ;;  %v10759_v15 = vcombine.low %v661_v56, %v665_v60  ;;  %v705_v2 = vld [vmem:[#allocation5 + $0x1078] sm:$0xff] }
 0x3c0   :  { %v956_v52 = vld [vmem:[#allocation5 + $0x1850] sm:$0xff]  ;;  %v709_v56 = vld [vmem:[#allocation5 + $0x1098] sm:$0xff] }
 0x3c1   :  { %7484 = vmatpush1.bf16.msra.mxu1 %v10711_v11  ;;  %v928_v11 = vld [vmem:[#allocation5 + $0x1770] sm:$0xff]  ;;  %v713_v60 = vld [vmem:[#allocation5 + $0x10b8] sm:$0xff] }
 0x3c2   :  { %7238 = vmatpush1.bf16.msra.mxu0 %v10965_v17  ;;  %7485 = vmatprep.subr.bf16.mxu1 %v10720_v18  ;;  %v11013_v17 = vcombine.low %v916_v62, %v920_v0  ;;  %v10768_v18 = vcombine.high %v669_v8, %v673_v9  ;;  %v960_v54 = vld [vmem:[#allocation5 + $0x1870] sm:$0xff] }
 0x3c3   :  { %7239 = vmatprep.subr.bf16.mxu0 %v10974_v19  ;;  %v11022_v19 = vcombine.high %v924_v10, %v928_v11  ;;  %v964_v62 = vld [vmem:[#allocation5 + $0x1890] sm:$0xff] }
 0x3c4   :  { %v968_v0 = vld [vmem:[#allocation5 + $0x18b0] sm:$0xff] }
 0x3c5   :  { %7486 = vmatpush1.bf16.msra.mxu1 %v10719_v25  ;;  %v10767_v25 = vcombine.low %v669_v8, %v673_v9  ;;  %v717_v8 = vld [vmem:[#allocation5 + $0x10d8] sm:$0xff] }
 0x3c6   :  { %7240 = vmatpush1.bf16.msra.mxu0 %v10973_v26  ;;  %7487 = vmatprep.subr.bf16.mxu1 %v10728_v28  ;;  %v11021_v26 = vcombine.low %v924_v10, %v928_v11  ;;  %v10776_v28 = vcombine.high %v677_v22, %v681_v23  ;;  %v721_v9 = vld [vmem:[#allocation5 + $0x10f8] sm:$0xff]  ;;  %v972_v10 = vld [vmem:[#allocation5 + $0x18d0] sm:$0xff] }
 0x3c7   :  { %7241 = vmatprep.subr.bf16.mxu0 %v10982_v29  ;;  %v11030_v29 = vcombine.high %v932_v24, %v936_v57  ;;  %v976_v11 = vld [vmem:[#allocation5 + $0x18f0] sm:$0xff] }
 0x3c9   :  { %7488 = vmatpush1.bf16.msra.mxu1 %v10727_v34  ;;  %v10775_v34 = vcombine.low %v677_v22, %v681_v23  ;;  %v729_v22 = vld [vmem:[#allocation5 + $0x1138] sm:$0xff]  ;;  %v980_v23 = vld [vmem:[#allocation5 + $0x1910] sm:$0xff] }
 0x3ca   :  { %7242 = vmatpush1.bf16.msra.mxu0 %v10981_v36  ;;  %7489 = vmatprep.subr.bf16.mxu1 %v10736_v37  ;;  %v11029_v36 = vcombine.low %v932_v24, %v936_v57  ;;  %v10784_v37 = vcombine.high %v685_v30, %v689_v32  ;;  %v984_v24 = vld [vmem:[#allocation5 + $0x1930] sm:$0xff]  ;;  %v10815_v57 = vcombine.low %v717_v8, %v721_v9 }
 0x3cb   :  { %7243 = vmatprep.subr.bf16.mxu0 %v10990_v39  ;;  %v11038_v39 = vcombine.high %v940_v35, %v944_v33 }
 0x3cd   :  { %7490 = vmatpush1.bf16.msra.mxu1 %v10735_v46  ;;  %v10783_v46 = vcombine.low %v685_v30, %v689_v32  ;;  %v988_v30 = vld [vmem:[#allocation5 + $0x1950] sm:$0xff] }
 0x3ce   :  { %7244 = vmatpush1.bf16.msra.mxu0 %v10989_v43  ;;  %7491 = vmatprep.subr.bf16.mxu1 %v10744_v47  ;;  %v11037_v43 = vcombine.low %v940_v35, %v944_v33  ;;  %v10792_v47 = vcombine.high %v693_v40, %v697_v41  ;;  %v992_v32 = vld [vmem:[#allocation5 + $0x1970] sm:$0xff]  ;;  %v11077_v33 = vcombine.low %v980_v23, %v984_v24 }
 0x3cf   :  { %7245 = vmatprep.subr.bf16.mxu0 %v10998_v49  ;;  %v11046_v49 = vcombine.high %v948_v42, %v952_v44 }
 0x3d1   :  { %7492 = vmatpush1.bf16.msra.mxu1 %v10743_v21  ;;  %v10791_v21 = vcombine.low %v693_v40, %v697_v41  ;;  %v996_v40 = vld [vmem:[#allocation5 + $0x1990] sm:$0xff] }
 0x3d2   :  { %7246 = vmatpush1.bf16.msra.mxu0 %v10997_v16  ;;  %7493 = vmatprep.subr.bf16.mxu1 %v10752_v6  ;;  %v11045_v16 = vcombine.low %v948_v42, %v952_v44  ;;  %v10800_v6 = vcombine.high %v701_v51, %v705_v2  ;;  %v1000_v41 = vld [vmem:[#allocation5 + $0x19b0] sm:$0xff]  ;;  %v11085_v44 = vcombine.low %v988_v30, %v992_v32 }
 0x3d3   :  { %7247 = vmatprep.subr.bf16.mxu0 %v11006_v55  ;;  %v11054_v55 = vcombine.high %v956_v52, %v960_v54 }
 0x3d5   :  { %7494 = vmatpush1.bf16.msra.mxu1 %v10751_v1  ;;  %v10799_v1 = vcombine.low %v701_v51, %v705_v2  ;;  %v1004_v51 = vld [vmem:[#allocation5 + $0x19d0] sm:$0xff] }
 0x3d6   :  { %7248 = vmatpush1.bf16.msra.mxu0 %v11005_v4  ;;  %7495 = vmatprep.subr.bf16.mxu1 %v10760_v27  ;;  %v11053_v4 = vcombine.low %v956_v52, %v960_v54  ;;  %v10808_v27 = vcombine.high %v709_v56, %v713_v60  ;;  %v1008_v2 = vld [vmem:[#allocation5 + $0x19f0] sm:$0xff]  ;;  %v11093_v54 = vcombine.low %v996_v40, %v1000_v41 }
 0x3d7   :  { %7249 = vmatprep.subr.bf16.mxu0 %v11014_v5  ;;  %v11062_v5 = vcombine.high %v964_v62, %v968_v0 }
 0x3d9   :  { %7496 = vmatpush1.bf16.msra.mxu1 %v10759_v15  ;;  %v11061_v15 = vcombine.low %v964_v62, %v968_v0  ;;  %v11101_v0 = vcombine.low %v1004_v51, %v1008_v2 }
 0x3da   :  { %7250 = vmatpush1.bf16.msra.mxu0 %v11013_v17  ;;  %7497 = vmatprep.subr.bf16.mxu1 %v10768_v18  ;;  %v10816_v17 = vcombine.high %v717_v8, %v721_v9  ;;  %v11070_v18 = vcombine.high %v972_v10, %v976_v11  ;;  %v1020_v8 = vld [vmem:[#allocation5 + $0x1a50] sm:$0xff] }
 0x3db   :  { %7251 = vmatprep.subr.bf16.mxu0 %v11022_v19  ;;  %v725_v19 = vld [vmem:[#allocation5 + $0x1118] sm:$0xff]  ;;  %v1024_v9 = vld [vmem:[#allocation5 + $0x1a70] sm:$0xff] }
 0x3dc   :  { %v10823_v35 = vcombine.low %v725_v19, %v729_v22 }
 0x3dd   :  { %7498 = vmatpush1.bf16.msra.mxu1 %v10767_v25  ;;  %v11069_v25 = vcombine.low %v972_v10, %v976_v11 }
 0x3de   :  { %7252 = vmatpush1.bf16.msra.mxu0 %v11021_v26  ;;  %7499 = vmatprep.subr.bf16.mxu1 %v10776_v28  ;;  %v10824_v26 = vcombine.high %v725_v19, %v729_v22  ;;  %v733_v28 = vld [vmem:[#allocation5 + $0x1158] sm:$0xff]  ;;  %v1028_v19 = vld [vmem:[#allocation5 + $0x1a90] sm:$0xff] }
 0x3df   :  { %7253 = vmatprep.subr.bf16.mxu0 %v11030_v29  ;;  %v737_v29 = vld [vmem:[#allocation5 + $0x1178] sm:$0xff]  ;;  %v1032_v22 = vld [vmem:[#allocation5 + $0x1ab0] sm:$0xff] }
 0x3e0   :  { %v10831_v42 = vcombine.low %v733_v28, %v737_v29 }
 0x3e1   :  { %7500 = vmatpush1.bf16.msra.mxu1 %v10775_v34  ;;  %v10832_v34 = vcombine.high %v733_v28, %v737_v29  ;;  %v1036_v28 = vld [vmem:[#allocation5 + $0x1ad0] sm:$0xff] }
 0x3e2   :  { %7254 = vmatpush1.bf16.msra.mxu0 %v11029_v36  ;;  %7501 = vmatprep.subr.bf16.mxu1 %v10784_v37  ;;  %v11086_v36 = vcombine.high %v988_v30, %v992_v32  ;;  %v741_v37 = vld [vmem:[#allocation5 + $0x1198] sm:$0xff]  ;;  %v1040_v29 = vld [vmem:[#allocation5 + $0x1af0] sm:$0xff]  ;;  %v11125_v32 = vcombine.low %v1028_v19, %v1032_v22 }
 0x3e3   :  { %7255 = vmatprep.subr.bf16.mxu0 %v11038_v39  ;;  %v745_v39 = vld [vmem:[#allocation5 + $0x11b8] sm:$0xff] }
 0x3e4   :  { %v10839_v52 = vcombine.low %v741_v37, %v745_v39 }
 0x3e5   :  { %7502 = vmatpush1.bf16.msra.mxu1 %v10783_v46  ;;  %v10840_v46 = vcombine.high %v741_v37, %v745_v39  ;;  %v1044_v37 = vld [vmem:[#allocation5 + $0x1b10] sm:$0xff] }
 0x3e6   :  { %7256 = vmatpush1.bf16.msra.mxu0 %v11037_v43  ;;  %7512 = vmatprep.subr.bf16.mxu1 %v10792_v47  ;;  %v11094_v43 = vcombine.high %v996_v40, %v1000_v41  ;;  %v749_v47 = vld [vmem:[#allocation5 + $0x11d8] sm:$0xff]  ;;  %v1048_v39 = vld [vmem:[#allocation5 + $0x1b30] sm:$0xff]  ;;  %v11133_v41 = vcombine.low %v1036_v28, %v1040_v29 }
 0x3e7   :  { %7266 = vmatprep.subr.bf16.mxu0 %v11046_v49  ;;  %v753_v49 = vld [vmem:[#allocation5 + $0x11f8] sm:$0xff] }
 0x3e8   :  { %7504 = vmatmul.mubr.bf16.vlgmr.msra.gmra.mrb[8].mxu1 %v12760_v53  ;;  %v10807_v53 = vcombine.low %v709_v56, %v713_v60  ;;  %v1012_v56 = vld [vmem:[#allocation5 + $0x1a10] sm:$0xff]  ;;  %v10847_v62 = vcombine.low %v749_v47, %v753_v49 }
 0x3e9   :  { %7258 = vmatmul.mubr.bf16.vlgmr.msra.gmra.mrb[4].mxu0 %v12780_v50  ;;  %7513 = vmatpush1.bf16.msra.mxu1 %v10791_v21  ;;  %v10848_v21 = vcombine.high %v749_v47, %v753_v49  ;;  %v1016_v60 = vld [vmem:[#allocation5 + $0x1a30] sm:$0xff] }
 0x3ea   :  { %7267 = vmatpush1.bf16.msra.mxu0 %v11045_v16  ;;  %7514 = vmatprep.subr.bf16.mxu1 %v10800_v6  ;;  %v11102_v16 = vcombine.high %v1004_v51, %v1008_v2  ;;  %v757_v6 = vld [vmem:[#allocation5 + $0x1218] sm:$0xff]  ;;  %v11109_v11 = vcombine.low %v1012_v56, %v1016_v60  ;;  %v1052_v47 = vld [vmem:[#allocation5 + $0x1b50] sm:$0xff]  ;;  %v11141_v2 = vcombine.low %v1044_v37, %v1048_v39 }
 0x3eb   :  { %7268 = vmatprep.subr.bf16.mxu0 %v11054_v55  ;;  %7298 = vmatprep.mubr.bf16.mxu0 %v12782_v58  ;;  %v761_v55 = vld [vmem:[#allocation5 + $0x1238] sm:$0xff]  ;;  %v1056_v49 = vld [vmem:[#allocation5 + $0x1b70] sm:$0xff] }
 0x3ec   :  { %7544 = vmatprep.mubr.bf16.mxu1 %v12762_v63  ;;  %v11078_v63 = vcombine.high %v980_v23, %v984_v24  ;;  %v10855_v10 = vcombine.low %v757_v6, %v761_v55  ;;  %v11117_v24 = vcombine.low %v1020_v8, %v1024_v9 }
 0x3ed   :  { %7515 = vmatpush1.bf16.msra.mxu1 %v10799_v1  ;;  %v10856_v1 = vcombine.high %v757_v6, %v761_v55  ;;  %v1060_v6 = vld [vmem:[#allocation5 + $0x1b90] sm:$0xff] }
 0x3ee   :  { %7269 = vmatpush1.bf16.msra.mxu0 %v11053_v4  ;;  %7516 = vmatprep.subr.bf16.mxu1 %v10808_v27  ;;  %v11110_v4 = vcombine.high %v1012_v56, %v1016_v60  ;;  %v765_v27 = vld [vmem:[#allocation5 + $0x1258] sm:$0xff]  ;;  %v1064_v55 = vld [vmem:[#allocation5 + $0x1bb0] sm:$0xff]  ;;  %v11149_v60 = vcombine.low %v1052_v47, %v1056_v49 }
 0x3ef   :  { %7270 = vmatprep.subr.bf16.mxu0 %v11062_v5  ;;  %v769_v5 = vld [vmem:[#allocation5 + $0x1278] sm:$0xff] }
 0x3f0   :  { %v10863_v23 = vcombine.low %v765_v27, %v769_v5 }
 0x3f1   :  { %7517 = vmatpush1.bf16.msra.mxu1 %v10807_v53  ;;  %v10864_v53 = vcombine.high %v765_v27, %v769_v5  ;;  %v1068_v27 = vld [vmem:[#allocation5 + $0x1bd0] sm:$0xff] }
 0x3f2   :  { %7271 = vmatpush1.bf16.msra.mxu0 %v11061_v15  ;;  %7518 = vmatprep.subr.bf16.mxu1 %v10816_v17  ;;  %v11118_v15 = vcombine.high %v1020_v8, %v1024_v9  ;;  %v773_v17 = vld [vmem:[#allocation5 + $0x1298] sm:$0xff]  ;;  %v1072_v5 = vld [vmem:[#allocation5 + $0x1bf0] sm:$0xff]  ;;  %v11157_v9 = vcombine.low %v1060_v6, %v1064_v55 }
 0x3f3   :  { %7272 = vmatprep.subr.bf16.mxu0 %v11070_v18  ;;  %v777_v18 = vld [vmem:[#allocation5 + $0x12b8] sm:$0xff] }
 0x3f4   :  { %v10871_v30 = vcombine.low %v773_v17, %v777_v18 }
 0x3f5   :  { %7519 = vmatpush1.bf16.msra.mxu1 %v10815_v57  ;;  %v10872_v57 = vcombine.high %v773_v17, %v777_v18  ;;  %v1076_v17 = vld [vmem:[#allocation5 + $0x1c10] sm:$0xff] }
 0x3f6   :  { %7273 = vmatpush1.bf16.msra.mxu0 %v11069_v25  ;;  %7520 = vmatprep.subr.bf16.mxu1 %v10824_v26  ;;  %v11126_v25 = vcombine.high %v1028_v19, %v1032_v22  ;;  %v781_v26 = vld [vmem:[#allocation5 + $0x12d8] sm:$0xff]  ;;  %v1080_v18 = vld [vmem:[#allocation5 + $0x1c30] sm:$0xff]  ;;  %v11165_v22 = vcombine.low %v1068_v27, %v1072_v5 }
 0x3f7   :  { %7274 = vmatprep.subr.bf16.mxu0 %v11078_v63  ;;  %v785_v63 = vld [vmem:[#allocation5 + $0x12f8] sm:$0xff] }
 0x3f8   :  { %v10879_v40 = vcombine.low %v781_v26, %v785_v63 }
 0x3f9   :  { %7521 = vmatpush1.bf16.msra.mxu1 %v10823_v35  ;;  %v10880_v35 = vcombine.high %v781_v26, %v785_v63  ;;  %v1084_v26 = vld [vmem:[#allocation5 + $0x1c50] sm:$0xff] }
 0x3fa   :  { %7275 = vmatpush1.bf16.msra.mxu0 %v11077_v33  ;;  %7522 = vmatprep.subr.bf16.mxu1 %v10832_v34  ;;  %v11134_v33 = vcombine.high %v1036_v28, %v1040_v29  ;;  %v789_v34 = vld [vmem:[#allocation5 + $0x1318] sm:$0xff]  ;;  %v1088_v63 = vld [vmem:[#allocation5 + $0x1c70] sm:$0xff]  ;;  %v11173_v29 = vcombine.low %v1076_v17, %v1080_v18 }
 0x3fb   :  { %7276 = vmatprep.subr.bf16.mxu0 %v11086_v36  ;;  %v793_v36 = vld [vmem:[#allocation5 + $0x1338] sm:$0xff] }
 0x3fc   :  { %v10887_v51 = vcombine.low %v789_v34, %v793_v36 }
 0x3fd   :  { %7523 = vmatpush1.bf16.msra.mxu1 %v10831_v42  ;;  %v10888_v42 = vcombine.high %v789_v34, %v793_v36  ;;  %v1092_v34 = vld [vmem:[#allocation5 + $0x1c90] sm:$0xff] }
 0x3fe   :  { %7277 = vmatpush1.bf16.msra.mxu0 %v11085_v44  ;;  %7524 = vmatprep.subr.bf16.mxu1 %v10840_v46  ;;  %v11142_v44 = vcombine.high %v1044_v37, %v1048_v39  ;;  %v797_v46 = vld [vmem:[#allocation5 + $0x1358] sm:$0xff]  ;;  %v1096_v36 = vld [vmem:[#allocation5 + $0x1cb0] sm:$0xff]  ;;  %v11181_v39 = vcombine.low %v1084_v26, %v1088_v63 }
 0x3ff   :  { %7278 = vmatprep.subr.bf16.mxu0 %v11094_v43  ;;  %v801_v43 = vld [vmem:[#allocation5 + $0x1378] sm:$0xff] }
 0x400   :  { %v10895_v56 = vcombine.low %v797_v46, %v801_v43 }
 0x401   :  { %7525 = vmatpush1.bf16.msra.mxu1 %v10839_v52  ;;  %v10896_v52 = vcombine.high %v797_v46, %v801_v43  ;;  %v1100_v46 = vld [vmem:[#allocation5 + $0x1cd0] sm:$0xff] }
 0x402   :  { %7279 = vmatpush1.bf16.msra.mxu0 %v11093_v54  ;;  %7526 = vmatprep.subr.bf16.mxu1 %v10848_v21  ;;  %v11150_v54 = vcombine.high %v1052_v47, %v1056_v49  ;;  %v805_v21 = vld [vmem:[#allocation5 + $0x1398] sm:$0xff]  ;;  %v1104_v43 = vld [vmem:[#allocation5 + $0x1cf0] sm:$0xff]  ;;  %v11189_v47 = vcombine.low %v1092_v34, %v1096_v36 }
 0x403   :  { %7280 = vmatprep.subr.bf16.mxu0 %v11102_v16  ;;  %v809_v16 = vld [vmem:[#allocation5 + $0x13b8] sm:$0xff] }
 0x404   :  { %v10903_v8 = vcombine.low %v805_v21, %v809_v16 }
 0x405   :  { %7527 = vmatpush1.bf16.msra.mxu1 %v10847_v62  ;;  %v10904_v62 = vcombine.high %v805_v21, %v809_v16  ;;  %v1112_v21 = vld [vmem:[#allocation5 + $0x1d30] sm:$0xff] }
 0x406   :  { %7281 = vmatpush1.bf16.msra.mxu0 %v11101_v0  ;;  %7528 = vmatprep.subr.bf16.mxu1 %v10856_v1  ;;  %v11158_v0 = vcombine.high %v1060_v6, %v1064_v55  ;;  %v813_v1 = vld [vmem:[#allocation5 + $0x13d8] sm:$0xff]  ;;  %v11197_v6 = vcombine.low %v1100_v46, %v1104_v43 }
 0x407   :  { %7282 = vmatprep.subr.bf16.mxu0 %v11110_v4  ;;  %v817_v4 = vld [vmem:[#allocation5 + $0x13f8] sm:$0xff] }
 0x408   :  { %v10911_v19 = vcombine.low %v813_v1, %v817_v4 }
 0x409   :  { %7529 = vmatpush1.bf16.msra.mxu1 %v10855_v10  ;;  %v10912_v10 = vcombine.high %v813_v1, %v817_v4 }
 0x40a   :  { %7283 = vmatpush1.bf16.msra.mxu0 %v11109_v11  ;;  %7530 = vmatprep.subr.bf16.mxu1 %v10864_v53  ;;  %v11166_v11 = vcombine.high %v1068_v27, %v1072_v5  ;;  %v821_v53 = vld [vmem:[#allocation5 + $0x1418] sm:$0xff] }
 0x40b   :  { %7284 = vmatprep.subr.bf16.mxu0 %v11118_v15  ;;  %v825_v15 = vld [vmem:[#allocation5 + $0x1438] sm:$0xff] }
 0x40c   :  { %v10919_v28 = vcombine.low %v821_v53, %v825_v15 }
 0x40d   :  { %7531 = vmatpush1.bf16.msra.mxu1 %v10863_v23  ;;  %v10920_v23 = vcombine.high %v821_v53, %v825_v15 }
 0x40e   :  { %7285 = vmatpush1.bf16.msra.mxu0 %v11117_v24  ;;  %7532 = vmatprep.subr.bf16.mxu1 %v10872_v57  ;;  %v11174_v24 = vcombine.high %v1076_v17, %v1080_v18  ;;  %v829_v57 = vld [vmem:[#allocation5 + $0x1458] sm:$0xff] }
 0x40f   :  { %7286 = vmatprep.subr.bf16.mxu0 %v11126_v25  ;;  %v833_v25 = vld [vmem:[#allocation5 + $0x1478] sm:$0xff] }
 0x410   :  { %v10927_v37 = vcombine.low %v829_v57, %v833_v25 }
 0x411   :  { %7533 = vmatpush1.bf16.msra.mxu1 %v10871_v30  ;;  %v10928_v30 = vcombine.high %v829_v57, %v833_v25 }
 0x412   :  { %7287 = vmatpush1.bf16.msra.mxu0 %v11125_v32  ;;  %7534 = vmatprep.subr.bf16.mxu1 %v10880_v35  ;;  %v11182_v32 = vcombine.high %v1084_v26, %v1088_v63  ;;  %v837_v35 = vld [vmem:[#allocation5 + $0x1498] sm:$0xff] }
 0x413   :  { %7288 = vmatprep.subr.bf16.mxu0 %v11134_v33  ;;  %v841_v33 = vld [vmem:[#allocation5 + $0x14b8] sm:$0xff] }
 0x415   :  { %7535 = vmatpush1.bf16.msra.mxu1 %v10879_v40  ;;  %v10936_v40 = vcombine.high %v837_v35, %v841_v33 }
 0x416   :  { %7289 = vmatpush1.bf16.msra.mxu0 %v11133_v41  ;;  %7536 = vmatprep.subr.bf16.mxu1 %v10888_v42  ;;  %v11190_v41 = vcombine.high %v1092_v34, %v1096_v36  ;;  %v845_v42 = vld [vmem:[#allocation5 + $0x14d8] sm:$0xff] }
 0x417   :  { %7290 = vmatprep.subr.bf16.mxu0 %v11142_v44  ;;  %v849_v44 = vld [vmem:[#allocation5 + $0x14f8] sm:$0xff] }
 0x418   :  { %v10944_v49 = vcombine.high %v845_v42, %v849_v44  ;;  %v10943_v16 = vcombine.low %v845_v42, %v849_v44 }
 0x419   :  { %7537 = vmatpush1.bf16.msra.mxu1 %v10887_v51  ;;  %v11198_v51 = vcombine.high %v1100_v46, %v1104_v43 }
 0x41a   :  { %7291 = vmatpush1.bf16.msra.mxu0 %v11141_v2  ;;  %7538 = vmatprep.subr.bf16.mxu1 %v10896_v52  ;;  %v853_v2 = vld [vmem:[#allocation5 + $0x1518] sm:$0xff] }
 0x41b   :  { %7292 = vmatprep.subr.bf16.mxu0 %v11150_v54  ;;  %v857_v52 = vld [vmem:[#allocation5 + $0x1538] sm:$0xff]  ;;  %v1108_v54 = vld [vmem:[#allocation5 + $0x1d10] sm:$0xff] }
 0x41c   :  { %v10952_v55 = vcombine.high %v853_v2, %v857_v52  ;;  %v10951_v1 = vcombine.low %v853_v2, %v857_v52  ;;  %v11205_v4 = vcombine.low %v1108_v54, %v1112_v21 }
 0x41d   :  { %7539 = vmatpush1.bf16.msra.mxu1 %v10895_v56  ;;  %v861_v56 = vld [vmem:[#allocation5 + $0x1558] sm:$0xff] }
 0x41e   :  { %7293 = vmatpush1.bf16.msra.mxu0 %v11149_v60  ;;  %7540 = vmatprep.subr.bf16.mxu1 %v10904_v62  ;;  %v865_v60 = vld [vmem:[#allocation5 + $0x1578] sm:$0xff]  ;;  %v1116_v62 = vld [vmem:[#allocation5 + $0x1d50] sm:$0xff] }
 0x41f   :  { %7294 = vmatprep.subr.bf16.mxu0 %v11158_v0  ;;  %v1120_v0 = vld [vmem:[#allocation5 + $0x1d70] sm:$0xff]  ;;  %v10960_v27 = vcombine.high %v861_v56, %v865_v60  ;;  %v10959_v53 = vcombine.low %v861_v56, %v865_v60 }
 0x420   :  { %v11214_v5 = vcombine.high %v1116_v62, %v1120_v0  ;;  %v11213_v15 = vcombine.low %v1116_v62, %v1120_v0 }
 0x421   :  { %7541 = vmatpush1.bf16.msra.mxu1 %v10903_v8  ;;  %v869_v8 = vld [vmem:[#allocation5 + $0x1598] sm:$0xff] }
 0x422   :  { %7295 = vmatpush1.bf16.msra.mxu0 %v11157_v9  ;;  %7542 = vmatprep.subr.bf16.mxu1 %v10912_v10  ;;  %v873_v9 = vld [vmem:[#allocation5 + $0x15b8] sm:$0xff]  ;;  %v1124_v10 = vld [vmem:[#allocation5 + $0x1d90] sm:$0xff] }
 0x423   :  { %7296 = vmatprep.subr.bf16.mxu0 %v11166_v11  ;;  %v1128_v11 = vld [vmem:[#allocation5 + $0x1db0] sm:$0xff]  ;;  %v10968_v17 = vcombine.high %v869_v8, %v873_v9  ;;  %v10967_v57 = vcombine.low %v869_v8, %v873_v9 }
 0x424   :  { %v11222_v18 = vcombine.high %v1124_v10, %v1128_v11  ;;  %v11221_v25 = vcombine.low %v1124_v10, %v1128_v11 }
 0x425   :  { %7543 = vmatpush1.bf16.msra.mxu1 %v10911_v19  ;;  %v877_v19 = vld [vmem:[#allocation5 + $0x15d8] sm:$0xff] }
 0x426   :  { %7297 = vmatpush1.bf16.msra.mxu0 %v11165_v22  ;;  %7553 = vmatprep.subr.bf16.mxu1 %v10920_v23  ;;  %v881_v22 = vld [vmem:[#allocation5 + $0x15f8] sm:$0xff]  ;;  %v1132_v23 = vld [vmem:[#allocation5 + $0x1dd0] sm:$0xff] }
 0x427   :  { %7307 = vmatprep.subr.bf16.mxu0 %v11174_v24  ;;  %v1136_v24 = vld [vmem:[#allocation5 + $0x1df0] sm:$0xff]  ;;  %v10976_v26 = vcombine.high %v877_v19, %v881_v22 }
 0x428   :  { %7545 = vmatmul.mubr.bf16.vlgmr.msra.gmra.mrb[8].mxu1 %v12768_v13  ;;  %v10935_v13 = vcombine.low %v837_v35, %v841_v33  ;;  %v11230_v63 = vcombine.high %v1132_v23, %v1136_v24  ;;  %v10975_v35 = vcombine.low %v877_v19, %v881_v22  ;;  %v11229_v33 = vcombine.low %v1132_v23, %v1136_v24 }
 0x429   :  { %7299 = vmatmul.mubr.bf16.vlgmr.msra.gmra.mrb[4].mxu0 %v12788_v31  ;;  %7554 = vmatpush1.bf16.msra.mxu1 %v10919_v28  ;;  %v885_v28 = vld [vmem:[#allocation5 + $0x1618] sm:$0xff] }
 0x42a   :  { %7308 = vmatpush1.bf16.msra.mxu0 %v11173_v29  ;;  %7555 = vmatprep.subr.bf16.mxu1 %v10928_v30  ;;  %v889_v29 = vld [vmem:[#allocation5 + $0x1638] sm:$0xff]  ;;  %v1140_v30 = vld [vmem:[#allocation5 + $0x1e10] sm:$0xff] }
 0x42b   :  { %7309 = vmatprep.subr.bf16.mxu0 %v11182_v32  ;;  %7339 = vmatprep.mubr.bf16.mxu0 %v12790_v38  ;;  %v1144_v32 = vld [vmem:[#allocation5 + $0x1e30] sm:$0xff]  ;;  %v10984_v34 = vcombine.high %v885_v28, %v889_v29  ;;  %v10983_v42 = vcombine.low %v885_v28, %v889_v29 }
 0x42c   :  { %7585 = vmatprep.mubr.bf16.mxu1 %v12770_v20  ;;  %v11206_v20 = vcombine.high %v1108_v54, %v1112_v21  ;;  %v11238_v36 = vcombine.high %v1140_v30, %v1144_v32  ;;  %v11237_v44 = vcombine.low %v1140_v30, %v1144_v32 }
 0x42d   :  { %7556 = vmatpush1.bf16.msra.mxu1 %v10927_v37  ;;  %v893_v37 = vld [vmem:[#allocation5 + $0x1658] sm:$0xff] }
 0x42e   :  { %7310 = vmatpush1.bf16.msra.mxu0 %v11181_v39  ;;  %7557 = vmatprep.subr.bf16.mxu1 %v10936_v40  ;;  %v897_v39 = vld [vmem:[#allocation5 + $0x1678] sm:$0xff]  ;;  %v1148_v40 = vld [vmem:[#allocation5 + $0x1e50] sm:$0xff] }
 0x42f   :  { %7311 = vmatprep.subr.bf16.mxu0 %v11190_v41  ;;  %v1152_v41 = vld [vmem:[#allocation5 + $0x1e70] sm:$0xff]  ;;  %v10992_v46 = vcombine.high %v893_v37, %v897_v39  ;;  %v10991_v2 = vcombine.low %v893_v37, %v897_v39 }
 0x430   :  { %v11246_v43 = vcombine.high %v1148_v40, %v1152_v41  ;;  %v11245_v52 = vcombine.low %v1148_v40, %v1152_v41 }
 0x431   :  { %7558 = vmatpush1.bf16.msra.mxu1 %v10935_v13  ;;  %v901_v13 = vld [vmem:[#allocation5 + $0x1698] sm:$0xff] }
 0x432   :  { %7312 = vmatpush1.bf16.msra.mxu0 %v11189_v47  ;;  %7559 = vmatprep.subr.bf16.mxu1 %v10944_v49  ;;  %v905_v47 = vld [vmem:[#allocation5 + $0x16b8] sm:$0xff]  ;;  %v1156_v49 = vld [vmem:[#allocation5 + $0x1e90] sm:$0xff] }
 0x433   :  { %7313 = vmatprep.subr.bf16.mxu0 %v11198_v51  ;;  %v1160_v51 = vld [vmem:[#allocation5 + $0x1eb0] sm:$0xff]  ;;  %v11000_v54 = vcombine.high %v901_v13, %v905_v47  ;;  %v10999_v56 = vcombine.low %v901_v13, %v905_v47  ;;  %v11828_v47 = vld [vmem:[#allocation8 + $0x4] ss:$16 sps:$4 sm:$0xff]  }
 0x434   :  { %v11254_v21 = vcombine.high %v1156_v49, %v1160_v51  ;;  %v11253_v60 = vcombine.low %v1156_v49, %v1160_v51  ;;  %v7677_v49 = vmax.f32 %v12828_v48, 0.0  ;;  %v957_v51 = vld [vmem:[#allocation5 + $0x1858] sm:$0xff] }
 0x435   :  { %7560 = vmatpush1.bf16.msra.mxu1 %v10943_v16  ;;  %v909_v16 = vld [vmem:[#allocation5 + $0x16d8] sm:$0xff] }
 0x436   :  { %7314 = vmatpush1.bf16.msra.mxu0 %v11197_v6  ;;  %7561 = vmatprep.subr.bf16.mxu1 %v10952_v55  ;;  %v913_v6 = vld [vmem:[#allocation5 + $0x16f8] sm:$0xff]  ;;  %v1164_v55 = vld [vmem:[#allocation5 + $0x1ed0] sm:$0xff] }
 0x437   :  { %7315 = vmatprep.subr.bf16.mxu0 %v11206_v20  ;;  %v1168_v20 = vld [vmem:[#allocation5 + $0x1ef0] sm:$0xff]  ;;  %v11008_v62 = vcombine.high %v909_v16, %v913_v6  ;;  %v11007_v8 = vcombine.low %v909_v16, %v913_v6  ;;  %v11831_v16 = vld [vmem:[#allocation8 + $0x24] ss:$16 sps:$4 sm:$0xff]  }
 0x438   :  { %v11262_v0 = vcombine.high %v1164_v55, %v1168_v20  ;;  %v11261_v9 = vcombine.low %v1164_v55, %v1168_v20  ;;  %v965_v6 = vld [vmem:[#allocation5 + $0x1898] sm:$0xff]  ;;  %v12851_v20 = vpack.c.bf16 %v7677_v49, %v7677_v49 }
 0x439   :  { %7562 = vmatpush1.bf16.msra.mxu1 %v10951_v1  ;;  %v917_v1 = vld [vmem:[#allocation5 + $0x1718] sm:$0xff] }
 0x43a   :  { %7316 = vmatpush1.bf16.msra.mxu0 %v11205_v4  ;;  %7563 = vmatprep.subr.bf16.mxu1 %v10960_v27  ;;  %v921_v4 = vld [vmem:[#allocation5 + $0x1738] sm:$0xff]  ;;  %v1172_v27 = vld [vmem:[#allocation5 + $0x1f10] sm:$0xff] }
 0x43b   :  { %7317 = vmatprep.subr.bf16.mxu0 %v11214_v5  ;;  %v1176_v5 = vld [vmem:[#allocation5 + $0x1f30] sm:$0xff]  ;;  %v11016_v10 = vcombine.high %v917_v1, %v921_v4  ;;  %v11015_v19 = vcombine.low %v917_v1, %v921_v4  ;;  %v969_v55 = vld [vmem:[#allocation5 + $0x18b8] sm:$0xff] }
 0x43c   :  { %v11270_v11 = vcombine.high %v1172_v27, %v1176_v5  ;;  %v11269_v22 = vcombine.low %v1172_v27, %v1176_v5  ;;  %v977_v1 = vld [vmem:[#allocation5 + $0x18f8] sm:$0xff]  ;;  %v11063_v4 = vcombine.low %v965_v6, %v969_v55 }
 0x43d   :  { %7564 = vmatpush1.bf16.msra.mxu1 %v10959_v53  ;;  %v925_v53 = vld [vmem:[#allocation5 + $0x1758] sm:$0xff] }
 0x43e   :  { %7318 = vmatpush1.bf16.msra.mxu0 %v11213_v15  ;;  %7565 = vmatprep.subr.bf16.mxu1 %v10968_v17  ;;  %v929_v15 = vld [vmem:[#allocation5 + $0x1778] sm:$0xff]  ;;  %v1180_v17 = vld [vmem:[#allocation5 + $0x1f50] sm:$0xff] }
 0x43f   :  { %7319 = vmatprep.subr.bf16.mxu0 %v11222_v18  ;;  %v1184_v18 = vld [vmem:[#allocation5 + $0x1f70] sm:$0xff]  ;;  %v11024_v23 = vcombine.high %v925_v53, %v929_v15  ;;  %v11023_v28 = vcombine.low %v925_v53, %v929_v15  ;;  %v11837_v5 = vld [vmem:[#allocation8 + $0x64] ss:$16 sps:$4 sm:$0xff]  }
 0x440   :  { %v11278_v24 = vcombine.high %v1180_v17, %v1184_v18  ;;  %v11277_v29 = vcombine.low %v1180_v17, %v1184_v18  ;;  %v11840_v15 = vld [vmem:[#allocation8 + $0x84] ss:$16 sps:$4 sm:$0xff]  }
 0x441   :  { %7566 = vmatpush1.bf16.msra.mxu1 %v10967_v57  ;;  %v933_v57 = vld [vmem:[#allocation5 + $0x1798] sm:$0xff] }
 0x442   :  { %7320 = vmatpush1.bf16.msra.mxu0 %v11221_v25  ;;  %7567 = vmatprep.subr.bf16.mxu1 %v10976_v26  ;;  %v937_v25 = vld [vmem:[#allocation5 + $0x17b8] sm:$0xff]  ;;  %v1188_v26 = vld [vmem:[#allocation5 + $0x1f90] sm:$0xff] }
 0x443   :  { %7321 = vmatprep.subr.bf16.mxu0 %v11230_v63  ;;  %v1192_v63 = vld [vmem:[#allocation5 + $0x1fb0] sm:$0xff]  ;;  %v11032_v30 = vcombine.high %v933_v57, %v937_v25  ;;  %v11031_v37 = vcombine.low %v933_v57, %v937_v25  ;;  %v989_v17 = vld [vmem:[#allocation5 + $0x1958] sm:$0xff] }
 0x444   :  { %v11286_v32 = vcombine.high %v1188_v26, %v1192_v63  ;;  %v11285_v39 = vcombine.low %v1188_v26, %v1192_v63  ;;  %v1001_v57 = vld [vmem:[#allocation5 + $0x19b8] sm:$0xff] }
 0x445   :  { %7568 = vmatpush1.bf16.msra.mxu1 %v10975_v35  ;;  %v941_v35 = vld [vmem:[#allocation5 + $0x17d8] sm:$0xff] }
 0x446   :  { %7322 = vmatpush1.bf16.msra.mxu0 %v11229_v33  ;;  %7569 = vmatprep.subr.bf16.mxu1 %v10984_v34  ;;  %v945_v33 = vld [vmem:[#allocation5 + $0x17f8] sm:$0xff]  ;;  %v1196_v34 = vld [vmem:[#allocation5 + $0x1fd0] sm:$0xff] }
 0x447   :  { %7323 = vmatprep.subr.bf16.mxu0 %v11238_v36  ;;  %v1200_v36 = vld [vmem:[#allocation5 + $0x1ff0] sm:$0xff]  ;;  %v11040_v40 = vcombine.high %v941_v35, %v945_v33  ;;  %v11841_v26 = vld [vmem:[#allocation8 + $0xa0] ss:$16 sps:$4 sm:$0xff]   ;;  %v11855_v49 = vld [vmem:[#allocation8 + $0x124] ss:$16 sps:$4 sm:$0xff]  }
 0x448   :  { %v11294_v41 = vcombine.high %v1196_v34, %v1200_v36 }
 0x449   :  { %7570 = vmatpush1.bf16.msra.mxu1 %v10983_v42  ;;  %v949_v42 = vld [vmem:[#allocation5 + $0x1818] sm:$0xff] }
 0x44a   :  { %7324 = vmatpush1.bf16.msra.mxu0 %v11237_v44  ;;  %7571 = vmatprep.subr.bf16.mxu1 %v10992_v46  ;;  %v953_v44 = vld [vmem:[#allocation5 + $0x1838] sm:$0xff]  ;;  %v11039_v46 = vcombine.low %v941_v35, %v945_v33 }
 0x44b   :  { %7325 = vmatprep.subr.bf16.mxu0 %v11246_v43  ;;  %v11293_v43 = vcombine.low %v1196_v34, %v1200_v36  ;;  %v11048_v13 = vcombine.high %v949_v42, %v953_v44  ;;  %v11844_v35 = vld [vmem:[#allocation8 + $0xc0] ss:$16 sps:$4 sm:$0xff]   ;;  %v11849_v34 = vld [vmem:[#allocation8 + $0xe4] ss:$16 sps:$4 sm:$0xff]  }
 0x44c   :  { %v1013_v36 = vld [vmem:[#allocation5 + $0x1a18] sm:$0xff] }
 0x44d   :  { %7572 = vmatpush1.bf16.msra.mxu1 %v10991_v2  ;;  %v961_v2 = vld [vmem:[#allocation5 + $0x1878] sm:$0xff] }
 0x44e   :  { %7326 = vmatpush1.bf16.msra.mxu0 %v11245_v52  ;;  %7573 = vmatprep.subr.bf16.mxu1 %v11000_v54  ;;  %v11047_v52 = vcombine.low %v949_v42, %v953_v44  ;;  %v11826_v54 = vld [vmem:[#allocation8] ss:$16 sps:$4 sm:$0xff]   ;;  %v11055_v48 = vcombine.low %v957_v51, %v961_v2  ;;  %v11852_v42 = vld [vmem:[#allocation8 + $0x104] ss:$16 sps:$4 sm:$0xff]  }
 0x44f   :  { %7327 = vmatprep.subr.bf16.mxu0 %v11254_v21  ;;  %v11056_v21 = vcombine.high %v957_v51, %v961_v2  ;;  %v1021_v44 = vld [vmem:[#allocation5 + $0x1a58] sm:$0xff] }
 0x450   :  { %v1029_v51 = vld [vmem:[#allocation5 + $0x1a98] sm:$0xff] }
 0x451   :  { %7574 = vmatpush1.bf16.msra.mxu1 %v10999_v56  ;;  %v11829_v56 = vld [vmem:[#allocation8 + $0x20] ss:$16 sps:$4 sm:$0xff]  }
 0x452   :  { %7328 = vmatpush1.bf16.msra.mxu0 %v11253_v60  ;;  %7575 = vmatprep.subr.bf16.mxu1 %v11008_v62  ;;  %v11064_v60 = vcombine.high %v965_v6, %v969_v55  ;;  %v11834_v62 = vld [vmem:[#allocation8 + $0x44] ss:$16 sps:$4 sm:$0xff]  }
 0x453   :  { %7329 = vmatprep.subr.bf16.mxu0 %v11262_v0  ;;  %v973_v0 = vld [vmem:[#allocation5 + $0x18d8] sm:$0xff] }
 0x454   :  { %v11072_v27 = vcombine.high %v973_v0, %v977_v1  ;;  %v1033_v2 = vld [vmem:[#allocation5 + $0x1ab8] sm:$0xff] }
 0x455   :  { %7576 = vmatpush1.bf16.msra.mxu1 %v11007_v8  ;;  %v981_v8 = vld [vmem:[#allocation5 + $0x1918] sm:$0xff] }
 0x456   :  { %7330 = vmatpush1.bf16.msra.mxu0 %v11261_v9  ;;  %7577 = vmatprep.subr.bf16.mxu1 %v11016_v10  ;;  %v985_v9 = vld [vmem:[#allocation5 + $0x1938] sm:$0xff]  ;;  %v11071_v10 = vcombine.low %v973_v0, %v977_v1 }
 0x457   :  { %7331 = vmatprep.subr.bf16.mxu0 %v11270_v11  ;;  %v11835_v11 = vld [vmem:[#allocation8 + $0x60] ss:$16 sps:$4 sm:$0xff]   ;;  %v11080_v53 = vcombine.high %v981_v8, %v985_v9  ;;  %v11079_v18 = vcombine.low %v981_v8, %v985_v9 }
 0x458   :  { %v1037_v6 = vld [vmem:[#allocation5 + $0x1ad8] sm:$0xff] }
 0x459   :  { %7578 = vmatpush1.bf16.msra.mxu1 %v11015_v19  ;;  %v11838_v19 = vld [vmem:[#allocation8 + $0x80] ss:$16 sps:$4 sm:$0xff]  }
 0x45a   :  { %7332 = vmatpush1.bf16.msra.mxu0 %v11269_v22  ;;  %7579 = vmatprep.subr.bf16.mxu1 %v11024_v23  ;;  %v11843_v23 = vld [vmem:[#allocation8 + $0xa4] ss:$16 sps:$4 sm:$0xff]  }
 0x45b   :  { %7333 = vmatprep.subr.bf16.mxu0 %v11278_v24  ;;  %v997_v24 = vld [vmem:[#allocation5 + $0x1998] sm:$0xff] }
 0x45c   :  { %v11096_v63 = vcombine.high %v997_v24, %v1001_v57  ;;  %v1041_v55 = vld [vmem:[#allocation5 + $0x1af8] sm:$0xff] }
 0x45d   :  { %7580 = vmatpush1.bf16.msra.mxu1 %v11023_v28  ;;  %v11846_v28 = vld [vmem:[#allocation8 + $0xc4] ss:$16 sps:$4 sm:$0xff]  }
 0x45e   :  { %7334 = vmatpush1.bf16.msra.mxu0 %v11277_v29  ;;  %7581 = vmatprep.subr.bf16.mxu1 %v11032_v30  ;;  %v1005_v29 = vld [vmem:[#allocation5 + $0x19d8] sm:$0xff] }
 0x45f   :  { %7335 = vmatprep.subr.bf16.mxu0 %v11286_v32  ;;  %v1009_v30 = vld [vmem:[#allocation5 + $0x19f8] sm:$0xff]  ;;  %v11095_v32 = vcombine.low %v997_v24, %v1001_v57 }
 0x460   :  { %v11104_v33 = vcombine.high %v1005_v29, %v1009_v30  ;;  %v1045_v0 = vld [vmem:[#allocation5 + $0x1b18] sm:$0xff] }
 0x461   :  { %7582 = vmatpush1.bf16.msra.mxu1 %v11031_v37  ;;  %v1017_v37 = vld [vmem:[#allocation5 + $0x1a38] sm:$0xff] }
 0x462   :  { %7336 = vmatpush1.bf16.msra.mxu0 %v11285_v39  ;;  %7583 = vmatprep.subr.bf16.mxu1 %v11040_v40  ;;  %v11103_v39 = vcombine.low %v1005_v29, %v1009_v30  ;;  %v11847_v40 = vld [vmem:[#allocation8 + $0xe0] ss:$16 sps:$4 sm:$0xff]   ;;  %v11870_v24 = vld [vmem:[#allocation8 + $0x1c4] ss:$16 sps:$4 sm:$0xff]  }
 0x463   :  { %7337 = vmatprep.subr.bf16.mxu0 %v11294_v41  ;;  %v11112_v41 = vcombine.high %v1013_v36, %v1017_v37  ;;  %v1049_v1 = vld [vmem:[#allocation5 + $0x1b38] sm:$0xff] }
 0x464   :  { %v1053_v8 = vld [vmem:[#allocation5 + $0x1b58] sm:$0xff] }
 0x465   :  { %7584 = vmatpush1.bf16.msra.mxu1 %v11039_v46  ;;  %v1025_v46 = vld [vmem:[#allocation5 + $0x1a78] sm:$0xff] }
 0x466   :  { %7338 = vmatpush1.bf16.msra.mxu0 %v11293_v43  ;;  %7594 = vmatprep.subr.bf16.mxu1 %v11048_v13  ;;  %v11111_v43 = vcombine.low %v1013_v36, %v1017_v37  ;;  %v11850_v13 = vld [vmem:[#allocation8 + $0x100] ss:$16 sps:$4 sm:$0xff]  }
 0x467   :  { %9250 = vmatprep.subr.bf16.mxu0 %v11828_v47  ;;  %v11120_v47 = vcombine.high %v1021_v44, %v1025_v46  ;;  %v1057_v9 = vld [vmem:[#allocation5 + $0x1b78] sm:$0xff] }
 0x468   :  { %7586 = vmatmul.mubr.bf16.vlgmr.msra.gmra.mrb[8].mxu1 %v12780_v50  ;;  %v11832_v50 = vld [vmem:[#allocation8 + $0x40] ss:$16 sps:$4 sm:$0xff]  }
 0x469   :  { %7340 = vmatmul.mubr.bf16.vlgmr.msra.gmra.mrb[4].mxu0 %v12796_v14  ;;  %7595 = vmatpush1.bf16.msra.mxu1 %v11047_v52  ;;  %v11119_v52 = vcombine.low %v1021_v44, %v1025_v46  ;;  %v1069_v57 = vld [vmem:[#allocation5 + $0x1bd8] sm:$0xff] }
 0x46a   :  { %9251 = vmatpush1.bf16.msra.mxu0 %v11826_v54  ;;  %9282 = vmatprep.mubr.bf16.mxu0 %v12851_v20  ;;  %v11853_v54 = vld [vmem:[#allocation8 + $0x120] ss:$16 sps:$4 sm:$0xff]  }
 0x46b   :  { %7596 = vmatprep.subr.bf16.mxu1 %v11056_v21  ;;  %9252 = vmatprep.subr.bf16.mxu0 %v11831_v16  ;;  %v11128_v21 = vcombine.high %v1029_v51, %v1033_v2  ;;  %v11858_v16 = vld [vmem:[#allocation8 + $0x144] ss:$16 sps:$4 sm:$0xff]   ;;  %v11868_v29 = vld [vmem:[#allocation8 + $0x1c0] ss:$16 sps:$4 sm:$0xff]  }
 0x46c   :  { %7626 = vmatprep.mubr.bf16.mxu1 %v12782_v58  ;;  %v993_v58 = vld [vmem:[#allocation5 + $0x1978] sm:$0xff] }
 0x46d   :  { %7597 = vmatpush1.bf16.msra.mxu1 %v11055_v48  ;;  %v11088_v22 = vcombine.high %v989_v17, %v993_v58  ;;  %v11087_v25 = vcombine.low %v989_v17, %v993_v58  ;;  %v11127_v48 = vcombine.low %v1029_v51, %v1033_v2  ;;  %v1061_v17 = vld [vmem:[#allocation5 + $0x1b98] sm:$0xff] }
 0x46e   :  { %9253 = vmatpush1.bf16.msra.mxu0 %v11829_v56  ;;  %7598 = vmatprep.subr.bf16.mxu1 %v11064_v60  ;;  %v11856_v56 = vld [vmem:[#allocation8 + $0x140] ss:$16 sps:$4 sm:$0xff]   ;;  %v11136_v60 = vcombine.high %v1037_v6, %v1041_v55 }
 0x46f   :  { %9254 = vmatprep.subr.bf16.mxu0 %v11834_v62  ;;  %v11861_v62 = vld [vmem:[#allocation8 + $0x164] ss:$16 sps:$4 sm:$0xff]   ;;  %v11871_v37 = vld [vmem:[#allocation8 + $0x1e0] ss:$16 sps:$4 sm:$0xff]  }
 0x470   :  { %v1065_v58 = vld [vmem:[#allocation5 + $0x1bb8] sm:$0xff] }
 0x471   :  { %7599 = vmatpush1.bf16.msra.mxu1 %v11063_v4  ;;  %v11135_v4 = vcombine.low %v1037_v6, %v1041_v55  ;;  %v1085_v44 = vld [vmem:[#allocation5 + $0x1c58] sm:$0xff] }
 0x472   :  { %9255 = vmatpush1.bf16.msra.mxu0 %v11832_v50  ;;  %7600 = vmatprep.subr.bf16.mxu1 %v11072_v27  ;;  %v11859_v50 = vld [vmem:[#allocation8 + $0x160] ss:$16 sps:$4 sm:$0xff]   ;;  %v11144_v27 = vcombine.high %v1045_v0, %v1049_v1 }
 0x473   :  { %9256 = vmatprep.subr.bf16.mxu0 %v11837_v5  ;;  %v11864_v5 = vld [vmem:[#allocation8 + $0x184] ss:$16 sps:$4 sm:$0xff]  }
 0x474   :  { %v1089_v46 = vld [vmem:[#allocation5 + $0x1c78] sm:$0xff] }
 0x475   :  { %7601 = vmatpush1.bf16.msra.mxu1 %v11071_v10  ;;  %v11143_v10 = vcombine.low %v1045_v0, %v1049_v1  ;;  %v1093_v51 = vld [vmem:[#allocation5 + $0x1c98] sm:$0xff] }
 0x476   :  { %9257 = vmatpush1.bf16.msra.mxu0 %v11835_v11  ;;  %7602 = vmatprep.subr.bf16.mxu1 %v11080_v53  ;;  %v11862_v11 = vld [vmem:[#allocation8 + $0x180] ss:$16 sps:$4 sm:$0xff]   ;;  %v11152_v53 = vcombine.high %v1053_v8, %v1057_v9 }
 0x477   :  { %9258 = vmatprep.subr.bf16.mxu0 %v11840_v15  ;;  %v11867_v15 = vld [vmem:[#allocation8 + $0x1a4] ss:$16 sps:$4 sm:$0xff]  }
 0x478   :  { %v1097_v2 = vld [vmem:[#allocation5 + $0x1cb8] sm:$0xff] }
 0x479   :  { %7603 = vmatpush1.bf16.msra.mxu1 %v11079_v18  ;;  %v1218_v18 = vsub.s32 3, %v12814_v59  ;;  %v1101_v6 = vld [vmem:[#allocation5 + $0x1cd8] sm:$0xff] }
 0x47a   :  { %9259 = vmatpush1.bf16.msra.mxu0 %v11838_v19  ;;  %7604 = vmatprep.subr.bf16.mxu1 %v11088_v22  ;;  %v11151_v19 = vcombine.low %v1053_v8, %v1057_v9  ;;  %v11865_v22 = vld [vmem:[#allocation8 + $0x1a0] ss:$16 sps:$4 sm:$0xff]  }
 0x47b   :  { %9260 = vmatprep.subr.bf16.mxu0 %v11843_v23  ;;  %v11160_v23 = vcombine.high %v1061_v17, %v1065_v58  ;;  %v1105_v55 = vld [vmem:[#allocation5 + $0x1cf8] sm:$0xff] }
 0x47c   :  { %v1113_v0 = vld [vmem:[#allocation5 + $0x1d38] sm:$0xff]  ;;  %v11199_v1 = vcombine.low %v1101_v6, %v1105_v55 }
 0x47d   :  { %7605 = vmatpush1.bf16.msra.mxu1 %v11087_v25  ;;  %v1073_v25 = vld [vmem:[#allocation5 + $0x1bf8] sm:$0xff] }
 0x47e   :  { %9261 = vmatpush1.bf16.msra.mxu0 %v11841_v26  ;;  %7606 = vmatprep.subr.bf16.mxu1 %v11096_v63  ;;  %v12858_v26 = vld [vmem:[#allocation7] sm:$0xff]  ;;  %v11168_v30 = vcombine.high %v1069_v57, %v1073_v25  ;;  %v11167_v36 = vcombine.low %v1069_v57, %v1073_v25  ;;  %v11886_v9 = vld [vmem:[#allocation8 + $0x280] ss:$16 sps:$4 sm:$0xff]  }
 0x47f   :  { %9262 = vmatprep.subr.bf16.mxu0 %v11846_v28  ;;  %v1219_v63 = vrot.slane %v12858_v26, %v1218_v18  ;;  %v11159_v28 = vcombine.low %v1061_v17, %v1065_v58  ;;  %v11889_v58 = vld [vmem:[#allocation8 + $0x2a0] ss:$16 sps:$4 sm:$0xff]  }
 0x480   :  { %v11892_v25 = vld [vmem:[#allocation8 + $0x2c0] ss:$16 sps:$4 sm:$0xff]  }
 0x481   :  { %7607 = vmatpush1.bf16.msra.mxu1 %v11095_v32  ;;  %v11873_v32 = vld [vmem:[#allocation8 + $0x1e4] ss:$16 sps:$4 sm:$0xff]  }
 0x482   :  { %9263 = vmatpush1.bf16.msra.mxu0 %v11844_v35  ;;  %7608 = vmatprep.subr.bf16.mxu1 %v11104_v33  ;;  %v1077_v35 = vld [vmem:[#allocation5 + $0x1c18] sm:$0xff] }
 0x483   :  { %9264 = vmatprep.subr.bf16.mxu0 %v11849_v34  ;;  %v1081_v33 = vld [vmem:[#allocation5 + $0x1c38] sm:$0xff]  ;;  %v11661_v34 = vadd.f32 %v12840_v61, %v1219_v63  ;;  %v11184_v61 = vcombine.high %v1085_v44, %v1089_v46 }
 0x485   :  { %7609 = vmatpush1.bf16.msra.mxu1 %v11103_v39  ;;  %v11176_v39 = vcombine.high %v1077_v35, %v1081_v33 }
 0x486   :  { %9265 = vmatpush1.bf16.msra.mxu0 %v11847_v40  ;;  %7610 = vmatprep.subr.bf16.mxu1 %v11112_v41  ;;  %v7676_v40 = vmax.f32 %v12826_v45, 0.0  ;;  %v11876_v41 = vld [vmem:[#allocation8 + $0x204] ss:$16 sps:$4 sm:$0xff]   ;;  %v11183_v45 = vcombine.low %v1085_v44, %v1089_v46 }
 0x487   :  { %9266 = vmatprep.subr.bf16.mxu0 %v11852_v42  ;;  %v7679_v42 = vmax.f32 %v11661_v34, 0.0  ;;  %v11900_v34 = vld [vmem:[#allocation8 + $0x304] ss:$16 sps:$4 sm:$0xff]  }
 0x488   :  { %v1157_v44 = vld [vmem:[#allocation5 + $0x1e98] sm:$0xff] }
 0x489   :  { %7611 = vmatpush1.bf16.msra.mxu1 %v11111_v43  ;;  %v11175_v43 = vcombine.low %v1077_v35, %v1081_v33  ;;  %v11895_v35 = vld [vmem:[#allocation8 + $0x2e0] ss:$16 sps:$4 sm:$0xff]  }
 0x48a   :  { %9267 = vmatpush1.bf16.msra.mxu0 %v11850_v13  ;;  %7612 = vmatprep.subr.bf16.mxu1 %v11120_v47  ;;  %v11874_v13 = vld [vmem:[#allocation8 + $0x200] ss:$16 sps:$4 sm:$0xff]   ;;  %v12865_v47 = vpack.c.bf16 %v7676_v40, %v7676_v40 }
 0x48b   :  { %9268 = vmatprep.subr.bf16.mxu0 %v11855_v49  ;;  %v11879_v49 = vld [vmem:[#allocation8 + $0x224] ss:$16 sps:$4 sm:$0xff]   ;;  %v11898_v40 = vld [vmem:[#allocation8 + $0x300] ss:$16 sps:$4 sm:$0xff]  }
 0x48c   :  { %v1161_v46 = vld [vmem:[#allocation5 + $0x1eb8] sm:$0xff] }
 0x48d   :  { %7613 = vmatpush1.bf16.msra.mxu1 %v11119_v52  ;;  %v12867_v52 = vpack.c.bf16 %v7679_v42, %v7679_v42  ;;  %v11903_v42 = vld [vmem:[#allocation8 + $0x324] ss:$16 sps:$4 sm:$0xff]  }
 0x48e   :  { %9269 = vmatpush1.bf16.msra.mxu0 %v11853_v54  ;;  %7614 = vmatprep.subr.bf16.mxu1 %v11128_v21  ;;  %v11877_v54 = vld [vmem:[#allocation8 + $0x220] ss:$16 sps:$4 sm:$0xff]   ;;  %v11192_v21 = vcombine.high %v1093_v51, %v1097_v2 }
 0x48f   :  { %9270 = vmatprep.subr.bf16.mxu0 %v11858_v16  ;;  %v11882_v16 = vld [vmem:[#allocation8 + $0x244] ss:$16 sps:$4 sm:$0xff]  }
 0x491   :  { %7615 = vmatpush1.bf16.msra.mxu1 %v11127_v48  ;;  %v11191_v48 = vcombine.low %v1093_v51, %v1097_v2  ;;  %v1165_v51 = vld [vmem:[#allocation5 + $0x1ed8] sm:$0xff] }
 0x492   :  { %9271 = vmatpush1.bf16.msra.mxu0 %v11856_v56  ;;  %7616 = vmatprep.subr.bf16.mxu1 %v11136_v60  ;;  %v11200_v56 = vcombine.high %v1101_v6, %v1105_v55  ;;  %v11885_v60 = vld [vmem:[#allocation8 + $0x264] ss:$16 sps:$4 sm:$0xff]  }
 0x493   :  { %9272 = vmatprep.subr.bf16.mxu0 %v11861_v62  ;;  %v1109_v62 = vld [vmem:[#allocation5 + $0x1d18] sm:$0xff] }
 0x494   :  { %v11207_v8 = vcombine.low %v1109_v62, %v1113_v0  ;;  %v1169_v2 = vld [vmem:[#allocation5 + $0x1ef8] sm:$0xff] }
 0x495   :  { %7617 = vmatpush1.bf16.msra.mxu1 %v11135_v4  ;;  %v11883_v4 = vld [vmem:[#allocation8 + $0x260] ss:$16 sps:$4 sm:$0xff]  }
 0x496   :  { %9273 = vmatpush1.bf16.msra.mxu0 %v11859_v50  ;;  %7618 = vmatprep.subr.bf16.mxu1 %v11144_v27  ;;  %v11208_v50 = vcombine.high %v1109_v62, %v1113_v0  ;;  %v11888_v27 = vld [vmem:[#allocation8 + $0x284] ss:$16 sps:$4 sm:$0xff]  }
 0x497   :  { %9274 = vmatprep.subr.bf16.mxu0 %v11864_v5  ;;  %v1117_v5 = vld [vmem:[#allocation5 + $0x1d58] sm:$0xff] }
 0x498   :  { %v1173_v6 = vld [vmem:[#allocation5 + $0x1f18] sm:$0xff] }
 0x499   :  { %7619 = vmatpush1.bf16.msra.mxu1 %v11143_v10  ;;  %v1177_v55 = vld [vmem:[#allocation5 + $0x1f38] sm:$0xff] }
 0x49a   :  { %9275 = vmatpush1.bf16.msra.mxu0 %v11862_v11  ;;  %7620 = vmatprep.subr.bf16.mxu1 %v11152_v53  ;;  %v11891_v11 = vld [vmem:[#allocation8 + $0x2a4] ss:$16 sps:$4 sm:$0xff]  }
 0x49b   :  { %9276 = vmatprep.subr.bf16.mxu0 %v11867_v15  ;;  %v1125_v53 = vld [vmem:[#allocation5 + $0x1d98] sm:$0xff] }
 0x49c   :  { %v1129_v15 = vld [vmem:[#allocation5 + $0x1db8] sm:$0xff] }
 0x49d   :  { %7621 = vmatpush1.bf16.msra.mxu1 %v11151_v19  ;;  %v11224_v19 = vcombine.high %v1125_v53, %v1129_v15  ;;  %v11223_v57 = vcombine.low %v1125_v53, %v1129_v15  ;;  %v1181_v62 = vld [vmem:[#allocation5 + $0x1f58] sm:$0xff] }
 0x49e   :  { %9277 = vmatpush1.bf16.msra.mxu0 %v11865_v22  ;;  %7622 = vmatprep.subr.bf16.mxu1 %v11160_v23  ;;  %v11894_v22 = vld [vmem:[#allocation8 + $0x2c4] ss:$16 sps:$4 sm:$0xff]  }
 0x49f   :  { %9278 = vmatprep.subr.bf16.mxu0 %v11870_v24  ;;  %v1133_v23 = vld [vmem:[#allocation5 + $0x1dd8] sm:$0xff] }
 0x4a0   :  { %v1137_v24 = vld [vmem:[#allocation5 + $0x1df8] sm:$0xff] }
 0x4a1   :  { %7623 = vmatpush1.bf16.msra.mxu1 %v11159_v28  ;;  %v11232_v63 = vcombine.high %v1133_v23, %v1137_v24  ;;  %v11897_v28 = vld [vmem:[#allocation8 + $0x2e4] ss:$16 sps:$4 sm:$0xff]  }
 0x4a2   :  { %9279 = vmatpush1.bf16.msra.mxu0 %v11868_v29  ;;  %7624 = vmatprep.subr.bf16.mxu1 %v11168_v30  ;;  %v1141_v29 = vld [vmem:[#allocation5 + $0x1e18] sm:$0xff] }
 0x4a3   :  { %9280 = vmatprep.subr.bf16.mxu0 %v11873_v32  ;;  %v1145_v30 = vld [vmem:[#allocation5 + $0x1e38] sm:$0xff]  ;;  %v11231_v32 = vcombine.low %v1133_v23, %v1137_v24 }
 0x4a4   :  { %v11240_v33 = vcombine.high %v1141_v29, %v1145_v30  ;;  %v1185_v0 = vld [vmem:[#allocation5 + $0x1f78] sm:$0xff] }
 0x4a5   :  { %7625 = vmatpush1.bf16.msra.mxu1 %v11167_v36  ;;  %v1149_v36 = vld [vmem:[#allocation5 + $0x1e58] sm:$0xff] }
 0x4a6   :  { %9281 = vmatpush1.bf16.msra.mxu0 %v11871_v37  ;;  %7635 = vmatprep.subr.bf16.mxu1 %v11176_v39  ;;  %v1153_v37 = vld [vmem:[#allocation5 + $0x1e78] sm:$0xff]  ;;  %v11239_v39 = vcombine.low %v1141_v29, %v1145_v30 }
 0x4a7   :  { %9291 = vmatprep.subr.bf16.mxu0 %v11876_v41  ;;  %v11248_v41 = vcombine.high %v1149_v36, %v1153_v37  ;;  %v11918_v15 = vld [vmem:[#allocation8 + $0x3c4] ss:$16 sps:$4 sm:$0xff]  }
 0x4a8   :  { %7627 = vmatmul.mubr.bf16.vlgmr.msra.gmra.mrb[8].mxu1 %v12788_v31  ;;  %v11880_v31 = vld [vmem:[#allocation8 + $0x240] ss:$16 sps:$4 sm:$0xff]   ;;  %v11945_v30 = vld [vmem:[#allocation8 + $0x404] ss:$16 sps:$4 sm:$0xff]  }
 0x4a9   :  { %9283 = vmatmul.mubr.bf16.vlgmr.msra.gmra.mrb[8].mxu0 %v12865_v47  ;;  %7636 = vmatpush1.bf16.msra.mxu1 %v11175_v43  ;;  %v11247_v43 = vcombine.low %v1149_v36, %v1153_v37  ;;  %v11925_v36 = vld [vmem:[#allocation8 + $0x28] ss:$16 sps:$4 sm:$0xff]   ;;  %v11930_v37 = vld [vmem:[#allocation8 + $0x4c] ss:$16 sps:$4 sm:$0xff]  }
 0x4aa   :  { %9292 = vmatpush1.bf16.msra.mxu0 %v11874_v13  ;;  %9323 = vmatprep.mubr.bf16.mxu0 %v12867_v52  ;;  %v11901_v13 = vld [vmem:[#allocation8 + $0x320] ss:$16 sps:$4 sm:$0xff]  }
 0x4ab   :  { %7637 = vmatprep.subr.bf16.mxu1 %v11184_v61  ;;  %9293 = vmatprep.subr.bf16.mxu0 %v11879_v49  ;;  %v11256_v61 = vcombine.high %v1157_v44, %v1161_v46  ;;  %v11906_v49 = vld [vmem:[#allocation8 + $0x344] ss:$16 sps:$4 sm:$0xff]  }
 0x4ac   :  { %7667 = vmatprep.mubr.bf16.mxu1 %v12790_v38  ;;  %v1121_v38 = vld [vmem:[#allocation5 + $0x1d78] sm:$0xff] }
 0x4ad   :  { %7638 = vmatpush1.bf16.msra.mxu1 %v11183_v45  ;;  %v11216_v10 = vcombine.high %v1117_v5, %v1121_v38  ;;  %v11215_v17 = vcombine.low %v1117_v5, %v1121_v38  ;;  %v11255_v45 = vcombine.low %v1157_v44, %v1161_v46  ;;  %v11915_v5 = vld [vmem:[#allocation8 + $0x3a4] ss:$16 sps:$4 sm:$0xff]   ;;  %v11955_v44 = vld [vmem:[#allocation8 + $0x440] ss:$16 sps:$4 sm:$0xff]   ;;  %v11931_v46 = vld [vmem:[#allocation8 + $0x68] ss:$16 sps:$4 sm:$0xff]  }
 0x4ae   :  { %9294 = vmatpush1.bf16.msra.mxu0 %v11877_v54  ;;  %7639 = vmatprep.subr.bf16.mxu1 %v11192_v21  ;;  %v11904_v54 = vld [vmem:[#allocation8 + $0x340] ss:$16 sps:$4 sm:$0xff]   ;;  %v11264_v21 = vcombine.high %v1165_v51, %v1169_v2 }
 0x4af   :  { %9295 = vmatprep.subr.bf16.mxu0 %v11882_v16  ;;  %v11909_v16 = vld [vmem:[#allocation8 + $0x364] ss:$16 sps:$4 sm:$0xff]  }
 0x4b0   :  { %v1189_v38 = vld [vmem:[#allocation5 + $0x1f98] sm:$0xff] }
 0x4b1   :  { %7640 = vmatpush1.bf16.msra.mxu1 %v11191_v48  ;;  %v11263_v48 = vcombine.low %v1165_v51, %v1169_v2  ;;  %v11967_v51 = vld [vmem:[#allocation8 + $0x480] ss:$16 sps:$4 sm:$0xff]   ;;  %v11975_v2 = vld [vmem:[#allocation8 + $0x4a4] ss:$16 sps:$4 sm:$0xff]  }
 0x4b2   :  { %9296 = vmatpush1.bf16.msra.mxu0 %v11880_v31  ;;  %7641 = vmatprep.subr.bf16.mxu1 %v11200_v56  ;;  %v11907_v31 = vld [vmem:[#allocation8 + $0x360] ss:$16 sps:$4 sm:$0xff]   ;;  %v11272_v56 = vcombine.high %v1173_v6, %v1177_v55 }
 0x4b3   :  { %9297 = vmatprep.subr.bf16.mxu0 %v11885_v60  ;;  %v11912_v60 = vld [vmem:[#allocation8 + $0x384] ss:$16 sps:$4 sm:$0xff]  }
 0x4b5   :  { %7642 = vmatpush1.bf16.msra.mxu1 %v11199_v1  ;;  %v11271_v1 = vcombine.low %v1173_v6, %v1177_v55  ;;  %v11940_v6 = vld [vmem:[#allocation8 + $0xc8] ss:$16 sps:$4 sm:$0xff]   ;;  %v11948_v55 = vld [vmem:[#allocation8 + $0xec] ss:$16 sps:$4 sm:$0xff]  }
 0x4b6   :  { %9298 = vmatpush1.bf16.msra.mxu0 %v11883_v4  ;;  %7643 = vmatprep.subr.bf16.mxu1 %v11208_v50  ;;  %v11910_v4 = vld [vmem:[#allocation8 + $0x380] ss:$16 sps:$4 sm:$0xff]   ;;  %v11280_v50 = vcombine.high %v1181_v62, %v1185_v0 }
 0x4b7   :  { %9299 = vmatprep.subr.bf16.mxu0 %v11888_v27  ;;  %v1214_v27 = vsub.s32 2, %v12814_v59 }
 0x4b9   :  { %7644 = vmatpush1.bf16.msra.mxu1 %v11207_v8  ;;  %v1193_v8 = vld [vmem:[#allocation5 + $0x1fb8] sm:$0xff]  ;;  %v1215_v53 = vrot.slane %v12858_v26, %v1214_v27 }
 0x4ba   :  { %9300 = vmatpush1.bf16.msra.mxu0 %v11886_v9  ;;  %7645 = vmatprep.subr.bf16.mxu1 %v11216_v10  ;;  %v11279_v9 = vcombine.low %v1181_v62, %v1185_v0  ;;  %v11913_v10 = vld [vmem:[#allocation8 + $0x3a0] ss:$16 sps:$4 sm:$0xff]   ;;  %v11993_v0 = vld [vmem:[#allocation8 + $0x504] ss:$16 sps:$4 sm:$0xff]  }
 0x4bb   :  { %9301 = vmatprep.subr.bf16.mxu0 %v11891_v11  ;;  %v11288_v11 = vcombine.high %v1189_v38, %v1193_v8  ;;  %v11660_v24 = vadd.f32 %v12838_v3, %v1215_v53  ;;  %v11951_v3 = vld [vmem:[#allocation8 + $0x424] ss:$16 sps:$4 sm:$0xff]   ;;  %v11985_v62 = vld [vmem:[#allocation8 + $0x4e0] ss:$16 sps:$4 sm:$0xff]   ;;  %v11972_v53 = vld [vmem:[#allocation8 + $0x16c] ss:$16 sps:$4 sm:$0xff]  }
 0x4bd   :  { %7646 = vmatpush1.bf16.msra.mxu1 %v11215_v17  ;;  %v1197_v17 = vld [vmem:[#allocation5 + $0x1fd8] sm:$0xff]  ;;  %v7678_v29 = vmax.f32 %v11660_v24, 0.0  ;;  %v11976_v24 = vld [vmem:[#allocation8 + $0x188] ss:$16 sps:$4 sm:$0xff]  }
 0x4be   :  { %9302 = vmatpush1.bf16.msra.mxu0 %v11889_v58  ;;  %7647 = vmatprep.subr.bf16.mxu1 %v11224_v19  ;;  %v1201_v58 = vld [vmem:[#allocation5 + $0x1ff8] sm:$0xff]  ;;  %v11287_v19 = vcombine.low %v1189_v38, %v1193_v8  ;;  %v11958_v38 = vld [vmem:[#allocation8 + $0x128] ss:$16 sps:$4 sm:$0xff]   ;;  %v11966_v8 = vld [vmem:[#allocation8 + $0x14c] ss:$16 sps:$4 sm:$0xff]  }
 0x4bf   :  { %9303 = vmatprep.subr.bf16.mxu0 %v11894_v22  ;;  %v11916_v22 = vld [vmem:[#allocation8 + $0x3c0] ss:$16 sps:$4 sm:$0xff]   ;;  %v11296_v23 = vcombine.high %v1197_v17, %v1201_v58 }
 0x4c1   :  { %7648 = vmatpush1.bf16.msra.mxu1 %v11223_v57  ;;  %v11921_v57 = vld [vmem:[#allocation8 + $0x3e4] ss:$16 sps:$4 sm:$0xff]  }
 0x4c2   :  { %9304 = vmatpush1.bf16.msra.mxu0 %v11892_v25  ;;  %7649 = vmatprep.subr.bf16.mxu1 %v11232_v63  ;;  %v11295_v25 = vcombine.low %v1197_v17, %v1201_v58  ;;  %v11919_v63 = vld [vmem:[#allocation8 + $0x3e0] ss:$16 sps:$4 sm:$0xff]   ;;  %v12011_v17 = vld [vmem:[#allocation8 + $0x564] ss:$16 sps:$4 sm:$0xff]   ;;  %v11970_v58 = vld [vmem:[#allocation8 + $0x168] ss:$16 sps:$4 sm:$0xff]  }
 0x4c3   :  { %9305 = vmatprep.subr.bf16.mxu0 %v11897_v28  ;;  %v11924_v28 = vld [vmem:[#allocation8 + $0xc] ss:$16 sps:$4 sm:$0xff]  }
 0x4c5   :  { %7650 = vmatpush1.bf16.msra.mxu1 %v11231_v32  ;;  %v11922_v32 = vld [vmem:[#allocation8 + $0x8] ss:$16 sps:$4 sm:$0xff]  }
 0x4c6   :  { %9306 = vmatpush1.bf16.msra.mxu0 %v11895_v35  ;;  %7651 = vmatprep.subr.bf16.mxu1 %v11240_v33  ;;  %v11927_v35 = vld [vmem:[#allocation8 + $0x2c] ss:$16 sps:$4 sm:$0xff]   ;;  %v12878_v33 = vpack.c.bf16 %v7678_v29, %v7678_v29 }
 0x4c7   :  { %9307 = vmatprep.subr.bf16.mxu0 %v11900_v34  ;;  %v11943_v34 = vld [vmem:[#allocation8 + $0x400] ss:$16 sps:$4 sm:$0xff]   ;;  %v11990_v29 = vld [vmem:[#allocation8 + $0x1cc] ss:$16 sps:$4 sm:$0xff]  }
 0x4c9   :  { %7652 = vmatpush1.bf16.msra.mxu1 %v11239_v39  ;;  %v11949_v39 = vld [vmem:[#allocation8 + $0x420] ss:$16 sps:$4 sm:$0xff]  }
 0x4ca   :  { %9308 = vmatpush1.bf16.msra.mxu0 %v11898_v40  ;;  %7653 = vmatprep.subr.bf16.mxu1 %v11248_v41  ;;  %v11957_v40 = vld [vmem:[#allocation8 + $0x444] ss:$16 sps:$4 sm:$0xff]   ;;  %v11928_v41 = vld [vmem:[#allocation8 + $0x48] ss:$16 sps:$4 sm:$0xff]  }
 0x4cb   :  { %9309 = vmatprep.subr.bf16.mxu0 %v11903_v42  ;;  %v11933_v42 = vld [vmem:[#allocation8 + $0x6c] ss:$16 sps:$4 sm:$0xff]  }
 0x4cd   :  { %7654 = vmatpush1.bf16.msra.mxu1 %v11247_v43  ;;  %v11936_v43 = vld [vmem:[#allocation8 + $0x8c] ss:$16 sps:$4 sm:$0xff]  }
 0x4ce   :  { %9310 = vmatpush1.bf16.msra.mxu0 %v11901_v13  ;;  %7655 = vmatprep.subr.bf16.mxu1 %v11256_v61  ;;  %v11969_v13 = vld [vmem:[#allocation8 + $0x484] ss:$16 sps:$4 sm:$0xff]   ;;  %v11934_v61 = vld [vmem:[#allocation8 + $0x88] ss:$16 sps:$4 sm:$0xff]  }
 0x4cf   :  { %9311 = vmatprep.subr.bf16.mxu0 %v11906_v49  ;;  %v11939_v49 = vld [vmem:[#allocation8 + $0xac] ss:$16 sps:$4 sm:$0xff]  }
 0x4d1   :  { %7656 = vmatpush1.bf16.msra.mxu1 %v11255_v45  ;;  %v11937_v45 = vld [vmem:[#allocation8 + $0xa8] ss:$16 sps:$4 sm:$0xff]  }
 0x4d2   :  { %9312 = vmatpush1.bf16.msra.mxu0 %v11904_v54  ;;  %7657 = vmatprep.subr.bf16.mxu1 %v11264_v21  ;;  %v11942_v54 = vld [vmem:[#allocation8 + $0xcc] ss:$16 sps:$4 sm:$0xff]   ;;  %v11973_v21 = vld [vmem:[#allocation8 + $0x4a0] ss:$16 sps:$4 sm:$0xff]  }
 0x4d3   :  { %9313 = vmatprep.subr.bf16.mxu0 %v11909_v16  ;;  %v11981_v16 = vld [vmem:[#allocation8 + $0x4c4] ss:$16 sps:$4 sm:$0xff]  }
 0x4d5   :  { %7658 = vmatpush1.bf16.msra.mxu1 %v11263_v48  ;;  %v11979_v48 = vld [vmem:[#allocation8 + $0x4c0] ss:$16 sps:$4 sm:$0xff]  }
 0x4d6   :  { %9314 = vmatpush1.bf16.msra.mxu0 %v11907_v31  ;;  %7659 = vmatprep.subr.bf16.mxu1 %v11272_v56  ;;  %v11987_v31 = vld [vmem:[#allocation8 + $0x4e4] ss:$16 sps:$4 sm:$0xff]   ;;  %v11946_v56 = vld [vmem:[#allocation8 + $0xe8] ss:$16 sps:$4 sm:$0xff]  }
 0x4d7   :  { %9315 = vmatprep.subr.bf16.mxu0 %v11912_v60  ;;  %v11954_v60 = vld [vmem:[#allocation8 + $0x10c] ss:$16 sps:$4 sm:$0xff]  }
 0x4d9   :  { %7660 = vmatpush1.bf16.msra.mxu1 %v11271_v1  ;;  %v11952_v1 = vld [vmem:[#allocation8 + $0x108] ss:$16 sps:$4 sm:$0xff]  }
 0x4da   :  { %9316 = vmatpush1.bf16.msra.mxu0 %v11910_v4  ;;  %7661 = vmatprep.subr.bf16.mxu1 %v11280_v50  ;;  %v11960_v4 = vld [vmem:[#allocation8 + $0x12c] ss:$16 sps:$4 sm:$0xff]   ;;  %v11991_v50 = vld [vmem:[#allocation8 + $0x500] ss:$16 sps:$4 sm:$0xff]  }
 0x4db   :  { %9317 = vmatprep.subr.bf16.mxu0 %v11915_v5  ;;  %v11999_v5 = vld [vmem:[#allocation8 + $0x524] ss:$16 sps:$4 sm:$0xff]  }
 0x4dd   :  { %7662 = vmatpush1.bf16.msra.mxu1 %v11279_v9  ;;  %v11997_v9 = vld [vmem:[#allocation8 + $0x520] ss:$16 sps:$4 sm:$0xff]  }
 0x4de   :  { %9318 = vmatpush1.bf16.msra.mxu0 %v11913_v10  ;;  %7663 = vmatprep.subr.bf16.mxu1 %v11288_v11  ;;  %v12005_v10 = vld [vmem:[#allocation8 + $0x544] ss:$16 sps:$4 sm:$0xff]   ;;  %v11964_v11 = vld [vmem:[#allocation8 + $0x148] ss:$16 sps:$4 sm:$0xff]  }
 0x4df   :  { %9319 = vmatprep.subr.bf16.mxu0 %v11918_v15  ;;  %v12003_v15 = vld [vmem:[#allocation8 + $0x540] ss:$16 sps:$4 sm:$0xff]  }
 0x4e1   :  { %7664 = vmatpush1.bf16.msra.mxu1 %v11287_v19  ;;  %v11978_v19 = vld [vmem:[#allocation8 + $0x18c] ss:$16 sps:$4 sm:$0xff]  }
 0x4e2   :  { %9320 = vmatpush1.bf16.msra.mxu0 %v11916_v22  ;;  %7665 = vmatprep.subr.bf16.mxu1 %v11296_v23  ;;  %v12009_v22 = vld [vmem:[#allocation8 + $0x560] ss:$16 sps:$4 sm:$0xff]   ;;  %v12017_v23 = vld [vmem:[#allocation8 + $0x584] ss:$16 sps:$4 sm:$0xff]  }
 0x4e3   :  { %9321 = vmatprep.subr.bf16.mxu0 %v11921_v57  ;;  %v11984_v57 = vld [vmem:[#allocation8 + $0x1ac] ss:$16 sps:$4 sm:$0xff]  }
 0x4e5   :  { %7666 = vmatpush1.bf16.msra.mxu1 %v11295_v25  ;;  %v12015_v25 = vld [vmem:[#allocation8 + $0x580] ss:$16 sps:$4 sm:$0xff]  }
 0x4e6   :  { %9322 = vmatpush1.bf16.msra.mxu0 %v11919_v63  ;;  %9414 = vmatprep.subr.bf16.mxu1 %v11924_v28  ;;  %v12023_v63 = vld [vmem:[#allocation8 + $0x5a4] ss:$16 sps:$4 sm:$0xff]   ;;  %v11982_v28 = vld [vmem:[#allocation8 + $0x1a8] ss:$16 sps:$4 sm:$0xff]  }
 0x4e7   :  { %9332 = vmatprep.subr.bf16.mxu0 %v11945_v30  ;;  %v12021_v30 = vld [vmem:[#allocation8 + $0x5a0] ss:$16 sps:$4 sm:$0xff]  }
 0x4e8   :  { %7668 = vmatmul.mubr.bf16.vlgmr.msra.gmra.mrb[8].mxu1 %v12796_v14  ;;  %v11963_v14 = vld [vmem:[#allocation8 + $0x464] ss:$16 sps:$4 sm:$0xff]  }
 0x4e9   :  { %9324 = vmatmul.mubr.bf16.vlgmr.msra.gmra.mrb[8].mxu0 %v12878_v33  ;;  %9415 = vmatpush1.bf16.msra.mxu1 %v11922_v32  ;;  %v12029_v32 = vld [vmem:[#allocation8 + $0x5c4] ss:$16 sps:$4 sm:$0xff]  }
 0x4ea   :  { %9446 = vmatprep.mubr.bf16.mxu1 %v12851_v20  ;;  %9416 = vmatprep.subr.bf16.mxu1 %v11927_v35  ;;  %v11961_v20 = vld [vmem:[#allocation8 + $0x460] ss:$16 sps:$4 sm:$0xff]   ;;  %v11988_v35 = vld [vmem:[#allocation8 + $0x1c8] ss:$16 sps:$4 sm:$0xff]  }
 0x4eb   :  { %9333 = vmatpush1.bf16.msra.mxu0 %v11943_v34  ;;  %v11996_v34 = vld [vmem:[#allocation8 + $0x1ec] ss:$16 sps:$4 sm:$0xff]  }
 0x4ec   :  { %9334 = vmatprep.subr.bf16.mxu0 %v11951_v3  ;;  %v12027_v3 = vld [vmem:[#allocation8 + $0x5c0] ss:$16 sps:$4 sm:$0xff]  }
 0x4ed   :  { %9417 = vmatpush1.bf16.msra.mxu1 %v11925_v36  ;;  %v12035_v36 = vld [vmem:[#allocation8 + $0x5e4] ss:$16 sps:$4 sm:$0xff]  }
 0x4ee   :  { %9418 = vmatprep.subr.bf16.mxu1 %v11930_v37  ;;  %v11994_v37 = vld [vmem:[#allocation8 + $0x1e8] ss:$16 sps:$4 sm:$0xff]  }
 0x4ef   :  { %9335 = vmatpush1.bf16.msra.mxu0 %v11949_v39  ;;  %v12002_v39 = vld [vmem:[#allocation8 + $0x20c] ss:$16 sps:$4 sm:$0xff]  }
 0x4f0   :  { %9336 = vmatprep.subr.bf16.mxu0 %v11957_v40  ;;  %v12033_v40 = vld [vmem:[#allocation8 + $0x5e0] ss:$16 sps:$4 sm:$0xff]  }
 0x4f1   :  { %9419 = vmatpush1.bf16.msra.mxu1 %v11928_v41  ;;  %v12089_v41 = vld [vmem:[#allocation8 + $0x604] ss:$16 sps:$4 sm:$0xff]  }
 0x4f2   :  { %9420 = vmatprep.subr.bf16.mxu1 %v11933_v42  ;;  %v12000_v42 = vld [vmem:[#allocation8 + $0x208] ss:$16 sps:$4 sm:$0xff]  }
 0x4f3   :  { %9337 = vmatpush1.bf16.msra.mxu0 %v11955_v44  ;;  %v12008_v44 = vld [vmem:[#allocation8 + $0x22c] ss:$16 sps:$4 sm:$0xff]  }
 0x4f4   :  { %9338 = vmatprep.subr.bf16.mxu0 %v11963_v14  ;;  %v12006_v14 = vld [vmem:[#allocation8 + $0x228] ss:$16 sps:$4 sm:$0xff]  }
 0x4f5   :  { %9421 = vmatpush1.bf16.msra.mxu1 %v11931_v46  ;;  %v12014_v46 = vld [vmem:[#allocation8 + $0x24c] ss:$16 sps:$4 sm:$0xff]  }
 0x4f6   :  { %9422 = vmatprep.subr.bf16.mxu1 %v11936_v43  ;;  %v12012_v43 = vld [vmem:[#allocation8 + $0x248] ss:$16 sps:$4 sm:$0xff]  }
 0x4f7   :  { %9339 = vmatpush1.bf16.msra.mxu0 %v11961_v20  ;;  %v12020_v20 = vld [vmem:[#allocation8 + $0x26c] ss:$16 sps:$4 sm:$0xff]  }
 0x4f8   :  { %9340 = vmatprep.subr.bf16.mxu0 %v11969_v13  ;;  %v12018_v13 = vld [vmem:[#allocation8 + $0x268] ss:$16 sps:$4 sm:$0xff]  }
 0x4f9   :  { %9423 = vmatpush1.bf16.msra.mxu1 %v11934_v61  ;;  %v12026_v61 = vld [vmem:[#allocation8 + $0x28c] ss:$16 sps:$4 sm:$0xff]  }
 0x4fa   :  { %9424 = vmatprep.subr.bf16.mxu1 %v11939_v49  ;;  %v12024_v49 = vld [vmem:[#allocation8 + $0x288] ss:$16 sps:$4 sm:$0xff]  }
 0x4fb   :  { %9341 = vmatpush1.bf16.msra.mxu0 %v11967_v51  ;;  %v1222_v51 = vsub.s32 4, %v12814_v59 }
 0x4fc   :  { %9342 = vmatprep.subr.bf16.mxu0 %v11975_v2  ;;  %v12032_v2 = vld [vmem:[#allocation8 + $0x2ac] ss:$16 sps:$4 sm:$0xff]  }
 0x4fd   :  { %9425 = vmatpush1.bf16.msra.mxu1 %v11937_v45  ;;  %v12030_v45 = vld [vmem:[#allocation8 + $0x2a8] ss:$16 sps:$4 sm:$0xff]  }
 0x4fe   :  { %9426 = vmatprep.subr.bf16.mxu1 %v11942_v54 }
 0x4ff   :  { %9343 = vmatpush1.bf16.msra.mxu0 %v11973_v21  ;;  %v12038_v21 = vld [vmem:[#allocation8 + $0x2cc] ss:$16 sps:$4 sm:$0xff]  }
 0x500   :  { %9344 = vmatprep.subr.bf16.mxu0 %v11981_v16 }
 0x501   :  { %9427 = vmatpush1.bf16.msra.mxu1 %v11940_v6 }
 0x502   :  { %9428 = vmatprep.subr.bf16.mxu1 %v11948_v55 }
 0x503   :  { %9345 = vmatpush1.bf16.msra.mxu0 %v11979_v48  ;;  %v12036_v48 = vld [vmem:[#allocation8 + $0x2c8] ss:$16 sps:$4 sm:$0xff]  }
 0x504   :  { %9346 = vmatprep.subr.bf16.mxu0 %v11987_v31 }
 0x505   :  { %9429 = vmatpush1.bf16.msra.mxu1 %v11946_v56 }
 0x506   :  { %9430 = vmatprep.subr.bf16.mxu1 %v11954_v60  ;;  %v12041_v60 = vld [vmem:[#allocation8 + $0x2ec] ss:$16 sps:$4 sm:$0xff]  }
 0x507   :  { %9347 = vmatpush1.bf16.msra.mxu0 %v11985_v62 }
 0x508   :  { %9348 = vmatprep.subr.bf16.mxu0 %v11993_v0 }
 0x509   :  { %9431 = vmatpush1.bf16.msra.mxu1 %v11952_v1 }
 0x50a   :  { %9432 = vmatprep.subr.bf16.mxu1 %v11960_v4  ;;  %v12039_v4 = vld [vmem:[#allocation8 + $0x2e8] ss:$16 sps:$4 sm:$0xff]  }
 0x50b   :  { %9349 = vmatpush1.bf16.msra.mxu0 %v11991_v50 }
 0x50c   :  { %9350 = vmatprep.subr.bf16.mxu0 %v11999_v5  ;;  %v12087_v5 = vld [vmem:[#allocation8 + $0x600] ss:$16 sps:$4 sm:$0xff]  }
 0x50d   :  { %9433 = vmatpush1.bf16.msra.mxu1 %v11958_v38 }
 0x50e   :  { %9434 = vmatprep.subr.bf16.mxu1 %v11966_v8  ;;  %v12095_v8 = vld [vmem:[#allocation8 + $0x624] ss:$16 sps:$4 sm:$0xff]  }
 0x50f   :  { %9351 = vmatpush1.bf16.msra.mxu0 %v11997_v9  ;;  %v12042_v9 = vld [vmem:[#allocation8 + $0x308] ss:$16 sps:$4 sm:$0xff]  }
 0x510   :  { %9352 = vmatprep.subr.bf16.mxu0 %v12005_v10  ;;  %v12047_v10 = vld [vmem:[#allocation8 + $0x32c] ss:$16 sps:$4 sm:$0xff]  }
 0x511   :  { %9435 = vmatpush1.bf16.msra.mxu1 %v11964_v11  ;;  %v12093_v11 = vld [vmem:[#allocation8 + $0x620] ss:$16 sps:$4 sm:$0xff]  }
 0x512   :  { %9436 = vmatprep.subr.bf16.mxu1 %v11972_v53  ;;  %v12101_v53 = vld [vmem:[#allocation8 + $0x644] ss:$16 sps:$4 sm:$0xff]  }
 0x513   :  { %9353 = vmatpush1.bf16.msra.mxu0 %v12003_v15  ;;  %v12045_v15 = vld [vmem:[#allocation8 + $0x328] ss:$16 sps:$4 sm:$0xff]  }
 0x514   :  { %9354 = vmatprep.subr.bf16.mxu0 %v12011_v17  ;;  %v12050_v17 = vld [vmem:[#allocation8 + $0x34c] ss:$16 sps:$4 sm:$0xff]  }
 0x515   :  { %9437 = vmatpush1.bf16.msra.mxu1 %v11970_v58  ;;  %v12099_v58 = vld [vmem:[#allocation8 + $0x640] ss:$16 sps:$4 sm:$0xff]  }
 0x516   :  { %9438 = vmatprep.subr.bf16.mxu1 %v11978_v19  ;;  %v12107_v19 = vld [vmem:[#allocation8 + $0x664] ss:$16 sps:$4 sm:$0xff]  }
 0x517   :  { %9355 = vmatpush1.bf16.msra.mxu0 %v12009_v22  ;;  %v12048_v22 = vld [vmem:[#allocation8 + $0x348] ss:$16 sps:$4 sm:$0xff]  }
 0x518   :  { %9356 = vmatprep.subr.bf16.mxu0 %v12017_v23  ;;  %v12053_v23 = vld [vmem:[#allocation8 + $0x36c] ss:$16 sps:$4 sm:$0xff]  }
 0x519   :  { %9439 = vmatpush1.bf16.msra.mxu1 %v11976_v24  ;;  %v12105_v24 = vld [vmem:[#allocation8 + $0x660] ss:$16 sps:$4 sm:$0xff]  }
 0x51a   :  { %9440 = vmatprep.subr.bf16.mxu1 %v11984_v57  ;;  %v12113_v57 = vld [vmem:[#allocation8 + $0x684] ss:$16 sps:$4 sm:$0xff]  }
 0x51b   :  { %9357 = vmatpush1.bf16.msra.mxu0 %v12015_v25  ;;  %v12051_v25 = vld [vmem:[#allocation8 + $0x368] ss:$16 sps:$4 sm:$0xff]  }
 0x51c   :  { %9358 = vmatprep.subr.bf16.mxu0 %v12023_v63  ;;  %v12056_v63 = vld [vmem:[#allocation8 + $0x38c] ss:$16 sps:$4 sm:$0xff]  }
 0x51d   :  { %9441 = vmatpush1.bf16.msra.mxu1 %v11982_v28  ;;  %v12111_v28 = vld [vmem:[#allocation8 + $0x680] ss:$16 sps:$4 sm:$0xff]  }
 0x51e   :  { %9442 = vmatprep.subr.bf16.mxu1 %v11990_v29  ;;  %v12119_v29 = vld [vmem:[#allocation8 + $0x6a4] ss:$16 sps:$4 sm:$0xff]  }
 0x51f   :  { %9359 = vmatpush1.bf16.msra.mxu0 %v12021_v30  ;;  %v12054_v30 = vld [vmem:[#allocation8 + $0x388] ss:$16 sps:$4 sm:$0xff]  }
 0x520   :  { %9360 = vmatprep.subr.bf16.mxu0 %v12029_v32  ;;  %v12059_v32 = vld [vmem:[#allocation8 + $0x3ac] ss:$16 sps:$4 sm:$0xff]  }
 0x521   :  { %9443 = vmatpush1.bf16.msra.mxu1 %v11988_v35  ;;  %v12117_v35 = vld [vmem:[#allocation8 + $0x6a0] ss:$16 sps:$4 sm:$0xff]  }
 0x522   :  { %9444 = vmatprep.subr.bf16.mxu1 %v11996_v34  ;;  %v12125_v34 = vld [vmem:[#allocation8 + $0x6c4] ss:$16 sps:$4 sm:$0xff]  }
 0x523   :  { %9361 = vmatpush1.bf16.msra.mxu0 %v12027_v3  ;;  %v12057_v3 = vld [vmem:[#allocation8 + $0x3a8] ss:$16 sps:$4 sm:$0xff]  }
 0x524   :  { %9362 = vmatprep.subr.bf16.mxu0 %v12035_v36  ;;  %v12062_v36 = vld [vmem:[#allocation8 + $0x3cc] ss:$16 sps:$4 sm:$0xff]  }
 0x525   :  { %9445 = vmatpush1.bf16.msra.mxu1 %v11994_v37  ;;  %v12123_v37 = vld [vmem:[#allocation8 + $0x6c0] ss:$16 sps:$4 sm:$0xff]  }
 0x526   :  { %9455 = vmatprep.subr.bf16.mxu1 %v12002_v39  ;;  %v12131_v39 = vld [vmem:[#allocation8 + $0x6e4] ss:$16 sps:$4 sm:$0xff]  }
 0x527   :  { %9363 = vmatpush1.bf16.msra.mxu0 %v12033_v40  ;;  %v12060_v40 = vld [vmem:[#allocation8 + $0x3c8] ss:$16 sps:$4 sm:$0xff]  }
 0x528   :  { %9447 = vmatmul.mubr.bf16.vlgmr.msra.gmra.mrb[12].mxu1 %v12865_v47  ;;  %9373 = vmatprep.subr.bf16.mxu0 %v12089_v41  ;;  %v1226_v47 = vsub.s32 5, %v12814_v59  ;;  %v12065_v41 = vld [vmem:[#allocation8 + $0x3ec] ss:$16 sps:$4 sm:$0xff]  }
 0x529   :  { %9456 = vmatpush1.bf16.msra.mxu1 %v12000_v42  ;;  %9487 = vmatprep.mubr.bf16.mxu1 %v12867_v52  ;;  %v1223_v52 = vrot.slane %v12858_v26, %v1222_v51  ;;  %v12129_v42 = vld [vmem:[#allocation8 + $0x6e0] ss:$16 sps:$4 sm:$0xff]   ;;  %v12149_v51 = vld [vmem:[#allocation8 + $0x744] ss:$16 sps:$4 sm:$0xff]  }
 0x52a   :  { %9457 = vmatprep.subr.bf16.mxu1 %v12008_v44  ;;  %v1227_v54 = vrot.slane %v12858_v26, %v1226_v47  ;;  %v12044_v26 = vld [vmem:[#allocation8 + $0x30c] ss:$16 sps:$4 sm:$0xff]   ;;  %v12137_v44 = vld [vmem:[#allocation8 + $0x704] ss:$16 sps:$4 sm:$0xff]   ;;  %v12069_v47 = vld [vmem:[#allocation8 + $0x428] ss:$16 sps:$4 sm:$0xff]  }
 0x52d   :  { %9458 = vmatpush1.bf16.msra.mxu1 %v12006_v14  ;;  %v12063_v14 = vld [vmem:[#allocation8 + $0x3e8] ss:$16 sps:$4 sm:$0xff]  }
 0x52e   :  { %9459 = vmatprep.subr.bf16.mxu1 %v12014_v46  ;;  %v12068_v46 = vld [vmem:[#allocation8 + $0x40c] ss:$16 sps:$4 sm:$0xff]  }
 0x531   :  { %9460 = vmatpush1.bf16.msra.mxu1 %v12012_v43  ;;  %v12135_v43 = vld [vmem:[#allocation8 + $0x700] ss:$16 sps:$4 sm:$0xff]  }
 0x532   :  { %9461 = vmatprep.subr.bf16.mxu1 %v12020_v20  ;;  %v12143_v20 = vld [vmem:[#allocation8 + $0x724] ss:$16 sps:$4 sm:$0xff]  }
 0x535   :  { %9462 = vmatpush1.bf16.msra.mxu1 %v12018_v13  ;;  %v12066_v13 = vld [vmem:[#allocation8 + $0x408] ss:$16 sps:$4 sm:$0xff]  }
 0x536   :  { %9463 = vmatprep.subr.bf16.mxu1 %v12026_v61  ;;  %v12071_v61 = vld [vmem:[#allocation8 + $0x42c] ss:$16 sps:$4 sm:$0xff]  }
 0x539   :  { %9464 = vmatpush1.bf16.msra.mxu1 %v12024_v49  ;;  %v12141_v49 = vld [vmem:[#allocation8 + $0x720] ss:$16 sps:$4 sm:$0xff]  }
 0x53a   :  { %9465 = vmatprep.subr.bf16.mxu1 %v12032_v2  ;;  %v12074_v2 = vld [vmem:[#allocation8 + $0x44c] ss:$16 sps:$4 sm:$0xff]  }
 0x53c   :  { %v7341_v16 = vpop.f32.mrb[4].mxu0 }
 0x53d   :  { %v11662_v6 = vadd.f32 %v7341_v16, %v1223_v52  ;;  %v7343_v55 = vpop.f32.mrb[5].mxu0  ;;  %9466 = vmatpush1.bf16.msra.mxu1 %v12030_v45  ;;  %v12147_v52 = vld [vmem:[#allocation8 + $0x740] ss:$16 sps:$4 sm:$0xff]   ;;  %v12155_v45 = vld [vmem:[#allocation8 + $0x764] ss:$16 sps:$4 sm:$0xff]  }
 0x53e   :  { %v11663_v31 = vadd.f32 %v7343_v55, %v1227_v54  ;;  %v7345_v56 = vpop.f32.mrb[6].mxu0  ;;  %9467 = vmatprep.subr.bf16.mxu1 %v12038_v21  ;;  %v12072_v54 = vld [vmem:[#allocation8 + $0x448] ss:$16 sps:$4 sm:$0xff]   ;;  %v12077_v21 = vld [vmem:[#allocation8 + $0x46c] ss:$16 sps:$4 sm:$0xff]  }
 0x53f   :  { %v7680_v62 = vmax.f32 %v11662_v6, 0.0  ;;  %v7346_v0 = vpop.f32.mrb[7].mxu0  ;;  %v12153_v16 = vld [vmem:[#allocation8 + $0x760] ss:$16 sps:$4 sm:$0xff]   ;;  %v12161_v6 = vld [vmem:[#allocation8 + $0x784] ss:$16 sps:$4 sm:$0xff]  }
 0x540   :  { %v7681_v1 = vmax.f32 %v11663_v31, 0.0  ;;  %v12080_v55 = vld [vmem:[#allocation8 + $0x48c] ss:$16 sps:$4 sm:$0xff]   ;;  %v12167_v31 = vld [vmem:[#allocation8 + $0x7a4] ss:$16 sps:$4 sm:$0xff]  }
 0x541   :  { %9468 = vmatpush1.bf16.msra.mxu1 %v12036_v48  ;;  %v12891_v38 = vpack.c.bf16 %v7680_v62, %v7680_v62  ;;  %v12159_v48 = vld [vmem:[#allocation8 + $0x780] ss:$16 sps:$4 sm:$0xff]   ;;  %v12078_v56 = vld [vmem:[#allocation8 + $0x488] ss:$16 sps:$4 sm:$0xff]   ;;  %v12173_v0 = vld [vmem:[#allocation8 + $0x7c4] ss:$16 sps:$4 sm:$0xff]  }
 0x542   :  { %v12889_v50 = vpack.c.bf16 %v7681_v1, %v7681_v1  ;;  %9469 = vmatprep.subr.bf16.mxu1 %v12041_v60  ;;  %v12083_v60 = vld [vmem:[#allocation8 + $0x4ac] ss:$16 sps:$4 sm:$0xff]   ;;  %v12165_v62 = vld [vmem:[#allocation8 + $0x7a0] ss:$16 sps:$4 sm:$0xff]   ;;  %v12081_v1 = vld [vmem:[#allocation8 + $0x4a8] ss:$16 sps:$4 sm:$0xff]  }
 0x544   :  { %9364 = vmatprep.mubr.bf16.mxu0 %v12889_v50 }
 0x545   :  { %9365 = vmatmul.mubr.bf16.vlgmr.msra.gmra.mrb[8].mxu0 %v12891_v38  ;;  %9470 = vmatpush1.bf16.msra.mxu1 %v12039_v4  ;;  %v12086_v4 = vld [vmem:[#allocation8 + $0x4cc] ss:$16 sps:$4 sm:$0xff]  }
 0x546   :  { %9471 = vmatprep.subr.bf16.mxu1 %v12044_v26  ;;  %9374 = vmatpush1.bf16.msra.mxu0 %v12087_v5  ;;  %v12179_v26 = vld [vmem:[#allocation8 + $0x7e4] ss:$16 sps:$4 sm:$0xff]   ;;  %v12084_v5 = vld [vmem:[#allocation8 + $0x4c8] ss:$16 sps:$4 sm:$0xff]  }
 0x547   :  { %9375 = vmatprep.subr.bf16.mxu0 %v12095_v8  ;;  %v12092_v8 = vld [vmem:[#allocation8 + $0x4ec] ss:$16 sps:$4 sm:$0xff]  }
 0x549   :  { %9472 = vmatpush1.bf16.msra.mxu1 %v12042_v9  ;;  %v12177_v9 = vld [vmem:[#allocation8 + $0x7e0] ss:$16 sps:$4 sm:$0xff]  }
 0x54a   :  { %9473 = vmatprep.subr.bf16.mxu1 %v12047_v10  ;;  %9376 = vmatpush1.bf16.msra.mxu0 %v12093_v11  ;;  %v12212_v10 = vld [vmem:[#allocation11 + $0x4] ss:$8 sps:$4 sm:$0xff]  }
 0x54b   :  { %9377 = vmatprep.subr.bf16.mxu0 %v12101_v53  ;;  %v12090_v11 = vld [vmem:[#allocation8 + $0x4e8] ss:$16 sps:$4 sm:$0xff]   ;;  %v12098_v53 = vld [vmem:[#allocation8 + $0x50c] ss:$16 sps:$4 sm:$0xff]  }
 0x54d   :  { %9474 = vmatpush1.bf16.msra.mxu1 %v12045_v15  ;;  %v12096_v15 = vld [vmem:[#allocation8 + $0x508] ss:$16 sps:$4 sm:$0xff]  }
 0x54e   :  { %9475 = vmatprep.subr.bf16.mxu1 %v12050_v17  ;;  %9378 = vmatpush1.bf16.msra.mxu0 %v12099_v58  ;;  %v12104_v17 = vld [vmem:[#allocation8 + $0x52c] ss:$16 sps:$4 sm:$0xff]   ;;  %v12102_v58 = vld [vmem:[#allocation8 + $0x528] ss:$16 sps:$4 sm:$0xff]  }
 0x54f   :  { %9379 = vmatprep.subr.bf16.mxu0 %v12107_v19  ;;  %v12110_v19 = vld [vmem:[#allocation8 + $0x54c] ss:$16 sps:$4 sm:$0xff]  }
 0x551   :  { %9476 = vmatpush1.bf16.msra.mxu1 %v12048_v22  ;;  %v12108_v22 = vld [vmem:[#allocation8 + $0x548] ss:$16 sps:$4 sm:$0xff]  }
 0x552   :  { %9477 = vmatprep.subr.bf16.mxu1 %v12053_v23  ;;  %9380 = vmatpush1.bf16.msra.mxu0 %v12105_v24  ;;  %v12116_v23 = vld [vmem:[#allocation8 + $0x56c] ss:$16 sps:$4 sm:$0xff]   ;;  %v12114_v24 = vld [vmem:[#allocation8 + $0x568] ss:$16 sps:$4 sm:$0xff]  }
 0x553   :  { %9381 = vmatprep.subr.bf16.mxu0 %v12113_v57  ;;  %v12122_v57 = vld [vmem:[#allocation8 + $0x58c] ss:$16 sps:$4 sm:$0xff]  }
 0x555   :  { %9478 = vmatpush1.bf16.msra.mxu1 %v12051_v25  ;;  %v12120_v25 = vld [vmem:[#allocation8 + $0x588] ss:$16 sps:$4 sm:$0xff]  }
 0x556   :  { %9479 = vmatprep.subr.bf16.mxu1 %v12056_v63  ;;  %9382 = vmatpush1.bf16.msra.mxu0 %v12111_v28  ;;  %v12128_v63 = vld [vmem:[#allocation8 + $0x5ac] ss:$16 sps:$4 sm:$0xff]   ;;  %v12126_v28 = vld [vmem:[#allocation8 + $0x5a8] ss:$16 sps:$4 sm:$0xff]  }
 0x557   :  { %9383 = vmatprep.subr.bf16.mxu0 %v12119_v29  ;;  %v12134_v29 = vld [vmem:[#allocation8 + $0x5cc] ss:$16 sps:$4 sm:$0xff]  }
 0x559   :  { %9480 = vmatpush1.bf16.msra.mxu1 %v12054_v30  ;;  %v12132_v30 = vld [vmem:[#allocation8 + $0x5c8] ss:$16 sps:$4 sm:$0xff]  }
 0x55a   :  { %9481 = vmatprep.subr.bf16.mxu1 %v12059_v32  ;;  %9384 = vmatpush1.bf16.msra.mxu0 %v12117_v35  ;;  %v12140_v32 = vld [vmem:[#allocation8 + $0x5ec] ss:$16 sps:$4 sm:$0xff]   ;;  %v12138_v35 = vld [vmem:[#allocation8 + $0x5e8] ss:$16 sps:$4 sm:$0xff]  }
 0x55b   :  { %9385 = vmatprep.subr.bf16.mxu0 %v12125_v34  ;;  %v12146_v34 = vld [vmem:[#allocation8 + $0x60c] ss:$16 sps:$4 sm:$0xff]  }
 0x55d   :  { %9482 = vmatpush1.bf16.msra.mxu1 %v12057_v3  ;;  %v12144_v3 = vld [vmem:[#allocation8 + $0x608] ss:$16 sps:$4 sm:$0xff]  }
 0x55e   :  { %9483 = vmatprep.subr.bf16.mxu1 %v12062_v36  ;;  %9386 = vmatpush1.bf16.msra.mxu0 %v12123_v37  ;;  %v12152_v36 = vld [vmem:[#allocation8 + $0x62c] ss:$16 sps:$4 sm:$0xff]   ;;  %v12150_v37 = vld [vmem:[#allocation8 + $0x628] ss:$16 sps:$4 sm:$0xff]  }
 0x55f   :  { %9387 = vmatprep.subr.bf16.mxu0 %v12131_v39  ;;  %v12158_v39 = vld [vmem:[#allocation8 + $0x64c] ss:$16 sps:$4 sm:$0xff]  }
 0x561   :  { %9484 = vmatpush1.bf16.msra.mxu1 %v12060_v40  ;;  %v12156_v40 = vld [vmem:[#allocation8 + $0x648] ss:$16 sps:$4 sm:$0xff]  }
 0x562   :  { %9485 = vmatprep.subr.bf16.mxu1 %v12065_v41  ;;  %9388 = vmatpush1.bf16.msra.mxu0 %v12129_v42  ;;  %v12164_v41 = vld [vmem:[#allocation8 + $0x66c] ss:$16 sps:$4 sm:$0xff]   ;;  %v12162_v42 = vld [vmem:[#allocation8 + $0x668] ss:$16 sps:$4 sm:$0xff]  }
 0x563   :  { %9389 = vmatprep.subr.bf16.mxu0 %v12137_v44  ;;  %v12170_v44 = vld [vmem:[#allocation8 + $0x68c] ss:$16 sps:$4 sm:$0xff]  }
 0x565   :  { %9486 = vmatpush1.bf16.msra.mxu1 %v12063_v14  ;;  %v1230_v14 = vsub.s32 6, %v12814_v59 }
 0x566   :  { %9496 = vmatprep.subr.bf16.mxu1 %v12068_v46  ;;  %9390 = vmatpush1.bf16.msra.mxu0 %v12135_v43  ;;  %v12168_v46 = vld [vmem:[#allocation8 + $0x688] ss:$16 sps:$4 sm:$0xff]   ;;  %v1234_v43 = vsub.s32 7, %v12814_v59  ;;  %v12320_v59 = vld [vmem:[#allocation14 + $0x78] sm:$0xff]  }
 0x567   :  { %9391 = vmatprep.subr.bf16.mxu0 %v12143_v20  ;;  %v12327_v20 = vld [vmem:[#allocation7] sm:$0xff] }
 0x568   :  { %9488 = vmatmul.mubr.bf16.vlgmr.msra.gmra.mrb[12].mxu1 %v12878_v33  ;;  %v12075_v33 = vld [vmem:[#allocation8 + $0x468] ss:$16 sps:$4 sm:$0xff]  }
 0x569   :  { %9497 = vmatpush1.bf16.msra.mxu1 %v12066_v13  ;;  %9528 = vmatprep.mubr.bf16.mxu1 %v12889_v50  ;;  %v12171_v50 = vld [vmem:[#allocation8 + $0x7c0] ss:$16 sps:$4 sm:$0xff]   ;;  %v1231_v13 = vrot.slane %v12327_v20, %v1230_v14 }
 0x56a   :  { %9498 = vmatprep.subr.bf16.mxu1 %v12071_v61  ;;  %9392 = vmatpush1.bf16.msra.mxu0 %v12141_v49  ;;  %v1235_v61 = vrot.slane %v12327_v20, %v1234_v43  ;;  %v12174_v49 = vld [vmem:[#allocation8 + $0x6a8] ss:$16 sps:$4 sm:$0xff]  }
 0x56b   :  { %9393 = vmatprep.subr.bf16.mxu0 %v12149_v51  ;;  %v12182_v51 = vld [vmem:[#allocation8 + $0x6cc] ss:$16 sps:$4 sm:$0xff]   ;;  %v12245_v14 = vld [vmem:[#allocation11 + $0xb4] ss:$8 sps:$4 sm:$0xff]   ;;  %v12248_v43 = vld [vmem:[#allocation11 + $0xc4] ss:$8 sps:$4 sm:$0xff]  }
 0x56c   :  { %v12251_v20 = vld [vmem:[#allocation11 + $0xd4] ss:$8 sps:$4 sm:$0xff]  }
 0x56d   :  { %9499 = vmatpush1.bf16.msra.mxu1 %v12069_v47 }
 0x56e   :  { %9500 = vmatprep.subr.bf16.mxu1 %v12074_v2  ;;  %9394 = vmatpush1.bf16.msra.mxu0 %v12147_v52 }
 0x56f   :  { %9395 = vmatprep.subr.bf16.mxu0 %v12155_v45 }
 0x571   :  { %9501 = vmatpush1.bf16.msra.mxu1 %v12072_v54 }
 0x572   :  { %9502 = vmatprep.subr.bf16.mxu1 %v12077_v21  ;;  %9396 = vmatpush1.bf16.msra.mxu0 %v12153_v16  ;;  %v12180_v21 = vld [vmem:[#allocation8 + $0x6c8] ss:$16 sps:$4 sm:$0xff]  }
 0x573   :  { %9397 = vmatprep.subr.bf16.mxu0 %v12161_v6 }
 0x575   :  { %9503 = vmatpush1.bf16.msra.mxu1 %v12075_v33  ;;  %v12185_v33 = vld [vmem:[#allocation8 + $0x6ec] ss:$16 sps:$4 sm:$0xff]  }
 0x576   :  { %9504 = vmatprep.subr.bf16.mxu1 %v12080_v55  ;;  %9398 = vmatpush1.bf16.msra.mxu0 %v12159_v48 }
 0x577   :  { %9399 = vmatprep.subr.bf16.mxu0 %v12167_v31  ;;  %v12183_v31 = vld [vmem:[#allocation8 + $0x6e8] ss:$16 sps:$4 sm:$0xff]  }
 0x579   :  { %9505 = vmatpush1.bf16.msra.mxu1 %v12078_v56  ;;  %v12210_v56 = vld [vmem:[#allocation11] ss:$8 sps:$4 sm:$0xff]  }
 0x57a   :  { %9506 = vmatprep.subr.bf16.mxu1 %v12083_v60  ;;  %9400 = vmatpush1.bf16.msra.mxu0 %v12165_v62  ;;  %v12188_v62 = vld [vmem:[#allocation8 + $0x70c] ss:$16 sps:$4 sm:$0xff]  }
 0x57b   :  { %9401 = vmatprep.subr.bf16.mxu0 %v12173_v0  ;;  %v12215_v0 = vld [vmem:[#allocation11 + $0x14] ss:$8 sps:$4 sm:$0xff]  }
 0x57d   :  { %9507 = vmatpush1.bf16.msra.mxu1 %v12081_v1  ;;  %v12186_v1 = vld [vmem:[#allocation8 + $0x708] ss:$16 sps:$4 sm:$0xff]  }
 0x57e   :  { %9508 = vmatprep.subr.bf16.mxu1 %v12086_v4  ;;  %9402 = vmatpush1.bf16.msra.mxu0 %v12171_v50  ;;  %v12213_v4 = vld [vmem:[#allocation11 + $0x10] ss:$8 sps:$4 sm:$0xff]  }
 0x57f   :  { %9403 = vmatprep.subr.bf16.mxu0 %v12179_v26  ;;  %v12191_v50 = vld [vmem:[#allocation8 + $0x72c] ss:$16 sps:$4 sm:$0xff]   ;;  %v12218_v26 = vld [vmem:[#allocation11 + $0x24] ss:$8 sps:$4 sm:$0xff]  }
 0x581   :  { %9509 = vmatpush1.bf16.msra.mxu1 %v12084_v5  ;;  %v12189_v5 = vld [vmem:[#allocation8 + $0x728] ss:$16 sps:$4 sm:$0xff]  }
 0x582   :  { %9510 = vmatprep.subr.bf16.mxu1 %v12092_v8  ;;  %9404 = vmatpush1.bf16.msra.mxu0 %v12177_v9  ;;  %v12216_v8 = vld [vmem:[#allocation11 + $0x20] ss:$8 sps:$4 sm:$0xff]  }
 0x583   :  { %9982 = vmatprep.subr.bf16.mxu0 %v12212_v10  ;;  %v12194_v9 = vld [vmem:[#allocation8 + $0x74c] ss:$16 sps:$4 sm:$0xff]   ;;  %v12221_v10 = vld [vmem:[#allocation11 + $0x34] ss:$8 sps:$4 sm:$0xff]  }
 0x585   :  { %9511 = vmatpush1.bf16.msra.mxu1 %v12090_v11  ;;  %v12192_v11 = vld [vmem:[#allocation8 + $0x748] ss:$16 sps:$4 sm:$0xff]  }
 0x586   :  { %9512 = vmatprep.subr.bf16.mxu1 %v12098_v53  ;;  %v12219_v53 = vld [vmem:[#allocation11 + $0x30] ss:$8 sps:$4 sm:$0xff]  }
 0x589   :  { %9513 = vmatpush1.bf16.msra.mxu1 %v12096_v15  ;;  %v12197_v15 = vld [vmem:[#allocation8 + $0x76c] ss:$16 sps:$4 sm:$0xff]  }
 0x58a   :  { %9514 = vmatprep.subr.bf16.mxu1 %v12104_v17  ;;  %v12224_v17 = vld [vmem:[#allocation11 + $0x44] ss:$8 sps:$4 sm:$0xff]  }
 0x58d   :  { %9515 = vmatpush1.bf16.msra.mxu1 %v12102_v58  ;;  %v12195_v58 = vld [vmem:[#allocation8 + $0x768] ss:$16 sps:$4 sm:$0xff]  }
 0x58e   :  { %9516 = vmatprep.subr.bf16.mxu1 %v12110_v19  ;;  %v12222_v19 = vld [vmem:[#allocation11 + $0x40] ss:$8 sps:$4 sm:$0xff]  }
 0x591   :  { %9517 = vmatpush1.bf16.msra.mxu1 %v12108_v22  ;;  %v12200_v22 = vld [vmem:[#allocation8 + $0x78c] ss:$16 sps:$4 sm:$0xff]  }
 0x592   :  { %9518 = vmatprep.subr.bf16.mxu1 %v12116_v23  ;;  %v12227_v23 = vld [vmem:[#allocation11 + $0x54] ss:$8 sps:$4 sm:$0xff]  }
 0x595   :  { %9519 = vmatpush1.bf16.msra.mxu1 %v12114_v24  ;;  %v12198_v24 = vld [vmem:[#allocation8 + $0x788] ss:$16 sps:$4 sm:$0xff]  }
 0x596   :  { %9520 = vmatprep.subr.bf16.mxu1 %v12122_v57  ;;  %v12225_v57 = vld [vmem:[#allocation11 + $0x50] ss:$8 sps:$4 sm:$0xff]  }
 0x599   :  { %9521 = vmatpush1.bf16.msra.mxu1 %v12120_v25  ;;  %v12203_v25 = vld [vmem:[#allocation8 + $0x7ac] ss:$16 sps:$4 sm:$0xff]  }
 0x59a   :  { %9522 = vmatprep.subr.bf16.mxu1 %v12128_v63  ;;  %v12230_v63 = vld [vmem:[#allocation11 + $0x64] ss:$8 sps:$4 sm:$0xff]  }
 0x59d   :  { %9523 = vmatpush1.bf16.msra.mxu1 %v12126_v28  ;;  %v12201_v28 = vld [vmem:[#allocation8 + $0x7a8] ss:$16 sps:$4 sm:$0xff]  }
 0x59e   :  { %9524 = vmatprep.subr.bf16.mxu1 %v12134_v29  ;;  %v12228_v29 = vld [vmem:[#allocation11 + $0x60] ss:$8 sps:$4 sm:$0xff]  }
 0x5a1   :  { %9525 = vmatpush1.bf16.msra.mxu1 %v12132_v30  ;;  %v12206_v30 = vld [vmem:[#allocation8 + $0x7cc] ss:$16 sps:$4 sm:$0xff]  }
 0x5a2   :  { %9526 = vmatprep.subr.bf16.mxu1 %v12140_v32  ;;  %v12233_v32 = vld [vmem:[#allocation11 + $0x74] ss:$8 sps:$4 sm:$0xff]  }
 0x5a5   :  { %9527 = vmatpush1.bf16.msra.mxu1 %v12138_v35  ;;  %v12204_v35 = vld [vmem:[#allocation8 + $0x7c8] ss:$16 sps:$4 sm:$0xff]  }
 0x5a6   :  { %9537 = vmatprep.subr.bf16.mxu1 %v12146_v34  ;;  %v12231_v34 = vld [vmem:[#allocation11 + $0x70] ss:$8 sps:$4 sm:$0xff]  }
 0x5a8   :  { %9529 = vmatmul.mubr.bf16.vlgmr.msra.gmra.mrb[12].mxu1 %v12891_v38  ;;  %v12176_v38 = vld [vmem:[#allocation8 + $0x6ac] ss:$16 sps:$4 sm:$0xff]  }
 0x5a9   :  { %9538 = vmatpush1.bf16.msra.mxu1 %v12144_v3  ;;  %v12209_v3 = vld [vmem:[#allocation8 + $0x7ec] ss:$16 sps:$4 sm:$0xff]  }
 0x5aa   :  { %9539 = vmatprep.subr.bf16.mxu1 %v12152_v36  ;;  %v12236_v36 = vld [vmem:[#allocation11 + $0x84] ss:$8 sps:$4 sm:$0xff]  }
 0x5ad   :  { %9540 = vmatpush1.bf16.msra.mxu1 %v12150_v37  ;;  %v12207_v37 = vld [vmem:[#allocation8 + $0x7e8] ss:$16 sps:$4 sm:$0xff]  }
 0x5ae   :  { %9541 = vmatprep.subr.bf16.mxu1 %v12158_v39  ;;  %v12234_v39 = vld [vmem:[#allocation11 + $0x80] ss:$8 sps:$4 sm:$0xff]  }
 0x5b1   :  { %9542 = vmatpush1.bf16.msra.mxu1 %v12156_v40  ;;  %v12239_v40 = vld [vmem:[#allocation11 + $0x94] ss:$8 sps:$4 sm:$0xff]  }
 0x5b2   :  { %9543 = vmatprep.subr.bf16.mxu1 %v12164_v41  ;;  %v12237_v41 = vld [vmem:[#allocation11 + $0x90] ss:$8 sps:$4 sm:$0xff]  }
 0x5b5   :  { %9544 = vmatpush1.bf16.msra.mxu1 %v12162_v42  ;;  %v12242_v42 = vld [vmem:[#allocation11 + $0xa4] ss:$8 sps:$4 sm:$0xff]  }
 0x5b6   :  { %9545 = vmatprep.subr.bf16.mxu1 %v12170_v44  ;;  %v12240_v44 = vld [vmem:[#allocation11 + $0xa0] ss:$8 sps:$4 sm:$0xff]  }
 0x5b9   :  { %9546 = vmatpush1.bf16.msra.mxu1 %v12168_v46  ;;  %v12243_v46 = vld [vmem:[#allocation11 + $0xb0] ss:$8 sps:$4 sm:$0xff]  }
 0x5ba   :  { %9547 = vmatprep.subr.bf16.mxu1 %v12176_v38  ;;  %v12246_v38 = vld [vmem:[#allocation11 + $0xc0] ss:$8 sps:$4 sm:$0xff]  }
 0x5bb   :  { %v7669_v47 = vpop.f32.mrb[8].mxu1 }
 0x5bc   :  { %v11664_v2 = vadd.f32 %v7669_v47, %v1231_v13  ;;  %v7671_v52 = vpop.f32.mrb[9].mxu1  ;;  %v12249_v13 = vld [vmem:[#allocation11 + $0xd0] ss:$8 sps:$4 sm:$0xff]  }
 0x5bd   :  { %v11665_v45 = vadd.f32 %v7671_v52, %v1235_v61  ;;  %v7673_v54 = vpop.f32.mrb[10].mxu1  ;;  %9548 = vmatpush1.bf16.msra.mxu1 %v12174_v49  ;;  %v12254_v61 = vld [vmem:[#allocation11 + $0xe4] ss:$8 sps:$4 sm:$0xff]   ;;  %v12252_v49 = vld [vmem:[#allocation11 + $0xe0] ss:$8 sps:$4 sm:$0xff]  }
 0x5be   :  { %v7682_v16 = vmax.f32 %v11664_v2, 0.0  ;;  %v7674_v6 = vpop.f32.mrb[11].mxu1  ;;  %9549 = vmatprep.subr.bf16.mxu1 %v12182_v51  ;;  %v12257_v51 = vld [vmem:[#allocation11 + $0xf4] ss:$8 sps:$4 sm:$0xff]   ;;  %v12255_v47 = vld [vmem:[#allocation11 + $0xf0] ss:$8 sps:$4 sm:$0xff]  }
 0x5bf   :  { %v7683_v55 = vmax.f32 %v11665_v45, 0.0  ;;  %v12260_v2 = vld [vmem:[#allocation11 + $0x104] ss:$8 sps:$4 sm:$0xff]   ;;  %v12311_v6 = vld [vmem:[#allocation14 + $0x10] sm:$0xff]  }
 0x5c0   :  { %v12900_v60 = vpack.c.bf16 %v7682_v16, %v7682_v16  ;;  %v12306_v52 = vld [vmem:[#allocation14 + $0x40] sm:$0xff]   ;;  %v12308_v54 = vld [vmem:[#allocation14 + $0x48] sm:$0xff]   ;;  %v12310_v16 = vld [vmem:[#allocation14 + $0x50] sm:$0xff]  }
 0x5c1   :  { %v7691_v48 = vpack.c.bf16 %v7683_v55, %v7683_v55  ;;  %9550 = vmatpush1.bf16.msra.mxu1 %v12180_v21  ;;  %v12307_v45 = vld [vmem:[#allocation14] sm:$0xff]   ;;  %v12309_v21 = vld [vmem:[#allocation14 + $0x8] sm:$0xff]   ;;  %v12313_v55 = vld [vmem:[#allocation14 + $0x18] sm:$0xff]  }
 0x5c2   :  { %9551 = vmatprep.subr.bf16.mxu1 %v12185_v33  ;;  %v12312_v33 = vld [vmem:[#allocation14 + $0x58] sm:$0xff]  }
 0x5c3   :  { %9405 = vmatprep.mubr.bf16.mxu0 %v7691_v48  ;;  %9569 = vmatprep.mubr.bf16.mxu1 %v7691_v48  ;;  %v12314_v48 = vld [vmem:[#allocation14 + $0x60] sm:$0xff]  }
 0x5c4   :  { %9406 = vmatmul.mubr.bf16.vlgmr.msra.gmra.mrb[8].mxu0 %v12900_v60 }
 0x5c5   :  { %9552 = vmatpush1.bf16.msra.mxu1 %v12183_v31  ;;  %9983 = vmatpush1.bf16.msra.mxu0 %v12210_v56  ;;  %v12315_v31 = vld [vmem:[#allocation14 + $0x20] sm:$0xff]   ;;  %v12316_v56 = vld [vmem:[#allocation14 + $0x68] sm:$0xff]  }
 0x5c6   :  { %9553 = vmatprep.subr.bf16.mxu1 %v12188_v62  ;;  %9984 = vmatprep.subr.bf16.mxu0 %v12215_v0  ;;  %v12904_v62 = vld [vmem:[#allocation10] sm:$0xf] }
 0x5c7   :  { %v7953_v0 = vrot.slane %v12904_v62, %v12817_v7 }
 0x5c9   :  { %9554 = vmatpush1.bf16.msra.mxu1 %v12186_v1  ;;  %9985 = vmatpush1.bf16.msra.mxu0 %v12213_v4  ;;  %v7957_v1 = vrot.slane %v12904_v62, %v12820_v12 }
 0x5ca   :  { %9555 = vmatprep.subr.bf16.mxu1 %v12191_v50  ;;  %9986 = vmatprep.subr.bf16.mxu0 %v12218_v26 }
 0x5cd   :  { %9556 = vmatpush1.bf16.msra.mxu1 %v12189_v5  ;;  %9987 = vmatpush1.bf16.msra.mxu0 %v12216_v8 }
 0x5ce   :  { %9557 = vmatprep.subr.bf16.mxu1 %v12194_v9  ;;  %9988 = vmatprep.subr.bf16.mxu0 %v12221_v10 }
 0x5d1   :  { %9558 = vmatpush1.bf16.msra.mxu1 %v12192_v11  ;;  %9989 = vmatpush1.bf16.msra.mxu0 %v12219_v53 }
 0x5d2   :  { %9559 = vmatprep.subr.bf16.mxu1 %v12197_v15  ;;  %9990 = vmatprep.subr.bf16.mxu0 %v12224_v17  ;;  %v12258_v15 = vld [vmem:[#allocation11 + $0x100] ss:$8 sps:$4 sm:$0xff]  }
 0x5d5   :  { %9560 = vmatpush1.bf16.msra.mxu1 %v12195_v58  ;;  %9991 = vmatpush1.bf16.msra.mxu0 %v12222_v19  ;;  %v12263_v58 = vld [vmem:[#allocation11 + $0x114] ss:$8 sps:$4 sm:$0xff]   ;;  %v12261_v19 = vld [vmem:[#allocation11 + $0x110] ss:$8 sps:$4 sm:$0xff]  }
 0x5d6   :  { %9561 = vmatprep.subr.bf16.mxu1 %v12200_v22  ;;  %9992 = vmatprep.subr.bf16.mxu0 %v12227_v23  ;;  %v12266_v22 = vld [vmem:[#allocation11 + $0x124] ss:$8 sps:$4 sm:$0xff]   ;;  %v12264_v23 = vld [vmem:[#allocation11 + $0x120] ss:$8 sps:$4 sm:$0xff]  }
 0x5d9   :  { %9562 = vmatpush1.bf16.msra.mxu1 %v12198_v24  ;;  %9993 = vmatpush1.bf16.msra.mxu0 %v12225_v57  ;;  %v12269_v24 = vld [vmem:[#allocation11 + $0x134] ss:$8 sps:$4 sm:$0xff]   ;;  %v12267_v57 = vld [vmem:[#allocation11 + $0x130] ss:$8 sps:$4 sm:$0xff]  }
 0x5da   :  { %9563 = vmatprep.subr.bf16.mxu1 %v12203_v25  ;;  %9994 = vmatprep.subr.bf16.mxu0 %v12230_v63  ;;  %v12272_v25 = vld [vmem:[#allocation11 + $0x144] ss:$8 sps:$4 sm:$0xff]   ;;  %v12270_v63 = vld [vmem:[#allocation11 + $0x140] ss:$8 sps:$4 sm:$0xff]  }
 0x5dd   :  { %9564 = vmatpush1.bf16.msra.mxu1 %v12201_v28  ;;  %9995 = vmatpush1.bf16.msra.mxu0 %v12228_v29  ;;  %v12275_v28 = vld [vmem:[#allocation11 + $0x154] ss:$8 sps:$4 sm:$0xff]   ;;  %v12273_v29 = vld [vmem:[#allocation11 + $0x150] ss:$8 sps:$4 sm:$0xff]  }
 0x5de   :  { %9565 = vmatprep.subr.bf16.mxu1 %v12206_v30  ;;  %9996 = vmatprep.subr.bf16.mxu0 %v12233_v32  ;;  %v12278_v30 = vld [vmem:[#allocation11 + $0x164] ss:$8 sps:$4 sm:$0xff]   ;;  %v12276_v32 = vld [vmem:[#allocation11 + $0x160] ss:$8 sps:$4 sm:$0xff]  }
 0x5e1   :  { %9566 = vmatpush1.bf16.msra.mxu1 %v12204_v35  ;;  %9997 = vmatpush1.bf16.msra.mxu0 %v12231_v34  ;;  %v12281_v35 = vld [vmem:[#allocation11 + $0x174] ss:$8 sps:$4 sm:$0xff]   ;;  %v12279_v34 = vld [vmem:[#allocation11 + $0x170] ss:$8 sps:$4 sm:$0xff]  }
 0x5e2   :  { %9567 = vmatprep.subr.bf16.mxu1 %v12209_v3  ;;  %9998 = vmatprep.subr.bf16.mxu0 %v12236_v36  ;;  %v7965_v3 = vrot.slane %v12904_v62, %v1218_v18  ;;  %v12284_v36 = vld [vmem:[#allocation11 + $0x184] ss:$8 sps:$4 sm:$0xff]   ;;  %v12288_v18 = vld [vmem:[#allocation11 + $0x1a0] ss:$8 sps:$4 sm:$0xff]  }
 0x5e5   :  { %9568 = vmatpush1.bf16.msra.mxu1 %v12207_v37  ;;  %9999 = vmatpush1.bf16.msra.mxu0 %v12234_v39 }
 0x5e6   :  { %10000 = vmatprep.subr.bf16.mxu0 %v12239_v40  ;;  %11634 = vmatprep.subr.bf16.mxu1 %v12306_v52  ;;  %v7961_v52 = vrot.slane %v12904_v62, %v1214_v27  ;;  %v12321_v27 = vld [vmem:[#allocation14 + $0x38] sm:$0xff]  }
 0x5e8   :  { %9570 = vmatmul.mubr.bf16.vlgmr.msra.gmra.mrb[12].mxu1 %v12900_v60  ;;  %v12317_v60 = vld [vmem:[#allocation14 + $0x28] sm:$0xff]  }
 0x5e9   :  { %10001 = vmatpush1.bf16.msra.mxu0 %v12237_v41  ;;  %11635 = vmatpush3.bf16.msra.mxu1 %v12307_v45  ;;  %v12302_v45 = vld [vmem:[#allocation11 + $0x1e4] ss:$8 sps:$4 sm:$0xff]  }
 0x5ea   :  { %10002 = vmatprep.subr.bf16.mxu0 %v12242_v42  ;;  %11636 = vmatprep.subr.bf16.mxu1 %v12308_v54  ;;  %v12282_v42 = vld [vmem:[#allocation11 + $0x180] ss:$8 sps:$4 sm:$0xff]  }
 0x5eb   :  { %v12300_v54 = vld [vmem:[#allocation11 + $0x1e0] ss:$8 sps:$4 sm:$0xff]  }
 0x5ed   :  { %10003 = vmatpush1.bf16.msra.mxu0 %v12240_v44  ;;  %11637 = vmatpush3.bf16.msra.mxu1 %v12309_v21 }
 0x5ee   :  { %10004 = vmatprep.subr.bf16.mxu0 %v12245_v14  ;;  %11638 = vmatprep.subr.bf16.mxu1 %v12310_v16  ;;  %v12287_v14 = vld [vmem:[#allocation11 + $0x194] ss:$8 sps:$4 sm:$0xff]  }
 0x5ef   :  { %v12305_v16 = vld [vmem:[#allocation11 + $0x1f4] ss:$8 sps:$4 sm:$0xff]  }
 0x5f1   :  { %10005 = vmatpush1.bf16.msra.mxu0 %v12243_v46  ;;  %11639 = vmatpush3.bf16.msra.mxu1 %v12311_v6  ;;  %v12303_v6 = vld [vmem:[#allocation11 + $0x1f0] ss:$8 sps:$4 sm:$0xff]  }
 0x5f2   :  { %10006 = vmatprep.subr.bf16.mxu0 %v12248_v43  ;;  %11640 = vmatprep.subr.bf16.mxu1 %v12312_v33 }
 0x5f5   :  { %10007 = vmatpush1.bf16.msra.mxu0 %v12246_v38  ;;  %11641 = vmatpush3.bf16.msra.mxu1 %v12313_v55  ;;  %v12285_v38 = vld [vmem:[#allocation11 + $0x190] ss:$8 sps:$4 sm:$0xff]  }
 0x5f6   :  { %10008 = vmatprep.subr.bf16.mxu0 %v12251_v20  ;;  %11642 = vmatprep.subr.bf16.mxu1 %v12314_v48  ;;  %v12290_v20 = vld [vmem:[#allocation11 + $0x1a4] ss:$8 sps:$4 sm:$0xff]   ;;  %v12318_v48 = vld [vmem:[#allocation14 + $0x70] sm:$0xff]  }
 0x5f9   :  { %10009 = vmatpush1.bf16.msra.mxu0 %v12249_v13  ;;  %11643 = vmatpush3.bf16.msra.mxu1 %v12315_v31  ;;  %v12293_v13 = vld [vmem:[#allocation11 + $0x1b4] ss:$8 sps:$4 sm:$0xff]  }
 0x5fa   :  { %10010 = vmatprep.subr.bf16.mxu0 %v12254_v61  ;;  %11644 = vmatprep.subr.bf16.mxu1 %v12316_v56  ;;  %v12291_v61 = vld [vmem:[#allocation11 + $0x1b0] ss:$8 sps:$4 sm:$0xff]   ;;  %v9650_v56 = vld [vmem:[#allocation13] sm:$0x3] }
 0x5fb   :  { %v12319_v31 = vld [vmem:[#allocation14 + $0x30] sm:$0xff]   ;;  %v9659_v62 = vrot.slane %v9650_v56, %v12820_v12 }
 0x5fd   :  { %10011 = vmatpush1.bf16.msra.mxu0 %v12252_v49  ;;  %11645 = vmatpush3.bf16.msra.mxu1 %v12317_v60  ;;  %v12296_v49 = vld [vmem:[#allocation11 + $0x1c4] ss:$8 sps:$4 sm:$0xff]   ;;  %v9655_v60 = vrot.slane %v9650_v56, %v12817_v7 }
 0x5fe   :  { %10012 = vmatprep.subr.bf16.mxu0 %v12257_v51  ;;  %v12294_v51 = vld [vmem:[#allocation11 + $0x1c0] ss:$8 sps:$4 sm:$0xff]   ;;  %11646 = vmatprep.subr.bf16.mxu1 %v12318_v48 }
 0x601   :  { %10013 = vmatpush1.bf16.msra.mxu0 %v12255_v47  ;;  %v12299_v47 = vld [vmem:[#allocation11 + $0x1d4] ss:$8 sps:$4 sm:$0xff]   ;;  %11647 = vmatpush3.bf16.msra.mxu1 %v12319_v31 }
 0x602   :  { %10023 = vmatprep.subr.bf16.mxu0 %v12260_v2  ;;  %v12297_v2 = vld [vmem:[#allocation11 + $0x1d0] ss:$8 sps:$4 sm:$0xff]   ;;  %11648 = vmatprep.subr.bf16.mxu1 %v12320_v59 }
 0x605   :  { %11649 = vmatpush3.bf16.msra.mxu1 %v12321_v27 }
 0x697   :  { %v9407_v4 = vpop.f32.mrb[8].mxu0 }
 0x698   :  { %v11666_v50 = vadd.f32 %v9407_v4, %v7953_v0  ;;  %v9409_v26 = vpop.f32.mrb[9].mxu0 }
 0x699   :  { %v11667_v5 = vadd.f32 %v9409_v26, %v7957_v1  ;;  %v9411_v8 = vpop.f32.mrb[10].mxu0 }
 0x69a   :  { %v9578_v9 = vmax.f32 %v11666_v50, 0.0  ;;  %v9412_v10 = vpop.f32.mrb[11].mxu0 }
 0x69b   :  { %v9579_v11 = vmax.f32 %v11667_v5, 0.0 }
 0x69c   :  { %v9582_v17 = vpack.c.bf16 %v9578_v9, %v9578_v9 }
 0x69d   :  { %v9583_v53 = vpack.c.bf16 %v9579_v11, %v9579_v11 }
 0x69f   :  { %10014 = vmatprep.mubr.bf16.mxu0 %v9583_v53 }
 0x6a0   :  { %10015 = vmatmul.mubr.bf16.vlgmr.msra.gmra.mrb[12].mxu0 %v9582_v17  ;;  %v11617_v17 = vld [vmem:[#allocation16] ss:$0 sm:$0xff] }
 0x6a1   :  { %10024 = vmatpush1.bf16.msra.mxu0 %v12258_v15 }
 0x6a2   :  { %10025 = vmatprep.subr.bf16.mxu0 %v12263_v58 }
 0x6a5   :  { %10026 = vmatpush1.bf16.msra.mxu0 %v12261_v19 }
 0x6a6   :  { %10027 = vmatprep.subr.bf16.mxu0 %v12266_v22 }
 0x6a9   :  { %10028 = vmatpush1.bf16.msra.mxu0 %v12264_v23 }
 0x6aa   :  { %10029 = vmatprep.subr.bf16.mxu0 %v12269_v24 }
 0x6ad   :  { %10030 = vmatpush1.bf16.msra.mxu0 %v12267_v57 }
 0x6ae   :  { %10031 = vmatprep.subr.bf16.mxu0 %v12272_v25 }
 0x6b1   :  { %10032 = vmatpush1.bf16.msra.mxu0 %v12270_v63 }
 0x6b2   :  { %10033 = vmatprep.subr.bf16.mxu0 %v12275_v28 }
 0x6b5   :  { %10034 = vmatpush1.bf16.msra.mxu0 %v12273_v29 }
 0x6b6   :  { %10035 = vmatprep.subr.bf16.mxu0 %v12278_v30 }
 0x6b9   :  { %10036 = vmatpush1.bf16.msra.mxu0 %v12276_v32 }
 0x6ba   :  { %10037 = vmatprep.subr.bf16.mxu0 %v12281_v35 }
 0x6bb   :  { %v9571_v37 = vpop.f32.mrb[12].mxu1 }
 0x6bc   :  { %v9573_v39 = vpop.f32.mrb[13].mxu1  ;;  %v11668_v21 = vadd.f32 %v9571_v37, %v7961_v52 }
 0x6bd   :  { %v11669_v40 = vadd.f32 %v9573_v39, %v7965_v3  ;;  %10038 = vmatpush1.bf16.msra.mxu0 %v12279_v34  ;;  %v9575_v41 = vpop.f32.mrb[14].mxu1 }
 0x6be   :  { %v9576_v44 = vpop.f32.mrb[15].mxu1  ;;  %10039 = vmatprep.subr.bf16.mxu0 %v12284_v36  ;;  %v9580_v33 = vmax.f32 %v11668_v21, 0.0 }
 0x6bf   :  { %v9581_v46 = vmax.f32 %v11669_v40, 0.0 }
 0x6c0   :  { %v9584_v55 = vpack.c.bf16 %v9580_v33, %v9580_v33 }
 0x6c1   :  { %v9585_v43 = vpack.c.bf16 %v9581_v46, %v9581_v46  ;;  %10040 = vmatpush1.bf16.msra.mxu0 %v12282_v42 }
 0x6c2   :  { %10041 = vmatprep.subr.bf16.mxu0 %v12287_v14 }
 0x6c3   :  { %10055 = vmatprep.mubr.bf16.mxu0 %v9585_v43 }
 0x6c5   :  { %10042 = vmatpush1.bf16.msra.mxu0 %v12285_v38 }
 0x6c6   :  { %10043 = vmatprep.subr.bf16.mxu0 %v12290_v20 }
 0x6c9   :  { %10044 = vmatpush1.bf16.msra.mxu0 %v12288_v18 }
 0x6ca   :  { %10045 = vmatprep.subr.bf16.mxu0 %v12293_v13 }
 0x6cd   :  { %10046 = vmatpush1.bf16.msra.mxu0 %v12291_v61 }
 0x6ce   :  { %10047 = vmatprep.subr.bf16.mxu0 %v12296_v49 }
 0x6d1   :  { %10048 = vmatpush1.bf16.msra.mxu0 %v12294_v51 }
 0x6d2   :  { %10049 = vmatprep.subr.bf16.mxu0 %v12299_v47 }
 0x6d5   :  { %10050 = vmatpush1.bf16.msra.mxu0 %v12297_v2 }
 0x6d6   :  { %10051 = vmatprep.subr.bf16.mxu0 %v12302_v45 }
 0x6d9   :  { %10052 = vmatpush1.bf16.msra.mxu0 %v12300_v54 }
 0x6da   :  { %10053 = vmatprep.subr.bf16.mxu0 %v12305_v16 }
 0x6dd   :  { %10054 = vmatpush1.bf16.msra.mxu0 %v12303_v6 }
 0x6e0   :  { %10056 = vmatmul.mubr.bf16.vlgmr.msra.gmra.mrb[12].mxu0 %v9584_v55 }
 0x7b3   :  { %v10057_v0 = vpop.f32.mrb[12].mxu0 }
 0x7b4   :  { %v11670_v1 = vadd.f32 %v10057_v0, %v9655_v60  ;;  %v10059_v4 = vpop.f32.mrb[13].mxu0 }
 0x7b5   :  { %v11671_v50 = vadd.f32 %v10059_v4, %v9659_v62  ;;  %v10061_v26 = vpop.f32.mrb[14].mxu0 }
 0x7b6   :  { %v10064_v5 = vmax.f32 %v11670_v1, 0.0  ;;  %v10062_v8 = vpop.f32.mrb[15].mxu0 }
 0x7b7   :  { %v10065_v9 = vmax.f32 %v11671_v50, 0.0 }
 0x7b8   :  { %v10066_v11 = vpack.c.bf16 %v10064_v5, %v10064_v5 }
 0x7b9   :  { %v10067_v10 = vpack.c.bf16 %v10065_v9, %v10065_v9 }
 0x7bb   :  { %10235 = vmatprep.mubr.bf16.mxu1 %v10067_v10 }
 0x7bc   :  { %10236 = vmatmul.mubr.bf16.vlgmr.msra.gmra.mrb[16].mxu1 %v10066_v11 }
 0x88f   :  { %v11650_v53 = vpop.f32.mrb[16].mxu1 }
 0x890   :  { %v11651_v15 = vpop.f32.mrb[17].mxu1 }
 0x891   :  { %v11652_v58 = vadd.f32 %v11651_v15, %v11650_v53  ;;  %v11653_v19 = vpop.f32.mrb[18].mxu1 }
 0x892   :  { %v11654_v7 = vpop.f32.mrb[19].mxu1 }
 0x893   :  { %v10238_v22 = vadd.f32 %v11652_v58, %v11617_v17 }
 0x895   :  { %10243 = vmax.xlane.f32.xlu0 %v10238_v22 }
 0x922   :  { %v10244_v12 = vpop.xlane.xlu0 %10243 }
 0x923   :  { %v10245_v23 = vsub.f32 %v10238_v22, %v10244_v12 }
 0x925   :  { %v10246_v24 = vmul.f32 1.442695, %v10245_v23 }
 0x927   :  { %12322 = vpow2.f32 %v10246_v24 }
 0x931   :  { %v12323_v57 = vpop.eup %12322 }
 0x932   :  { %10248 = vadd.xlane.f32.xlu0 %v12323_v57 }
 0x9bf   :  { %v10249_v25 = vpop.xlane.xlu0 %10248 }
 0x9c0   :  { %12324 = vlog2.f32 %v10249_v25 }
 0x9ca   :  { %v12325_v63 = vpop.eup %12324 }
 0x9cb   :  { %v10251_v28 = vmul.f32 0.6931472, %v12325_v63 }
 0x9cd   :  { %v10252_v29 = vsub.f32 %v10245_v23, %v10251_v28 }
 0x9cf   :  { %10253 = vst [vmem:[#allocation17] sm:$0xff] %v10252_v29 }
 0x9d0   :  { %12537 = shalt.err (!%p12534_p6)
}
 0x9d1   :  { %s12538_s22 = scalar_lea.hbm %s12939_s9, 128 }
 0x9d2   :  { %p12539_p7 = scmp.ne.s32.totalorder %s12939_s9, %s12538_s22  ;;  %p12542_p8 = scmp.lt.u32.totalorder %s12538_s22, %s12939_s9 }
 0x9d4   :  { %p12544_p9 = pnand %p12542_p8, %p12539_p7 }
 0x9d6   :  { %12547 = shalt.err (!%p12544_p9)
}
 0x9d7   :  { %10263 = dma.vmem_to_hbm [thread:$0]  %s10261_s24, 128, %s12939_s9, [#allocation4]  }
 0x9d8   :  { %12558 = dma.done.wait [#allocation4], 128  }
 0x9d9   :  { %12559 = vsyncadd [#allocation4], 4294967168 }
 0x9da   :  { %10267 = vsyncpa [#allocation3], 1 }
 0x9db   :  { %10268 = vsyncpa [#allocation6], 1 }
 0x9dc   :  { %10269 = vsyncpa [#allocation9], 1 }
 0x9dd   :  { %10270 = vsyncpa [#allocation12], 1 }
 0x9de   :  { %10271 = vsyncpa [#allocation15], 1 }
 0x9df   :  { %10272 = vsyncpa [#allocation4], 1 }

</bundles_post_ra>
